<compile_context>
chip_gen: v7x
topology: tpu7x:2x2x1
jax: 0.10.0
libtpu: 0.0.40
codegen_flags: <defaults>
</compile_context>

<pallas_src>
import jax
import jax.numpy as jnp
from jax import lax
from jax.experimental import pallas as pl
from jax.experimental.pallas import tpu as pltpu


# ---------------------------------------------------------------------------
# Down path (fused):  PReLU(Conv2d(k=4,s=2,p=1)(a - b) + bias) + c
# ---------------------------------------------------------------------------
def _down_conv_fused_call(N, Hi, Wi, Cin, Cout, dtype):
    Ho, Wo = Hi // 2, Wi // 2
    K = 24 * Cin

    def kernel(xa_ref, xb_ref, add_ref, w_ref, b_ref, alpha_ref, o_ref, xA, xB):
        # xa_ref/xb_ref : (1, Ho, 2, Wo, 2*Cin) f32  (column-pair view of NHWC input)
        # add_ref       : (1, Ho, Wo, Cout)     f32  residual added after activation
        # w_ref         : (24*Cin, Cout)        bf16 zero-padded im2col weights
        # b_ref         : (1, Cout)             f32
        # alpha_ref     : (1,)                  f32  (SMEM)
        # o_ref         : (1, Ho, Wo, Cout)
        # xA/xB         : (Ho+1, Wo+2, 2*Cin)   bf16 scratch: padded rows split by parity
        diff = (xa_ref[...] - xb_ref[...]).astype(jnp.bfloat16)

        xA[...] = jnp.zeros_like(xA)
        xB[...] = jnp.zeros_like(xB)
        # padded row R = h_in + 1 (1-px zero border):
        #   R even -> xA[R//2]     (R = 2m, m>=1 holds input row 2m-1)
        #   R odd  -> xB[(R-1)//2] (R = 2m+1, m<Ho holds input row 2m)
        xA[1:Ho + 1, 1:Wo + 1, :] = diff[0, :, 1]
        xB[0:Ho, 1:Wo + 1, :] = diff[0, :, 0]

        # im2col: 4 kh-taps x 3 column-pair taps, all contiguous slices.
        taps = []
        for src, roff in ((xA, 0), (xB, 0), (xA, 1), (xB, 1)):   # kh = 0,1,2,3
            for dp in range(3):
                taps.append(src[roff:roff + Ho, dp:dp + Wo, :])
        col = jnp.concatenate(taps, axis=-1).reshape(Ho * Wo, K)

        acc = jnp.dot(col, w_ref[...], preferred_element_type=jnp.float32)
        acc = acc + b_ref[...]                                    # bias
        alpha = alpha_ref[0]
        acc = jnp.where(acc >= 0, acc, alpha * acc)               # PReLU
        acc = acc.reshape(1, Ho, Wo, Cout) + add_ref[...]         # fused residual add
        o_ref[...] = acc.astype(o_ref.dtype)

    flops = 2 * N * Ho * Wo * K * Cout
    bytes_accessed = 4 * N * (2 * Hi * Wi * Cin + 2 * Ho * Wo * Cout) + 2 * K * Cout
    return pl.pallas_call(
        kernel,
        out_shape=jax.ShapeDtypeStruct((N, Ho, Wo, Cout), dtype),
        grid_spec=pltpu.PrefetchScalarGridSpec(
            num_scalar_prefetch=0,
            grid=(N,),
            in_specs=[
                pl.BlockSpec((1, Ho, 2, Wo, 2 * Cin), lambda n: (n, 0, 0, 0, 0)),
                pl.BlockSpec((1, Ho, 2, Wo, 2 * Cin), lambda n: (n, 0, 0, 0, 0)),
                pl.BlockSpec((1, Ho, Wo, Cout), lambda n: (n, 0, 0, 0)),
                pl.BlockSpec((K, Cout), lambda n: (0, 0)),
                pl.BlockSpec((1, Cout), lambda n: (0, 0)),
                pl.BlockSpec(memory_space=pltpu.MemorySpace.SMEM),
            ],
            out_specs=pl.BlockSpec((1, Ho, Wo, Cout), lambda n: (n, 0, 0, 0)),
            scratch_shapes=[
                pltpu.VMEM((Ho + 1, Wo + 2, 2 * Cin), jnp.bfloat16),
                pltpu.VMEM((Ho + 1, Wo + 2, 2 * Cin), jnp.bfloat16),
            ],
        ),
        compiler_params=pltpu.CompilerParams(dimension_semantics=("parallel",)),
        cost_estimate=pl.CostEstimate(flops=flops, transcendentals=0,
                                      bytes_accessed=bytes_accessed),
    )


def _down_conv_weight(w_oihw):
    # (Cout, Cin, 4, 4) -> (24*Cin, Cout) bf16.
    # row index = ((kh*3 + dp)*2 + s)*Cin + ci   with kw = 2*dp + s - 1 (else zero row)
    Cout, Cin = w_oihw.shape[0], w_oihw.shape[1]
    wk = jnp.transpose(w_oihw, (2, 3, 1, 0))              # (kh, kw, Cin, Cout)
    wm = jnp.zeros((4, 3, 2, Cin, Cout), w_oihw.dtype)
    for dp in range(3):
        for s in range(2):
            kw = 2 * dp + s - 1
            if 0 <= kw < 4:
                wm = wm.at[:, dp, s].set(wk[:, kw])
    return wm.reshape(24 * Cin, Cout).astype(jnp.bfloat16)


def down_conv_prelu_fused(a_nhwc, b_nhwc, add_nhwc, w_oihw, bias, alpha):
    """PReLU(conv4x4_s2_p1(a - b) + bias) + add, all tensors NHWC."""
    N, Hi, Wi, Cin = a_nhwc.shape
    Cout = w_oihw.shape[0]
    Ho, Wo = Hi // 2, Wi // 2
    # Free (row-major) reshape into the column-pair layout used by the kernel.
    a5 = a_nhwc.reshape(N, Ho, 2, Wo, 2 * Cin)
    b5 = b_nhwc.reshape(N, Ho, 2, Wo, 2 * Cin)
    wmat = _down_conv_weight(w_oihw)
    bvec = bias.astype(jnp.float32).reshape(1, Cout)
    avec = jnp.asarray(alpha, jnp.float32).reshape(1)
    call = _down_conv_fused_call(N, Hi, Wi, Cin, Cout, a_nhwc.dtype)
    return call(a5, b5, add_nhwc, wmat, bvec, avec)


# ---------------------------------------------------------------------------
# Up path:  PReLU(ConvTranspose2d(k=4, s=2, p=1)(x) + bias)
# ---------------------------------------------------------------------------
def _deconv_call(N, H, W, Cin, Cout, dtype):
    K = 9 * Cin

    def kernel(x_ref, w_ref, b_ref, alpha_ref, o_ref, xp):
        # x_ref : (1, H, W, Cin) f32
        # w_ref : (9*Cin, 4*Cout) bf16, columns ordered (pa, pb, cout)
        # b_ref : (1, 4*Cout) f32
        # o_ref : (1, H, 2, W, 2*Cout) -> free-reshapes to (N, 2H, 2W, Cout) outside
        # xp    : (H+2, W+2, Cin) bf16 scratch, zero-padded input
        xp[...] = jnp.zeros_like(xp)
        xp[1:H + 1, 1:W + 1, :] = x_ref[0].astype(jnp.bfloat16)

        taps = []
        for ra in range(3):
            for cb in range(3):
                taps.append(xp[ra:ra + H, cb:cb + W, :])
        col = jnp.concatenate(taps, axis=-1).reshape(H * W, K)

        acc = jnp.dot(col, w_ref[...], preferred_element_type=jnp.float32)
        acc = acc + b_ref[...]                                    # bias (tiled per phase)
        alpha = alpha_ref[0]
        acc = jnp.where(acc >= 0, acc, alpha * acc)               # PReLU
        res = acc.reshape(H, W, 4 * Cout)
        # phase pa interleaves output rows; (pb, cout) stays lane-dense in the last dim.
        o_ref[0, :, 0] = res[:, :, 0:2 * Cout].astype(o_ref.dtype)
        o_ref[0, :, 1] = res[:, :, 2 * Cout:4 * Cout].astype(o_ref.dtype)

    flops = 2 * N * H * W * K * 4 * Cout
    bytes_accessed = 4 * N * (H * W * Cin + 4 * H * W * Cout) + 2 * K * 4 * Cout
    return pl.pallas_call(
        kernel,
        out_shape=jax.ShapeDtypeStruct((N, H, 2, W, 2 * Cout), dtype),
        grid_spec=pltpu.PrefetchScalarGridSpec(
            num_scalar_prefetch=0,
            grid=(N,),
            in_specs=[
                pl.BlockSpec((1, H, W, Cin), lambda n: (n, 0, 0, 0)),
                pl.BlockSpec((K, 4 * Cout), lambda n: (0, 0)),
                pl.BlockSpec((1, 4 * Cout), lambda n: (0, 0)),
                pl.BlockSpec(memory_space=pltpu.MemorySpace.SMEM),
            ],
            out_specs=pl.BlockSpec((1, H, 2, W, 2 * Cout),
                                   lambda n: (n, 0, 0, 0, 0)),
            scratch_shapes=[pltpu.VMEM((H + 2, W + 2, Cin), jnp.bfloat16)],
        ),
        compiler_params=pltpu.CompilerParams(dimension_semantics=("parallel",)),
        cost_estimate=pl.CostEstimate(flops=flops, transcendentals=0,
                                      bytes_accessed=bytes_accessed),
    )


def _deconv_weight(w_iokk):
    # torch ConvTranspose2d weight (Cin, Cout, 4, 4) -> (9*Cin, 4*Cout) bf16.
    # row = (ra*3 + cb)*Cin + ci ; col = (pa*2 + pb)*Cout + co ;
    # tap (ra, cb) of output phase (pa, pb) uses kernel (kh, kw) = (pa+3-2ra, pb+3-2cb),
    # zero weight when out of range.
    Cin, Cout = w_iokk.shape[0], w_iokk.shape[1]
    wb = jnp.zeros((3, 3, Cin, 4, Cout), w_iokk.dtype)
    for ra in range(3):
        for cb in range(3):
            for pa in range(2):
                for pb in range(2):
                    kh = pa + 3 - 2 * ra
                    kw = pb + 3 - 2 * cb
                    if 0 <= kh < 4 and 0 <= kw < 4:
                        wb = wb.at[ra, cb, :, pa * 2 + pb, :].set(w_iokk[:, :, kh, kw])
    return wb.reshape(9 * Cin, 4 * Cout).astype(jnp.bfloat16)


def deconv_prelu(x_nhwc, w_iokk, bias, alpha):
    """PReLU(ConvTranspose2d(k=4, s=2, p=1)(x) + bias), NHWC."""
    N, H, W, Cin = x_nhwc.shape
    Cout = w_iokk.shape[1]
    wmat = _deconv_weight(w_iokk)
    b4 = jnp.tile(bias.astype(jnp.float32), 4).reshape(1, 4 * Cout)
    avec = jnp.asarray(alpha, jnp.float32).reshape(1)
    out5 = _deconv_call(N, H, W, Cin, Cout, x_nhwc.dtype)(x_nhwc, wmat, b4, avec)
    # Free (row-major) reshape back to NHWC at 2x resolution.
    return out5.reshape(N, 2 * H, 2 * W, Cout)


# ---------------------------------------------------------------------------
# Encoder_MDCBlock1 forward (mode='iter1', norm=None — the module defaults)
# ---------------------------------------------------------------------------
def encoder_mdcblock1_iter1(ft_l_nchw, ft_h_list_nchw, up_params, down_params):
    num_ft = len(up_params)                       # == module.num_ft (== num_ft-1)
    L = len(ft_h_list_nchw)
    # Single NCHW -> NHWC transpose at the module boundary; kernels run NHWC.
    x = jnp.transpose(ft_l_nchw, (0, 2, 3, 1))
    hs = [jnp.transpose(t, (0, 2, 3, 1)) for t in ft_h_list_nchw]

    ft_l_list = []
    for i in range(L):
        ft_l_list.append(x)
        w, b, a = up_params[num_ft - L + i]
        x = deconv_prelu(x, w, b, a)
    fusion = x
    for i in range(L):
        w, b, a = down_params[num_ft - i - 1]
        # down_conv(fusion - ft_h) + ft_l_list[...] fused into one kernel.
        fusion = down_conv_prelu_fused(fusion, hs[i], ft_l_list[L - i - 1], w, b, a)
    return jnp.transpose(fusion, (0, 3, 1, 2))


# ---------------------------------------------------------------------------
# Plain-JAX reference (NCHW, f32 HIGHEST) mirroring the PyTorch module.
# ---------------------------------------------------------------------------
def _conv_block_ref(x, w, b, alpha):
    y = lax.conv_general_dilated(
        x, w, window_strides=(2, 2), padding=((1, 1), (1, 1)),
        dimension_numbers=("NCHW", "OIHW", "NCHW"),
        precision=lax.Precision.HIGHEST)
    y = y + b[None, :, None, None]
    return jnp.where(y >= 0, y, alpha * y)


def _deconv_block_ref(x, w_iokk, b, alpha):
    w = jnp.transpose(w_iokk, (1, 0, 2, 3))[:, :, ::-1, ::-1]
    y = lax.conv_general_dilated(
        x, w, window_strides=(1, 1), padding=((2, 2), (2, 2)),
        lhs_dilation=(2, 2), dimension_numbers=("NCHW", "OIHW", "NCHW"),
        precision=lax.Precision.HIGHEST)
    y = y + b[None, :, None, None]
    return jnp.where(y >= 0, y, alpha * y)


def encoder_mdcblock1_ref(ft_l, ft_h_list, up_params, down_params):
    num_ft = len(up_params)
    L = len(ft_h_list)
    x = ft_l
    ft_l_list = []
    for i in range(L):
        ft_l_list.append(x)
        w, b, a = up_params[num_ft - L + i]
        x = _deconv_block_ref(x, w, b, a)
    fusion = x
    for i in range(L):
        w, b, a = down_params[num_ft - i - 1]
        fusion = _conv_block_ref(fusion - ft_h_list[i], w, b, a) + ft_l_list[L - i - 1]
    return fusion


if __name__ == "__main__":
    key = jax.random.PRNGKey(0)
    num_filter, num_ft_arg = 16, 3            # Encoder_MDCBlock1(16, 3)
    nft = num_ft_arg - 1                      # number of up/down conv pairs
    N, H0, W0 = 2, 8, 8                       # ft_l spatial size

    keys = jax.random.split(key, 3 + 4 * nft)
    ft_l = jax.random.normal(keys[0], (N, num_filter, H0, W0), jnp.float32)
    ft_h_list = []
    for i in range(nft):
        c = num_filter // (2 ** (nft - i))
        s = 2 ** (nft - i)
        ft_h_list.append(
            jax.random.normal(keys[1 + i], (N, c, H0 * s, W0 * s), jnp.float32))

    up_params, down_params = [], []
    kbase = 1 + nft
    for i in range(nft):
        cin = num_filter // (2 ** i)
        cout = num_filter // (2 ** (i + 1))
        # DeconvBlock(cin -> cout): ConvTranspose2d weight (cin, cout, 4, 4)
        w_up = jax.random.normal(keys[kbase + 4 * i + 0], (cin, cout, 4, 4),
                                 jnp.float32) * 0.05
        b_up = jax.random.normal(keys[kbase + 4 * i + 1], (cout,),
                                 jnp.float32) * 0.05
        up_params.append((w_up, b_up, jnp.float32(0.25)))   # nn.PReLU() default
        # ConvBlock(cout -> cin): Conv2d weight OIHW = (cin, cout, 4, 4)
        w_dn = jax.random.normal(keys[kbase + 4 * i + 2], (cin, cout, 4, 4),
                                 jnp.float32) * 0.05
        b_dn = jax.random.normal(keys[kbase + 4 * i + 3], (cin,),
                                 jnp.float32) * 0.05
        down_params.append((w_dn, b_dn, jnp.float32(0.25)))

    fwd = jax.jit(encoder_mdcblock1_iter1)
    out = fwd(ft_l, ft_h_list, up_params, down_params)
    out = jax.block_until_ready(out)

    ref = encoder_mdcblock1_ref(ft_l, ft_h_list, up_params, down_params)
    assert out.shape == ref.shape == (N, num_filter, H0, W0)
    max_err = float(jnp.max(jnp.abs(out - ref)))
    # Tolerance loosened vs the f32 HIGHEST reference because MXU operands are bf16
    # (accumulation stays f32).
    assert jnp.allclose(out, ref, rtol=3e-2, atol=3e-2), max_err
    print("KERNEL_OK")
</pallas_src>

<mosaic_0001>
module attributes {stable_mosaic.version = 11 : i64} {
  func.func @kernel(%arg0: i32, %arg1: memref<1x8x8x16xf32, #tpu.memory_space<vmem>>, %arg2: memref<144x32xbf16, #tpu.memory_space<vmem>>, %arg3: memref<1x32xf32, #tpu.memory_space<vmem>>, %arg4: memref<1xf32, #tpu.memory_space<smem>>, %arg5: memref<1x8x2x8x16xf32, #tpu.memory_space<vmem>>, %arg6: memref<10x10x16xbf16, #tpu.memory_space<vmem>>) attributes {dimension_semantics = [#tpu.dimension_semantics<parallel>], iteration_bounds = array<i64: 2>, scalar_prefetch = 0 : i64, scratch_operands = 1 : i64, tpu.core_type = #tpu.core_type<tc>, window_params = [{transform_indices = @transform_0, window_bounds = array<i64: 1, 8, 8, 16>}, {pipeline_mode = #tpu.pipeline_mode<synchronous>, transform_indices = @transform_1, window_bounds = array<i64: 144, 32>}, {pipeline_mode = #tpu.pipeline_mode<synchronous>, transform_indices = @transform_2, window_bounds = array<i64: 1, 32>}, {transform_indices = @transform_3, window_bounds = array<i64: 1>}, {transform_indices = @transform_4, window_bounds = array<i64: 1, 8, 2, 8, 16>}]} {
    %cst = arith.constant 0.000000e+00 : bf16
    %0 = vector.broadcast %cst : bf16 to vector<10x10x16xbf16>
    %c0 = arith.constant 0 : index
    %c0_0 = arith.constant 0 : index
    %c0_1 = arith.constant 0 : index
    %1 = vector.load %arg6[%c0, %c0_0, %c0_1] : memref<10x10x16xbf16, #tpu.memory_space<vmem>>, vector<10x10x16xbf16>
    tpu.vector_store %arg6[%c0, %c0_0, %c0_1], %0 {strides = array<i32>} : memref<10x10x16xbf16, #tpu.memory_space<vmem>>, vector<10x10x16xbf16>,
    %c0_2 = arith.constant 0 : index
    %c0_3 = arith.constant 0 : index
    %c0_4 = arith.constant 0 : index
    %c0_5 = arith.constant 0 : index
    %2 = vector.load %arg1[%c0_2, %c0_3, %c0_4, %c0_5] : memref<1x8x8x16xf32, #tpu.memory_space<vmem>>, vector<1x8x8x16xf32>
    %3 = vector.shape_cast %2 : vector<1x8x8x16xf32> to vector<8x8x16xf32>
    %4 = arith.truncf %3 : vector<8x8x16xf32> to vector<8x8x16xbf16>
    %c1 = arith.constant 1 : index
    %c1_6 = arith.constant 1 : index
    %c0_7 = arith.constant 0 : index
    %5 = vector.load %arg6[%c1, %c1_6, %c0_7] : memref<10x10x16xbf16, #tpu.memory_space<vmem>>, vector<8x8x16xbf16>
    tpu.vector_store %arg6[%c1, %c1_6, %c0_7], %4 {strides = array<i32>} : memref<10x10x16xbf16, #tpu.memory_space<vmem>>, vector<8x8x16xbf16>,
    %c0_8 = arith.constant 0 : index
    %c0_9 = arith.constant 0 : index
    %c0_10 = arith.constant 0 : index
    %6 = vector.load %arg6[%c0_8, %c0_9, %c0_10] : memref<10x10x16xbf16, #tpu.memory_space<vmem>>, vector<8x8x16xbf16>
    %c0_11 = arith.constant 0 : index
    %c1_12 = arith.constant 1 : index
    %c0_13 = arith.constant 0 : index
    %7 = vector.load %arg6[%c0_11, %c1_12, %c0_13] : memref<10x10x16xbf16, #tpu.memory_space<vmem>>, vector<8x8x16xbf16>
    %c0_14 = arith.constant 0 : index
    %c2 = arith.constant 2 : index
    %c0_15 = arith.constant 0 : index
    %8 = vector.load %arg6[%c0_14, %c2, %c0_15] : memref<10x10x16xbf16, #tpu.memory_space<vmem>>, vector<8x8x16xbf16>
    %c1_16 = arith.constant 1 : index
    %c0_17 = arith.constant 0 : index
    %c0_18 = arith.constant 0 : index
    %9 = vector.load %arg6[%c1_16, %c0_17, %c0_18] : memref<10x10x16xbf16, #tpu.memory_space<vmem>>, vector<8x8x16xbf16>
    %c1_19 = arith.constant 1 : index
    %c1_20 = arith.constant 1 : index
    %c0_21 = arith.constant 0 : index
    %10 = vector.load %arg6[%c1_19, %c1_20, %c0_21] : memref<10x10x16xbf16, #tpu.memory_space<vmem>>, vector<8x8x16xbf16>
    %c1_22 = arith.constant 1 : index
    %c2_23 = arith.constant 2 : index
    %c0_24 = arith.constant 0 : index
    %11 = vector.load %arg6[%c1_22, %c2_23, %c0_24] : memref<10x10x16xbf16, #tpu.memory_space<vmem>>, vector<8x8x16xbf16>
    %c2_25 = arith.constant 2 : index
    %c0_26 = arith.constant 0 : index
    %c0_27 = arith.constant 0 : index
    %12 = vector.load %arg6[%c2_25, %c0_26, %c0_27] : memref<10x10x16xbf16, #tpu.memory_space<vmem>>, vector<8x8x16xbf16>
    %c2_28 = arith.constant 2 : index
    %c1_29 = arith.constant 1 : index
    %c0_30 = arith.constant 0 : index
    %13 = vector.load %arg6[%c2_28, %c1_29, %c0_30] : memref<10x10x16xbf16, #tpu.memory_space<vmem>>, vector<8x8x16xbf16>
    %c2_31 = arith.constant 2 : index
    %c2_32 = arith.constant 2 : index
    %c0_33 = arith.constant 0 : index
    %14 = vector.load %arg6[%c2_31, %c2_32, %c0_33] : memref<10x10x16xbf16, #tpu.memory_space<vmem>>, vector<8x8x16xbf16>
    %15 = tpu.concatenate %6, %7, %8, %9, %10, %11, %12, %13, %14 in 2 : vector<8x8x16xbf16>, vector<8x8x16xbf16>, vector<8x8x16xbf16>, vector<8x8x16xbf16>, vector<8x8x16xbf16>, vector<8x8x16xbf16>, vector<8x8x16xbf16>, vector<8x8x16xbf16>, vector<8x8x16xbf16> -> vector<8x8x144xbf16>
    %16 = vector.shape_cast %15 : vector<8x8x144xbf16> to vector<64x144xbf16>
    %c0_34 = arith.constant 0 : index
    %c0_35 = arith.constant 0 : index
    %17 = vector.load %arg2[%c0_34, %c0_35] : memref<144x32xbf16, #tpu.memory_space<vmem>>, vector<144x32xbf16>
    %cst_36 = arith.constant dense<0.000000e+00> : vector<64x32xf32>
    %18 = tpu.matmul %16, %17, %cst_36 {dimension_numbers = #tpu.dot_dimension_numbers<[1], [0], [0], [1], [0, 0, 1, 1], [], []>} : vector<64x144xbf16>, vector<144x32xbf16>, vector<64x32xf32> -> vector<64x32xf32>
    %c0_37 = arith.constant 0 : index
    %c0_38 = arith.constant 0 : index
    %19 = vector.load %arg3[%c0_37, %c0_38] : memref<1x32xf32, #tpu.memory_space<vmem>>, vector<1x32xf32>
    %20 = vector.broadcast %19 : vector<1x32xf32> to vector<64x32xf32>
    %21 = arith.addf %18, %20 : vector<64x32xf32>
    %c0_39 = arith.constant 0 : index
    %22 = memref.load %arg4[%c0_39] : memref<1xf32, #tpu.memory_space<smem>>
    %cst_40 = arith.constant 0.000000e+00 : f32
    %23 = vector.broadcast %cst_40 : f32 to vector<64x32xf32>
    %24 = arith.cmpf oge, %21, %23 : vector<64x32xf32>
    %25 = vector.broadcast %22 : f32 to vector<64x32xf32>
    %26 = arith.mulf %25, %21 : vector<64x32xf32>
    %27 = arith.select %24, %21, %26 : vector<64x32xi1>, vector<64x32xf32>
    %28 = vector.shape_cast %27 : vector<64x32xf32> to vector<8x8x32xf32>
    %29 = vector.extract_strided_slice %28 {offsets = [0, 0, 0], sizes = [8, 8, 16], strides = [1, 1, 1]} : vector<8x8x32xf32> to vector<8x8x16xf32>
    %c0_41 = arith.constant 0 : index
    %c0_42 = arith.constant 0 : index
    %c0_43 = arith.constant 0 : index
    %c0_44 = arith.constant 0 : index
    %c0_45 = arith.constant 0 : index
    %30 = vector.load %arg5[%c0_41, %c0_42, %c0_43, %c0_44, %c0_45] : memref<1x8x2x8x16xf32, #tpu.memory_space<vmem>>, vector<1x8x1x8x16xf32>
    %31 = vector.shape_cast %30 : vector<1x8x1x8x16xf32> to vector<8x8x16xf32>
    %32 = vector.shape_cast %29 : vector<8x8x16xf32> to vector<1x8x1x8x16xf32>
    tpu.vector_store %arg5[%c0_41, %c0_42, %c0_43, %c0_44, %c0_45], %32 {strides = array<i32>} : memref<1x8x2x8x16xf32, #tpu.memory_space<vmem>>, vector<1x8x1x8x16xf32>,
    %33 = vector.extract_strided_slice %28 {offsets = [0, 0, 16], sizes = [8, 8, 16], strides = [1, 1, 1]} : vector<8x8x32xf32> to vector<8x8x16xf32>
    %c0_46 = arith.constant 0 : index
    %c0_47 = arith.constant 0 : index
    %c1_48 = arith.constant 1 : index
    %c0_49 = arith.constant 0 : index
    %c0_50 = arith.constant 0 : index
    %34 = vector.load %arg5[%c0_46, %c0_47, %c1_48, %c0_49, %c0_50] : memref<1x8x2x8x16xf32, #tpu.memory_space<vmem>>, vector<1x8x1x8x16xf32>
    %35 = vector.shape_cast %34 : vector<1x8x1x8x16xf32> to vector<8x8x16xf32>
    %36 = vector.shape_cast %33 : vector<8x8x16xf32> to vector<1x8x1x8x16xf32>
    tpu.vector_store %arg5[%c0_46, %c0_47, %c1_48, %c0_49, %c0_50], %36 {strides = array<i32>} : memref<1x8x2x8x16xf32, #tpu.memory_space<vmem>>, vector<1x8x1x8x16xf32>,
    return
  }
  func.func @transform_0(%arg0: i32) -> (i32, i32, i32, i32) {
    %c0_i32 = arith.constant 0 : i32
    %c0_i32_0 = arith.constant 0 : i32
    %c0_i32_1 = arith.constant 0 : i32
    %c0_i32_2 = arith.constant 0 : i32
    return %arg0, %c0_i32, %c0_i32_0, %c0_i32_1 : i32, i32, i32, i32
  }
  func.func @transform_1(%arg0: i32) -> (i32, i32) {
    %c0_i32 = arith.constant 0 : i32
    %c0_i32_0 = arith.constant 0 : i32
    %c0_i32_1 = arith.constant 0 : i32
    return %c0_i32, %c0_i32_0 : i32, i32
  }
  func.func @transform_2(%arg0: i32) -> (i32, i32) {
    %c0_i32 = arith.constant 0 : i32
    %c0_i32_0 = arith.constant 0 : i32
    %c0_i32_1 = arith.constant 0 : i32
    return %c0_i32, %c0_i32_0 : i32, i32
  }
  func.func @transform_3(%arg0: i32) -> i32 {
    %c0_i32 = arith.constant 0 : i32
    %c0_i32_0 = arith.constant 0 : i32
    return %c0_i32 : i32
  }
  func.func @transform_4(%arg0: i32) -> (i32, i32, i32, i32, i32) {
    %c0_i32 = arith.constant 0 : i32
    %c0_i32_0 = arith.constant 0 : i32
    %c0_i32_1 = arith.constant 0 : i32
    %c0_i32_2 = arith.constant 0 : i32
    %c0_i32_3 = arith.constant 0 : i32
    return %arg0, %c0_i32, %c0_i32_0, %c0_i32_1, %c0_i32_2 : i32, i32, i32, i32, i32
  }
}

module attributes {stable_mosaic.version = 11 : i64} {
  func.func @kernel(%arg0: i32, %arg1: memref<1x16x16x8xf32, #tpu.memory_space<vmem>>, %arg2: memref<72x16xbf16, #tpu.memory_space<vmem>>, %arg3: memref<1x16xf32, #tpu.memory_space<vmem>>, %arg4: memref<1xf32, #tpu.memory_space<smem>>, %arg5: memref<1x16x2x16x8xf32, #tpu.memory_space<vmem>>, %arg6: memref<18x18x8xbf16, #tpu.memory_space<vmem>>) attributes {dimension_semantics = [#tpu.dimension_semantics<parallel>], iteration_bounds = array<i64: 2>, scalar_prefetch = 0 : i64, scratch_operands = 1 : i64, tpu.core_type = #tpu.core_type<tc>, window_params = [{transform_indices = @transform_0, window_bounds = array<i64: 1, 16, 16, 8>}, {pipeline_mode = #tpu.pipeline_mode<synchronous>, transform_indices = @transform_1, window_bounds = array<i64: 72, 16>}, {pipeline_mode = #tpu.pipeline_mode<synchronous>, transform_indices = @transform_2, window_bounds = array<i64: 1, 16>}, {transform_indices = @transform_3, window_bounds = array<i64: 1>}, {transform_indices = @transform_4, window_bounds = array<i64: 1, 16, 2, 16, 8>}]} {
    %cst = arith.constant 0.000000e+00 : bf16
    %0 = vector.broadcast %cst : bf16 to vector<18x18x8xbf16>
    %c0 = arith.constant 0 : index
    %c0_0 = arith.constant 0 : index
    %c0_1 = arith.constant 0 : index
    %1 = vector.load %arg6[%c0, %c0_0, %c0_1] : memref<18x18x8xbf16, #tpu.memory_space<vmem>>, vector<18x18x8xbf16>
    tpu.vector_store %arg6[%c0, %c0_0, %c0_1], %0 {strides = array<i32>} : memref<18x18x8xbf16, #tpu.memory_space<vmem>>, vector<18x18x8xbf16>,
    %c0_2 = arith.constant 0 : index
    %c0_3 = arith.constant 0 : index
    %c0_4 = arith.constant 0 : index
    %c0_5 = arith.constant 0 : index
    %2 = vector.load %arg1[%c0_2, %c0_3, %c0_4, %c0_5] : memref<1x16x16x8xf32, #tpu.memory_space<vmem>>, vector<1x16x16x8xf32>
    %3 = vector.shape_cast %2 : vector<1x16x16x8xf32> to vector<16x16x8xf32>
    %4 = arith.truncf %3 : vector<16x16x8xf32> to vector<16x16x8xbf16>
    %c1 = arith.constant 1 : index
    %c1_6 = arith.constant 1 : index
    %c0_7 = arith.constant 0 : index
    %5 = vector.load %arg6[%c1, %c1_6, %c0_7] : memref<18x18x8xbf16, #tpu.memory_space<vmem>>, vector<16x16x8xbf16>
    tpu.vector_store %arg6[%c1, %c1_6, %c0_7], %4 {strides = array<i32>} : memref<18x18x8xbf16, #tpu.memory_space<vmem>>, vector<16x16x8xbf16>,
    %c0_8 = arith.constant 0 : index
    %c0_9 = arith.constant 0 : index
    %c0_10 = arith.constant 0 : index
    %6 = vector.load %arg6[%c0_8, %c0_9, %c0_10] : memref<18x18x8xbf16, #tpu.memory_space<vmem>>, vector<16x16x8xbf16>
    %c0_11 = arith.constant 0 : index
    %c1_12 = arith.constant 1 : index
    %c0_13 = arith.constant 0 : index
    %7 = vector.load %arg6[%c0_11, %c1_12, %c0_13] : memref<18x18x8xbf16, #tpu.memory_space<vmem>>, vector<16x16x8xbf16>
    %c0_14 = arith.constant 0 : index
    %c2 = arith.constant 2 : index
    %c0_15 = arith.constant 0 : index
    %8 = vector.load %arg6[%c0_14, %c2, %c0_15] : memref<18x18x8xbf16, #tpu.memory_space<vmem>>, vector<16x16x8xbf16>
    %c1_16 = arith.constant 1 : index
    %c0_17 = arith.constant 0 : index
    %c0_18 = arith.constant 0 : index
    %9 = vector.load %arg6[%c1_16, %c0_17, %c0_18] : memref<18x18x8xbf16, #tpu.memory_space<vmem>>, vector<16x16x8xbf16>
    %c1_19 = arith.constant 1 : index
    %c1_20 = arith.constant 1 : index
    %c0_21 = arith.constant 0 : index
    %10 = vector.load %arg6[%c1_19, %c1_20, %c0_21] : memref<18x18x8xbf16, #tpu.memory_space<vmem>>, vector<16x16x8xbf16>
    %c1_22 = arith.constant 1 : index
    %c2_23 = arith.constant 2 : index
    %c0_24 = arith.constant 0 : index
    %11 = vector.load %arg6[%c1_22, %c2_23, %c0_24] : memref<18x18x8xbf16, #tpu.memory_space<vmem>>, vector<16x16x8xbf16>
    %c2_25 = arith.constant 2 : index
    %c0_26 = arith.constant 0 : index
    %c0_27 = arith.constant 0 : index
    %12 = vector.load %arg6[%c2_25, %c0_26, %c0_27] : memref<18x18x8xbf16, #tpu.memory_space<vmem>>, vector<16x16x8xbf16>
    %c2_28 = arith.constant 2 : index
    %c1_29 = arith.constant 1 : index
    %c0_30 = arith.constant 0 : index
    %13 = vector.load %arg6[%c2_28, %c1_29, %c0_30] : memref<18x18x8xbf16, #tpu.memory_space<vmem>>, vector<16x16x8xbf16>
    %c2_31 = arith.constant 2 : index
    %c2_32 = arith.constant 2 : index
    %c0_33 = arith.constant 0 : index
    %14 = vector.load %arg6[%c2_31, %c2_32, %c0_33] : memref<18x18x8xbf16, #tpu.memory_space<vmem>>, vector<16x16x8xbf16>
    %15 = tpu.concatenate %6, %7, %8, %9, %10, %11, %12, %13, %14 in 2 : vector<16x16x8xbf16>, vector<16x16x8xbf16>, vector<16x16x8xbf16>, vector<16x16x8xbf16>, vector<16x16x8xbf16>, vector<16x16x8xbf16>, vector<16x16x8xbf16>, vector<16x16x8xbf16>, vector<16x16x8xbf16> -> vector<16x16x72xbf16>
    %16 = vector.shape_cast %15 : vector<16x16x72xbf16> to vector<256x72xbf16>
    %c0_34 = arith.constant 0 : index
    %c0_35 = arith.constant 0 : index
    %17 = vector.load %arg2[%c0_34, %c0_35] : memref<72x16xbf16, #tpu.memory_space<vmem>>, vector<72x16xbf16>
    %cst_36 = arith.constant dense<0.000000e+00> : vector<256x16xf32>
    %18 = tpu.matmul %16, %17, %cst_36 {dimension_numbers = #tpu.dot_dimension_numbers<[1], [0], [0], [1], [0, 0, 1, 1], [], []>} : vector<256x72xbf16>, vector<72x16xbf16>, vector<256x16xf32> -> vector<256x16xf32>
    %c0_37 = arith.constant 0 : index
    %c0_38 = arith.constant 0 : index
    %19 = vector.load %arg3[%c0_37, %c0_38] : memref<1x16xf32, #tpu.memory_space<vmem>>, vector<1x16xf32>
    %20 = vector.broadcast %19 : vector<1x16xf32> to vector<256x16xf32>
    %21 = arith.addf %18, %20 : vector<256x16xf32>
    %c0_39 = arith.constant 0 : index
    %22 = memref.load %arg4[%c0_39] : memref<1xf32, #tpu.memory_space<smem>>
    %cst_40 = arith.constant 0.000000e+00 : f32
    %23 = vector.broadcast %cst_40 : f32 to vector<256x16xf32>
    %24 = arith.cmpf oge, %21, %23 : vector<256x16xf32>
    %25 = vector.broadcast %22 : f32 to vector<256x16xf32>
    %26 = arith.mulf %25, %21 : vector<256x16xf32>
    %27 = arith.select %24, %21, %26 : vector<256x16xi1>, vector<256x16xf32>
    %28 = vector.shape_cast %27 : vector<256x16xf32> to vector<16x16x16xf32>
    %29 = vector.extract_strided_slice %28 {offsets = [0, 0, 0], sizes = [16, 16, 8], strides = [1, 1, 1]} : vector<16x16x16xf32> to vector<16x16x8xf32>
    %c0_41 = arith.constant 0 : index
    %c0_42 = arith.constant 0 : index
    %c0_43 = arith.constant 0 : index
    %c0_44 = arith.constant 0 : index
    %c0_45 = arith.constant 0 : index
    %30 = vector.load %arg5[%c0_41, %c0_42, %c0_43, %c0_44, %c0_45] : memref<1x16x2x16x8xf32, #tpu.memory_space<vmem>>, vector<1x16x1x16x8xf32>
    %31 = vector.shape_cast %30 : vector<1x16x1x16x8xf32> to vector<16x16x8xf32>
    %32 = vector.shape_cast %29 : vector<16x16x8xf32> to vector<1x16x1x16x8xf32>
    tpu.vector_store %arg5[%c0_41, %c0_42, %c0_43, %c0_44, %c0_45], %32 {strides = array<i32>} : memref<1x16x2x16x8xf32, #tpu.memory_space<vmem>>, vector<1x16x1x16x8xf32>,
    %33 = vector.extract_strided_slice %28 {offsets = [0, 0, 8], sizes = [16, 16, 8], strides = [1, 1, 1]} : vector<16x16x16xf32> to vector<16x16x8xf32>
    %c0_46 = arith.constant 0 : index
    %c0_47 = arith.constant 0 : index
    %c1_48 = arith.constant 1 : index
    %c0_49 = arith.constant 0 : index
    %c0_50 = arith.constant 0 : index
    %34 = vector.load %arg5[%c0_46, %c0_47, %c1_48, %c0_49, %c0_50] : memref<1x16x2x16x8xf32, #tpu.memory_space<vmem>>, vector<1x16x1x16x8xf32>
    %35 = vector.shape_cast %34 : vector<1x16x1x16x8xf32> to vector<16x16x8xf32>
    %36 = vector.shape_cast %33 : vector<16x16x8xf32> to vector<1x16x1x16x8xf32>
    tpu.vector_store %arg5[%c0_46, %c0_47, %c1_48, %c0_49, %c0_50], %36 {strides = array<i32>} : memref<1x16x2x16x8xf32, #tpu.memory_space<vmem>>, vector<1x16x1x16x8xf32>,
    return
  }
  func.func @transform_0(%arg0: i32) -> (i32, i32, i32, i32) {
    %c0_i32 = arith.constant 0 : i32
    %c0_i32_0 = arith.constant 0 : i32
    %c0_i32_1 = arith.constant 0 : i32
    %c0_i32_2 = arith.constant 0 : i32
    return %arg0, %c0_i32, %c0_i32_0, %c0_i32_1 : i32, i32, i32, i32
  }
  func.func @transform_1(%arg0: i32) -> (i32, i32) {
    %c0_i32 = arith.constant 0 : i32
    %c0_i32_0 = arith.constant 0 : i32
    %c0_i32_1 = arith.constant 0 : i32
    return %c0_i32, %c0_i32_0 : i32, i32
  }
  func.func @transform_2(%arg0: i32) -> (i32, i32) {
    %c0_i32 = arith.constant 0 : i32
    %c0_i32_0 = arith.constant 0 : i32
    %c0_i32_1 = arith.constant 0 : i32
    return %c0_i32, %c0_i32_0 : i32, i32
  }
  func.func @transform_3(%arg0: i32) -> i32 {
    %c0_i32 = arith.constant 0 : i32
    %c0_i32_0 = arith.constant 0 : i32
    return %c0_i32 : i32
  }
  func.func @transform_4(%arg0: i32) -> (i32, i32, i32, i32, i32) {
    %c0_i32 = arith.constant 0 : i32
    %c0_i32_0 = arith.constant 0 : i32
    %c0_i32_1 = arith.constant 0 : i32
    %c0_i32_2 = arith.constant 0 : i32
    %c0_i32_3 = arith.constant 0 : i32
    return %arg0, %c0_i32, %c0_i32_0, %c0_i32_1, %c0_i32_2 : i32, i32, i32, i32, i32
  }
}

module attributes {stable_mosaic.version = 11 : i64} {
  func.func @kernel(%arg0: i32, %arg1: memref<1x16x2x16x8xf32, #tpu.memory_space<vmem>>, %arg2: memref<1x16x2x16x8xf32, #tpu.memory_space<vmem>>, %arg3: memref<1x16x16x8xf32, #tpu.memory_space<vmem>>, %arg4: memref<96x8xbf16, #tpu.memory_space<vmem>>, %arg5: memref<1x8xf32, #tpu.memory_space<vmem>>, %arg6: memref<1xf32, #tpu.memory_space<smem>>, %arg7: memref<1x16x16x8xf32, #tpu.memory_space<vmem>>, %arg8: memref<17x18x8xbf16, #tpu.memory_space<vmem>>, %arg9: memref<17x18x8xbf16, #tpu.memory_space<vmem>>) attributes {dimension_semantics = [#tpu.dimension_semantics<parallel>], iteration_bounds = array<i64: 2>, scalar_prefetch = 0 : i64, scratch_operands = 2 : i64, tpu.core_type = #tpu.core_type<tc>, window_params = [{transform_indices = @transform_0, window_bounds = array<i64: 1, 16, 2, 16, 8>}, {transform_indices = @transform_1, window_bounds = array<i64: 1, 16, 2, 16, 8>}, {transform_indices = @transform_2, window_bounds = array<i64: 1, 16, 16, 8>}, {pipeline_mode = #tpu.pipeline_mode<synchronous>, transform_indices = @transform_3, window_bounds = array<i64: 96, 8>}, {pipeline_mode = #tpu.pipeline_mode<synchronous>, transform_indices = @transform_4, window_bounds = array<i64: 1, 8>}, {transform_indices = @transform_5, window_bounds = array<i64: 1>}, {transform_indices = @transform_6, window_bounds = array<i64: 1, 16, 16, 8>}]} {
    %c0 = arith.constant 0 : index
    %c0_0 = arith.constant 0 : index
    %c0_1 = arith.constant 0 : index
    %c0_2 = arith.constant 0 : index
    %c0_3 = arith.constant 0 : index
    %0 = vector.load %arg1[%c0, %c0_0, %c0_1, %c0_2, %c0_3] : memref<1x16x2x16x8xf32, #tpu.memory_space<vmem>>, vector<1x16x2x16x8xf32>
    %c0_4 = arith.constant 0 : index
    %c0_5 = arith.constant 0 : index
    %c0_6 = arith.constant 0 : index
    %c0_7 = arith.constant 0 : index
    %c0_8 = arith.constant 0 : index
    %1 = vector.load %arg2[%c0_4, %c0_5, %c0_6, %c0_7, %c0_8] : memref<1x16x2x16x8xf32, #tpu.memory_space<vmem>>, vector<1x16x2x16x8xf32>
    %2 = arith.subf %0, %1 : vector<1x16x2x16x8xf32>
    %3 = arith.truncf %2 : vector<1x16x2x16x8xf32> to vector<1x16x2x16x8xbf16>
    %cst = arith.constant 0.000000e+00 : bf16
    %4 = vector.broadcast %cst : bf16 to vector<17x18x8xbf16>
    %c0_9 = arith.constant 0 : index
    %c0_10 = arith.constant 0 : index
    %c0_11 = arith.constant 0 : index
    %5 = vector.load %arg8[%c0_9, %c0_10, %c0_11] : memref<17x18x8xbf16, #tpu.memory_space<vmem>>, vector<17x18x8xbf16>
    tpu.vector_store %arg8[%c0_9, %c0_10, %c0_11], %4 {strides = array<i32>} : memref<17x18x8xbf16, #tpu.memory_space<vmem>>, vector<17x18x8xbf16>,
    %cst_12 = arith.constant 0.000000e+00 : bf16
    %6 = vector.broadcast %cst_12 : bf16 to vector<17x18x8xbf16>
    %c0_13 = arith.constant 0 : index
    %c0_14 = arith.constant 0 : index
    %c0_15 = arith.constant 0 : index
    %7 = vector.load %arg9[%c0_13, %c0_14, %c0_15] : memref<17x18x8xbf16, #tpu.memory_space<vmem>>, vector<17x18x8xbf16>
    tpu.vector_store %arg9[%c0_13, %c0_14, %c0_15], %6 {strides = array<i32>} : memref<17x18x8xbf16, #tpu.memory_space<vmem>>, vector<17x18x8xbf16>,
    %8 = vector.extract_strided_slice %3 {offsets = [0, 0, 1, 0, 0], sizes = [1, 16, 1, 16, 8], strides = [1, 1, 1, 1, 1]} : vector<1x16x2x16x8xbf16> to vector<1x16x1x16x8xbf16>
    %9 = vector.shape_cast %8 : vector<1x16x1x16x8xbf16> to vector<16x16x8xbf16>
    %c1 = arith.constant 1 : index
    %c1_16 = arith.constant 1 : index
    %c0_17 = arith.constant 0 : index
    %10 = vector.load %arg8[%c1, %c1_16, %c0_17] : memref<17x18x8xbf16, #tpu.memory_space<vmem>>, vector<16x16x8xbf16>
    tpu.vector_store %arg8[%c1, %c1_16, %c0_17], %9 {strides = array<i32>} : memref<17x18x8xbf16, #tpu.memory_space<vmem>>, vector<16x16x8xbf16>,
    %11 = vector.extract_strided_slice %3 {offsets = [0, 0, 0, 0, 0], sizes = [1, 16, 1, 16, 8], strides = [1, 1, 1, 1, 1]} : vector<1x16x2x16x8xbf16> to vector<1x16x1x16x8xbf16>
    %12 = vector.shape_cast %11 : vector<1x16x1x16x8xbf16> to vector<16x16x8xbf16>
    %c0_18 = arith.constant 0 : index
    %c1_19 = arith.constant 1 : index
    %c0_20 = arith.constant 0 : index
    %13 = vector.load %arg9[%c0_18, %c1_19, %c0_20] : memref<17x18x8xbf16, #tpu.memory_space<vmem>>, vector<16x16x8xbf16>
    tpu.vector_store %arg9[%c0_18, %c1_19, %c0_20], %12 {strides = array<i32>} : memref<17x18x8xbf16, #tpu.memory_space<vmem>>, vector<16x16x8xbf16>,
    %c0_21 = arith.constant 0 : index
    %c0_22 = arith.constant 0 : index
    %c0_23 = arith.constant 0 : index
    %14 = vector.load %arg8[%c0_21, %c0_22, %c0_23] : memref<17x18x8xbf16, #tpu.memory_space<vmem>>, vector<16x16x8xbf16>
    %c0_24 = arith.constant 0 : index
    %c1_25 = arith.constant 1 : index
    %c0_26 = arith.constant 0 : index
    %15 = vector.load %arg8[%c0_24, %c1_25, %c0_26] : memref<17x18x8xbf16, #tpu.memory_space<vmem>>, vector<16x16x8xbf16>
    %c0_27 = arith.constant 0 : index
    %c2 = arith.constant 2 : index
    %c0_28 = arith.constant 0 : index
    %16 = vector.load %arg8[%c0_27, %c2, %c0_28] : memref<17x18x8xbf16, #tpu.memory_space<vmem>>, vector<16x16x8xbf16>
    %c0_29 = arith.constant 0 : index
    %c0_30 = arith.constant 0 : index
    %c0_31 = arith.constant 0 : index
    %17 = vector.load %arg9[%c0_29, %c0_30, %c0_31] : memref<17x18x8xbf16, #tpu.memory_space<vmem>>, vector<16x16x8xbf16>
    %c0_32 = arith.constant 0 : index
    %c1_33 = arith.constant 1 : index
    %c0_34 = arith.constant 0 : index
    %18 = vector.load %arg9[%c0_32, %c1_33, %c0_34] : memref<17x18x8xbf16, #tpu.memory_space<vmem>>, vector<16x16x8xbf16>
    %c0_35 = arith.constant 0 : index
    %c2_36 = arith.constant 2 : index
    %c0_37 = arith.constant 0 : index
    %19 = vector.load %arg9[%c0_35, %c2_36, %c0_37] : memref<17x18x8xbf16, #tpu.memory_space<vmem>>, vector<16x16x8xbf16>
    %c1_38 = arith.constant 1 : index
    %c0_39 = arith.constant 0 : index
    %c0_40 = arith.constant 0 : index
    %20 = vector.load %arg8[%c1_38, %c0_39, %c0_40] : memref<17x18x8xbf16, #tpu.memory_space<vmem>>, vector<16x16x8xbf16>
    %c1_41 = arith.constant 1 : index
    %c1_42 = arith.constant 1 : index
    %c0_43 = arith.constant 0 : index
    %21 = vector.load %arg8[%c1_41, %c1_42, %c0_43] : memref<17x18x8xbf16, #tpu.memory_space<vmem>>, vector<16x16x8xbf16>
    %c1_44 = arith.constant 1 : index
    %c2_45 = arith.constant 2 : index
    %c0_46 = arith.constant 0 : index
    %22 = vector.load %arg8[%c1_44, %c2_45, %c0_46] : memref<17x18x8xbf16, #tpu.memory_space<vmem>>, vector<16x16x8xbf16>
    %c1_47 = arith.constant 1 : index
    %c0_48 = arith.constant 0 : index
    %c0_49 = arith.constant 0 : index
    %23 = vector.load %arg9[%c1_47, %c0_48, %c0_49] : memref<17x18x8xbf16, #tpu.memory_space<vmem>>, vector<16x16x8xbf16>
    %c1_50 = arith.constant 1 : index
    %c1_51 = arith.constant 1 : index
    %c0_52 = arith.constant 0 : index
    %24 = vector.load %arg9[%c1_50, %c1_51, %c0_52] : memref<17x18x8xbf16, #tpu.memory_space<vmem>>, vector<16x16x8xbf16>
    %c1_53 = arith.constant 1 : index
    %c2_54 = arith.constant 2 : index
    %c0_55 = arith.constant 0 : index
    %25 = vector.load %arg9[%c1_53, %c2_54, %c0_55] : memref<17x18x8xbf16, #tpu.memory_space<vmem>>, vector<16x16x8xbf16>
    %26 = tpu.concatenate %14, %15, %16, %17, %18, %19, %20, %21, %22, %23, %24, %25 in 2 : vector<16x16x8xbf16>, vector<16x16x8xbf16>, vector<16x16x8xbf16>, vector<16x16x8xbf16>, vector<16x16x8xbf16>, vector<16x16x8xbf16>, vector<16x16x8xbf16>, vector<16x16x8xbf16>, vector<16x16x8xbf16>, vector<16x16x8xbf16>, vector<16x16x8xbf16>, vector<16x16x8xbf16> -> vector<16x16x96xbf16>
    %27 = vector.shape_cast %26 : vector<16x16x96xbf16> to vector<256x96xbf16>
    %c0_56 = arith.constant 0 : index
    %c0_57 = arith.constant 0 : index
    %28 = vector.load %arg4[%c0_56, %c0_57] : memref<96x8xbf16, #tpu.memory_space<vmem>>, vector<96x8xbf16>
    %cst_58 = arith.constant dense<0.000000e+00> : vector<256x8xf32>
    %29 = tpu.matmul %27, %28, %cst_58 {dimension_numbers = #tpu.dot_dimension_numbers<[1], [0], [0], [1], [0, 0, 1, 1], [], []>} : vector<256x96xbf16>, vector<96x8xbf16>, vector<256x8xf32> -> vector<256x8xf32>
    %c0_59 = arith.constant 0 : index
    %c0_60 = arith.constant 0 : index
    %30 = vector.load %arg5[%c0_59, %c0_60] : memref<1x8xf32, #tpu.memory_space<vmem>>, vector<1x8xf32>
    %31 = vector.broadcast %30 : vector<1x8xf32> to vector<256x8xf32>
    %32 = arith.addf %29, %31 : vector<256x8xf32>
    %c0_61 = arith.constant 0 : index
    %33 = memref.load %arg6[%c0_61] : memref<1xf32, #tpu.memory_space<smem>>
    %cst_62 = arith.constant 0.000000e+00 : f32
    %34 = vector.broadcast %cst_62 : f32 to vector<256x8xf32>
    %35 = arith.cmpf oge, %32, %34 : vector<256x8xf32>
    %36 = vector.broadcast %33 : f32 to vector<256x8xf32>
    %37 = arith.mulf %36, %32 : vector<256x8xf32>
    %38 = arith.select %35, %32, %37 : vector<256x8xi1>, vector<256x8xf32>
    %39 = vector.shape_cast %38 : vector<256x8xf32> to vector<1x16x16x8xf32>
    %c0_63 = arith.constant 0 : index
    %c0_64 = arith.constant 0 : index
    %c0_65 = arith.constant 0 : index
    %c0_66 = arith.constant 0 : index
    %40 = vector.load %arg3[%c0_63, %c0_64, %c0_65, %c0_66] : memref<1x16x16x8xf32, #tpu.memory_space<vmem>>, vector<1x16x16x8xf32>
    %41 = arith.addf %39, %40 : vector<1x16x16x8xf32>
    %c0_67 = arith.constant 0 : index
    %c0_68 = arith.constant 0 : index
    %c0_69 = arith.constant 0 : index
    %c0_70 = arith.constant 0 : index
    %42 = vector.load %arg7[%c0_67, %c0_68, %c0_69, %c0_70] : memref<1x16x16x8xf32, #tpu.memory_space<vmem>>, vector<1x16x16x8xf32>
    tpu.vector_store %arg7[%c0_67, %c0_68, %c0_69, %c0_70], %41 {strides = array<i32>} : memref<1x16x16x8xf32, #tpu.memory_space<vmem>>, vector<1x16x16x8xf32>,
    return
  }
  func.func @transform_0(%arg0: i32) -> (i32, i32, i32, i32, i32) {
    %c0_i32 = arith.constant 0 : i32
    %c0_i32_0 = arith.constant 0 : i32
    %c0_i32_1 = arith.constant 0 : i32
    %c0_i32_2 = arith.constant 0 : i32
    %c0_i32_3 = arith.constant 0 : i32
    return %arg0, %c0_i32, %c0_i32_0, %c0_i32_1, %c0_i32_2 : i32, i32, i32, i32, i32
  }
  func.func @transform_1(%arg0: i32) -> (i32, i32, i32, i32, i32) {
    %c0_i32 = arith.constant 0 : i32
    %c0_i32_0 = arith.constant 0 : i32
    %c0_i32_1 = arith.constant 0 : i32
    %c0_i32_2 = arith.constant 0 : i32
    %c0_i32_3 = arith.constant 0 : i32
    return %arg0, %c0_i32, %c0_i32_0, %c0_i32_1, %c0_i32_2 : i32, i32, i32, i32, i32
  }
  func.func @transform_2(%arg0: i32) -> (i32, i32, i32, i32) {
    %c0_i32 = arith.constant 0 : i32
    %c0_i32_0 = arith.constant 0 : i32
    %c0_i32_1 = arith.constant 0 : i32
    %c0_i32_2 = arith.constant 0 : i32
    return %arg0, %c0_i32, %c0_i32_0, %c0_i32_1 : i32, i32, i32, i32
  }
  func.func @transform_3(%arg0: i32) -> (i32, i32) {
    %c0_i32 = arith.constant 0 : i32
    %c0_i32_0 = arith.constant 0 : i32
    %c0_i32_1 = arith.constant 0 : i32
    return %c0_i32, %c0_i32_0 : i32, i32
  }
  func.func @transform_4(%arg0: i32) -> (i32, i32) {
    %c0_i32 = arith.constant 0 : i32
    %c0_i32_0 = arith.constant 0 : i32
    %c0_i32_1 = arith.constant 0 : i32
    return %c0_i32, %c0_i32_0 : i32, i32
  }
  func.func @transform_5(%arg0: i32) -> i32 {
    %c0_i32 = arith.constant 0 : i32
    %c0_i32_0 = arith.constant 0 : i32
    return %c0_i32 : i32
  }
  func.func @transform_6(%arg0: i32) -> (i32, i32, i32, i32) {
    %c0_i32 = arith.constant 0 : i32
    %c0_i32_0 = arith.constant 0 : i32
    %c0_i32_1 = arith.constant 0 : i32
    %c0_i32_2 = arith.constant 0 : i32
    return %arg0, %c0_i32, %c0_i32_0, %c0_i32_1 : i32, i32, i32, i32
  }
}

module attributes {stable_mosaic.version = 11 : i64} {
  func.func @kernel(%arg0: i32, %arg1: memref<1x8x2x8x16xf32, #tpu.memory_space<vmem>>, %arg2: memref<1x8x2x8x16xf32, #tpu.memory_space<vmem>>, %arg3: memref<1x8x8x16xf32, #tpu.memory_space<vmem>>, %arg4: memref<192x16xbf16, #tpu.memory_space<vmem>>, %arg5: memref<1x16xf32, #tpu.memory_space<vmem>>, %arg6: memref<1xf32, #tpu.memory_space<smem>>, %arg7: memref<1x8x8x16xf32, #tpu.memory_space<vmem>>, %arg8: memref<9x10x16xbf16, #tpu.memory_space<vmem>>, %arg9: memref<9x10x16xbf16, #tpu.memory_space<vmem>>) attributes {dimension_semantics = [#tpu.dimension_semantics<parallel>], iteration_bounds = array<i64: 2>, scalar_prefetch = 0 : i64, scratch_operands = 2 : i64, tpu.core_type = #tpu.core_type<tc>, window_params = [{transform_indices = @transform_0, window_bounds = array<i64: 1, 8, 2, 8, 16>}, {transform_indices = @transform_1, window_bounds = array<i64: 1, 8, 2, 8, 16>}, {transform_indices = @transform_2, window_bounds = array<i64: 1, 8, 8, 16>}, {pipeline_mode = #tpu.pipeline_mode<synchronous>, transform_indices = @transform_3, window_bounds = array<i64: 192, 16>}, {pipeline_mode = #tpu.pipeline_mode<synchronous>, transform_indices = @transform_4, window_bounds = array<i64: 1, 16>}, {transform_indices = @transform_5, window_bounds = array<i64: 1>}, {transform_indices = @transform_6, window_bounds = array<i64: 1, 8, 8, 16>}]} {
    %c0 = arith.constant 0 : index
    %c0_0 = arith.constant 0 : index
    %c0_1 = arith.constant 0 : index
    %c0_2 = arith.constant 0 : index
    %c0_3 = arith.constant 0 : index
    %0 = vector.load %arg1[%c0, %c0_0, %c0_1, %c0_2, %c0_3] : memref<1x8x2x8x16xf32, #tpu.memory_space<vmem>>, vector<1x8x2x8x16xf32>
    %c0_4 = arith.constant 0 : index
    %c0_5 = arith.constant 0 : index
    %c0_6 = arith.constant 0 : index
    %c0_7 = arith.constant 0 : index
    %c0_8 = arith.constant 0 : index
    %1 = vector.load %arg2[%c0_4, %c0_5, %c0_6, %c0_7, %c0_8] : memref<1x8x2x8x16xf32, #tpu.memory_space<vmem>>, vector<1x8x2x8x16xf32>
    %2 = arith.subf %0, %1 : vector<1x8x2x8x16xf32>
    %3 = arith.truncf %2 : vector<1x8x2x8x16xf32> to vector<1x8x2x8x16xbf16>
    %cst = arith.constant 0.000000e+00 : bf16
    %4 = vector.broadcast %cst : bf16 to vector<9x10x16xbf16>
    %c0_9 = arith.constant 0 : index
    %c0_10 = arith.constant 0 : index
    %c0_11 = arith.constant 0 : index
    %5 = vector.load %arg8[%c0_9, %c0_10, %c0_11] : memref<9x10x16xbf16, #tpu.memory_space<vmem>>, vector<9x10x16xbf16>
    tpu.vector_store %arg8[%c0_9, %c0_10, %c0_11], %4 {strides = array<i32>} : memref<9x10x16xbf16, #tpu.memory_space<vmem>>, vector<9x10x16xbf16>,
    %cst_12 = arith.constant 0.000000e+00 : bf16
    %6 = vector.broadcast %cst_12 : bf16 to vector<9x10x16xbf16>
    %c0_13 = arith.constant 0 : index
    %c0_14 = arith.constant 0 : index
    %c0_15 = arith.constant 0 : index
    %7 = vector.load %arg9[%c0_13, %c0_14, %c0_15] : memref<9x10x16xbf16, #tpu.memory_space<vmem>>, vector<9x10x16xbf16>
    tpu.vector_store %arg9[%c0_13, %c0_14, %c0_15], %6 {strides = array<i32>} : memref<9x10x16xbf16, #tpu.memory_space<vmem>>, vector<9x10x16xbf16>,
    %8 = vector.extract_strided_slice %3 {offsets = [0, 0, 1, 0, 0], sizes = [1, 8, 1, 8, 16], strides = [1, 1, 1, 1, 1]} : vector<1x8x2x8x16xbf16> to vector<1x8x1x8x16xbf16>
    %9 = vector.shape_cast %8 : vector<1x8x1x8x16xbf16> to vector<8x8x16xbf16>
    %c1 = arith.constant 1 : index
    %c1_16 = arith.constant 1 : index
    %c0_17 = arith.constant 0 : index
    %10 = vector.load %arg8[%c1, %c1_16, %c0_17] : memref<9x10x16xbf16, #tpu.memory_space<vmem>>, vector<8x8x16xbf16>
    tpu.vector_store %arg8[%c1, %c1_16, %c0_17], %9 {strides = array<i32>} : memref<9x10x16xbf16, #tpu.memory_space<vmem>>, vector<8x8x16xbf16>,
    %11 = vector.extract_strided_slice %3 {offsets = [0, 0, 0, 0, 0], sizes = [1, 8, 1, 8, 16], strides = [1, 1, 1, 1, 1]} : vector<1x8x2x8x16xbf16> to vector<1x8x1x8x16xbf16>
    %12 = vector.shape_cast %11 : vector<1x8x1x8x16xbf16> to vector<8x8x16xbf16>
    %c0_18 = arith.constant 0 : index
    %c1_19 = arith.constant 1 : index
    %c0_20 = arith.constant 0 : index
    %13 = vector.load %arg9[%c0_18, %c1_19, %c0_20] : memref<9x10x16xbf16, #tpu.memory_space<vmem>>, vector<8x8x16xbf16>
    tpu.vector_store %arg9[%c0_18, %c1_19, %c0_20], %12 {strides = array<i32>} : memref<9x10x16xbf16, #tpu.memory_space<vmem>>, vector<8x8x16xbf16>,
    %c0_21 = arith.constant 0 : index
    %c0_22 = arith.constant 0 : index
    %c0_23 = arith.constant 0 : index
    %14 = vector.load %arg8[%c0_21, %c0_22, %c0_23] : memref<9x10x16xbf16, #tpu.memory_space<vmem>>, vector<8x8x16xbf16>
    %c0_24 = arith.constant 0 : index
    %c1_25 = arith.constant 1 : index
    %c0_26 = arith.constant 0 : index
    %15 = vector.load %arg8[%c0_24, %c1_25, %c0_26] : memref<9x10x16xbf16, #tpu.memory_space<vmem>>, vector<8x8x16xbf16>
    %c0_27 = arith.constant 0 : index
    %c2 = arith.constant 2 : index
    %c0_28 = arith.constant 0 : index
    %16 = vector.load %arg8[%c0_27, %c2, %c0_28] : memref<9x10x16xbf16, #tpu.memory_space<vmem>>, vector<8x8x16xbf16>
    %c0_29 = arith.constant 0 : index
    %c0_30 = arith.constant 0 : index
    %c0_31 = arith.constant 0 : index
    %17 = vector.load %arg9[%c0_29, %c0_30, %c0_31] : memref<9x10x16xbf16, #tpu.memory_space<vmem>>, vector<8x8x16xbf16>
    %c0_32 = arith.constant 0 : index
    %c1_33 = arith.constant 1 : index
    %c0_34 = arith.constant 0 : index
    %18 = vector.load %arg9[%c0_32, %c1_33, %c0_34] : memref<9x10x16xbf16, #tpu.memory_space<vmem>>, vector<8x8x16xbf16>
    %c0_35 = arith.constant 0 : index
    %c2_36 = arith.constant 2 : index
    %c0_37 = arith.constant 0 : index
    %19 = vector.load %arg9[%c0_35, %c2_36, %c0_37] : memref<9x10x16xbf16, #tpu.memory_space<vmem>>, vector<8x8x16xbf16>
    %c1_38 = arith.constant 1 : index
    %c0_39 = arith.constant 0 : index
    %c0_40 = arith.constant 0 : index
    %20 = vector.load %arg8[%c1_38, %c0_39, %c0_40] : memref<9x10x16xbf16, #tpu.memory_space<vmem>>, vector<8x8x16xbf16>
    %c1_41 = arith.constant 1 : index
    %c1_42 = arith.constant 1 : index
    %c0_43 = arith.constant 0 : index
    %21 = vector.load %arg8[%c1_41, %c1_42, %c0_43] : memref<9x10x16xbf16, #tpu.memory_space<vmem>>, vector<8x8x16xbf16>
    %c1_44 = arith.constant 1 : index
    %c2_45 = arith.constant 2 : index
    %c0_46 = arith.constant 0 : index
    %22 = vector.load %arg8[%c1_44, %c2_45, %c0_46] : memref<9x10x16xbf16, #tpu.memory_space<vmem>>, vector<8x8x16xbf16>
    %c1_47 = arith.constant 1 : index
    %c0_48 = arith.constant 0 : index
    %c0_49 = arith.constant 0 : index
    %23 = vector.load %arg9[%c1_47, %c0_48, %c0_49] : memref<9x10x16xbf16, #tpu.memory_space<vmem>>, vector<8x8x16xbf16>
    %c1_50 = arith.constant 1 : index
    %c1_51 = arith.constant 1 : index
    %c0_52 = arith.constant 0 : index
    %24 = vector.load %arg9[%c1_50, %c1_51, %c0_52] : memref<9x10x16xbf16, #tpu.memory_space<vmem>>, vector<8x8x16xbf16>
    %c1_53 = arith.constant 1 : index
    %c2_54 = arith.constant 2 : index
    %c0_55 = arith.constant 0 : index
    %25 = vector.load %arg9[%c1_53, %c2_54, %c0_55] : memref<9x10x16xbf16, #tpu.memory_space<vmem>>, vector<8x8x16xbf16>
    %26 = tpu.concatenate %14, %15, %16, %17, %18, %19, %20, %21, %22, %23, %24, %25 in 2 : vector<8x8x16xbf16>, vector<8x8x16xbf16>, vector<8x8x16xbf16>, vector<8x8x16xbf16>, vector<8x8x16xbf16>, vector<8x8x16xbf16>, vector<8x8x16xbf16>, vector<8x8x16xbf16>, vector<8x8x16xbf16>, vector<8x8x16xbf16>, vector<8x8x16xbf16>, vector<8x8x16xbf16> -> vector<8x8x192xbf16>
    %27 = vector.shape_cast %26 : vector<8x8x192xbf16> to vector<64x192xbf16>
    %c0_56 = arith.constant 0 : index
    %c0_57 = arith.constant 0 : index
    %28 = vector.load %arg4[%c0_56, %c0_57] : memref<192x16xbf16, #tpu.memory_space<vmem>>, vector<192x16xbf16>
    %cst_58 = arith.constant dense<0.000000e+00> : vector<64x16xf32>
    %29 = tpu.matmul %27, %28, %cst_58 {dimension_numbers = #tpu.dot_dimension_numbers<[1], [0], [0], [1], [0, 0, 1, 1], [], []>} : vector<64x192xbf16>, vector<192x16xbf16>, vector<64x16xf32> -> vector<64x16xf32>
    %c0_59 = arith.constant 0 : index
    %c0_60 = arith.constant 0 : index
    %30 = vector.load %arg5[%c0_59, %c0_60] : memref<1x16xf32, #tpu.memory_space<vmem>>, vector<1x16xf32>
    %31 = vector.broadcast %30 : vector<1x16xf32> to vector<64x16xf32>
    %32 = arith.addf %29, %31 : vector<64x16xf32>
    %c0_61 = arith.constant 0 : index
    %33 = memref.load %arg6[%c0_61] : memref<1xf32, #tpu.memory_space<smem>>
    %cst_62 = arith.constant 0.000000e+00 : f32
    %34 = vector.broadcast %cst_62 : f32 to vector<64x16xf32>
    %35 = arith.cmpf oge, %32, %34 : vector<64x16xf32>
    %36 = vector.broadcast %33 : f32 to vector<64x16xf32>
    %37 = arith.mulf %36, %32 : vector<64x16xf32>
    %38 = arith.select %35, %32, %37 : vector<64x16xi1>, vector<64x16xf32>
    %39 = vector.shape_cast %38 : vector<64x16xf32> to vector<1x8x8x16xf32>
    %c0_63 = arith.constant 0 : index
    %c0_64 = arith.constant 0 : index
    %c0_65 = arith.constant 0 : index
    %c0_66 = arith.constant 0 : index
    %40 = vector.load %arg3[%c0_63, %c0_64, %c0_65, %c0_66] : memref<1x8x8x16xf32, #tpu.memory_space<vmem>>, vector<1x8x8x16xf32>
    %41 = arith.addf %39, %40 : vector<1x8x8x16xf32>
    %c0_67 = arith.constant 0 : index
    %c0_68 = arith.constant 0 : index
    %c0_69 = arith.constant 0 : index
    %c0_70 = arith.constant 0 : index
    %42 = vector.load %arg7[%c0_67, %c0_68, %c0_69, %c0_70] : memref<1x8x8x16xf32, #tpu.memory_space<vmem>>, vector<1x8x8x16xf32>
    tpu.vector_store %arg7[%c0_67, %c0_68, %c0_69, %c0_70], %41 {strides = array<i32>} : memref<1x8x8x16xf32, #tpu.memory_space<vmem>>, vector<1x8x8x16xf32>,
    return
  }
  func.func @transform_0(%arg0: i32) -> (i32, i32, i32, i32, i32) {
    %c0_i32 = arith.constant 0 : i32
    %c0_i32_0 = arith.constant 0 : i32
    %c0_i32_1 = arith.constant 0 : i32
    %c0_i32_2 = arith.constant 0 : i32
    %c0_i32_3 = arith.constant 0 : i32
    return %arg0, %c0_i32, %c0_i32_0, %c0_i32_1, %c0_i32_2 : i32, i32, i32, i32, i32
  }
  func.func @transform_1(%arg0: i32) -> (i32, i32, i32, i32, i32) {
    %c0_i32 = arith.constant 0 : i32
    %c0_i32_0 = arith.constant 0 : i32
    %c0_i32_1 = arith.constant 0 : i32
    %c0_i32_2 = arith.constant 0 : i32
    %c0_i32_3 = arith.constant 0 : i32
    return %arg0, %c0_i32, %c0_i32_0, %c0_i32_1, %c0_i32_2 : i32, i32, i32, i32, i32
  }
  func.func @transform_2(%arg0: i32) -> (i32, i32, i32, i32) {
    %c0_i32 = arith.constant 0 : i32
    %c0_i32_0 = arith.constant 0 : i32
    %c0_i32_1 = arith.constant 0 : i32
    %c0_i32_2 = arith.constant 0 : i32
    return %arg0, %c0_i32, %c0_i32_0, %c0_i32_1 : i32, i32, i32, i32
  }
  func.func @transform_3(%arg0: i32) -> (i32, i32) {
    %c0_i32 = arith.constant 0 : i32
    %c0_i32_0 = arith.constant 0 : i32
    %c0_i32_1 = arith.constant 0 : i32
    return %c0_i32, %c0_i32_0 : i32, i32
  }
  func.func @transform_4(%arg0: i32) -> (i32, i32) {
    %c0_i32 = arith.constant 0 : i32
    %c0_i32_0 = arith.constant 0 : i32
    %c0_i32_1 = arith.constant 0 : i32
    return %c0_i32, %c0_i32_0 : i32, i32
  }
  func.func @transform_5(%arg0: i32) -> i32 {
    %c0_i32 = arith.constant 0 : i32
    %c0_i32_0 = arith.constant 0 : i32
    return %c0_i32 : i32
  }
  func.func @transform_6(%arg0: i32) -> (i32, i32, i32, i32) {
    %c0_i32 = arith.constant 0 : i32
    %c0_i32_0 = arith.constant 0 : i32
    %c0_i32_1 = arith.constant 0 : i32
    %c0_i32_2 = arith.constant 0 : i32
    return %arg0, %c0_i32, %c0_i32_0, %c0_i32_1 : i32, i32, i32, i32
  }
}

</mosaic_0001>

<bundles_post_ra>
// kernel: tile.13
= control target key start
LH: loop header
LB: loop body
LE: loop exit
PB: predicated region body
PF: predicated region fallthrough
CT: control target
= control target key end

     0   :  { %s22_s0 = inlined_call_operand.vmem [shape: f32[8], index: 0, kind: input, shape index: {}]   ;;  %s23_s1 = inlined_call_operand.vmem [shape: f32[4,8], index: 1, kind: output, shape index: {}]  }
   0x1   :  { %v4_v0 = vld [vmem:[%s22_s0] ss:$0 sm:$0xff] }
   0x2   :  { %5 = vst [vmem:[%s23_s1] sm:$0xf] %v4_v0 }

// kernel: tile.14
= control target key start
LH: loop header
LB: loop body
LE: loop exit
PB: predicated region body
PF: predicated region fallthrough
CT: control target
= control target key end

     0   :  { %vm7_vm0 = vcmask 64512   ;;  %s37_s8 = smov 8   ;;  %s38_s9 = smov 16   ;;  %vm13_vm1 = vcmask 261312   ;;  %vm19_vm2 = vcmask 195712   ;;  %vm25_vm3 = vcmask 130112   ;;  %s55_s0 = inlined_call_operand.vmem [shape: f32[4,8], index: 0, kind: input, shape index: {}]   ;;  %s56_s1 = inlined_call_operand.vmem [shape: f32[1,32], index: 1, kind: output, shape index: {}]  }
   0x1   :  { %v4_v0 = vld [vmem:[%s55_s0] sm:$0xf]  ;;  %s36_s0 = smov 24  }
   0x2   :  { %5 = vst [vmem:[#allocation1] sm:$0xf] %v4_v0 }
   0x9   :  { %v10_v1 = vld [vmem:[#allocation1 + $0x3] sm:$0x1]   ;;  %v22_v2 = vld [vmem:[#allocation1 + $0x1] sm:$0x1]   ;;  %v6_v3 = vld [vmem:[#allocation1] sm:$0x1]  }
   0xa   :  { %11 = vrot.lane.b32.xlu0 %v10_v1, %s36_s0  ;;  %23 = vrot.lane.b32.xlu1 %v22_v2, %s37_s8  ;;  %v16_v4 = vld [vmem:[#allocation1 + $0x2] sm:$0x1]   ;;  %8 = vst.msk [vmem:[#allocation0] sm:$0x1] %vm7_vm0, %v6_v3  }
   0xe   :  { %17 = vrot.lane.b32.xlu0 %v16_v4, %s38_s9 }
  0x7c   :  { %v12_v5 = vpop.permute.xlu0 %11   ;;  %v24_v6 = vpop.permute.xlu1 %23  }
  0x7d   :  { %14 = vst.msk [vmem:[#allocation0] sm:$0x1] %vm13_vm1, %v12_v5  }
  0x80   :  { %v18_v7 = vpop.permute.xlu0 %17  }
  0x81   :  { %20 = vst.msk [vmem:[#allocation0] sm:$0x1] %vm19_vm2, %v18_v7  }
  0x82   :  { %26 = vst.msk [vmem:[#allocation0] sm:$0x1] %vm25_vm3, %v24_v6  }
  0x89   :  { %v30_v8 = vld [vmem:[#allocation0] sm:$0x1] }
  0x8a   :  { %32 = vst [vmem:[%s56_s1] sm:$0x1] %v30_v8 }

// kernel: tile.18
= control target key start
LH: loop header
LB: loop body
LE: loop exit
PB: predicated region body
PF: predicated region fallthrough
CT: control target
= control target key end

     0   :  { %s22_s0 = inlined_call_operand.vmem [shape: f32[4], index: 0, kind: input, shape index: {}]   ;;  %s23_s1 = inlined_call_operand.vmem [shape: f32[4,4], index: 1, kind: output, shape index: {}]  }
   0x1   :  { %v4_v0 = vld [vmem:[%s22_s0] ss:$0 sm:$0xff] }
   0x2   :  { %5 = vst [vmem:[%s23_s1] sm:$0xf] %v4_v0 }

// kernel: tile.19
= control target key start
LH: loop header
LB: loop body
LE: loop exit
PB: predicated region body
PF: predicated region fallthrough
CT: control target
= control target key end

     0   :  { %vm7_vm0 = vcmask 31744   ;;  %s37_s8 = smov 4   ;;  %s38_s9 = smov 8   ;;  %vm13_vm1 = vcmask 130144   ;;  %vm19_vm2 = vcmask 97344   ;;  %vm25_vm3 = vcmask 64544   ;;  %s55_s0 = inlined_call_operand.vmem [shape: f32[4,4], index: 0, kind: input, shape index: {}]   ;;  %s56_s1 = inlined_call_operand.vmem [shape: f32[1,16], index: 1, kind: output, shape index: {}]  }
   0x1   :  { %v4_v0 = vld [vmem:[%s55_s0] sm:$0xf]  ;;  %s36_s0 = smov 12  }
   0x2   :  { %5 = vst [vmem:[#allocation1] sm:$0xf] %v4_v0 }
   0x9   :  { %v10_v1 = vld [vmem:[#allocation1 + $0x3] sm:$0x1]   ;;  %v22_v2 = vld [vmem:[#allocation1 + $0x1] sm:$0x1]   ;;  %v6_v3 = vld [vmem:[#allocation1] sm:$0x1]  }
   0xa   :  { %11 = vrot.lane.b32.xlu0 %v10_v1, %s36_s0  ;;  %23 = vrot.lane.b32.xlu1 %v22_v2, %s37_s8  ;;  %v16_v4 = vld [vmem:[#allocation1 + $0x2] sm:$0x1]   ;;  %8 = vst.msk [vmem:[#allocation0] sm:$0x1] %vm7_vm0, %v6_v3  }
   0xe   :  { %17 = vrot.lane.b32.xlu0 %v16_v4, %s38_s9 }
  0x7c   :  { %v12_v5 = vpop.permute.xlu0 %11   ;;  %v24_v6 = vpop.permute.xlu1 %23  }
  0x7d   :  { %14 = vst.msk [vmem:[#allocation0] sm:$0x1] %vm13_vm1, %v12_v5  }
  0x80   :  { %v18_v7 = vpop.permute.xlu0 %17  }
  0x81   :  { %20 = vst.msk [vmem:[#allocation0] sm:$0x1] %vm19_vm2, %v18_v7  }
  0x82   :  { %26 = vst.msk [vmem:[#allocation0] sm:$0x1] %vm25_vm3, %v24_v6  }
  0x89   :  { %v30_v8 = vld [vmem:[#allocation0] sm:$0x1] }
  0x8a   :  { %32 = vst [vmem:[%s56_s1] sm:$0x1] %v30_v8 }

// kernel: encoder_mdcblock1_iter1.4
= control target key start
LH: loop header
LB: loop body
LE: loop exit
PB: predicated region body
PF: predicated region fallthrough
CT: control target
= control target key end

     0   :  { %s1704_s17 = smov 0   ;;  %s2148_s0 = inlined_call_operand.vmem [shape: f32[2,8,8,16], index: 0, kind: input, shape index: {}]   ;;  %s2149_s1 = inlined_call_operand.vmem [shape: bf16[144,32], index: 1, kind: input, shape index: {}]   ;;  %s2150_s2 = inlined_call_operand.vmem [shape: f32[1,32], index: 2, kind: input, shape index: {}]   ;;  %s2151_s3 = inlined_call_operand.<no memory space> [shape: f32[1], index: 3, kind: input, shape index: {}]   ;;  %s2152_s4 = inlined_call_operand.vmem [shape: f32[2,8,2,8,16], index: 4, kind: output, shape index: {}]  }
   0x1   :  { %9 = sst [smem:[#allocation3]] %s2151_s3 }
   0x2 LB: > { %s1431_s18 = sadd.s32 4294967295, %s1666_s17   ;;  %p1435_p0 = scmp.ge.s32.totalorder %s1666_s17, 1  ;;  %s1666_s17 = sphi %s1704_s17, %s15_s17  }
   0x3   : > { %p163_p1 = scmp.lt.s32.totalorder %s1666_s17, 3 }
   0x5   : > { %p164_p2 = pnand %p1435_p0, %p163_p1 }
   0x6   : > { %vm200_vm0 = vcmask (!%p164_p2), 125952   ;;  %vm202_vm1 = vcmask (!%p164_p2), 122880   ;;  %v1668_v0 = vmov (!%p164_p2), 0   ;;  %p189_p3 = scmp.lt.s32.totalorder (!%p164_p2), %s1431_s18, 1  ;;  %vm344_vm2 = vsmask.f32 (!%p164_p2), 7938 }
   0x7   : > { %167 = sbr.rel (%p164_p2) target bundleno = 598 (0x256), region = 36  ;;  %201 = vst.msk [vmem:[#allocation2] sm:$0xf] (!%p164_p2), %vm200_vm0, %v1668_v0  ;;  %204 = vst.msk [vmem:[#allocation2 + $0x8] sm:$0xf] (!%p164_p2), %vm200_vm0, %v1668_v0  ;;  %1236 = vmatprep.subr.bf16.mxu0 (!%p164_p2), %v1668_v0  ;;  %1554 = vmatprep.subr.bf16.mxu1 (!%p164_p2), %v1668_v0  ;;  %s1669_s22 = smov (!%p164_p2), 32  }
   0x8   : > { %203 = vst.msk [vmem:[#allocation2 + $0x4] sm:$0x1] (!%p164_p2), %vm202_vm1, %v1668_v0  ;;  %205 = vst.msk [vmem:[#allocation2 + $0xc] sm:$0x1] (!%p164_p2), %vm202_vm1, %v1668_v0  ;;  %vm350_vm3 = vsmask.f32 (!%p164_p2), 256 }
   0x9   : > { %206 = vst.msk [vmem:[#allocation2 + $0x10] sm:$0xf] (!%p164_p2), %vm200_vm0, %v1668_v0  ;;  %208 = vst.msk [vmem:[#allocation2 + $0x18] sm:$0xf] (!%p164_p2), %vm200_vm0, %v1668_v0  ;;  %s1670_s23 = smov (!%p164_p2), 16   ;;  %s1671_s24 = smov (!%p164_p2), 48  }
   0xa   : > { %207 = vst.msk [vmem:[#allocation2 + $0x14] sm:$0x1] (!%p164_p2), %vm202_vm1, %v1668_v0  ;;  %209 = vst.msk [vmem:[#allocation2 + $0x1c] sm:$0x1] (!%p164_p2), %vm202_vm1, %v1668_v0  ;;  %s1672_s29 = smov (!%p164_p2), 80   ;;  %s1673_s8 = smov (!%p164_p2), 64  }
   0xb   : > { %210 = vst.msk [vmem:[#allocation2 + $0x20] sm:$0xf] (!%p164_p2), %vm200_vm0, %v1668_v0  ;;  %212 = vst.msk [vmem:[#allocation2 + $0x28] sm:$0xf] (!%p164_p2), %vm200_vm0, %v1668_v0  ;;  %s1674_s15 = smov (!%p164_p2), 96   ;;  %vm982_vm6 = vcmask (!%p164_p2), 130048  }
   0xc   : > { %211 = vst.msk [vmem:[#allocation2 + $0x24] sm:$0x1] (!%p164_p2), %vm202_vm1, %v1668_v0  ;;  %213 = vst.msk [vmem:[#allocation2 + $0x2c] sm:$0x1] (!%p164_p2), %vm202_vm1, %v1668_v0  ;;  %vm1007_vm7 = vcmask (!%p164_p2), 261120   ;;  %vm1024_vm8 = vcmask (!%p164_p2), 392192  }
   0xd   : > { %214 = vst.msk [vmem:[#allocation2 + $0x30] sm:$0xf] (!%p164_p2), %vm200_vm0, %v1668_v0  ;;  %216 = vst.msk [vmem:[#allocation2 + $0x38] sm:$0xf] (!%p164_p2), %vm200_vm0, %v1668_v0  ;;  %vm1041_vm9 = vcmask (!%p164_p2), 523264   ;;  %vm1058_vm10 = vcmask (!%p164_p2), 654336  }
   0xe   : > { %215 = vst.msk [vmem:[#allocation2 + $0x34] sm:$0x1] %vm202_vm1, %v1668_v0  ;;  %217 = vst.msk [vmem:[#allocation2 + $0x3c] sm:$0x1] %vm202_vm1, %v1668_v0  ;;  %s2158_s18 = smov (!%p189_p3, %s1431_s18), 1  ;;  %vm1075_vm11 = vcmask 785408  }
   0xf   : > { %218 = vst.msk [vmem:[#allocation2 + $0x40] sm:$0xf] %vm200_vm0, %v1668_v0  ;;  %220 = vst.msk [vmem:[#allocation2 + $0x48] sm:$0xf] %vm200_vm0, %v1668_v0  ;;  %s1544_s3 = sshll.u32 %s2158_s18, 6  ;;  %vm1092_vm12 = vcmask 916480  }
  0x10   : > { %219 = vst.msk [vmem:[#allocation2 + $0x44] sm:$0x1] %vm202_vm1, %v1668_v0  ;;  %221 = vst.msk [vmem:[#allocation2 + $0x4c] sm:$0x1] %vm202_vm1, %v1668_v0  ;;  %s1764_s21 = scalar_lea.vmem %s2148_s0, %s1544_s3  ;;  %v405_v4 = vld [vmem:[#allocation2 + $0x4] sm:$0x1] }
  0x11   : > { %v223_v1 = vld [vmem:[%s1764_s21 + $0x8] sm:$0xff]  ;;  %v222_v2 = vld [vmem:[%s1764_s21] sm:$0xff]  ;;  %v355_v19 = vld [vmem:[#allocation2 + $0x10] sm:$0xf]  ;;  %s1545_s25 = sshll.u32 %s2158_s18, 7 }
  0x12   : > { %v227_v3 = vld [vmem:[%s1764_s21 + $0x28] sm:$0xff]  ;;  %v413_v5 = vld [vmem:[#allocation2] sm:$0xe]  ;;  %v1547_v7 = vpack.c.bf16 %v223_v1, %v223_v1  ;;  %v1546_v8 = vpack.c.bf16 %v222_v2, %v222_v2  ;;  %v358_v22 = vld [vmem:[#allocation2 + $0x14] sm:$0x1]  ;;  %s2103_s28 = scalar_lea.vmem %s2152_s4, %s1545_s25 }
  0x13   : > { %v1769_v6 = vld [vmem:[#allocation2] sm:$0xf]  ;;  %v1551_v9 = vpack.c.bf16 %v227_v3, %v227_v3  ;;  %v1456_v10 = vcombine.low %v413_v5, %v405_v4  ;;  %vm1776_vm4 = vmand %vm200_vm0, %vm344_vm2  ;;  %v346_v28 = vld [vmem:[#allocation2 + $0x8] sm:$0xf] }
  0x14   : > { %v1448_v11 = vcombine.low %v1769_v6, %v405_v4  ;;  %v271_v12 = vshrl.u32 %v1547_v7, 16  ;;  %v274_v13 = vshll.u32 %v1547_v7, 16  ;;  %v263_v14 = vshrl.u32 %v1546_v8, 16  ;;  %v226_v25 = vld [vmem:[%s1764_s21 + $0x20] sm:$0xff]  ;;  %v225_v31 = vld [vmem:[%s1764_s21 + $0x18] sm:$0xff]  ;;  %vm1783_vm5 = vmand %vm202_vm1, %vm350_vm3 }
  0x15   : > { %v266_v15 = vshll.u32 %v1546_v8, 16  ;;  %v606_v16 = vrot.slane %v1456_v10, 1  ;;  %v303_v20 = vshrl.u32 %v1551_v9, 16  ;;  %v306_v24 = vshll.u32 %v1551_v9, 16  ;;  %v379_v35 = vld [vmem:[#allocation2 + $0x30] sm:$0xf] }
  0x16   : > { %v513_v17 = vshll.u32 %v1448_v11, 16  ;;  %v511_v18 = vshrl.u32 %v1448_v11, 16  ;;  %v273_v21 = vrot.slane %v271_v12, 7  ;;  %v265_v23 = vrot.slane %v263_v14, 7  ;;  %v382_v36 = vld [vmem:[#allocation2 + $0x34] sm:$0x1] }
  0x17   : > { %614 = vrot.lane.b32.xlu0 %v606_v16, %s1669_s22  ;;  %v305_v29 = vrot.slane %v303_v20, 7  ;;  %v1550_v30 = vpack.c.bf16 %v226_v25, %v226_v25  ;;  %v1549_v37 = vpack.c.bf16 %v225_v31, %v225_v31  ;;  %v224_v43 = vld [vmem:[%s1764_s21 + $0x10] sm:$0xff]  ;;  %v352_v53 = vld [vmem:[#allocation2 + $0xc] sm:$0x1]  ;;  %v373_v54 = vld [vmem:[#allocation2 + $0x28] sm:$0xf] }
  0x18   : > { %v515_v26 = vrot.slane %v513_v17, 1  ;;  %v276_v32 = vor.u32 %v274_v13, %v273_v21  ;;  %v277_v33 = vrot.slane %v273_v21, 4  ;;  %v268_v34 = vor.u32 %v266_v15, %v265_v23  ;;  %v228_v44 = vld [vmem:[%s1764_s21 + $0x30] sm:$0xff]  ;;  %v376_v55 = vld [vmem:[#allocation2 + $0x2c] sm:$0x1] }
  0x19   : > { %v308_v40 = vor.u32 %v306_v24, %v305_v29  ;;  %v309_v41 = vrot.slane %v305_v29, 4  ;;  %v295_v42 = vshrl.u32 %v1550_v30, 16  ;;  %v298_v48 = vshll.u32 %v1550_v30, 16  ;;  %v367_v63 = vld [vmem:[#allocation2 + $0x20] sm:$0xf] }
  0x1a   : > { %v516_v38 = vor.u32 %v515_v26, %v511_v18  ;;  %v356_v45 = vsel %vm1776_vm4, %v276_v32, %v355_v19  ;;  %v359_v46 = vsel %vm1783_vm5, %v277_v33, %v358_v22  ;;  %v347_v47 = vsel %vm1776_vm4, %v268_v34, %v346_v28  ;;  %v370_v1 = vld [vmem:[#allocation2 + $0x24] sm:$0x1]  ;;  %v361_v11 = vld [vmem:[#allocation2 + $0x18] sm:$0xf] }
  0x1b   : > { %357 = vst [vmem:[#allocation2 + $0x10] sm:$0xf] %v356_v45  ;;  %360 = vst [vmem:[#allocation2 + $0x14] sm:$0x1] %v359_v46  ;;  %v380_v49 = vsel %vm1776_vm4, %v308_v40, %v379_v35  ;;  %v383_v50 = vsel %vm1783_vm5, %v309_v41, %v382_v36  ;;  %v297_v51 = vrot.slane %v295_v42, 7  ;;  %v287_v52 = vshrl.u32 %v1549_v37, 16 }
  0x1c   : > { %566 = vrot.lane.b32.xlu0 %v516_v38, %s1670_s23  ;;  %348 = vst [vmem:[#allocation2 + $0x8] sm:$0xf] %v347_v47  ;;  %381 = vst [vmem:[#allocation2 + $0x30] sm:$0xf] %v380_v49  ;;  %v290_v56 = vshll.u32 %v1549_v37, 16  ;;  %v269_v57 = vrot.slane %v265_v23, 4  ;;  %v1548_v58 = vpack.c.bf16 %v224_v43, %v224_v43  ;;  %v1552_v59 = vpack.c.bf16 %v228_v44, %v228_v44 }
  0x1d   : > { %384 = vst [vmem:[#allocation2 + $0x34] sm:$0x1] %v383_v50  ;;  %v300_v60 = vor.u32 %v298_v48, %v297_v51  ;;  %v301_v61 = vrot.slane %v297_v51, 4  ;;  %v289_v62 = vrot.slane %v287_v52, 7  ;;  %v385_v17 = vld [vmem:[#allocation2 + $0x38] sm:$0xf] }
  0x1e   : > { %v353_v2 = vsel %vm1783_vm5, %v269_v57, %v352_v53  ;;  %v279_v3 = vshrl.u32 %v1548_v58, 16  ;;  %v282_v4 = vshll.u32 %v1548_v58, 16  ;;  %v311_v5 = vshrl.u32 %v1552_v59, 16 }
  0x1f   : > { %v374_v7 = vsel %vm1776_vm4, %v300_v60, %v373_v54  ;;  %v377_v8 = vsel %vm1783_vm5, %v301_v61, %v376_v55  ;;  %v292_v9 = vor.u32 %v290_v56, %v289_v62  ;;  %v293_v10 = vrot.slane %v289_v62, 4  ;;  %354 = vst [vmem:[#allocation2 + $0xc] sm:$0x1] %v353_v2  ;;  %v1647_v2 = vld [vmem:[%s2149_s1] sm:$0xff]  }
  0x20   : > { %375 = vst [vmem:[#allocation2 + $0x28] sm:$0xf] %v374_v7  ;;  %378 = vst [vmem:[#allocation2 + $0x2c] sm:$0x1] %v377_v8  ;;  %v1806_v12 = vrot.slane %v279_v3, 7  ;;  %v1808_v13 = vrot.slane %v311_v5, 7  ;;  %1237 = vmatpush1.bf16.msra.mxu0 %v1647_v2  ;;  %1563 = vmatpush1.bf16.msra.mxu1 %v1647_v2 }
  0x21   : > { %v314_v14 = vshll.u32 %v1552_v59, 16  ;;  %v368_v15 = vsel %vm1776_vm4, %v292_v9, %v367_v63  ;;  %v371_v16 = vsel %vm1783_vm5, %v293_v10, %v370_v1  ;;  %v364_v5 = vld [vmem:[#allocation2 + $0x1c] sm:$0x1]  ;;  %v1648_v8 = vld [vmem:[%s2149_s1 + $0x8] sm:$0xff]   ;;  %1238 = vmatprep.subr.bf16.mxu0 %v1668_v0  ;;  %1555 = vmatprep.subr.bf16.mxu1 %v1668_v0 }
  0x22   : > { %v422_v18 = vld [vmem:[#allocation2 + $0x10] sm:$0xf]  ;;  %369 = vst [vmem:[#allocation2 + $0x20] sm:$0xf] %v368_v15  ;;  %372 = vst [vmem:[#allocation2 + $0x24] sm:$0x1] %v371_v16  ;;  %v284_v20 = vor.u32 %v282_v4, %v1806_v12 }
  0x23   : > { %v421_v19 = vld [vmem:[#allocation2 + $0x8] sm:$0xf]  ;;  %v316_v21 = vor.u32 %v314_v14, %v1808_v13  ;;  %v1465_v22 = vcombine.low %v422_v18, %v422_v18  ;;  %v1816_v24 = vld [vmem:[#allocation2 + $0x30] sm:$0xf]  ;;  %v430_v32 = vld [vmem:[#allocation2 + $0x14] sm:$0x1] }
  0x24   : > { %v1464_v23 = vcombine.low %v421_v19, %v421_v19  ;;  %v414_v25 = vld [vmem:[#allocation2 + $0x8] sm:$0xe]  ;;  %v362_v28 = vsel %vm1776_vm4, %v284_v20, %v361_v11  ;;  %v1469_v30 = vcombine.low %v1816_v24, %v1816_v24  ;;  %v438_v42 = vld [vmem:[#allocation2 + $0x10] sm:$0xe]  ;;  %v1847_v3 = vcombine.low %v422_v18, %v430_v32  ;;  %v229_v7 = vld [vmem:[%s1764_s21 + $0x38] sm:$0xff]  ;;  %1239 = vmatpush1.bf16.msra.mxu0 %v1648_v8  ;;  %s1675_s21 = smov 112  }
  0x25   : > { %v1818_v26 = vld [vmem:[#allocation2 + $0x8] sm:$0xf]  ;;  %v386_v29 = vsel %vm1776_vm4, %v316_v21, %v385_v17  ;;  %656 = vrot.lane.b32.xlu1 %v1465_v22, %s1671_s24  ;;  %363 = vst [vmem:[#allocation2 + $0x18] sm:$0xf] %v362_v28  ;;  %v1481_v56 = vcombine.low %v438_v42, %v430_v32  ;;  %v1853_v9 = vld [vmem:[#allocation2 + $0x34] sm:$0x1]  ;;  %v1553_v22 = vpack.c.bf16 %v229_v7, %v229_v7 }
  0x26   : > { %654 = vrot.lane.b32.xlu0 %v1464_v23, %s1671_s24  ;;  %387 = vst [vmem:[#allocation2 + $0x38] sm:$0xf] %v386_v29  ;;  %v406_v31 = vld [vmem:[#allocation2 + $0xc] sm:$0x1]  ;;  %v437_v37 = vld [vmem:[#allocation2 + $0x8] sm:$0xe]  ;;  %1564 = vmatpush1.bf16.msra.mxu1 %v1648_v8 }
  0x27   : > { %v425_v33 = vld [vmem:[#allocation2 + $0x28] sm:$0xf]  ;;  %v1457_v34 = vcombine.low %v414_v25, %v406_v31  ;;  %v1449_v35 = vcombine.low %v1818_v26, %v406_v31  ;;  %v429_v36 = vld [vmem:[#allocation2 + $0xc] sm:$0x1]  ;;  %v791_v4 = vrot.slane %v1481_v56, 1  ;;  %v317_v21 = vrot.slane %v1808_v13, 4  ;;  %1240 = vmatprep.subr.bf16.mxu0 %v1668_v0  ;;  %1556 = vmatprep.subr.bf16.mxu1 %v1668_v0 }
  0x28   : > { %v1468_v38 = vcombine.low %v425_v33, %v425_v33  ;;  %v410_v40 = vld [vmem:[#allocation2 + $0x2c] sm:$0x1]  ;;  %v418_v41 = vld [vmem:[#allocation2 + $0x28] sm:$0xe]  ;;  %v1472_v46 = vcombine.low %v421_v19, %v429_v36  ;;  %v1480_v52 = vcombine.low %v437_v37, %v429_v36  ;;  %v285_v19 = vrot.slane %v1806_v12, 4  ;;  %v1649_v12 = vld [vmem:[%s2149_s1 + $0x10] sm:$0xff]  }
  0x29   : > { %664 = vrot.lane.b32.xlu1 %v1469_v30, %s1671_s24  ;;  %v1830_v43 = vld [vmem:[#allocation2 + $0x20] sm:$0xf]  ;;  %v409_v44 = vld [vmem:[#allocation2 + $0x24] sm:$0x1]  ;;  %v1461_v47 = vcombine.low %v418_v41, %v410_v40  ;;  %v1832_v48 = vld [vmem:[#allocation2 + $0x2c] sm:$0x1]  ;;  %v1477_v25 = vcombine.low %v1816_v24, %v1853_v9  ;;  %1241 = vmatpush1.bf16.msra.mxu0 %v1649_v12 }
  0x2a   : > { %v417_v45 = vld [vmem:[#allocation2 + $0x20] sm:$0xe]  ;;  %662 = vrot.lane.b32.xlu0 %v1468_v38, %s1671_s24  ;;  %v1452_v49 = vcombine.low %v1830_v43, %v409_v44  ;;  %v607_v51 = vrot.slane %v1457_v34, 1  ;;  %v1836_v53 = vld [vmem:[#allocation2 + $0x28] sm:$0xf]  ;;  %v520_v54 = vshll.u32 %v1449_v35, 16  ;;  %v1839_v57 = vcombine.low %v425_v33, %v1832_v48  ;;  %1565 = vmatpush1.bf16.msra.mxu1 %v1649_v12 }
  0x2b   : > { %v1460_v50 = vcombine.low %v417_v45, %v409_v44  ;;  %v1453_v58 = vcombine.low %v1836_v53, %v410_v40  ;;  %v611_v59 = vrot.slane %v1461_v47, 1  ;;  %v790_v61 = vrot.slane %v1480_v52, 1  ;;  %v388_v20 = vld [vmem:[#allocation2 + $0x3c] sm:$0x1]  ;;  %v441_v34 = vld [vmem:[#allocation2 + $0x28] sm:$0xe]  ;;  %1242 = vmatprep.subr.bf16.mxu0 %v1668_v0  ;;  %1557 = vmatprep.subr.bf16.mxu1 %v1668_v0 }
  0x2c   : > { %v541_v60 = vshll.u32 %v1452_v49, 16  ;;  %v518_v62 = vshrl.u32 %v1449_v35, 16  ;;  %v522_v63 = vrot.slane %v520_v54, 1  ;;  %v697_v1 = vshll.u32 %v1472_v46, 16  ;;  %v1650_v36 = vld [vmem:[%s2149_s1 + $0x18] sm:$0xff]  }
  0x2d   : > { %v610_v55 = vrot.slane %v1460_v50, 1  ;;  %616 = vrot.lane.b32.xlu1 %v607_v51, %s1669_s22  ;;  %v539_v10 = vshrl.u32 %v1452_v49, 16  ;;  %v695_v14 = vshrl.u32 %v1472_v46, 16  ;;  %v548_v15 = vshll.u32 %v1453_v58, 16  ;;  %v1886_v45 = vld [vmem:[#allocation2 + $0x14] sm:$0x1]  ;;  %1243 = vmatpush1.bf16.msra.mxu0 %v1650_v36 }
  0x2e   : > { %v543_v11 = vrot.slane %v541_v60, 1  ;;  %v523_v16 = vor.u32 %v522_v63, %v518_v62  ;;  %v699_v17 = vrot.slane %v697_v1, 1  ;;  %v725_v18 = vshll.u32 %v1839_v57, 16  ;;  %v1651_v49 = vld [vmem:[%s2149_s1 + $0x20] sm:$0xff]   ;;  %v446_v54 = vld [vmem:[#allocation2 + $0x10] sm:$0xf]  ;;  %1244 = vmatprep.subr.bf16.mxu0 %v1668_v0  ;;  %1566 = vmatpush1.bf16.msra.mxu1 %v1650_v36 }
  0x2f   : > { %622 = vrot.lane.b32.xlu0 %v610_v55, %s1669_s22  ;;  %v704_v23 = vshll.u32 %v1847_v3, 16  ;;  %v365_v28 = vsel %vm1783_vm5, %v285_v19, %v364_v5  ;;  %v546_v30 = vshrl.u32 %v1453_v58, 16  ;;  %v550_v13 = vrot.slane %v548_v15, 1  ;;  %v1892_v55 = vld [vmem:[#allocation2 + $0x34] sm:$0x1]  ;;  %1558 = vmatprep.subr.bf16.mxu1 %v1668_v0  ;;  %v1652_v62 = vld [vmem:[%s2149_s1 + $0x28] sm:$0xff]  }
  0x30   : > { %v544_v29 = vor.u32 %v543_v11, %v539_v10  ;;  %366 = vst [vmem:[#allocation2 + $0x1c] sm:$0x1] %v365_v28  ;;  %v389_v31 = vsel %vm1783_vm5, %v317_v21, %v388_v20  ;;  %v700_v24 = vor.u32 %v699_v17, %v695_v14  ;;  %v723_v32 = vshrl.u32 %v1839_v57, 16  ;;  %v442_v57 = vld [vmem:[#allocation2 + $0x30] sm:$0xe] }
  0x31   : > { %624 = vrot.lane.b32.xlu1 %v611_v59, %s1669_s22  ;;  %v727_v33 = vrot.slane %v725_v18, 1  ;;  %390 = vst [vmem:[#allocation2 + $0x3c] sm:$0x1] %v389_v31  ;;  %v319_v35 = vshrl.u32 %v1553_v22, 16  ;;  %v702_v37 = vshrl.u32 %v1847_v3, 16  ;;  %v551_v38 = vor.u32 %v550_v13, %v546_v30  ;;  %1245 = vmatpush1.bf16.msra.mxu0 %v1651_v49  ;;  %v1653_v15 = vld [vmem:[%s2149_s1 + $0x30] sm:$0xff]  }
  0x32   : > { %v706_v40 = vrot.slane %v704_v23, 1  ;;  %v732_v41 = vshll.u32 %v1477_v25, 16  ;;  %v1484_v44 = vcombine.low %v441_v34, %v1832_v48  ;;  %v322_v47 = vshll.u32 %v1553_v22, 16  ;;  %v450_v58 = vld [vmem:[#allocation2 + $0x30] sm:$0xf]  ;;  %1246 = vmatprep.subr.bf16.mxu0 %v1668_v0  ;;  %1567 = vmatpush1.bf16.msra.mxu1 %v1651_v49 }
  0x33   : > { %798 = vrot.lane.b32.xlu0 %v790_v61, %s1672_s29  ;;  %v728_v42 = vor.u32 %v727_v33, %v723_v32  ;;  %v321_v46 = vrot.slane %v319_v35, 7  ;;  %v730_v51 = vshrl.u32 %v1477_v25, 16  ;;  %v1496_v56 = vcombine.low %v446_v54, %v1886_v45  ;;  %v391_v61 = vld [vmem:[#allocation2 + $0x40] sm:$0xf]  ;;  %v394_v5 = vld [vmem:[#allocation2 + $0x44] sm:$0x1]  ;;  %1559 = vmatprep.subr.bf16.mxu1 %v1668_v0 }
  0x34   : > { %v707_v50 = vor.u32 %v706_v40, %v702_v37  ;;  %v734_v52 = vrot.slane %v732_v41, 1  ;;  %v794_v48 = vrot.slane %v1484_v44, 1  ;;  %v1898_v60 = vcombine.low %v450_v58, %v1892_v55  ;;  %v1910_v7 = vld [vmem:[#allocation2 + $0x10] sm:$0xf]  ;;  %v1912_v8 = vld [vmem:[#allocation2 + $0x14] sm:$0x1] }
  0x35   : > { %800 = vrot.lane.b32.xlu1 %v791_v4, %s1672_s29  ;;  %v324_v59 = vor.u32 %v322_v47, %v321_v46  ;;  %v1485_v1 = vcombine.low %v442_v57, %v1853_v9  ;;  %v1488_v2 = vcombine.low %v446_v54, %v446_v54  ;;  %v881_v4 = vshll.u32 %v1496_v56, 16  ;;  %v447_v14 = vld [vmem:[#allocation2 + $0x18] sm:$0xf]  ;;  %1247 = vmatpush1.bf16.msra.mxu0 %v1652_v62  ;;  %v1933_v23 = vld [vmem:[#allocation2 + $0x30] sm:$0xf]  ;;  %v1655_v44 = vld [vmem:[%s2149_s1 + $0x40] sm:$0xff]  }
  0x36   : > { %v735_v63 = vor.u32 %v734_v52, %v730_v51  ;;  %v325_v10 = vrot.slane %v321_v46, 4  ;;  %v909_v9 = vshll.u32 %v1898_v60, 16  ;;  %1248 = vmatprep.subr.bf16.mxu0 %v1668_v0  ;;  %v1492_v18 = vcombine.low %v450_v58, %v450_v58  ;;  %v1935_v25 = vld [vmem:[#allocation2 + $0x34] sm:$0x1]  ;;  %1568 = vmatpush1.bf16.msra.mxu1 %v1652_v62  ;;  %v451_v39 = vld [vmem:[#allocation2 + $0x38] sm:$0xf] }
  0x37   : > { %568 = vrot.lane.b32.xlu0 %v523_v16, %s1670_s23  ;;  %v1908_v3 = vld [vmem:[#allocation2 + $0x1c] sm:$0x1]  ;;  %v392_v11 = vsel %vm1776_vm4, %v324_v59, %v391_v61  ;;  %v795_v16 = vrot.slane %v1485_v1, 1  ;;  %v879_v19 = vshrl.u32 %v1496_v56, 16  ;;  %v883_v20 = vrot.slane %v881_v4, 1  ;;  %1560 = vmatprep.subr.bf16.mxu1 %v1668_v0 }
  0x38   : > { %393 = vst [vmem:[#allocation2 + $0x40] sm:$0xf] %v392_v11  ;;  %v1923_v17 = vcombine.low %v447_v14, %v1908_v3  ;;  %v395_v27 = vsel %vm1783_vm5, %v325_v10, %v394_v5  ;;  %v1929_v21 = vld [vmem:[#allocation2 + $0x3c] sm:$0x1]  ;;  %v1450_v22 = vcombine.low %v1910_v7, %v1912_v8  ;;  %v907_v28 = vshrl.u32 %v1898_v60, 16 }
  0x39   : > { %574 = vrot.lane.b32.xlu1 %v544_v29, %s1670_s23  ;;  %396 = vst [vmem:[#allocation2 + $0x44] sm:$0x1] %v395_v27  ;;  %v911_v12 = vrot.slane %v909_v9, 1  ;;  %1249 = vmatpush1.bf16.msra.mxu0 %v1653_v15  ;;  %v1654_v29 = vld [vmem:[%s2149_s1 + $0x38] sm:$0xff]   ;;  %v1489_v30 = vcombine.low %v447_v14, %v447_v14  ;;  %v1501_v13 = vcombine.low %v451_v39, %v1929_v21  ;;  %v462_v37 = vld [vmem:[#allocation2 + $0x10] sm:$0xe] }
  0x3a   : > { %v888_v31 = vshll.u32 %v1923_v17, 16  ;;  %1250 = vmatprep.subr.bf16.mxu0 %v1668_v0  ;;  %v527_v32 = vshll.u32 %v1450_v22, 16  ;;  %v1454_v33 = vcombine.low %v1933_v23, %v1935_v25  ;;  %v1949_v34 = vld [vmem:[#allocation2 + $0x18] sm:$0xf]  ;;  %v1951_v35 = vld [vmem:[#allocation2 + $0x1c] sm:$0x1]  ;;  %1569 = vmatpush1.bf16.msra.mxu1 %v1653_v15  ;;  %v1493_v40 = vcombine.low %v451_v39, %v451_v39 }
  0x3b   : > { %750 = vrot.lane.b32.xlu0 %v700_v24, %s1673_s8  ;;  %v884_v24 = vor.u32 %v883_v20, %v879_v19  ;;  %v1953_v36 = vld [vmem:[#allocation2 + $0x38] sm:$0xf]  ;;  %v912_v41 = vor.u32 %v911_v12, %v907_v28  ;;  %1561 = vmatprep.subr.bf16.mxu1 %v1668_v0  ;;  %v466_v46 = vld [vmem:[#allocation2 + $0x30] sm:$0xe]  ;;  %v886_v49 = vshrl.u32 %v1923_v17, 16  ;;  %v916_v51 = vshll.u32 %v1501_v13, 16 }
  0x3c   : > { %v467_v47 = vld [vmem:[#allocation2 + $0x38] sm:$0xe]  ;;  %v1451_v52 = vcombine.low %v1949_v34, %v1951_v35  ;;  %v1963_v54 = vld [vmem:[#allocation2 + $0x3c] sm:$0x1]  ;;  %v555_v56 = vshll.u32 %v1454_v33, 16  ;;  %v1504_v57 = vcombine.low %v462_v37, %v1886_v45  ;;  %v1508_v59 = vcombine.low %v466_v46, %v1892_v55 }
  0x3d   : > { %576 = vrot.lane.b32.xlu1 %v551_v38, %s1670_s23  ;;  %v463_v38 = vld [vmem:[#allocation2 + $0x18] sm:$0xe]  ;;  %1251 = vmatpush1.bf16.msra.mxu0 %v1654_v29  ;;  %v1509_v60 = vcombine.low %v467_v47, %v1929_v21  ;;  %v553_v61 = vshrl.u32 %v1454_v33, 16  ;;  %v1455_v62 = vcombine.low %v1953_v36, %v1963_v54  ;;  %v914_v1 = vshrl.u32 %v1501_v13, 16  ;;  %v415_v10 = vld [vmem:[#allocation2 + $0x10] sm:$0xe] }
  0x3e   : > { %1252 = vmatprep.subr.bf16.mxu0 %v1668_v0  ;;  %v1505_v58 = vcombine.low %v463_v38, %v1908_v3  ;;  %1570 = vmatpush1.bf16.msra.mxu1 %v1654_v29  ;;  %v534_v45 = vshll.u32 %v1451_v52, 16  ;;  %v557_v4 = vrot.slane %v555_v56, 1  ;;  %v974_v55 = vrot.slane %v1504_v57, 1  ;;  %v419_v20 = vld [vmem:[#allocation2 + $0x30] sm:$0xe] }
  0x3f   : > { %758 = vrot.lane.b32.xlu0 %v728_v42, %s1673_s8  ;;  %v525_v42 = vshrl.u32 %v1450_v22, 16  ;;  %1562 = vmatprep.subr.bf16.mxu1 %v1668_v0  ;;  %v978_v11 = vrot.slane %v1508_v59, 1  ;;  %v979_v14 = vrot.slane %v1509_v60, 1  ;;  %v532_v9 = vshrl.u32 %v1451_v52, 16  ;;  %v416_v29 = vld [vmem:[#allocation2 + $0x18] sm:$0xe] }
  0x40   : > { %v975_v5 = vrot.slane %v1505_v58, 1  ;;  %v562_v17 = vshll.u32 %v1455_v62, 16  ;;  %v1458_v19 = vcombine.low %v415_v10, %v1912_v8  ;;  %v560_v22 = vshrl.u32 %v1455_v62, 16  ;;  %v420_v33 = vld [vmem:[#allocation2 + $0x38] sm:$0xe] }
  0x41   : > { %752 = vrot.lane.b32.xlu1 %v707_v50, %s1673_s8  ;;  %v890_v50 = vrot.slane %v888_v31, 1  ;;  %1253 = vmatpush1.bf16.msra.mxu0 %v1655_v44  ;;  %v1518_v27 = vcombine.low %v978_v11, %v979_v14  ;;  %v1462_v12 = vcombine.low %v419_v20, %v1935_v25  ;;  %v1459_v13 = vcombine.low %v416_v29, %v1951_v35  ;;  %v423_v31 = vld [vmem:[#allocation2 + $0x18] sm:$0xf]  ;;  %v435_v37 = vld [vmem:[#allocation2 + $0x3c] sm:$0x1] }
  0x42   : > { %1571 = vmatpush1.bf16.msra.mxu1 %v1655_v44  ;;  %v1514_v15 = vcombine.low %v974_v55, %v975_v5  ;;  %v564_v39 = vrot.slane %v562_v17, 1  ;;  %v608_v28 = vrot.slane %v1458_v19, 1  ;;  %v427_v25 = vld [vmem:[#allocation2 + $0x38] sm:$0xf]  ;;  %v432_v44 = vld [vmem:[#allocation2 + $0x24] sm:$0x1] }
  0x43   : > { %806 = vrot.lane.b32.xlu0 %v794_v48, %s1672_s29  ;;  %v529_v48 = vrot.slane %v527_v32, 1  ;;  %1532 = vmatprep.mubr.msk.bf16.mxu1 %vm982_vm6, %v1518_v27  ;;  %v609_v38 = vrot.slane %v1459_v13, 1  ;;  %v424_v35 = vld [vmem:[#allocation2 + $0x20] sm:$0xf]  ;;  %v443_v5 = vld [vmem:[#allocation2 + $0x38] sm:$0xe] }
  0x44   : > { %1530 = vmatprep.mubr.msk.bf16.mxu0 %vm982_vm6, %v1514_v15  ;;  %v565_v8 = vor.u32 %v564_v39, %v560_v22  ;;  %v1467_v57 = vcombine.low %v424_v35, %v424_v35  ;;  %v1486_v15 = vcombine.low %v443_v5, %v435_v37  ;;  %v464_v19 = vld [vmem:[#allocation2 + $0x20] sm:$0xe]  ;;  %v465_v39 = vld [vmem:[#allocation2 + $0x28] sm:$0xe]  ;;  %v457_v29 = vld [vmem:[#allocation2 + $0x2c] sm:$0x1] }
  0x45   : > { %760 = vrot.lane.b32.xlu1 %v735_v63, %s1673_s8  ;;  %v891_v63 = vor.u32 %v890_v50, %v886_v49  ;;  %v530_v3 = vor.u32 %v529_v48, %v525_v42  ;;  %v1478_v42 = vcombine.low %v427_v25, %v435_v37  ;;  %v1475_v49 = vcombine.low %v424_v35, %v432_v44  ;;  %v436_v48 = vld [vmem:[#allocation2 + $0x44] sm:$0x1]  ;;  %v444_v22 = vld [vmem:[#allocation2 + $0x40] sm:$0xe] }
  0x46   : > { %v1470_v50 = vcombine.low %v427_v25, %v427_v25  ;;  %v796_v20 = vrot.slane %v1486_v15, 1  ;;  %v452_v13 = vld [vmem:[#allocation2 + $0x40] sm:$0xf] }
  0x47   : > { %838 = vrot.lane.b32.xlu0 %v1488_v2, %s1674_s15  ;;  %v918_v2 = vrot.slane %v916_v51, 1  ;;  %v739_v56 = vshll.u32 %v1478_v42, 16  ;;  %v718_v59 = vshll.u32 %v1475_v49, 16 }
  0x49   : > { %808 = vrot.lane.b32.xlu1 %v795_v16, %s1672_s29  ;;  %v919_v0 = vor.u32 %v918_v2, %v914_v1  ;;  %v536_v16 = vrot.slane %v534_v45, 1  ;;  %v741_v62 = vrot.slane %v739_v56, 1  ;;  %v716_v2 = vshrl.u32 %v1475_v49, 16 }
  0x4a   : > { %v720_v45 = vrot.slane %v718_v59, 1  ;;  %v1494_v49 = vcombine.low %v452_v13, %v452_v13 }
  0x4b   : > { %846 = vrot.lane.b32.xlu0 %v1492_v18, %s1674_s15  ;;  %v558_v18 = vor.u32 %v557_v4, %v553_v61  ;;  %v537_v21 = vor.u32 %v536_v16, %v532_v9  ;;  %v737_v61 = vshrl.u32 %v1478_v42, 16  ;;  %v456_v16 = vld [vmem:[#allocation2 + $0x24] sm:$0x1] }
  0x4c   : > { %v721_v10 = vor.u32 %v720_v45, %v716_v2 }
  0x4d   : > { %840 = vrot.lane.b32.xlu1 %v1489_v30, %s1674_s15  ;;  %v431_v30 = vld [vmem:[#allocation2 + $0x1c] sm:$0x1]  ;;  %v742_v4 = vor.u32 %v741_v62, %v737_v61 }
  0x4e   : > { %v1474_v32 = vcombine.low %v423_v31, %v431_v30 }
  0x4f   : > { %934 = vrot.lane.b32.xlu0 %v884_v24, %s1675_s21  ;;  %v612_v24 = vrot.slane %v1462_v12, 1  ;;  %v1506_v12 = vcombine.low %v464_v19, %v456_v16 }
  0x50   : > { %v711_v46 = vshll.u32 %v1474_v32, 16  ;;  %v709_v51 = vshrl.u32 %v1474_v32, 16 }
  0x51   : > { %848 = vrot.lane.b32.xlu1 %v1493_v40, %s1674_s15  ;;  %v1463_v40 = vcombine.low %v420_v33, %v1963_v54  ;;  %v428_v54 = vld [vmem:[#allocation2 + $0x40] sm:$0xf]  ;;  %v2002_v25 = vrot.slane %v1506_v12, 1 }
  0x52   : > { %v713_v52 = vrot.slane %v711_v46, 1  ;;  %v1479_v58 = vcombine.low %v428_v54, %v436_v48  ;;  %v1471_v1 = vcombine.low %v428_v54, %v428_v54  ;;  %v468_v33 = vld [vmem:[#allocation2 + $0x40] sm:$0xe] }
  0x53   : > { %942 = vrot.lane.b32.xlu0 %v912_v41, %s1675_s21  ;;  %v1466_v41 = vcombine.low %v423_v31, %v423_v31  ;;  %v613_v47 = vrot.slane %v1463_v40, 1  ;;  %v1507_v31 = vcombine.low %v465_v39, %v457_v29  ;;  %v461_v40 = vld [vmem:[#allocation2 + $0x4c] sm:$0x1] }
  0x54   : > { %v714_v60 = vor.u32 %v713_v52, %v709_v51  ;;  %v744_v11 = vshrl.u32 %v1479_v58, 16 }
  0x55   : > { %936 = vrot.lane.b32.xlu1 %v891_v63, %s1675_s21  ;;  %v439_v63 = vld [vmem:[#allocation2 + $0x18] sm:$0xe] }
  0x56   : > { %v1482_v55 = vcombine.low %v439_v63, %v431_v30 }
  0x57   : > { %570 = vrot.lane.b32.xlu0 %v530_v3, %s1670_s23  ;;  %v746_v3 = vshll.u32 %v1479_v58, 16 }
  0x58   : > { %v792_v9 = vrot.slane %v1482_v55, 1 }
  0x59   : > { %944 = vrot.lane.b32.xlu1 %v919_v0, %s1675_s21  ;;  %v748_v14 = vrot.slane %v746_v3, 1  ;;  %v440_v0 = vld [vmem:[#allocation2 + $0x20] sm:$0xe] }
  0x5a   : > { %v1483_v27 = vcombine.low %v440_v0, %v432_v44 }
  0x5b   : > { %578 = vrot.lane.b32.xlu0 %v558_v18, %s1670_s23  ;;  %v749_v17 = vor.u32 %v748_v14, %v744_v11  ;;  %v448_v18 = vld [vmem:[#allocation2 + $0x20] sm:$0xf] }
  0x5c   : > { %v793_v30 = vrot.slane %v1483_v27, 1  ;;  %v1490_v32 = vcombine.low %v448_v18, %v448_v18 }
  0x5d   : > { %572 = vrot.lane.b32.xlu1 %v537_v21, %s1670_s23  ;;  %v1498_v21 = vcombine.low %v448_v18, %v456_v16 }
  0x5f   : > { %618 = vrot.lane.b32.xlu0 %v608_v28, %s1669_s22  ;;  %v460_v28 = vld [vmem:[#allocation2 + $0x44] sm:$0x1] }
  0x60   : > { %v1502_v37 = vcombine.low %v452_v13, %v460_v28  ;;  %v1510_v46 = vcombine.low %v468_v33, %v460_v28 }
  0x61   : > { %580 = vrot.lane.b32.xlu1 %v565_v8, %s1670_s23  ;;  %v1487_v8 = vcombine.low %v444_v22, %v436_v48  ;;  %v453_v48 = vld [vmem:[#allocation2 + $0x48] sm:$0xf] }
  0x62   : > { %v923_v52 = vshll.u32 %v1502_v37, 16  ;;  %v1503_v54 = vcombine.low %v453_v48, %v461_v40  ;;  %v921_v62 = vshrl.u32 %v1502_v37, 16 }
  0x63   : > { %626 = vrot.lane.b32.xlu0 %v612_v24, %s1669_s22  ;;  %v469_v24 = vld [vmem:[#allocation2 + $0x48] sm:$0xe]  ;;  %v797_v44 = vrot.slane %v1487_v8, 1 }
  0x64   : > { %v1511_v42 = vcombine.low %v469_v24, %v461_v40  ;;  %v925_v63 = vrot.slane %v923_v52, 1  ;;  %v930_v3 = vshll.u32 %v1503_v54, 16 }
  0x65   : > { %620 = vrot.lane.b32.xlu1 %v609_v38, %s1669_s22  ;;  %v895_v38 = vshll.u32 %v1498_v21, 16 }
  0x66   : > { %v2011_v58 = vrot.slane %v1511_v42, 1  ;;  %v926_v55 = vor.u32 %v925_v63, %v921_v62  ;;  %v932_v11 = vrot.slane %v930_v3, 1 }
  0x67   : > { %658 = vrot.lane.b32.xlu0 %v1466_v41, %s1671_s24  ;;  %v449_v41 = vld [vmem:[#allocation2 + $0x28] sm:$0xf]  ;;  %v897_v51 = vrot.slane %v895_v38, 1 }
  0x68   : > { %v1499_v35 = vcombine.low %v449_v41, %v457_v29  ;;  %v1491_v56 = vcombine.low %v449_v41, %v449_v41 }
  0x69   : > { %628 = vrot.lane.b32.xlu1 %v613_v47, %s1669_s22  ;;  %v2005_v47 = vrot.slane %v1507_v31, 1  ;;  %s1301_s22 = sld [smem:[#allocation3]] }
  0x6a   : > { %v902_v59 = vshll.u32 %v1499_v35, 16  ;;  %v900_v2 = vshrl.u32 %v1499_v35, 16 }
  0x6b   : > { %666 = vrot.lane.b32.xlu0 %v1470_v50, %s1671_s24  ;;  %v893_v50 = vshrl.u32 %v1498_v21, 16 }
  0x6c   : > { %v904_v45 = vrot.slane %v902_v59, 1 }
  0x6d   : > { %660 = vrot.lane.b32.xlu1 %v1467_v57, %s1671_s24  ;;  %v2009_v57 = vrot.slane %v1510_v46, 1  ;;  %v898_v61 = vor.u32 %v897_v51, %v893_v50 }
  0x6e   : > { %v905_v5 = vor.u32 %v904_v45, %v900_v2 }
  0x6f   : > { %754 = vrot.lane.b32.xlu0 %v714_v60, %s1673_s8  ;;  %v1516_v60 = vcombine.low %v2002_v25, %v2005_v47 }
  0x71   : > { %668 = vrot.lane.b32.xlu1 %v1471_v1, %s1671_s24  ;;  %v1495_v1 = vcombine.low %v453_v48, %v453_v48 }
  0x73   : > { %762 = vrot.lane.b32.xlu0 %v742_v4, %s1673_s8  ;;  %v1520_v4 = vcombine.low %v2009_v57, %v2011_v58 }
  0x75   : > { %756 = vrot.lane.b32.xlu1 %v721_v10, %s1673_s8  ;;  %v928_v10 = vshrl.u32 %v1503_v54, 16 }
  0x77   : > { %802 = vrot.lane.b32.xlu0 %v792_v9, %s1672_s29  ;;  %v933_v9 = vor.u32 %v932_v11, %v928_v10 }
  0x79   : > { %764 = vrot.lane.b32.xlu1 %v749_v17, %s1673_s8 }
  0x7b   : > { %810 = vrot.lane.b32.xlu0 %v796_v20, %s1672_s29 }
  0x7d   : > { %804 = vrot.lane.b32.xlu1 %v793_v30, %s1672_s29 }
  0x7f   : > { %842 = vrot.lane.b32.xlu0 %v1490_v32, %s1674_s15 }
  0x81   : > { %812 = vrot.lane.b32.xlu1 %v797_v44, %s1672_s29 }
  0x83   : > { %850 = vrot.lane.b32.xlu0 %v1494_v49, %s1674_s15 }
  0x85   : > { %844 = vrot.lane.b32.xlu1 %v1491_v56, %s1674_s15 }
  0x87   : > { %938 = vrot.lane.b32.xlu0 %v898_v61, %s1675_s21 }
  0x89   : > { %852 = vrot.lane.b32.xlu1 %v1495_v1, %s1674_s15  ;;  %v615_v14 = vpop.permute.xlu0 %614 }
  0x8b   : > { %946 = vrot.lane.b32.xlu0 %v926_v55, %s1675_s21 }
  0x8d   : > { %940 = vrot.lane.b32.xlu1 %v905_v5, %s1675_s21 }
  0x8e   : > { %v567_v15 = vpop.permute.xlu0 %566 }
  0x8f   : > { %v985_v33 = vsel %vm982_vm6, %v1769_v6, %v567_v15 }
  0x90   : > { %v1009_v40 = vsel %vm1007_vm7, %v985_v33, %v615_v14 }
  0x91   : > { %948 = vrot.lane.b32.xlu1 %v933_v9, %s1675_s21 }
  0x97   : > { %v657_v0 = vpop.permute.xlu1 %656 }
  0x98   : > { %v655_v16 = vpop.permute.xlu0 %654 }
  0x99   : > { %v1026_v35 = vsel %vm1024_vm8, %v1009_v40, %v655_v16 }
  0x9b   : > { %v665_v17 = vpop.permute.xlu1 %664 }
  0x9c   : > { %v663_v27 = vpop.permute.xlu0 %662 }
  0x9f   : > { %v617_v18 = vpop.permute.xlu1 %616 }
  0xa1   : > { %v623_v19 = vpop.permute.xlu0 %622 }
  0xa3   : > { %v625_v20 = vpop.permute.xlu1 %624 }
  0xa5   : > { %v799_v21 = vpop.permute.xlu0 %798 }
  0xa7   : > { %v801_v22 = vpop.permute.xlu1 %800 }
  0xa9   : > { %v569_v39 = vpop.permute.xlu0 %568 }
  0xaa   : > { %v988_v37 = vsel %vm982_vm6, %v1818_v26, %v569_v39 }
  0xab   : > { %v575_v28 = vpop.permute.xlu1 %574  ;;  %v1011_v41 = vsel %vm1007_vm7, %v988_v37, %v617_v18 }
  0xac   : > { %v997_v44 = vsel %vm982_vm6, %v1830_v43, %v575_v28  ;;  %v1028_v49 = vsel %vm1024_vm8, %v1011_v41, %v657_v0 }
  0xad   : > { %v751_v12 = vpop.permute.xlu0 %750  ;;  %v1017_v26 = vsel %vm1007_vm7, %v997_v44, %v623_v19 }
  0xae   : > { %v1043_v50 = vsel %vm1041_vm9, %v1026_v35, %v751_v12  ;;  %v1034_v56 = vsel %vm1024_vm8, %v1017_v26, %v663_v27 }
  0xaf   : > { %v577_v29 = vpop.permute.xlu1 %576  ;;  %v1060_v54 = vsel %vm1058_vm10, %v1043_v50, %v799_v21 }
  0xb0   : > { %v1000_v6 = vsel %vm982_vm6, %v1836_v53, %v577_v29 }
  0xb1   : > { %v759_v30 = vpop.permute.xlu0 %758  ;;  %v1019_v43 = vsel %vm1007_vm7, %v1000_v6, %v625_v20 }
  0xb2   : > { %v1036_v63 = vsel %vm1024_vm8, %v1019_v43, %v665_v17  ;;  %v1051_v3 = vsel %vm1041_vm9, %v1034_v56, %v759_v30 }
  0xb3   : > { %v753_v8 = vpop.permute.xlu1 %752 }
  0xb4   : > { %v1045_v51 = vsel %vm1041_vm9, %v1028_v49, %v753_v8 }
  0xb5   : > { %v807_v13 = vpop.permute.xlu0 %806  ;;  %v1062_v53 = vsel %vm1058_vm10, %v1045_v51, %v801_v22 }
  0xb6   : > { %v1068_v10 = vsel %vm1058_vm10, %v1051_v3, %v807_v13 }
  0xb7   : > { %v761_v31 = vpop.permute.xlu1 %760 }
  0xb8   : > { %v1053_v55 = vsel %vm1041_vm9, %v1036_v63, %v761_v31 }
  0xb9   : > { %v839_v24 = vpop.permute.xlu0 %838 }
  0xba   : > { %v1077_v59 = vsel %vm1075_vm11, %v1060_v54, %v839_v24 }
  0xbb   : > { %v809_v32 = vpop.permute.xlu1 %808 }
  0xbc   : > { %v1070_v11 = vsel %vm1058_vm10, %v1053_v55, %v809_v32 }
  0xbd   : > { %v847_v38 = vpop.permute.xlu0 %846 }
  0xbe   : > { %v1085_v14 = vsel %vm1075_vm11, %v1068_v10, %v847_v38 }
  0xbf   : > { %v841_v42 = vpop.permute.xlu1 %840 }
  0xc0   : > { %v1079_v61 = vsel %vm1075_vm11, %v1062_v53, %v841_v42 }
  0xc1   : > { %v935_v46 = vpop.permute.xlu0 %934 }
  0xc2   : > { %v1094_v1 = vsel %vm1092_vm12, %v1077_v59, %v935_v46 }
  0xc3   : > { %v849_v52 = vpop.permute.xlu1 %848 }
  0xc4   : > { %v1087_v9 = vsel %vm1075_vm11, %v1070_v11, %v849_v52  ;;  %v1512_v11 = vld [vmem:[%s2150_s2] ss:$0 sm:$0xff] }
  0xc5   : > { %v943_v48 = vpop.permute.xlu0 %942 }
  0xc6   : > { %v1102_v0 = vsel %vm1092_vm12, %v1085_v14, %v943_v48 }
  0xc7   : > { %v937_v62 = vpop.permute.xlu1 %936 }
  0xc8   : > { %v1096_v2 = vsel %vm1092_vm12, %v1079_v61, %v937_v62 }
  0xc9   : > { %v571_v45 = vpop.permute.xlu0 %570  ;;  %v1513_v5 = vcombine.low %v1094_v1, %v1096_v2 }
  0xcb   : > { %v945_v15 = vpop.permute.xlu1 %944  ;;  %1269 = vmatmul.mubr.bf16.vlgmr.msra.gmra.mrb[0].mxu0 %v1513_v5 }
  0xcc   : > { %v1104_v16 = vsel %vm1092_vm12, %v1087_v9, %v945_v15  ;;  %1531 = vmatprep.mubr.msk.bf16.mxu0 %vm982_vm6, %v1516_v60  ;;  %v1310_v9 = vstv %s1301_s22 }
  0xcd   : > { %v579_v17 = vpop.permute.xlu0 %578  ;;  %v1517_v27 = vcombine.low %v1102_v0, %v1104_v16 }
  0xce   : > { %v1003_v44 = vsel %vm982_vm6, %v1933_v23, %v579_v17 }
  0xcf   : > { %v573_v18 = vpop.permute.xlu1 %572  ;;  %1285 = vmatmul.mubr.bf16.vlgmr.msra.gmra.mrb[0].mxu1 %v1517_v27 }
  0xd0   : > { %1533 = vmatprep.mubr.msk.bf16.mxu1 %vm982_vm6, %v1520_v4  ;;  %v991_v4 = vsel %vm982_vm6, %v1910_v7, %v571_v45  ;;  %v994_v37 = vsel %vm982_vm6, %v1949_v34, %v573_v18 }
  0xd1   : > { %v619_v19 = vpop.permute.xlu0 %618 }
  0xd2   : > { %v1013_v38 = vsel %vm1007_vm7, %v991_v4, %v619_v19 }
  0xd3   : > { %v581_v20 = vpop.permute.xlu1 %580 }
  0xd4   : > { %v1006_v34 = vsel %vm982_vm6, %v1953_v36, %v581_v20 }
  0xd5   : > { %v627_v21 = vpop.permute.xlu0 %626 }
  0xd6   : > { %v1021_v50 = vsel %vm1007_vm7, %v1003_v44, %v627_v21 }
  0xd7   : > { %v621_v22 = vpop.permute.xlu1 %620 }
  0xd8   : > { %v1015_v40 = vsel %vm1007_vm7, %v994_v37, %v621_v22 }
  0xd9   : > { %v659_v39 = vpop.permute.xlu0 %658 }
  0xda   : > { %v1030_v46 = vsel %vm1024_vm8, %v1013_v38, %v659_v39 }
  0xdb   : > { %v629_v28 = vpop.permute.xlu1 %628 }
  0xdc   : > { %v1023_v51 = vsel %vm1007_vm7, %v1006_v34, %v629_v28 }
  0xdd   : > { %v667_v12 = vpop.permute.xlu0 %666 }
  0xde   : > { %v1038_v43 = vsel %vm1024_vm8, %v1021_v50, %v667_v12 }
  0xdf   : > { %v661_v29 = vpop.permute.xlu1 %660 }
  0xe0   : > { %v1032_v35 = vsel %vm1024_vm8, %v1015_v40, %v661_v29 }
  0xe1   : > { %v755_v30 = vpop.permute.xlu0 %754 }
  0xe2   : > { %v1047_v6 = vsel %vm1041_vm9, %v1030_v46, %v755_v30 }
  0xe3   : > { %v669_v25 = vpop.permute.xlu1 %668 }
  0xe4   : > { %v1040_v56 = vsel %vm1024_vm8, %v1023_v51, %v669_v25 }
  0xe5   : > { %v763_v47 = vpop.permute.xlu0 %762 }
  0xe6   : > { %v1055_v53 = vsel %vm1041_vm9, %v1038_v43, %v763_v47 }
  0xe7   : > { %v757_v60 = vpop.permute.xlu1 %756 }
  0xe8   : > { %v1049_v7 = vsel %vm1041_vm9, %v1032_v35, %v757_v60 }
  0xe9   : > { %v803_v8 = vpop.permute.xlu0 %802 }
  0xea   : > { %v1064_v49 = vsel %vm1058_vm10, %v1047_v6, %v803_v8 }
  0xeb   : > { %v765_v13 = vpop.permute.xlu1 %764 }
  0xec   : > { %v1057_v59 = vsel %vm1041_vm9, %v1040_v56, %v765_v13 }
  0xed   : > { %v811_v31 = vpop.permute.xlu0 %810 }
  0xee   : > { %v1072_v63 = vsel %vm1058_vm10, %v1055_v53, %v811_v31 }
  0xef   : > { %v805_v24 = vpop.permute.xlu1 %804 }
  0xf0   : > { %v1066_v26 = vsel %vm1058_vm10, %v1049_v7, %v805_v24 }
  0xf1   : > { %v843_v32 = vpop.permute.xlu0 %842 }
  0xf2   : > { %v1081_v23 = vsel %vm1075_vm11, %v1064_v49, %v843_v32 }
  0xf3   : > { %v813_v33 = vpop.permute.xlu1 %812 }
  0xf4   : > { %v1074_v1 = vsel %vm1058_vm10, %v1057_v59, %v813_v33 }
  0xf5   : > { %v851_v57 = vpop.permute.xlu0 %850 }
  0xf6   : > { %v1089_v2 = vsel %vm1075_vm11, %v1072_v63, %v851_v57 }
  0xf7   : > { %v845_v58 = vpop.permute.xlu1 %844 }
  0xf8   : > { %v1083_v52 = vsel %vm1075_vm11, %v1066_v26, %v845_v58 }
  0xf9   : > { %v939_v41 = vpop.permute.xlu0 %938 }
  0xfa   : > { %v1098_v54 = vsel %vm1092_vm12, %v1081_v23, %v939_v41 }
  0xfb   : > { %v853_v42 = vpop.permute.xlu1 %852 }
  0xfc   : > { %v1091_v45 = vsel %vm1075_vm11, %v1074_v1, %v853_v42 }
  0xfd   : > { %v947_v61 = vpop.permute.xlu0 %946 }
  0xfe   : > { %v1106_v55 = vsel %vm1092_vm12, %v1089_v2, %v947_v61 }
  0xff   : > { %v941_v48 = vpop.permute.xlu1 %940 }
 0x100   : > { %v1100_v36 = vsel %vm1092_vm12, %v1083_v52, %v941_v48 }
 0x101   : > { %v1515_v62 = vcombine.low %v1098_v54, %v1100_v36 }
 0x103   : > { %v949_v3 = vpop.permute.xlu1 %948  ;;  %1277 = vmatmul.mubr.bf16.gmra.mrb[4].mxu0 %v1515_v62 }
 0x104   : > { %v1108_v5 = vsel %vm1092_vm12, %v1091_v45, %v949_v3 }
 0x105   : > { %v1519_v10 = vcombine.low %v1106_v55, %v1108_v5 }
 0x107   : > { %1293 = vmatmul.mubr.bf16.gmra.mrb[4].mxu1 %v1519_v10 }
 0x19e   : > { %v1270_v14 = vpop.f32.mrb[0].mxu0 }
 0x19f   : > { %v1271_v15 = vadd.f32 %v1512_v11, %v1270_v14  ;;  %v1272_v0 = vpop.f32.mrb[1].mxu0 }
 0x1a0   : > { %v1273_v16 = vpop.f32.mrb[2].mxu0 }
 0x1a1   : > { %v1311_v17 = vmul.f32 %v1310_v9, %v1271_v15  ;;  %v1274_v27 = vadd.f32 %v1512_v11, %v1273_v16  ;;  %v1275_v18 = vpop.f32.mrb[3].mxu0  ;;  %vm1302_vm13 = vcmp.ge.f32.partialorder %v1271_v15, 0.0 }
 0x1a2   : > { %v1286_v19 = vpop.f32.mrb[0].mxu1 }
 0x1a3   : > { %v1312_v20 = vmul.f32 %v1310_v9, %v1274_v27  ;;  %v1287_v21 = vadd.f32 %v1512_v11, %v1286_v19  ;;  %v1288_v22 = vpop.f32.mrb[1].mxu1  ;;  %v1319_v39 = vsel %vm1302_vm13, %v1271_v15, %v1311_v17  ;;  %vm1303_vm14 = vcmp.ge.f32.partialorder %v1274_v27, 0.0 }
 0x1a4   : > { %1343 = vrot.lane.b32.xlu0 %v1319_v39, %s1675_s21  ;;  %1327 = vst.msk [vmem:[%s2103_s28] sm:$0xff] %vm982_vm6, %v1319_v39  ;;  %v1289_v28 = vpop.f32.mrb[2].mxu1 }
 0x1a5   : > { %v1315_v12 = vmul.f32 %v1310_v9, %v1287_v21  ;;  %v1290_v29 = vadd.f32 %v1512_v11, %v1289_v28  ;;  %v1291_v30 = vpop.f32.mrb[3].mxu1  ;;  %v1320_v25 = vsel %vm1303_vm14, %v1274_v27, %v1312_v20  ;;  %vm1306_vm15 = vcmp.ge.f32.partialorder %v1287_v21, 0.0 }
 0x1a6   : > { %1345 = vrot.lane.b32.xlu1 %v1320_v25, %s1675_s21  ;;  %1328 = vst.msk [vmem:[%s2103_s28 + $0x10] sm:$0xff] %vm982_vm6, %v1320_v25 }
 0x1a7   : > { %v1316_v47 = vmul.f32 %v1310_v9, %v1290_v29  ;;  %v1323_v60 = vsel %vm1306_vm15, %v1287_v21, %v1315_v12  ;;  %vm1307_vm0 = vcmp.ge.f32.partialorder %v1290_v29, 0.0 }
 0x1a8   : > { %1351 = vrot.lane.b32.xlu0 %v1323_v60, %s1675_s21  ;;  %1331 = vst.msk [vmem:[%s2103_s28 + $0x40] sm:$0xff] %vm982_vm6, %v1323_v60 }
 0x1a9   : > { %v1324_v8 = vsel %vm1307_vm0, %v1290_v29, %v1316_v47 }
 0x1aa   : > { %1353 = vrot.lane.b32.xlu1 %v1324_v8, %s1675_s21  ;;  %1332 = vst.msk [vmem:[%s2103_s28 + $0x50] sm:$0xff] %vm982_vm6, %v1324_v8 }
 0x1d6   : > { %v1278_v13 = vpop.f32.mrb[4].mxu0 }
 0x1d7   : > { %v1279_v31 = vadd.f32 %v1512_v11, %v1278_v13  ;;  %v1280_v24 = vpop.f32.mrb[5].mxu0 }
 0x1d8   : > { %v1281_v32 = vpop.f32.mrb[6].mxu0 }
 0x1d9   : > { %v1313_v33 = vmul.f32 %v1310_v9, %v1279_v31  ;;  %v1282_v57 = vadd.f32 %v1512_v11, %v1281_v32  ;;  %v1283_v58 = vpop.f32.mrb[7].mxu0  ;;  %vm1304_vm1 = vcmp.ge.f32.partialorder %v1279_v31, 0.0 }
 0x1da   : > { %v1294_v4 = vpop.f32.mrb[4].mxu1 }
 0x1db   : > { %v1314_v37 = vmul.f32 %v1310_v9, %v1282_v57  ;;  %v1295_v38 = vadd.f32 %v1512_v11, %v1294_v4  ;;  %v1296_v40 = vpop.f32.mrb[5].mxu1  ;;  %v1321_v41 = vsel %vm1304_vm1, %v1279_v31, %v1313_v33  ;;  %vm1305_vm2 = vcmp.ge.f32.partialorder %v1282_v57, 0.0 }
 0x1dc   : > { %1347 = vrot.lane.b32.xlu0 %v1321_v41, %s1675_s21  ;;  %1329 = vst.msk [vmem:[%s2103_s28 + $0x20] sm:$0xff] %vm982_vm6, %v1321_v41  ;;  %v1297_v42 = vpop.f32.mrb[6].mxu1 }
 0x1dd   : > { %v1317_v44 = vmul.f32 %v1310_v9, %v1295_v38  ;;  %v1298_v46 = vadd.f32 %v1512_v11, %v1297_v42  ;;  %v1299_v35 = vpop.f32.mrb[7].mxu1  ;;  %v1322_v6 = vsel %vm1305_vm2, %v1282_v57, %v1314_v37  ;;  %vm1308_vm3 = vcmp.ge.f32.partialorder %v1295_v38, 0.0 }
 0x1de   : > { %1349 = vrot.lane.b32.xlu1 %v1322_v6, %s1675_s21  ;;  %1330 = vst.msk [vmem:[%s2103_s28 + $0x30] sm:$0xff] %vm982_vm6, %v1322_v6 }
 0x1df   : > { %v1318_v7 = vmul.f32 %v1310_v9, %v1298_v46  ;;  %v1325_v34 = vsel %vm1308_vm3, %v1295_v38, %v1317_v44  ;;  %vm1309_vm4 = vcmp.ge.f32.partialorder %v1298_v46, 0.0 }
 0x1e0   : > { %1355 = vrot.lane.b32.xlu0 %v1325_v34, %s1675_s21  ;;  %1333 = vst.msk [vmem:[%s2103_s28 + $0x60] sm:$0xff] %vm982_vm6, %v1325_v34 }
 0x1e1   : > { %v1326_v49 = vsel %vm1309_vm4, %v1298_v46, %v1318_v7 }
 0x1e2   : > { %1357 = vrot.lane.b32.xlu1 %v1326_v49, %s1675_s21  ;;  %1334 = vst.msk [vmem:[%s2103_s28 + $0x70] sm:$0xff] %vm982_vm6, %v1326_v49 }
 0x216   : > { %v1344_v26 = vpop.permute.xlu0 %1343 }
 0x217   : > { %1534 = vst.msk [vmem:[%s2103_s28 + $0x8] sm:$0xff] %vm982_vm6, %v1344_v26 }
 0x218   : > { %v1346_v50 = vpop.permute.xlu1 %1345 }
 0x219   : > { %1535 = vst.msk [vmem:[%s2103_s28 + $0x18] sm:$0xff] %vm982_vm6, %v1346_v50 }
 0x21a   : > { %v1352_v51 = vpop.permute.xlu0 %1351 }
 0x21b   : > { %1538 = vst.msk [vmem:[%s2103_s28 + $0x48] sm:$0xff] %vm982_vm6, %v1352_v51 }
 0x21c   : > { %v1354_v23 = vpop.permute.xlu1 %1353 }
 0x21d   : > { %1539 = vst.msk [vmem:[%s2103_s28 + $0x58] sm:$0xff] %vm982_vm6, %v1354_v23 }
 0x24e   : > { %v1348_v52 = vpop.permute.xlu0 %1347 }
 0x24f   : > { %1536 = vst.msk [vmem:[%s2103_s28 + $0x28] sm:$0xff] %vm982_vm6, %v1348_v52 }
 0x250   : > { %v1350_v48 = vpop.permute.xlu1 %1349 }
 0x251   : > { %1537 = vst.msk [vmem:[%s2103_s28 + $0x38] sm:$0xff] %vm982_vm6, %v1350_v48 }
 0x252   : > { %v1356_v43 = vpop.permute.xlu0 %1355 }
 0x253   : > { %1540 = vst.msk [vmem:[%s2103_s28 + $0x68] sm:$0xff] %vm982_vm6, %v1356_v43 }
 0x254   : > { %v1358_v56 = vpop.permute.xlu1 %1357 }
 0x255   : > { %1541 = vst.msk [vmem:[%s2103_s28 + $0x78] sm:$0xff] %vm982_vm6, %v1358_v56 }
 0x256 PF: > { %s15_s17 = sadd.s32 1, %s1666_s17  }
 0x257   : > { %p12_p4 = scmp.ge.s32.totalorder %s15_s17, 4  }
 0x259   :  { %14 = sbr.rel (!%p12_p4) target bundleno = 2 (0x2), region = 69 }

// kernel: encoder_mdcblock1_iter1.5
= control target key start
LH: loop header
LB: loop body
LE: loop exit
PB: predicated region body
PF: predicated region fallthrough
CT: control target
= control target key end

     0   :  { %s3933_s17 = smov 0   ;;  %s5591_s0 = inlined_call_operand.vmem [shape: f32[2,16,16,8], index: 0, kind: input, shape index: {}]   ;;  %s5592_s1 = inlined_call_operand.vmem [shape: bf16[72,16], index: 1, kind: input, shape index: {}]   ;;  %s5593_s2 = inlined_call_operand.vmem [shape: f32[1,16], index: 2, kind: input, shape index: {}]   ;;  %s5594_s3 = inlined_call_operand.<no memory space> [shape: f32[1], index: 3, kind: input, shape index: {}]   ;;  %s5595_s4 = inlined_call_operand.vmem [shape: f32[2,16,2,16,8], index: 4, kind: output, shape index: {}]  }
   0x1   :  { %9 = sst [smem:[#allocation3]] %s5594_s3 }
   0x2 LB: > { %s3375_s18 = sadd.s32 4294967295, %s3893_s17   ;;  %p3379_p0 = scmp.ge.s32.totalorder %s3893_s17, 1  ;;  %s3893_s17 = sphi %s3933_s17, %s15_s17  }
   0x3   : > { %p163_p1 = scmp.lt.s32.totalorder %s3893_s17, 3 }
   0x5   : > { %p164_p2 = pnand %p3379_p0, %p163_p1 }
   0x7   : > { %167 = sbr.rel (%p164_p2) target bundleno = 769 (0x301), region = 36 }
   0xe   : > { %vm200_vm0 = vcmask 60416   ;;  %vm203_vm1 = vcmask 57344   ;;  %v3895_v0 = vmov 0   ;;  %p189_p3 = scmp.lt.s32.totalorder %s3375_s18, 1  ;;  %vm384_vm2 = vsmask.f32 256 }
   0xf   : > { %201 = vst.msk [vmem:[#allocation2] sm:$0xf] %vm200_vm0, %v3895_v0  ;;  %202 = vst.msk [vmem:[#allocation2 + $0x4] sm:$0xf] %vm200_vm0, %v3895_v0  ;;  %vm385_vm3 = vsmask.f32 4368 }
  0x10   : > { %204 = vst.msk [vmem:[#allocation2 + $0x8] sm:$0x1] %vm203_vm1, %v3895_v0  ;;  %207 = vst.msk [vmem:[#allocation2 + $0x14] sm:$0x1] %vm203_vm1, %v3895_v0  ;;  %s5618_s18 = smov (!%p189_p3, %s3375_s18), 1  ;;  %vm1419_vm6 = vcmask 1046528  }
  0x11   : > { %205 = vst.msk [vmem:[#allocation2 + $0xc] sm:$0xf] %vm200_vm0, %v3895_v0  ;;  %206 = vst.msk [vmem:[#allocation2 + $0x10] sm:$0xf] %vm200_vm0, %v3895_v0  ;;  %s3616_s3 = sshll.u32 %s5618_s18, 8  ;;  %s3896_s22 = smov 16  }
  0x12   : > { %208 = vst.msk [vmem:[#allocation2 + $0x18] sm:$0xf] %vm200_vm0, %v3895_v0  ;;  %209 = vst.msk [vmem:[#allocation2 + $0x1c] sm:$0xf] %vm200_vm0, %v3895_v0  ;;  %s4005_s21 = scalar_lea.vmem %s5591_s0, %s3616_s3  ;;  %vm1146_vm4 = vsmask.f32 7424 }
  0x13   : > { %210 = vst.msk [vmem:[#allocation2 + $0x20] sm:$0x1] %vm203_vm1, %v3895_v0  ;;  %213 = vst.msk [vmem:[#allocation2 + $0x2c] sm:$0x1] %vm203_vm1, %v3895_v0  ;;  %v272_v1 = vld [vmem:[%s4005_s21 + $0x80] sm:$0xff]  ;;  %v273_v2 = vld [vmem:[%s4005_s21 + $0x88] sm:$0xff] }
  0x14   : > { %211 = vst.msk [vmem:[#allocation2 + $0x24] sm:$0xf] %vm200_vm0, %v3895_v0  ;;  %212 = vst.msk [vmem:[#allocation2 + $0x28] sm:$0xf] %vm200_vm0, %v3895_v0  ;;  %vm709_vm5 = vsmask.f32 7938  ;;  %v3634_v6 = vpack.c.bf16 %v272_v1, %v272_v1  ;;  %v3635_v7 = vpack.c.bf16 %v273_v2, %v273_v2 }
  0x15   : > { %214 = vst.msk [vmem:[#allocation2 + $0x30] sm:$0xf] %vm200_vm0, %v3895_v0  ;;  %215 = vst.msk [vmem:[#allocation2 + $0x34] sm:$0xf] %vm200_vm0, %v3895_v0  ;;  %v256_v3 = vld [vmem:[%s4005_s21] sm:$0xff]  ;;  %v257_v16 = vld [vmem:[%s4005_s21 + $0x8] sm:$0xff] }
  0x16   : > { %216 = vst.msk [vmem:[#allocation2 + $0x38] sm:$0x1] %vm203_vm1, %v3895_v0  ;;  %219 = vst.msk [vmem:[#allocation2 + $0x44] sm:$0x1] %vm203_vm1, %v3895_v0  ;;  %v826_v4 = vld [vmem:[#allocation2 + $0x4] sm:$0xf]  ;;  %v3618_v11 = vpack.c.bf16 %v256_v3, %v256_v3  ;;  %v3619_v30 = vpack.c.bf16 %v257_v16, %v257_v16 }
  0x17   : > { %217 = vst.msk [vmem:[#allocation2 + $0x3c] sm:$0xf] %vm200_vm0, %v3895_v0  ;;  %218 = vst.msk [vmem:[#allocation2 + $0x40] sm:$0xf] %vm200_vm0, %v3895_v0  ;;  %v873_v5 = vld [vmem:[#allocation2] sm:$0xe] }
  0x18   : > { %220 = vst.msk [vmem:[#allocation2 + $0x48] sm:$0xf] %vm200_vm0, %v3895_v0  ;;  %221 = vst.msk [vmem:[#allocation2 + $0x4c] sm:$0xf] %vm200_vm0, %v3895_v0  ;;  %v3448_v9 = vcombine.low %v873_v5, %v826_v4  ;;  %v825_v10 = vld [vmem:[#allocation2] sm:$0xf] }
  0x19   : > { %222 = vst.msk [vmem:[#allocation2 + $0x50] sm:$0x1] %vm203_vm1, %v3895_v0  ;;  %225 = vst.msk [vmem:[#allocation2 + $0x5c] sm:$0x1] %vm203_vm1, %v3895_v0  ;;  %v4010_v12 = vcombine.low %v825_v10, %v826_v4  ;;  %v524_v13 = vshrl.u32 %v3634_v6, 16  ;;  %v527_v14 = vshll.u32 %v3634_v6, 16 }
  0x1a   : > { %223 = vst.msk [vmem:[#allocation2 + $0x54] sm:$0xf] %vm200_vm0, %v3895_v0  ;;  %224 = vst.msk [vmem:[#allocation2 + $0x58] sm:$0xf] %vm200_vm0, %v3895_v0  ;;  %v532_v15 = vshrl.u32 %v3635_v7, 16  ;;  %v1420_v17 = vrot.slane %v3448_v9, 1 }
  0x1b   : > { %226 = vst.msk [vmem:[#allocation2 + $0x60] sm:$0xf] %vm200_vm0, %v3895_v0  ;;  %227 = vst.msk [vmem:[#allocation2 + $0x64] sm:$0xf] %vm200_vm0, %v3895_v0  ;;  %v535_v20 = vshll.u32 %v3635_v7, 16  ;;  %v1148_v21 = vshrl.u32 %v4010_v12, 16 }
  0x1c   : > { %228 = vst.msk [vmem:[#allocation2 + $0x68] sm:$0x1] %vm203_vm1, %v3895_v0  ;;  %231 = vst.msk [vmem:[#allocation2 + $0x74] sm:$0x1] %vm203_vm1, %v3895_v0  ;;  %v1150_v22 = vshll.u32 %v4010_v12, 16  ;;  %v526_v24 = vrot.slane %v524_v13, 7 }
  0x1d   : > { %229 = vst.msk [vmem:[#allocation2 + $0x6c] sm:$0xf] %vm200_vm0, %v3895_v0  ;;  %230 = vst.msk [vmem:[#allocation2 + $0x70] sm:$0xf] %vm200_vm0, %v3895_v0  ;;  %v4021_v25 = vrot.slane %v532_v15, 7  ;;  %v388_v31 = vshrl.u32 %v3618_v11, 16 }
  0x1e   : > { %232 = vst.msk [vmem:[#allocation2 + $0x78] sm:$0xf] %vm200_vm0, %v3895_v0  ;;  %233 = vst.msk [vmem:[#allocation2 + $0x7c] sm:$0xf] %vm200_vm0, %v3895_v0  ;;  %v274_v32 = vld [vmem:[%s4005_s21 + $0x90] sm:$0xff]  ;;  %v1152_v33 = vrot.slane %v1150_v22, 1  ;;  %v529_v34 = vor.u32 %v527_v14, %v526_v24 }
  0x1f   : > { %234 = vst.msk [vmem:[#allocation2 + $0x80] sm:$0x1] %vm203_vm1, %v3895_v0  ;;  %237 = vst.msk [vmem:[#allocation2 + $0x8c] sm:$0x1] %vm203_vm1, %v3895_v0  ;;  %v530_v35 = vrot.slane %v526_v24, 4  ;;  %v537_v36 = vor.u32 %v535_v20, %v4021_v25  ;;  %v275_v37 = vld [vmem:[%s4005_s21 + $0x98] sm:$0xff]  ;;  %v3636_v47 = vpack.c.bf16 %v274_v32, %v274_v32 }
  0x20   : > { %235 = vst.msk [vmem:[#allocation2 + $0x84] sm:$0xf] %vm200_vm0, %v3895_v0  ;;  %236 = vst.msk [vmem:[#allocation2 + $0x88] sm:$0xf] %vm200_vm0, %v3895_v0  ;;  %v390_v38 = vrot.slane %v388_v31, 7  ;;  %v391_v39 = vshll.u32 %v3618_v11, 16  ;;  %v1153_v43 = vor.u32 %v1152_v33, %v1148_v21  ;;  %v3637_v51 = vpack.c.bf16 %v275_v37, %v275_v37 }
  0x21   : > { %238 = vst.msk [vmem:[#allocation2 + $0x90] sm:$0xf] %vm200_vm0, %v3895_v0  ;;  %239 = vst.msk [vmem:[#allocation2 + $0x94] sm:$0xf] %vm200_vm0, %v3895_v0  ;;  %v396_v40 = vshrl.u32 %v3619_v30, 16  ;;  %v399_v41 = vshll.u32 %v3619_v30, 16 }
  0x22   : > { %240 = vst.msk [vmem:[#allocation2 + $0x98] sm:$0x1] %vm203_vm1, %v3895_v0  ;;  %243 = vst.msk [vmem:[#allocation2 + $0xa4] sm:$0x1] %vm203_vm1, %v3895_v0  ;;  %v258_v42 = vld [vmem:[%s4005_s21 + $0x10] sm:$0xff]  ;;  %v393_v48 = vor.u32 %v391_v39, %v390_v38  ;;  %v394_v49 = vrot.slane %v390_v38, 4 }
  0x23   : > { %241 = vst.msk [vmem:[#allocation2 + $0x9c] sm:$0xf] %vm200_vm0, %v3895_v0  ;;  %242 = vst.msk [vmem:[#allocation2 + $0xa0] sm:$0xf] %vm200_vm0, %v3895_v0  ;;  %v711_v46 = vld [vmem:[#allocation2 + $0xc] sm:$0xf]  ;;  %v3620_v56 = vpack.c.bf16 %v258_v42, %v258_v42 }
  0x24   : > { %244 = vst.msk [vmem:[#allocation2 + $0xa8] sm:$0xf] %vm200_vm0, %v3895_v0  ;;  %245 = vst.msk [vmem:[#allocation2 + $0xac] sm:$0xf] %vm200_vm0, %v3895_v0  ;;  %v769_v29 = vld [vmem:[#allocation2 + $0x6c] sm:$0xf] }
  0x25   : > { %246 = vst.msk [vmem:[#allocation2 + $0xb0] sm:$0x1] %vm203_vm1, %v3895_v0  ;;  %249 = vst.msk [vmem:[#allocation2 + $0xbc] sm:$0x1] %vm203_vm1, %v3895_v0  ;;  %v4040_v50 = vrot.slane %v396_v40, 7  ;;  %v259_v52 = vld [vmem:[%s4005_s21 + $0x18] sm:$0xff] }
  0x26   : > { %247 = vst.msk [vmem:[#allocation2 + $0xb4] sm:$0xf] %vm200_vm0, %v3895_v0  ;;  %248 = vst.msk [vmem:[#allocation2 + $0xb8] sm:$0xf] %vm200_vm0, %v3895_v0  ;;  %v541_v54 = vshrl.u32 %v3636_v47, 16  ;;  %v544_v55 = vshll.u32 %v3636_v47, 16 }
  0x27   : > { %250 = vst.msk [vmem:[#allocation2 + $0xc0] sm:$0xf] %vm200_vm0, %v3895_v0  ;;  %251 = vst.msk [vmem:[#allocation2 + $0xc4] sm:$0xf] %vm200_vm0, %v3895_v0  ;;  %v270_v57 = vld [vmem:[%s4005_s21 + $0x70] sm:$0xff]  ;;  %v271_v58 = vld [vmem:[%s4005_s21 + $0x78] sm:$0xff]  ;;  %v401_v59 = vor.u32 %v399_v41, %v4040_v50 }
  0x28   : > { %252 = vst.msk [vmem:[#allocation2 + $0xc8] sm:$0x1] %vm203_vm1, %v3895_v0  ;;  %255 = vst.msk [vmem:[#allocation2 + $0xd4] sm:$0x1] %vm203_vm1, %v3895_v0  ;;  %s3897_s23 = smov 8   ;;  %v549_v61 = vshrl.u32 %v3637_v51, 16  ;;  %v3632_v6 = vpack.c.bf16 %v270_v57, %v270_v57  ;;  %v3633_v7 = vpack.c.bf16 %v271_v58, %v271_v58 }
  0x29   : > { %253 = vst.msk [vmem:[#allocation2 + $0xcc] sm:$0xf] %vm200_vm0, %v3895_v0  ;;  %254 = vst.msk [vmem:[#allocation2 + $0xd0] sm:$0xf] %vm200_vm0, %v3895_v0  ;;  %v552_v62 = vshll.u32 %v3637_v51, 16  ;;  %v543_v63 = vrot.slane %v541_v54, 7  ;;  %v3621_v0 = vpack.c.bf16 %v259_v52, %v259_v52 }
  0x2a   : > { %v3743_v8 = vld [vmem:[#allocation2 + $0x8] ss:$0 sps:$4 sm:$0x11]   ;;  %vm4017_vm7 = vmor %vm384_vm2, %vm385_vm3  ;;  %v405_v1 = vshrl.u32 %v3620_v56, 16  ;;  %v408_v2 = vshll.u32 %v3620_v56, 16  ;;  %v4052_v4 = vrot.slane %v549_v61, 7 }
  0x2b   : > { %v1421_v18 = vrot.slane %v3743_v8, 1  ;;  %v1155_v19 = vshll.u32 %v3743_v8, 16  ;;  %vm4026_vm8 = vmand %vm200_vm0, %vm709_vm5  ;;  %v538_v44 = vsel %vm4017_vm7, %v530_v35, %v537_v36  ;;  %v402_v3 = vsel %vm4017_vm7, %v394_v49, %v401_v59  ;;  %v776_v5 = vld [vmem:[#allocation2 + $0x78] sm:$0xf]  ;;  %v762_v32 = vld [vmem:[#allocation2 + $0x60] sm:$0xf] }
  0x2c   : > { %v770_v45 = vsel %vm4026_vm8, %v529_v34, %v769_v29  ;;  %772 = vst.msk [vmem:[#allocation2 + $0x70] sm:$0xf] %vm200_vm0, %v538_v44  ;;  %v712_v60 = vsel %vm4026_vm8, %v393_v48, %v711_v46  ;;  %714 = vst.msk [vmem:[#allocation2 + $0x10] sm:$0xf] %vm200_vm0, %v402_v3  ;;  %v546_v8 = vor.u32 %v544_v55, %v543_v63  ;;  %v547_v9 = vrot.slane %v543_v63, 4  ;;  %s3898_s24 = smov 24  }
  0x2d   : > { %v1422_v26 = vsel %vm1419_vm6, %v1420_v17, %v1421_v18  ;;  %v1157_v27 = vrot.slane %v1155_v19, 1  ;;  %771 = vst [vmem:[#allocation2 + $0x6c] sm:$0xf] %v770_v45  ;;  %713 = vst [vmem:[#allocation2 + $0xc] sm:$0xf] %v712_v60  ;;  %v407_v10 = vrot.slane %v405_v1, 7  ;;  %v554_v13 = vor.u32 %v552_v62, %v4052_v4 }
  0x2e   : > { %1468 = vrot.lane.b32.xlu0 %v1422_v26, %s3896_s22  ;;  %v413_v11 = vshrl.u32 %v3621_v0, 16  ;;  %v720_v14 = vld [vmem:[#allocation2 + $0x18] sm:$0xf]  ;;  %v507_v15 = vshrl.u32 %v3632_v6, 16  ;;  %v777_v18 = vsel %vm4026_vm8, %v546_v8, %v776_v5  ;;  %v416_v20 = vshll.u32 %v3621_v0, 16  ;;  %vm4074_vm9 = vmand %vm203_vm1, %vm384_vm2  ;;  %s3899_s25 = smov 40  }
  0x2f   : > { %v1158_v53 = vsel %vm1146_vm4, %v1153_v43, %v1157_v27  ;;  %v410_v19 = vor.u32 %v408_v2, %v407_v10  ;;  %v510_v21 = vshll.u32 %v3632_v6, 16  ;;  %v555_v24 = vsel %vm4017_vm7, %v547_v9, %v554_v13  ;;  %778 = vst [vmem:[#allocation2 + $0x78] sm:$0xf] %v777_v18  ;;  %v717_v35 = vld [vmem:[#allocation2 + $0x14] sm:$0x1]  ;;  %s3900_s26 = smov 32  }
  0x30   : > { %v411_v26 = vrot.slane %v407_v10, 4  ;;  %779 = vst.msk [vmem:[#allocation2 + $0x7c] sm:$0xf] %vm200_vm0, %v555_v24  ;;  %v4066_v27 = vrot.slane %v413_v11, 7  ;;  %v509_v30 = vrot.slane %v507_v15, 7  ;;  %v515_v31 = vshrl.u32 %v3633_v7, 16 }
  0x31   : > { %v721_v29 = vsel %vm4026_vm8, %v410_v19, %v720_v14  ;;  %v518_v34 = vshll.u32 %v3633_v7, 16  ;;  %v766_v41 = vld [vmem:[#allocation2 + $0x68] sm:$0x1]  ;;  %v773_v42 = vld [vmem:[#allocation2 + $0x74] sm:$0x1]  ;;  %v403_v45 = vrot.slane %v4040_v50, 4 }
  0x32   : > { %1339 = vrot.lane.b32.xlu0 %v1158_v53, %s3897_s23  ;;  %722 = vst [vmem:[#allocation2 + $0x18] sm:$0xf] %v721_v29  ;;  %v418_v37 = vor.u32 %v416_v20, %v4066_v27  ;;  %v512_v38 = vor.u32 %v510_v21, %v509_v30  ;;  %v513_v39 = vrot.slane %v509_v30, 4  ;;  %v517_v40 = vrot.slane %v515_v31, 7  ;;  %v724_v5 = vld [vmem:[#allocation2 + $0x20] sm:$0x1] }
  0x33   : > { %v4056_v17 = vld [vmem:[#allocation2 + $0x70] sm:$0xf]  ;;  %v539_v46 = vrot.slane %v4021_v25, 4  ;;  %v718_v50 = vsel %vm4074_vm9, %v403_v45, %v717_v35  ;;  %v420_v6 = vrot.slane %v4066_v27, 4  ;;  %v260_v27 = vld [vmem:[%s4005_s21 + $0x20] sm:$0xff]  ;;  %s3901_s5 = smov 48  }
  0x34   : > { %v905_v16 = vld [vmem:[#allocation2 + $0x6c] sm:$0xf]  ;;  %v844_v43 = vld [vmem:[#allocation2 + $0x70] sm:$0xf]  ;;  %v419_v51 = vsel %vm4017_vm7, %v411_v26, %v418_v37  ;;  %v520_v52 = vor.u32 %v518_v34, %v517_v40  ;;  %v522_v55 = vrot.slane %v517_v40, 4  ;;  %v763_v56 = vsel %vm4026_vm8, %v512_v38, %v762_v32  ;;  %s3902_s6 = smov 56  }
  0x35   : > { %v4061_v22 = vcombine.low %v905_v16, %v4056_v17  ;;  %v889_v33 = vld [vmem:[#allocation2 + $0xc] sm:$0xf]  ;;  %v890_v44 = vld [vmem:[#allocation2 + $0x10] sm:$0xf]  ;;  %723 = vst.msk [vmem:[#allocation2 + $0x1c] sm:$0xf] %vm200_vm0, %v419_v51  ;;  %v774_v58 = vsel %vm4074_vm9, %v539_v46, %v773_v42  ;;  %v725_v15 = vsel %vm4074_vm9, %v420_v6, %v724_v5  ;;  %v4135_v45 = vpack.c.bf16 %v260_v27, %v260_v27 }
  0x36   : > { %v882_v47 = vld [vmem:[#allocation2 + $0x6c] sm:$0xe]  ;;  %v4081_v49 = vcombine.low %v889_v33, %v890_v44  ;;  %v828_v53 = vld [vmem:[#allocation2 + $0x10] sm:$0xf]  ;;  %v907_v25 = vld [vmem:[#allocation2 + $0x78] sm:$0xf]  ;;  %v521_v57 = vsel %vm4017_vm7, %v513_v39, %v520_v52  ;;  %v767_v61 = vsel %vm4074_vm9, %v522_v55, %v766_v41 }
  0x37   : > { %1596 = vrot.lane.b32.xlu1 %v4061_v22, %s3898_s24  ;;  %v937_v48 = vld [vmem:[#allocation2 + $0xc] sm:$0xe]  ;;  %764 = vst [vmem:[#allocation2 + $0x60] sm:$0xf] %v763_v56  ;;  %719 = vst [vmem:[#allocation2 + $0x14] sm:$0x1] %v718_v50  ;;  %v3457_v1 = vcombine.low %v882_v47, %v844_v43 }
  0x38   : > { %v874_v54 = vld [vmem:[#allocation2 + $0xc] sm:$0xe]  ;;  %1580 = vrot.lane.b32.xlu0 %v4081_v49, %s3898_s24  ;;  %v3496_v59 = vcombine.low %v937_v48, %v890_v44  ;;  %v4096_v60 = vld [vmem:[#allocation2 + $0x7c] sm:$0xf]  ;;  %765 = vst.msk [vmem:[#allocation2 + $0x64] sm:$0xf] %vm200_vm0, %v521_v57 }
  0x39   : > { %v3449_v62 = vcombine.low %v874_v54, %v828_v53  ;;  %v827_v63 = vld [vmem:[#allocation2 + $0xc] sm:$0xf]  ;;  %775 = vst [vmem:[#allocation2 + $0x74] sm:$0x1] %v774_v58  ;;  %v1663_v2 = vshll.u32 %v4081_v49, 16  ;;  %v4103_v3 = vcombine.low %v907_v25, %v4096_v60  ;;  %v1759_v7 = vshll.u32 %v4061_v22, 16 }
  0x3a   : > { %v843_v0 = vld [vmem:[#allocation2 + $0x6c] sm:$0xf]  ;;  %768 = vst [vmem:[#allocation2 + $0x68] sm:$0x1] %v767_v61  ;;  %v891_v8 = vld [vmem:[#allocation2 + $0x18] sm:$0xf]  ;;  %v4109_v9 = vcombine.low %v827_v63, %v828_v53 }
  0x3b   : > { %1598 = vrot.lane.b32.xlu1 %v4103_v3, %s3898_s24  ;;  %v4111_v10 = vcombine.low %v843_v0, %v844_v43  ;;  %v1423_v11 = vrot.slane %v3449_v62, 1  ;;  %v1447_v13 = vrot.slane %v3457_v1, 1  ;;  %v1932_v14 = vrot.slane %v3496_v59, 1  ;;  %v780_v16 = vld [vmem:[#allocation2 + $0x80] sm:$0x1]  ;;  %v261_v58 = vld [vmem:[%s4005_s21 + $0x28] sm:$0xff] }
  0x3c   : > { %v945_v18 = vld [vmem:[#allocation2 + $0x6c] sm:$0xe]  ;;  %v4115_v19 = vld [vmem:[#allocation2 + $0x1c] sm:$0xf]  ;;  %v1661_v20 = vshrl.u32 %v4081_v49, 16  ;;  %v1665_v21 = vrot.slane %v1663_v2, 1 }
  0x3d   : > { %v1160_v24 = vshrl.u32 %v4109_v9, 16  ;;  %726 = vst [vmem:[#allocation2 + $0x20] sm:$0x1] %v725_v15  ;;  %v556_v26 = vrot.slane %v4052_v4, 4  ;;  %v4122_v29 = vcombine.low %v891_v8, %v4115_v19  ;;  %v1162_v34 = vshll.u32 %v4109_v9, 16  ;;  %v276_v8 = vld [vmem:[%s4005_s21 + $0xa0] sm:$0xff] }
  0x3e   : > { %v881_v30 = vld [vmem:[#allocation2 + $0x60] sm:$0xe]  ;;  %v3757_v33 = vld [vmem:[#allocation2 + $0x14] ss:$0 sps:$4 sm:$0x11]   ;;  %v1258_v4 = vshll.u32 %v4111_v10, 16  ;;  %v3504_v42 = vcombine.low %v945_v18, %v4056_v17  ;;  %v1666_v5 = vor.u32 %v1665_v21, %v1661_v20 }
  0x3f   : > { %v841_v31 = vld [vmem:[#allocation2 + $0x60] sm:$0xf]  ;;  %v842_v32 = vld [vmem:[#allocation2 + $0x64] sm:$0xf]  ;;  %v781_v35 = vsel %vm4074_vm9, %v556_v26, %v780_v16  ;;  %1582 = vrot.lane.b32.xlu0 %v4122_v29, %s3898_s24  ;;  %v1424_v40 = vrot.slane %v3757_v33, 1  ;;  %v1164_v54 = vrot.slane %v1162_v34, 1 }
  0x40   : > { %v3456_v38 = vcombine.low %v881_v30, %v842_v32  ;;  %v4129_v39 = vcombine.low %v841_v31, %v842_v32  ;;  %782 = vst [vmem:[#allocation2 + $0x80] sm:$0x1] %v781_v35  ;;  %v4132_v41 = vld [vmem:[#allocation2 + $0x74] ss:$0 sps:$4 sm:$0x11]   ;;  %v1167_v55 = vshll.u32 %v3757_v33, 16  ;;  %v3623_v32 = vpack.c.bf16 %v261_v58, %v261_v58 }
  0x41   : > { %v3754_v37 = vld [vmem:[#allocation2 + $0x68] ss:$0 sps:$4 sm:$0x11]   ;;  %v1425_v46 = vsel %vm1419_vm6, %v1423_v11, %v1424_v40  ;;  %v1448_v47 = vrot.slane %v4132_v41, 1  ;;  %v1675_v56 = vshll.u32 %v4122_v29, 16  ;;  %v1956_v61 = vrot.slane %v3504_v42, 1 }
  0x42   : > { %v1444_v43 = vrot.slane %v3456_v38, 1  ;;  %v1445_v44 = vrot.slane %v3754_v37, 1  ;;  %v3763_v48 = vld [vmem:[#allocation2 + $0x14] ss:$0 sps:$4 sm:$0x11]   ;;  %v1244_v49 = vshrl.u32 %v4129_v39, 16  ;;  %v4163_v33 = vpack.c.bf16 %v276_v8, %v276_v8 }
  0x43   : > { %v1246_v51 = vshll.u32 %v4129_v39, 16  ;;  %1470 = vrot.lane.b32.xlu0 %v1425_v46, %s3896_s22  ;;  %v4143_v53 = vld [vmem:[#allocation2 + $0x74] ss:$0 sps:$4 sm:$0x11]   ;;  %v1251_v17 = vshll.u32 %v3754_v37, 16  ;;  %v1933_v50 = vrot.slane %v3763_v48, 1  ;;  %v1449_v59 = vsel %vm1419_vm6, %v1447_v13, %v1448_v47 }
  0x44   : > { %v1446_v52 = vsel %vm1419_vm6, %v1444_v43, %v1445_v44  ;;  %v1668_v57 = vshll.u32 %v3763_v48, 16  ;;  %v1957_v62 = vrot.slane %v4143_v53, 1  ;;  %v4150_v0 = vld [vmem:[#allocation2 + $0x20] ss:$0 sps:$4 sm:$0x11]   ;;  %v1256_v6 = vshrl.u32 %v4111_v10, 16 }
  0x45   : > { %1484 = vrot.lane.b32.xlu1 %v1446_v52, %s3896_s22  ;;  %v1248_v25 = vrot.slane %v1246_v51, 1  ;;  %v1253_v63 = vrot.slane %v1251_v17, 1  ;;  %v1934_v1 = vsel %vm1419_vm6, %v1932_v14, %v1933_v50  ;;  %v938_v11 = vld [vmem:[#allocation2 + $0x18] sm:$0xe]  ;;  %v1165_v13 = vor.u32 %v1164_v54, %v1160_v24  ;;  %v277_v26 = vld [vmem:[%s4005_s21 + $0xa8] sm:$0xff]  ;;  %s3903_s11 = smov 64  }
  0x46   : > { %v1670_v15 = vrot.slane %v1668_v57, 1  ;;  %v1169_v16 = vrot.slane %v1167_v55, 1  ;;  %v1260_v18 = vrot.slane %v1258_v4, 1  ;;  %v1673_v14 = vshrl.u32 %v4122_v29, 16  ;;  %v954_v37 = vld [vmem:[#allocation2 + $0x18] sm:$0xf] }
  0x47   : > { %v1249_v2 = vor.u32 %v1248_v25, %v1244_v49  ;;  %1980 = vrot.lane.b32.xlu0 %v1934_v1, %s3899_s25  ;;  %v1677_v30 = vrot.slane %v1675_v56, 1  ;;  %v1680_v20 = vshll.u32 %v4150_v0, 16  ;;  %v1958_v21 = vsel %vm1419_vm6, %v1956_v61, %v1957_v62  ;;  %v4175_v42 = vld [vmem:[#allocation2 + $0x1c] sm:$0xf]  ;;  %v727_v25 = vld [vmem:[#allocation2 + $0x24] sm:$0xf] }
  0x48   : > { %v1263_v31 = vshll.u32 %v4132_v41, 16  ;;  %v3497_v24 = vcombine.low %v938_v11, %v4115_v19  ;;  %v1757_v34 = vshrl.u32 %v4061_v22, 16  ;;  %v1761_v35 = vrot.slane %v1759_v7, 1  ;;  %v4177_v19 = vld [vmem:[#allocation2 + $0x80] ss:$0 sps:$4 sm:$0x11]  }
  0x49   : > { %1486 = vrot.lane.b32.xlu1 %v1449_v59, %s3896_s22  ;;  %v1254_v27 = vsel %vm1146_vm4, %v1249_v2, %v1253_v63  ;;  %v4169_v38 = vpack.c.bf16 %v277_v26, %v277_v26  ;;  %v1771_v29 = vshll.u32 %v4103_v3, 16  ;;  %v1671_v4 = vsel %vm1146_vm4, %v1666_v5, %v1670_v15  ;;  %v731_v61 = vld [vmem:[#allocation2 + $0x2c] sm:$0x1]  ;;  %v970_v2 = vld [vmem:[#allocation2 + $0x78] sm:$0xf]  ;;  %s3029_s14 = sld [smem:[#allocation3]] }
  0x4a   : > { %v1170_v40 = vsel %vm1146_vm4, %v1165_v13, %v1169_v16  ;;  %v1261_v41 = vor.u32 %v1260_v18, %v1256_v6  ;;  %v1678_v22 = vor.u32 %v1677_v30, %v1673_v14  ;;  %v1682_v7 = vrot.slane %v1680_v20, 1  ;;  %v946_v5 = vld [vmem:[#allocation2 + $0x78] sm:$0xe]  ;;  %v3835_v13 = vld [vmem:[%s5592_s1] sm:$0xff]   ;;  %s3617_s3 = sshll.u32 %s5618_s18, 9  ;;  %s3904_s18 = smov 120  }
  0x4b   : > { %1355 = vrot.lane.b32.xlu0 %v1254_v27, %s3897_s23  ;;  %v422_v43 = vshrl.u32 %v4135_v45, 16  ;;  %v425_v44 = vshll.u32 %v4135_v45, 16  ;;  %v1265_v46 = vrot.slane %v1263_v31, 1  ;;  %v1764_v47 = vshll.u32 %v4143_v53, 16  ;;  %3671 = vmatprep.subr.bf16.mxu0 %v3835_v13 }
  0x4c   : > { %v430_v48 = vshrl.u32 %v3623_v32, 16  ;;  %v433_v49 = vshll.u32 %v3623_v32, 16  ;;  %v1935_v51 = vrot.slane %v3497_v24, 1  ;;  %v1762_v52 = vor.u32 %v1761_v35, %v1757_v34  ;;  %v4207_v26 = vld [vmem:[#allocation2 + $0x20] ss:$0 sps:$4 sm:$0x11]   ;;  %3672 = vmatpush3.bf16.msra.mxu0 %v3835_v13  ;;  %3713 = vmatprep.subr.bf16.mxu1 %v3835_v13 }
  0x4d   : > { %1996 = vrot.lane.b32.xlu1 %v1958_v21, %s3899_s25  ;;  %v4184_v17 = vcombine.low %v954_v37, %v4175_v42  ;;  %v424_v54 = vrot.slane %v422_v43, 7  ;;  %v1936_v55 = vrot.slane %v4150_v0, 1  ;;  %v1769_v56 = vshrl.u32 %v4103_v3, 16  ;;  %v4193_v0 = vld [vmem:[#allocation2 + $0x7c] sm:$0xf]  ;;  %3718 = vmatpush3.bf16.msra.mxu1 %v3835_v13 }
  0x4e   : > { %v1773_v50 = vrot.slane %v1771_v29, 1  ;;  %v432_v45 = vrot.slane %v430_v48, 7  ;;  %v1683_v53 = vsel %vm1146_vm4, %v1678_v22, %v1682_v7  ;;  %v1776_v57 = vshll.u32 %v4177_v19, 16  ;;  %v783_v35 = vld [vmem:[#allocation2 + $0x84] sm:$0xf] }
  0x4f   : > { %1852 = vrot.lane.b32.xlu0 %v1671_v4, %s3900_s26  ;;  %v427_v58 = vor.u32 %v425_v44, %v424_v54  ;;  %v428_v59 = vrot.slane %v424_v54, 4  ;;  %v1266_v62 = vsel %vm1146_vm4, %v1261_v41, %v1265_v46  ;;  %v1766_v63 = vrot.slane %v1764_v47, 1  ;;  %v787_v37 = vld [vmem:[#allocation2 + $0x8c] sm:$0x1]  ;;  %v4232_v47 = vld [vmem:[#allocation2 + $0x1c] sm:$0xf] }
  0x50   : > { %v435_v1 = vor.u32 %v433_v49, %v432_v45  ;;  %v437_v3 = vrot.slane %v432_v45, 4  ;;  %v558_v8 = vshrl.u32 %v4163_v33, 16  ;;  %v561_v11 = vshll.u32 %v4163_v33, 16  ;;  %v3837_v41 = vld [vmem:[%s5592_s1 + $0x8] sm:$0xff]   ;;  %v1002_v49 = vld [vmem:[#allocation2 + $0x18] sm:$0xe] }
  0x51   : > { %1341 = vrot.lane.b32.xlu1 %v1170_v40, %s3897_s23  ;;  %v728_v6 = vsel %vm4026_vm8, %v427_v58, %v727_v25  ;;  %v566_v15 = vshrl.u32 %v4169_v38, 16  ;;  %v2175_v16 = vshll.u32 %v4184_v17, 16  ;;  %v569_v14 = vshll.u32 %v4169_v38, 16  ;;  %v829_v40 = vld [vmem:[#allocation2 + $0x18] sm:$0xf]  ;;  %3673 = vmatprep.subr.bf16.mxu0 %v3837_v41  ;;  %v262_v45 = vld [vmem:[%s4005_s21 + $0x30] sm:$0xff] }
  0x52   : > { %v436_v18 = vsel %vm4017_vm7, %v428_v59, %v435_v1  ;;  %729 = vst [vmem:[#allocation2 + $0x24] sm:$0xf] %v728_v6  ;;  %v732_v27 = vsel %vm4074_vm9, %v437_v3, %v731_v61  ;;  %v1937_v30 = vsel %vm1419_vm6, %v1935_v51, %v1936_v55  ;;  %v4216_v20 = vcombine.low %v970_v2, %v4193_v0  ;;  %v278_v1 = vld [vmem:[%s4005_s21 + $0xb0] sm:$0xff] }
  0x53   : > { %1854 = vrot.lane.b32.xlu0 %v1683_v53, %s3900_s26  ;;  %730 = vst.msk [vmem:[#allocation2 + $0x28] sm:$0xf] %vm200_vm0, %v436_v18  ;;  %733 = vst [vmem:[#allocation2 + $0x2c] sm:$0x1] %v732_v27  ;;  %v560_v21 = vrot.slane %v558_v8, 7  ;;  %v568_v31 = vrot.slane %v566_v15, 7  ;;  %v3505_v32 = vcombine.low %v946_v5, %v4096_v60  ;;  %v1767_v33 = vsel %vm1146_vm4, %v1762_v52, %v1766_v63 }
  0x54   : > { %v1774_v24 = vor.u32 %v1773_v50, %v1769_v56  ;;  %v1778_v34 = vrot.slane %v1776_v57, 1  ;;  %v2173_v60 = vshrl.u32 %v4184_v17, 16  ;;  %v2177_v22 = vrot.slane %v2175_v16, 1  ;;  %3674 = vmatpush3.bf16.msra.mxu0 %v3837_v41  ;;  %3714 = vmatprep.subr.bf16.mxu1 %v3837_v41  ;;  %v4237_v56 = vld [vmem:[#allocation2 + $0x80] ss:$0 sps:$4 sm:$0x11]  }
  0x55   : > { %1357 = vrot.lane.b32.xlu1 %v1266_v62, %s3897_s23  ;;  %v563_v38 = vor.u32 %v561_v11, %v560_v21  ;;  %v564_v29 = vrot.slane %v560_v21, 4  ;;  %v571_v4 = vor.u32 %v569_v14, %v568_v31  ;;  %v2180_v7 = vshll.u32 %v4207_v26, 16  ;;  %3719 = vmatpush3.bf16.msra.mxu1 %v3837_v41  ;;  %v263_v57 = vld [vmem:[%s4005_s21 + $0x38] sm:$0xff]  ;;  %v4263_v16 = vld [vmem:[#allocation2 + $0x20] ss:$0 sps:$4 sm:$0x11]  }
  0x56   : > { %v2271_v43 = vshll.u32 %v4216_v20, 16  ;;  %v573_v48 = vrot.slane %v568_v31, 4  ;;  %v1779_v51 = vsel %vm1146_vm4, %v1774_v24, %v1778_v34  ;;  %v1959_v52 = vrot.slane %v3505_v32, 1  ;;  %v1010_v8 = vld [vmem:[#allocation2 + $0x78] sm:$0xe] }
  0x57   : > { %1982 = vrot.lane.b32.xlu0 %v1937_v30, %s3899_s25  ;;  %v572_v44 = vsel %vm4017_vm7, %v564_v29, %v571_v4  ;;  %v784_v46 = vsel %vm4026_vm8, %v563_v38, %v783_v35  ;;  %v1960_v54 = vrot.slane %v4177_v19, 1  ;;  %v2178_v25 = vor.u32 %v2177_v22, %v2173_v60  ;;  %v845_v27 = vld [vmem:[#allocation2 + $0x78] sm:$0xf]  ;;  %v4280_v4 = vld [vmem:[#allocation2 + $0x7c] sm:$0xf] }
  0x58   : > { %785 = vst [vmem:[#allocation2 + $0x84] sm:$0xf] %v784_v46  ;;  %786 = vst.msk [vmem:[#allocation2 + $0x88] sm:$0xf] %vm200_vm0, %v572_v44  ;;  %v788_v50 = vsel %vm4074_vm9, %v573_v48, %v787_v37  ;;  %v4247_v53 = vcombine.low %v829_v40, %v4232_v47  ;;  %v2182_v59 = vrot.slane %v2180_v7, 1  ;;  %v2269_v62 = vshrl.u32 %v4216_v20, 16 }
  0x59   : > { %1868 = vrot.lane.b32.xlu1 %v1767_v33, %s3900_s26  ;;  %v956_v55 = vld [vmem:[#allocation2 + $0x24] sm:$0xf]  ;;  %789 = vst [vmem:[#allocation2 + $0x8c] sm:$0x1] %v788_v50  ;;  %v2273_v63 = vrot.slane %v2271_v43, 1  ;;  %v1961_v2 = vsel %vm1419_vm6, %v1959_v52, %v1960_v54  ;;  %v2276_v13 = vshll.u32 %v4237_v56, 16  ;;  %v4268_v14 = vpack.c.bf16 %v263_v57, %v263_v57 }
  0x5a   : > { %v4244_v19 = vld [vmem:[#allocation2 + $0x28] sm:$0xf]  ;;  %v4252_v61 = vld [vmem:[#allocation2 + $0x2c] ss:$0 sps:$4 sm:$0x11]   ;;  %v1174_v18 = vshll.u32 %v4247_v53, 16  ;;  %v2183_v21 = vsel %vm1146_vm4, %v2178_v25, %v2182_v59  ;;  %v4284_v41 = vpack.c.bf16 %v278_v1, %v278_v1  ;;  %v3552_v60 = vcombine.low %v1010_v8, %v4193_v0 }
  0x5b   : > { %2092 = vrot.lane.b32.xlu0 %v4184_v17, %s3901_s5  ;;  %v3513_v58 = vcombine.low %v956_v55, %v4244_v19  ;;  %v3544_v17 = vcombine.low %v1002_v49, %v4175_v42  ;;  %v831_v3 = vld [vmem:[#allocation2 + $0x24] sm:$0xf]  ;;  %v4258_v5 = vld [vmem:[#allocation2 + $0x28] sm:$0xf]  ;;  %v2192_v15 = vshll.u32 %v4252_v61, 16  ;;  %v4266_v42 = vpack.c.bf16 %v262_v45, %v262_v45  ;;  %v279_v30 = vld [vmem:[%s4005_s21 + $0xb8] sm:$0xff] }
  0x5c   : > { %v4276_v34 = vcombine.low %v831_v3, %v4258_v5  ;;  %v1003_v35 = vld [vmem:[#allocation2 + $0x24] sm:$0xe]  ;;  %v2445_v29 = vrot.slane %v4207_v26, 1  ;;  %v4282_v40 = vld [vmem:[#allocation2 + $0x80] ss:$0 sps:$4 sm:$0x11]   ;;  %v2274_v7 = vor.u32 %v2273_v63, %v2269_v62  ;;  %v4302_v55 = vcombine.low %v845_v27, %v4280_v4 }
  0x5d   : > { %1870 = vrot.lane.b32.xlu1 %v1779_v51, %s3900_s26  ;;  %v2187_v6 = vshll.u32 %v3513_v58, 16  ;;  %v2185_v11 = vshrl.u32 %v3513_v58, 16  ;;  %v2194_v32 = vrot.slane %v2192_v15, 1  ;;  %v2444_v38 = vrot.slane %v3544_v17, 1  ;;  %v3839_v51 = vld [vmem:[%s5592_s1 + $0x10] sm:$0xff]   ;;  %v264_v17 = vld [vmem:[%s4005_s21 + $0x40] sm:$0xff] }
  0x5e   : > { %v2278_v43 = vrot.slane %v2276_v13, 1  ;;  %v1172_v48 = vshrl.u32 %v4247_v53, 16  ;;  %v1176_v26 = vrot.slane %v1174_v18, 1  ;;  %v1179_v49 = vshll.u32 %v4263_v16, 16  ;;  %3675 = vmatprep.subr.bf16.mxu0 %v3839_v51  ;;  %3715 = vmatprep.subr.bf16.mxu1 %v3839_v51  ;;  %v875_v1 = vld [vmem:[#allocation2 + $0x18] sm:$0xe] }
  0x5f   : > { %2094 = vrot.lane.b32.xlu0 %v3513_v58, %s3901_s5  ;;  %v2189_v31 = vrot.slane %v2187_v6, 1  ;;  %v972_v33 = vld [vmem:[#allocation2 + $0x84] sm:$0xf]  ;;  %v4273_v24 = vld [vmem:[#allocation2 + $0x88] sm:$0xf]  ;;  %v1186_v54 = vshll.u32 %v4276_v34, 16  ;;  %v4304_v50 = vpack.c.bf16 %v279_v30, %v279_v30  ;;  %v3545_v45 = vcombine.low %v1003_v35, %v4244_v19  ;;  %3676 = vmatpush3.bf16.msra.mxu0 %v3839_v51 }
  0x60   : > { %v3521_v37 = vcombine.low %v972_v33, %v4273_v24  ;;  %v4287_v44 = vld [vmem:[#allocation2 + $0x8c] ss:$0 sps:$4 sm:$0x11]   ;;  %v2279_v59 = vsel %vm1146_vm4, %v2274_v7, %v2278_v43  ;;  %v2468_v62 = vrot.slane %v3552_v60, 1  ;;  %v2469_v63 = vrot.slane %v4237_v56, 1  ;;  %v3842_v19 = vld [vmem:[%s5592_s1 + $0x18] sm:$0xff]   ;;  %3720 = vmatpush3.bf16.msra.mxu1 %v3839_v51 }
  0x61   : > { %1998 = vrot.lane.b32.xlu1 %v1961_v2, %s3899_s25  ;;  %v2190_v22 = vor.u32 %v2189_v31, %v2185_v11  ;;  %v4298_v52 = vld [vmem:[#allocation2 + $0x2c] ss:$0 sps:$4 sm:$0x11]   ;;  %v2288_v58 = vshll.u32 %v4287_v44, 16  ;;  %v1177_v2 = vor.u32 %v1176_v26, %v1172_v48  ;;  %v1181_v3 = vrot.slane %v1179_v49, 1  ;;  %3677 = vmatprep.subr.bf16.mxu0 %v3842_v19 }
  0x62   : > { %v2283_v46 = vshll.u32 %v3521_v37, 16  ;;  %v2281_v25 = vshrl.u32 %v3521_v37, 16  ;;  %v1268_v6 = vshrl.u32 %v4302_v55, 16  ;;  %v1275_v8 = vshll.u32 %v4282_v40, 16  ;;  %v265_v11 = vld [vmem:[%s4005_s21 + $0x48] sm:$0xff]  ;;  %3716 = vmatprep.subr.bf16.mxu1 %v3842_v19 }
  0x63   : > { %2364 = vrot.lane.b32.xlu0 %v2183_v21, %s3902_s6  ;;  %v2195_v0 = vsel %vm1146_vm4, %v2190_v22, %v2194_v32  ;;  %v1184_v56 = vshrl.u32 %v4276_v34, 16  ;;  %v1188_v15 = vrot.slane %v1186_v54, 1  ;;  %v1191_v13 = vshll.u32 %v4298_v52, 16  ;;  %v4324_v32 = vld [vmem:[#allocation2 + $0x78] sm:$0xe]  ;;  %3678 = vmatpush3.bf16.msra.mxu0 %v3842_v19 }
  0x64   : > { %v2285_v57 = vrot.slane %v2283_v46, 1  ;;  %v1270_v18 = vshll.u32 %v4302_v55, 16  ;;  %v2290_v30 = vrot.slane %v2288_v58, 1  ;;  %v2447_v21 = vrot.slane %v3545_v45, 1  ;;  %v847_v35 = vld [vmem:[#allocation2 + $0x84] sm:$0xf]  ;;  %3721 = vmatpush3.bf16.msra.mxu1 %v3842_v19 }
  0x65   : > { %2108 = vrot.lane.b32.xlu1 %v4216_v20, %s3901_s5  ;;  %v2446_v20 = vsel %vm1419_vm6, %v2444_v38, %v2445_v29  ;;  %v2448_v31 = vrot.slane %v4252_v61, 1  ;;  %v3450_v33 = vcombine.low %v875_v1, %v4232_v47  ;;  %v4329_v38 = vpack.c.bf16 %v264_v17, %v264_v17  ;;  %v876_v61 = vld [vmem:[#allocation2 + $0x24] sm:$0xe]  ;;  %v738_v19 = vld [vmem:[#allocation2 + $0x38] sm:$0x1] }
  0x66   : > { %v2286_v27 = vor.u32 %v2285_v57, %v2281_v25  ;;  %v4331_v29 = vpack.c.bf16 %v265_v11, %v265_v11  ;;  %v1182_v60 = vsel %vm1146_vm4, %v1177_v2, %v1181_v3  ;;  %v439_v22 = vshrl.u32 %v4266_v42, 16  ;;  %v1011_v43 = vld [vmem:[#allocation2 + $0x84] sm:$0xe] }
  0x67   : > { %2366 = vrot.lane.b32.xlu0 %v2195_v0, %s3902_s6  ;;  %v442_v7 = vshll.u32 %v4266_v42, 16  ;;  %v447_v47 = vshrl.u32 %v4268_v14, 16  ;;  %v1189_v46 = vor.u32 %v1188_v15, %v1184_v56  ;;  %v1193_v48 = vrot.slane %v1191_v13, 1  ;;  %v893_v56 = vld [vmem:[#allocation2 + $0x24] sm:$0xf] }
  0x68   : > { %v1272_v26 = vrot.slane %v1270_v18, 1  ;;  %v450_v49 = vshll.u32 %v4268_v14, 16  ;;  %v2291_v51 = vsel %vm1146_vm4, %v2286_v27, %v2290_v30  ;;  %v441_v54 = vrot.slane %v439_v22, 7  ;;  %v4361_v27 = vld [vmem:[#allocation2 + $0x28] sm:$0xf] }
  0x69   : > { %2110 = vrot.lane.b32.xlu1 %v3521_v37, %s3901_s5  ;;  %v4327_v37 = vld [vmem:[#allocation2 + $0x88] sm:$0xf]  ;;  %v449_v45 = vrot.slane %v447_v47, 7  ;;  %v2449_v25 = vsel %vm1419_vm6, %v2447_v21, %v2448_v31  ;;  %v2470_v42 = vsel %vm1419_vm6, %v2468_v62, %v2469_v63  ;;  %v3451_v57 = vcombine.low %v876_v61, %v4258_v5  ;;  %v4353_v5 = vld [vmem:[#allocation2 + $0x8c] ss:$0 sps:$4 sm:$0x11]  }
  0x6a   : > { %v4342_v0 = vcombine.low %v847_v35, %v4327_v37  ;;  %v3458_v58 = vcombine.low %v4324_v32, %v4280_v4  ;;  %v444_v14 = vor.u32 %v442_v7, %v441_v54  ;;  %v445_v1 = vrot.slane %v441_v54, 4 }
  0x6b   : > { %2492 = vrot.lane.b32.xlu0 %v2446_v20, %s3903_s11  ;;  %v734_v20 = vld [vmem:[#allocation2 + $0x30] sm:$0xf]  ;;  %v452_v17 = vor.u32 %v450_v49, %v449_v45  ;;  %v1194_v2 = vsel %vm1146_vm4, %v1189_v46, %v1193_v48  ;;  %v1273_v3 = vor.u32 %v1272_v26, %v1268_v6  ;;  %v1277_v62 = vrot.slane %v1275_v8, 1  ;;  %v794_v49 = vld [vmem:[#allocation2 + $0x98] sm:$0x1] }
  0x6c   : > { %v1426_v63 = vrot.slane %v3450_v33, 1  ;;  %v1282_v11 = vshll.u32 %v4342_v0, 16  ;;  %v735_v15 = vsel %vm4026_vm8, %v444_v14, %v734_v20  ;;  %v454_v13 = vrot.slane %v449_v45, 4  ;;  %v884_v45 = vld [vmem:[#allocation2 + $0x84] sm:$0xe] }
  0x6d   : > { %2380 = vrot.lane.b32.xlu1 %v2279_v59, %s3902_s6  ;;  %v3553_v59 = vcombine.low %v1011_v43, %v4273_v24  ;;  %v453_v24 = vsel %vm4017_vm7, %v445_v1, %v452_v17  ;;  %v1427_v18 = vrot.slane %v4263_v16, 1  ;;  %736 = vst [vmem:[#allocation2 + $0x30] sm:$0xf] %v735_v15  ;;  %v575_v6 = vshrl.u32 %v4284_v41, 16  ;;  %v790_v43 = vld [vmem:[#allocation2 + $0x90] sm:$0xf] }
  0x6e   : > { %737 = vst.msk [vmem:[#allocation2 + $0x34] sm:$0xf] %vm200_vm0, %v453_v24  ;;  %v578_v8 = vshll.u32 %v4284_v41, 16  ;;  %v583_v30 = vshrl.u32 %v4304_v50, 16  ;;  %v2472_v31 = vrot.slane %v4287_v44, 1  ;;  %v739_v33 = vsel %vm4074_vm9, %v454_v13, %v738_v19 }
  0x6f   : > { %1343 = vrot.lane.b32.xlu0 %v1182_v60, %s3897_s23  ;;  %v2471_v21 = vrot.slane %v3553_v59, 1  ;;  %v586_v16 = vshll.u32 %v4304_v50, 16  ;;  %v1278_v35 = vsel %vm1146_vm4, %v1273_v3, %v1277_v62  ;;  %v1287_v60 = vshll.u32 %v4353_v5, 16  ;;  %740 = vst [vmem:[#allocation2 + $0x38] sm:$0x1] %v739_v33 }
  0x70   : > { %v577_v41 = vrot.slane %v575_v6, 7  ;;  %v585_v61 = vrot.slane %v583_v30, 7  ;;  %v1429_v22 = vrot.slane %v3451_v57, 1  ;;  %v1280_v7 = vshrl.u32 %v4342_v0, 16  ;;  %v741_v30 = vld [vmem:[#allocation2 + $0x3c] sm:$0xf] }
  0x71   : > { %2382 = vrot.lane.b32.xlu1 %v2291_v51, %s3902_s6  ;;  %v1284_v47 = vrot.slane %v1282_v11, 1  ;;  %v4377_v44 = vcombine.low %v893_v56, %v4361_v27  ;;  %v1428_v46 = vsel %vm1419_vm6, %v1426_v63, %v1427_v18  ;;  %v2473_v51 = vsel %vm1419_vm6, %v2471_v21, %v2472_v31  ;;  %v4385_v20 = vld [vmem:[#allocation2 + $0x2c] ss:$0 sps:$4 sm:$0x11]   ;;  %v909_v63 = vld [vmem:[#allocation2 + $0x84] sm:$0xf] }
  0x72   : > { %v580_v50 = vor.u32 %v578_v8, %v577_v41  ;;  %v581_v48 = vrot.slane %v577_v41, 4  ;;  %v588_v26 = vor.u32 %v586_v16, %v585_v61  ;;  %v1430_v54 = vrot.slane %v4298_v52, 1  ;;  %v4399_v11 = vld [vmem:[#allocation2 + $0x88] sm:$0xf]  ;;  %v280_v16 = vld [vmem:[%s4005_s21 + $0xc0] sm:$0xff] }
  0x73   : > { %2494 = vrot.lane.b32.xlu0 %v2449_v25, %s3903_s11  ;;  %v590_v25 = vrot.slane %v585_v61, 4  ;;  %v1289_v57 = vrot.slane %v1287_v60, 1  ;;  %v464_v1 = vshrl.u32 %v4331_v29, 16  ;;  %v1285_v17 = vor.u32 %v1284_v47, %v1280_v7  ;;  %v939_v60 = vld [vmem:[#allocation2 + $0x24] sm:$0xe] }
  0x74   : > { %v589_v59 = vsel %vm4017_vm7, %v581_v48, %v588_v26  ;;  %v791_v14 = vsel %vm4026_vm8, %v580_v50, %v790_v43  ;;  %v1687_v52 = vshll.u32 %v4377_v44, 16  ;;  %v895_v19 = vld [vmem:[#allocation2 + $0x30] sm:$0xf]  ;;  %v459_v62 = vshll.u32 %v4329_v38, 16 }
  0x75   : > { %2508 = vrot.lane.b32.xlu1 %v2470_v42, %s3903_s11  ;;  %v456_v42 = vshrl.u32 %v4329_v38, 16  ;;  %792 = vst [vmem:[#allocation2 + $0x90] sm:$0xf] %v791_v14  ;;  %793 = vst.msk [vmem:[#allocation2 + $0x94] sm:$0xf] %vm200_vm0, %v589_v59  ;;  %v795_v3 = vsel %vm4074_vm9, %v590_v25, %v794_v49  ;;  %v1431_v56 = vsel %vm1419_vm6, %v1429_v22, %v1430_v54  ;;  %v1450_v24 = vrot.slane %v3458_v58, 1 }
  0x76   : > { %796 = vst [vmem:[#allocation2 + $0x98] sm:$0x1] %v795_v3  ;;  %v1451_v15 = vrot.slane %v4282_v40, 1  ;;  %v3459_v18 = vcombine.low %v884_v45, %v4327_v37  ;;  %v1685_v6 = vshrl.u32 %v4377_v44, 16  ;;  %v466_v8 = vrot.slane %v464_v1, 7 }
  0x77   : > { %1345 = vrot.lane.b32.xlu0 %v1194_v2, %s3897_s23  ;;  %v4393_v2 = vld [vmem:[#allocation2 + $0x34] sm:$0xf]  ;;  %v458_v13 = vrot.slane %v456_v42, 7  ;;  %v1290_v21 = vsel %vm1146_vm4, %v1285_v17, %v1289_v57  ;;  %v1689_v31 = vrot.slane %v1687_v52, 1  ;;  %v1692_v4 = vshll.u32 %v4385_v20, 16 }
  0x78   : > { %v3467_v38 = vcombine.low %v895_v19, %v4393_v2  ;;  %v4414_v40 = vcombine.low %v909_v63, %v4399_v11  ;;  %v467_v33 = vshll.u32 %v4331_v29, 16  ;;  %v1452_v41 = vsel %vm1419_vm6, %v1450_v24, %v1451_v15  ;;  %v4424_v22 = vld [vmem:[#allocation2 + $0x38] ss:$0 sps:$4 sm:$0x11]   ;;  %v745_v45 = vld [vmem:[#allocation2 + $0x44] sm:$0x1] }
  0x79   : > { %1359 = vrot.lane.b32.xlu1 %v1278_v35, %s3897_s23  ;;  %v461_v32 = vor.u32 %v459_v62, %v458_v13  ;;  %v462_v58 = vrot.slane %v458_v13, 4  ;;  %v281_v35 = vld [vmem:[%s4005_s21 + $0xc8] sm:$0xff]  ;;  %v1453_v29 = vrot.slane %v3459_v18, 1  ;;  %v1454_v43 = vrot.slane %v4353_v5, 1  ;;  %v940_v42 = vld [vmem:[#allocation2 + $0x30] sm:$0xe] }
  0x7a   : > { %v1699_v61 = vshll.u32 %v3467_v38, 16  ;;  %v4426_v7 = vld [vmem:[#allocation2 + $0x8c] ss:$0 sps:$4 sm:$0x11]   ;;  %v469_v47 = vor.u32 %v467_v33, %v466_v8  ;;  %v1694_v50 = vrot.slane %v1692_v4, 1  ;;  %v1783_v48 = vshll.u32 %v4414_v40, 16 }
  0x7b   : > { %1472 = vrot.lane.b32.xlu0 %v1428_v46, %s3896_s22  ;;  %v742_v37 = vsel %vm4026_vm8, %v461_v32, %v741_v30  ;;  %v1690_v46 = vor.u32 %v1689_v31, %v1685_v6  ;;  %v3642_v54 = vpack.c.bf16 %v280_v16, %v280_v16  ;;  %v3643_v25 = vpack.c.bf16 %v281_v35, %v281_v35  ;;  %v797_v18 = vld [vmem:[#allocation2 + $0x9c] sm:$0xf]  ;;  %v4450_v30 = vld [vmem:[#allocation2 + $0x34] sm:$0xf] }
  0x7c   : > { %743 = vst [vmem:[#allocation2 + $0x3c] sm:$0xf] %v742_v37  ;;  %v911_v26 = vld [vmem:[#allocation2 + $0x90] sm:$0xf]  ;;  %v4430_v49 = vld [vmem:[#allocation2 + $0x94] sm:$0xf]  ;;  %v3498_v5 = vcombine.low %v939_v60, %v4361_v27  ;;  %v1455_v1 = vsel %vm1419_vm6, %v1453_v29, %v1454_v43  ;;  %v3499_v63 = vcombine.low %v940_v42, %v4393_v2 }
  0x7d   : > { %2510 = vrot.lane.b32.xlu1 %v2473_v51, %s3903_s11  ;;  %v470_v51 = vsel %vm4017_vm7, %v462_v58, %v469_v47  ;;  %v1697_v57 = vshrl.u32 %v3467_v38, 16  ;;  %v1701_v59 = vrot.slane %v1699_v61, 1  ;;  %v1704_v14 = vshll.u32 %v4424_v22, 16  ;;  %v4452_v2 = vld [vmem:[#allocation2 + $0x98] ss:$0 sps:$4 sm:$0x11]  }
  0x7e   : > { %744 = vst.msk [vmem:[#allocation2 + $0x40] sm:$0xf] %vm200_vm0, %v470_v51  ;;  %v1695_v17 = vsel %vm1146_vm4, %v1690_v46, %v1694_v50  ;;  %v3475_v52 = vcombine.low %v911_v26, %v4430_v49  ;;  %v1781_v19 = vshrl.u32 %v4414_v40, 16  ;;  %v1785_v3 = vrot.slane %v1783_v48, 1  ;;  %v801_v43 = vld [vmem:[#allocation2 + $0xa4] sm:$0x1] }
  0x7f   : > { %1474 = vrot.lane.b32.xlu0 %v1431_v56, %s3896_s22  ;;  %v1788_v62 = vshll.u32 %v4426_v7, 16  ;;  %v592_v27 = vshrl.u32 %v3642_v54, 16  ;;  %v958_v56 = vld [vmem:[#allocation2 + $0x30] sm:$0xf]  ;;  %v595_v15 = vshll.u32 %v3642_v54, 16  ;;  %v600_v13 = vshrl.u32 %v3643_v25, 16 }
  0x80   : > { %v1702_v6 = vor.u32 %v1701_v59, %v1697_v57  ;;  %v603_v31 = vshll.u32 %v3643_v25, 16  ;;  %v1795_v4 = vshll.u32 %v3475_v52, 16  ;;  %v1938_v32 = vrot.slane %v3498_v5, 1  ;;  %v947_v46 = vld [vmem:[#allocation2 + $0x84] sm:$0xe] }
  0x81   : > { %1361 = vrot.lane.b32.xlu1 %v1290_v21, %s3897_s23  ;;  %v594_v21 = vrot.slane %v592_v27, 7  ;;  %v1939_v58 = vrot.slane %v4385_v20, 1  ;;  %v1786_v16 = vor.u32 %v1785_v3, %v1781_v19  ;;  %v1790_v35 = vrot.slane %v1788_v62, 1  ;;  %v948_v54 = vld [vmem:[#allocation2 + $0x90] sm:$0xe] }
  0x82   : > { %v4457_v60 = vcombine.low %v958_v56, %v4450_v30  ;;  %v1941_v47 = vrot.slane %v3499_v63, 1  ;;  %v1942_v29 = vrot.slane %v4424_v22, 1  ;;  %v1793_v50 = vshrl.u32 %v3475_v52, 16  ;;  %v974_v22 = vld [vmem:[#allocation2 + $0x90] sm:$0xf] }
  0x83   : > { %1584 = vrot.lane.b32.xlu0 %v4377_v44, %s3898_s24  ;;  %v471_v44 = vrot.slane %v466_v8, 4  ;;  %v1706_v8 = vrot.slane %v1704_v14, 1  ;;  %v597_v33 = vor.u32 %v595_v15, %v594_v21  ;;  %v598_v37 = vrot.slane %v594_v21, 4  ;;  %v4472_v25 = vld [vmem:[#allocation2 + $0x94] sm:$0xf] }
  0x84   : > { %v1797_v48 = vrot.slane %v1795_v4, 1  ;;  %v1800_v26 = vshll.u32 %v4452_v2, 16  ;;  %v3506_v5 = vcombine.low %v947_v46, %v4399_v11  ;;  %v1940_v42 = vsel %vm1419_vm6, %v1938_v32, %v1939_v58  ;;  %v960_v57 = vld [vmem:[#allocation2 + $0x3c] sm:$0xf]  ;;  %v266_v56 = vld [vmem:[%s4005_s21 + $0x50] sm:$0xff] }
  0x85   : > { %1488 = vrot.lane.b32.xlu1 %v1452_v41, %s3896_s22  ;;  %v746_v24 = vsel %vm4074_vm9, %v471_v44, %v745_v45  ;;  %v1707_v61 = vsel %vm1146_vm4, %v1702_v6, %v1706_v8  ;;  %v798_v20 = vsel %vm4026_vm8, %v597_v33, %v797_v18  ;;  %v4477_v59 = vld [vmem:[#allocation2 + $0x40] sm:$0xf]  ;;  %v2199_v19 = vshll.u32 %v4457_v60, 16  ;;  %v1004_v15 = vld [vmem:[#allocation2 + $0x30] sm:$0xe]  ;;  %v267_v6 = vld [vmem:[%s4005_s21 + $0x58] sm:$0xff] }
  0x86   : > { %747 = vst [vmem:[#allocation2 + $0x44] sm:$0x1] %v746_v24  ;;  %799 = vst [vmem:[#allocation2 + $0x9c] sm:$0xf] %v798_v20  ;;  %v1802_v44 = vrot.slane %v1800_v26, 1  ;;  %v4484_v11 = vcombine.low %v974_v22, %v4472_v25  ;;  %v3515_v3 = vcombine.low %v960_v57, %v4477_v59  ;;  %v1943_v62 = vsel %vm1419_vm6, %v1941_v47, %v1942_v29 }
  0x87   : > { %1586 = vrot.lane.b32.xlu0 %v3467_v38, %s3898_s24  ;;  %v602_v38 = vrot.slane %v600_v13, 7  ;;  %v1962_v27 = vrot.slane %v3506_v5, 1  ;;  %v2197_v13 = vshrl.u32 %v4457_v60, 16  ;;  %v2201_v18 = vrot.slane %v2199_v19, 1  ;;  %v4500_v4 = vld [vmem:[#allocation2 + $0x34] sm:$0xf] }
  0x88   : > { %v2295_v8 = vshll.u32 %v4484_v11, 16  ;;  %v4498_v21 = vld [vmem:[#allocation2 + $0x98] ss:$0 sps:$4 sm:$0x11]   ;;  %v2211_v32 = vshll.u32 %v3515_v3, 16  ;;  %v1966_v33 = vrot.slane %v4452_v2, 1 }
  0x89   : > { %1490 = vrot.lane.b32.xlu1 %v1455_v1, %s3896_s22  ;;  %v605_v41 = vor.u32 %v603_v31, %v602_v38  ;;  %v607_v45 = vrot.slane %v602_v38, 4  ;;  %v1791_v1 = vsel %vm1146_vm4, %v1786_v16, %v1790_v35  ;;  %v833_v31 = vld [vmem:[#allocation2 + $0x30] sm:$0xf]  ;;  %v268_v16 = vld [vmem:[%s4005_s21 + $0x60] sm:$0xff]  ;;  %v2293_v29 = vshrl.u32 %v4484_v11, 16 }
  0x8a   : > { %v282_v38 = vld [vmem:[%s4005_s21 + $0xd0] sm:$0xff]  ;;  %v4515_v20 = vld [vmem:[#allocation2 + $0x38] ss:$0 sps:$4 sm:$0x11]   ;;  %v2202_v46 = vor.u32 %v2201_v18, %v2197_v13  ;;  %v2300_v26 = vshll.u32 %v4498_v21, 16  ;;  %v4523_v22 = vcombine.low %v833_v31, %v4500_v4  ;;  %vm2864_vm10 = vcmask 1043456  }
  0x8b   : > { %1856 = vrot.lane.b32.xlu0 %v1695_v17, %s3900_s26  ;;  %v606_v51 = vsel %vm4017_vm7, %v598_v37, %v605_v41  ;;  %v802_v14 = vsel %vm4074_vm9, %v607_v45, %v801_v43  ;;  %v1798_v17 = vor.u32 %v1797_v48, %v1793_v50  ;;  %v4505_v37 = vld [vmem:[#allocation2 + $0x90] sm:$0xe]  ;;  %v3628_v43 = vpack.c.bf16 %v266_v56, %v266_v56  ;;  %v4547_v18 = vld [vmem:[#allocation2 + $0x40] sm:$0xf] }
  0x8c   : > { %800 = vst.msk [vmem:[#allocation2 + $0xa0] sm:$0xf] %vm200_vm0, %v606_v51  ;;  %803 = vst [vmem:[#allocation2 + $0xa4] sm:$0x1] %v802_v14  ;;  %v2297_v48 = vrot.slane %v2295_v8, 1  ;;  %v3629_v51 = vpack.c.bf16 %v267_v6, %v267_v6  ;;  %v2213_v45 = vrot.slane %v2211_v32, 1  ;;  %v4525_v5 = vpack.c.bf16 %v282_v38, %v282_v38 }
  0x8d   : > { %1600 = vrot.lane.b32.xlu1 %v4414_v40, %s3898_s24  ;;  %v4468_v40 = vld [vmem:[#allocation2 + $0x38] ss:$0 sps:$4 sm:$0x11]   ;;  %v1803_v24 = vsel %vm1146_vm4, %v1798_v17, %v1802_v44  ;;  %v4510_v41 = vld [vmem:[#allocation2 + $0x44] ss:$0 sps:$4 sm:$0x11]  }
  0x8e   : > { %v2204_v63 = vshll.u32 %v4468_v40, 16  ;;  %v976_v2 = vld [vmem:[#allocation2 + $0x9c] sm:$0xf]  ;;  %5606 = vst [vmem:[#allocation4_spill] sm:$0xff] %v4523_v22  ;;  %v2216_v57 = vshll.u32 %v4510_v41, 16  ;;  %v2451_v19 = vrot.slane %v4468_v40, 1 }
  0x8f   : > { %1858 = vrot.lane.b32.xlu0 %v1707_v61, %s3900_s26  ;;  %v3546_v61 = vcombine.low %v1004_v15, %v4450_v30  ;;  %v2209_v30 = vshrl.u32 %v3515_v3, 16  ;;  %v2302_v56 = vrot.slane %v2300_v26, 1  ;;  %v1203_v13 = vshll.u32 %v4515_v20, 16 }
  0x90   : > { %v2206_v35 = vrot.slane %v2204_v63, 1  ;;  %v2298_v63 = vor.u32 %v2297_v48, %v2293_v29  ;;  %v473_v40 = vshrl.u32 %v3628_v43, 16  ;;  %v2218_v6 = vrot.slane %v2216_v57, 1 }
  0x91   : > { %1602 = vrot.lane.b32.xlu1 %v3475_v52, %s3898_s24  ;;  %v3507_v52 = vcombine.low %v948_v54, %v4430_v49  ;;  %v1963_v49 = vrot.slane %v4426_v7, 1  ;;  %v283_v7 = vld [vmem:[%s4005_s21 + $0xd8] sm:$0xff]  ;;  %v2450_v44 = vrot.slane %v3546_v61, 1  ;;  %v2214_v15 = vor.u32 %v2213_v45, %v2209_v30 }
  0x92   : > { %v1005_v54 = vld [vmem:[#allocation2 + $0x3c] sm:$0xe]  ;;  %v4531_v14 = vpack.c.bf16 %v283_v7, %v283_v7  ;;  %v481_v8 = vshrl.u32 %v3629_v51, 16  ;;  %v484_v31 = vshll.u32 %v3629_v51, 16  ;;  %v2303_v7 = vsel %vm1146_vm4, %v2298_v63, %v2302_v56 }
  0x93   : > { %1984 = vrot.lane.b32.xlu0 %v1940_v42, %s3899_s25  ;;  %v1965_v58 = vrot.slane %v3507_v52, 1  ;;  %v1964_v47 = vsel %vm1419_vm6, %v1962_v27, %v1963_v49  ;;  %v4517_v50 = vld [vmem:[#allocation2 + $0xa0] sm:$0xf]  ;;  %v3554_v42 = vcombine.low %v4505_v37, %v4472_v25  ;;  %v835_v52 = vld [vmem:[#allocation2 + $0x3c] sm:$0xf]  ;;  %v3547_v27 = vcombine.low %v1005_v54, %v4477_v59 }
  0x94   : > { %v4537_v17 = vcombine.low %v976_v2, %v4517_v50  ;;  %v2207_v25 = vsel %vm1146_vm4, %v2202_v46, %v2206_v35  ;;  %v1198_v49 = vshll.u32 %v4523_v22, 16  ;;  %v476_v59 = vshll.u32 %v3628_v43, 16 }
  0x95   : > { %1872 = vrot.lane.b32.xlu1 %v1791_v1, %s3900_s26  ;;  %v4533_v1 = vpack.c.bf16 %v268_v16, %v268_v16  ;;  %v475_v37 = vrot.slane %v473_v40, 7  ;;  %v4559_v16 = vcombine.low %v835_v52, %v4547_v18  ;;  %v483_v61 = vrot.slane %v481_v8, 7  ;;  %v4577_v52 = vld [vmem:[#allocation2 + $0x44] ss:$0 sps:$4 sm:$0x11]  }
  0x96   : > { %v2307_v32 = vshll.u32 %v4537_v17, 16  ;;  %v1200_v29 = vrot.slane %v1198_v49, 1  ;;  %v1205_v43 = vrot.slane %v1203_v13, 1  ;;  %v2219_v48 = vsel %vm1146_vm4, %v2214_v15, %v2218_v6 }
  0x97   : > { %1986 = vrot.lane.b32.xlu0 %v1943_v62, %s3899_s25  ;;  %v849_v62 = vld [vmem:[#allocation2 + $0x90] sm:$0xf]  ;;  %5607 = vst [vmem:[#allocation5_spill] sm:$0xff] %v4559_v16  ;;  %v478_v46 = vor.u32 %v476_v59, %v475_v37  ;;  %v479_v2 = vrot.slane %v475_v37, 4  ;;  %v4568_v26 = vrot.slane %v3547_v27, 1  ;;  %v2454_v51 = vrot.slane %v4510_v41, 1 }
  0x98   : > { %v486_v54 = vor.u32 %v484_v31, %v483_v61  ;;  %v2305_v30 = vshrl.u32 %v4537_v17, 16  ;;  %v2309_v45 = vrot.slane %v2307_v32, 1  ;;  %v612_v56 = vshll.u32 %v4525_v5, 16  ;;  %v851_v59 = vld [vmem:[#allocation2 + $0x9c] sm:$0xf] }
  0x99   : > { %1874 = vrot.lane.b32.xlu1 %v1803_v24, %s3900_s26  ;;  %v4542_v24 = vld [vmem:[#allocation2 + $0x94] sm:$0xf]  ;;  %v617_v15 = vshrl.u32 %v4531_v14, 16  ;;  %v620_v49 = vshll.u32 %v4531_v14, 16  ;;  %v2475_v40 = vrot.slane %v4498_v21, 1  ;;  %v1215_v21 = vshll.u32 %v4577_v52, 16 }
  0x9a   : > { %v4562_v35 = vcombine.low %v849_v62, %v4542_v24  ;;  %v4580_v62 = vld [vmem:[#allocation2 + $0x98] ss:$0 sps:$4 sm:$0x11]   ;;  %v487_v27 = vsel %vm4017_vm7, %v479_v2, %v486_v54  ;;  %v804_v31 = vld [vmem:[#allocation2 + $0xa8] sm:$0xf]  ;;  %v2310_v32 = vor.u32 %v2309_v45, %v2305_v30  ;;  %v1433_v41 = vrot.slane %v4515_v20, 1 }
  0x9b   : > { %2096 = vrot.lane.b32.xlu0 %v4457_v60, %s3901_s5  ;;  %v1967_v60 = vsel %vm1419_vm6, %v1965_v58, %v1966_v33  ;;  %v1196_v58 = vshrl.u32 %v4523_v22, 16  ;;  %v4555_v33 = vld [vmem:[#allocation2 + $0xa4] ss:$0 sps:$4 sm:$0x11]   ;;  %751 = vst.msk [vmem:[#allocation2 + $0x4c] sm:$0xf] %vm200_vm0, %v487_v27 }
  0x9c   : > { %5608 = vst [vmem:[#allocation6_spill] sm:$0xff] %v4562_v35  ;;  %v2312_v57 = vshll.u32 %v4555_v33, 16  ;;  %v1294_v6 = vshll.u32 %v4562_v35, 16  ;;  %v619_v14 = vrot.slane %v617_v15, 7  ;;  %v1013_v15 = vld [vmem:[#allocation2 + $0x9c] sm:$0xe] }
  0x9d   : > { %2000 = vrot.lane.b32.xlu1 %v1964_v47, %s3899_s25  ;;  %v748_v47 = vld [vmem:[#allocation2 + $0x48] sm:$0xf]  ;;  %v1201_v13 = vor.u32 %v1200_v29, %v1196_v58  ;;  %v1292_v29 = vshrl.u32 %v4562_v35, 16  ;;  %vm2524_vm11 = vcmask 64512   ;;  %vm2557_vm12 = vcmask 130048  }
  0x9e   : > { %v2314_v37 = vrot.slane %v2312_v57, 1  ;;  %v622_v45 = vor.u32 %v620_v49, %v619_v14  ;;  %v624_v57 = vrot.slane %v619_v14, 4  ;;  %vm2590_vm13 = vcmask 195584  }
  0x9f   : > { %2098 = vrot.lane.b32.xlu0 %v3515_v3, %s3901_s5  ;;  %v2452_v3 = vsel %vm1419_vm6, %v2450_v44, %v2451_v19  ;;  %v752_v44 = vld [vmem:[#allocation2 + $0x50] sm:$0x1]  ;;  %v4575_v19 = vrot.slane %v3554_v42, 1  ;;  %v609_v42 = vshrl.u32 %v4525_v5, 16  ;;  %v4598_v5 = vld [vmem:[#allocation2 + $0xa0] sm:$0xf] }
  0xa0   : > { %v4550_v38 = vpop.permute.xlu0 %1468  ;;  %v4612_v27 = vcombine.low %v851_v59, %v4598_v5  ;;  %vm2623_vm14 = vcmask 261120   ;;  %vm2656_vm15 = vcmask 326656   ;;  %vm2689_vm1 = vcmask 392192  }
  0xa1   : > { %2002 = vrot.lane.b32.xlu1 %v1967_v60, %s3899_s25  ;;  %v749_v60 = vsel %vm4026_vm8, %v478_v46, %v748_v47  ;;  %v808_v46 = vld [vmem:[#allocation2 + $0xb0] sm:$0x1]  ;;  %vm2722_vm2 = vcmask 457728   ;;  %vm2755_vm3 = vcmask 523264   ;;  %vm2831_vm5 = vcmask 588800  }
  0xa2   : > { %750 = vst [vmem:[#allocation2 + $0x48] sm:$0xf] %v749_v60  ;;  %v1206_v60 = vsel %vm1146_vm4, %v1201_v13, %v1205_v43  ;;  %5609 = vst [vmem:[#allocation7_spill] sm:$0xff] %v4612_v27  ;;  %v1217_v13 = vrot.slane %v1215_v21, 1 }
  0xa3   : > { %2368 = vrot.lane.b32.xlu0 %v2207_v25, %s3902_s6  ;;  %v488_v25 = vrot.slane %v483_v61, 4  ;;  %v611_v61 = vrot.slane %v609_v42, 7 }
  0xa4   : > { %v4584_v63 = vpop.permute.xlu0 %1339 }
  0xa5   : > { %2112 = vrot.lane.b32.xlu1 %v4484_v11, %s3901_s5  ;;  %v1210_v11 = vshll.u32 %v4559_v16, 16  ;;  %v753_v8 = vsel %vm4074_vm9, %v488_v25, %v752_v44  ;;  %v614_v54 = vor.u32 %v612_v56, %v611_v61  ;;  %v615_v30 = vrot.slane %v611_v61, 4  ;;  %v269_v25 = vld [vmem:[%s4005_s21 + $0x68] sm:$0xff] }
  0xa6   : > { %754 = vst [vmem:[#allocation2 + $0x50] sm:$0x1] %v753_v8  ;;  %v1296_v44 = vrot.slane %v1294_v6, 1  ;;  %v4625_v6 = vld [vmem:[#allocation2 + $0xa4] ss:$0 sps:$4 sm:$0x11]   ;;  %v3631_v59 = vpack.c.bf16 %v269_v25, %v269_v25  ;;  %v3555_v61 = vcombine.low %v1013_v15, %v4517_v50 }
  0xa7   : > { %2370 = vrot.lane.b32.xlu0 %v2219_v48, %s3902_s6  ;;  %v1212_v58 = vrot.slane %v1210_v11, 1  ;;  %v877_v48 = vld [vmem:[#allocation2 + $0x30] sm:$0xe]  ;;  %v1299_v11 = vshll.u32 %v4580_v62, 16  ;;  %v623_v42 = vsel %vm4017_vm7, %v615_v30, %v622_v45  ;;  %v805_v56 = vsel %vm4026_vm8, %v614_v54, %v804_v31  ;;  %v878_v31 = vld [vmem:[#allocation2 + $0x3c] sm:$0xe] }
  0xa8   : > { %v3452_v43 = vcombine.low %v877_v48, %v4500_v4  ;;  %806 = vst [vmem:[#allocation2 + $0xa8] sm:$0xf] %v805_v56  ;;  %807 = vst.msk [vmem:[#allocation2 + $0xac] sm:$0xf] %vm200_vm0, %v623_v42  ;;  %v2455_v4 = vsel %vm1419_vm6, %v4568_v26, %v2454_v51  ;;  %v493_v26 = vshll.u32 %v4533_v1, 16  ;;  %v3453_v30 = vcombine.low %v878_v31, %v4547_v18 }
  0xa9   : > { %2114 = vrot.lane.b32.xlu1 %v4537_v17, %s3901_s5  ;;  %v4600_v47 = vpop.permute.xlu1 %1596  ;;  %v1208_v17 = vshrl.u32 %v4559_v16, 16  ;;  %v1301_v21 = vrot.slane %v1299_v11, 1  ;;  %v3845_v51 = vld [vmem:[%s5592_s1 + $0x20] ss:$0 sps:$4 sm:$0xff]   ;;  %v498_v45 = vshrl.u32 %v3631_v59, 16  ;;  %v2477_v25 = vrot.slane %v3555_v61, 1 }
  0xaa   : > { %v4606_v2 = vpop.permute.xlu0 %1580  ;;  %v1432_v48 = vrot.slane %v3452_v43, 1  ;;  %3723 = vmatprep.subr.msk.bf16.mxu0 %vm2864_vm10, %v3845_v51  ;;  %3724 = vmatprep.subr.msk.bf16.mxu1 %vm2864_vm10, %v3845_v51 }
  0xab   : > { %2496 = vrot.lane.b32.xlu0 %v2452_v3, %s3903_s11  ;;  %v2315_v3 = vsel %vm1146_vm4, %v2310_v32, %v2314_v37  ;;  %v1213_v49 = vor.u32 %v1212_v58, %v1208_v17  ;;  %v1306_v32 = vshll.u32 %v4612_v27, 16  ;;  %v490_v37 = vshrl.u32 %v4533_v1, 16 }
  0xac   : > { %v2476_v17 = vsel %vm1419_vm6, %v4575_v19, %v2475_v40  ;;  %v1297_v58 = vor.u32 %v1296_v44, %v1292_v29  ;;  %v1304_v19 = vshrl.u32 %v4612_v27, 16  ;;  %v897_v40 = vld [vmem:[#allocation2 + $0x3c] sm:$0xf]  ;;  %v4650_v29 = vld [vmem:[#allocation2 + $0x40] sm:$0xf]  ;;  %v1311_v1 = vshll.u32 %v4625_v6, 16 }
  0xad   : > { %2384 = vrot.lane.b32.xlu1 %v2303_v7, %s3902_s6  ;;  %v809_v7 = vsel %vm4074_vm9, %v624_v57, %v808_v46  ;;  %v4628_v8 = vpop.permute.xlu1 %1598  ;;  %v755_v46 = vld [vmem:[#allocation2 + $0x54] sm:$0xf]  ;;  %v492_v54 = vrot.slane %v490_v37, 7  ;;  %v1218_v50 = vsel %vm1146_vm4, %v1213_v49, %v1217_v13  ;;  %v1308_v20 = vrot.slane %v1306_v32, 1  ;;  %v885_v57 = vld [vmem:[#allocation2 + $0x90] sm:$0xe] }
  0xae   : > { %810 = vst [vmem:[#allocation2 + $0xb0] sm:$0x1] %v809_v7  ;;  %v501_v44 = vshll.u32 %v3631_v59, 16  ;;  %v1302_v18 = vsel %vm1146_vm4, %v1297_v58, %v1301_v21  ;;  %v4661_v56 = vcombine.low %v897_v40, %v4650_v29  ;;  %v500_v15 = vrot.slane %v498_v45, 7  ;;  %v284_v49 = vld [vmem:[%s4005_s21 + $0xe0] sm:$0xff]  ;;  %v285_v13 = vld [vmem:[%s4005_s21 + $0xe8] sm:$0xff] }
  0xaf   : > { %1347 = vrot.lane.b32.xlu0 %v1206_v60, %s3897_s23  ;;  %v495_v60 = vor.u32 %v493_v26, %v492_v54  ;;  %v496_v7 = vrot.slane %v492_v54, 4  ;;  %v1435_v59 = vrot.slane %v3453_v30, 1  ;;  %v3460_v31 = vcombine.low %v885_v57, %v4542_v24  ;;  %v899_v21 = vld [vmem:[#allocation2 + $0x48] sm:$0xf]  ;;  %v913_v57 = vld [vmem:[#allocation2 + $0x9c] sm:$0xf] }
  0xb0   : > { %v1309_v32 = vor.u32 %v1308_v20, %v1304_v19  ;;  %v1313_v37 = vrot.slane %v1311_v1, 1  ;;  %v503_v61 = vor.u32 %v501_v44, %v500_v15  ;;  %v3646_v24 = vpack.c.bf16 %v284_v49, %v284_v49  ;;  %v4687_v45 = vld [vmem:[#allocation2 + $0x44] ss:$0 sps:$4 sm:$0x11]  }
  0xb1   : > { %2386 = vrot.lane.b32.xlu1 %v2315_v3, %s3902_s6  ;;  %v4637_v14 = vpop.permute.xlu0 %1582  ;;  %v2478_v3 = vrot.slane %v4555_v33, 1  ;;  %v756_v43 = vsel %vm4026_vm8, %v495_v60, %v755_v46  ;;  %v1434_v33 = vsel %vm1419_vm6, %v1432_v48, %v1433_v41  ;;  %v4676_v46 = vld [vmem:[#allocation2 + $0x4c] sm:$0xf]  ;;  %v3647_v54 = vpack.c.bf16 %v285_v13, %v285_v13  ;;  %v886_v41 = vld [vmem:[#allocation2 + $0x9c] sm:$0xe] }
  0xb2   : > { %757 = vst [vmem:[#allocation2 + $0x54] sm:$0xf] %v756_v43  ;;  %v1711_v48 = vshll.u32 %v4661_v56, 16  ;;  %v1456_v19 = vrot.slane %v3460_v31, 1  ;;  %v1457_v40 = vrot.slane %v4580_v62, 1  ;;  %v1314_v20 = vsel %vm1146_vm4, %v1309_v32, %v1313_v37 }
  0xb3   : > { %2498 = vrot.lane.b32.xlu0 %v2455_v4, %s3903_s11  ;;  %v1436_v4 = vrot.slane %v4577_v52, 1  ;;  %v2479_v58 = vsel %vm1419_vm6, %v2477_v25, %v2478_v3  ;;  %v759_v52 = vld [vmem:[#allocation2 + $0x5c] sm:$0x1]  ;;  %v4693_v1 = vcombine.low %v899_v21, %v4676_v46  ;;  %v4695_v60 = vld [vmem:[#allocation2 + $0xa0] sm:$0xf]  ;;  %v2866_v44 = vsel %vm2864_vm10, %v3845_v51, 0 }
  0xb4   : > { %v3461_v62 = vcombine.low %v886_v41, %v4598_v5  ;;  %3680 = vmatpush3.bf16.msra.mxu0 %v2866_v44  ;;  %v626_v3 = vshrl.u32 %v3646_v24, 16  ;;  %v634_v43 = vshrl.u32 %v3647_v54, 16  ;;  %3722 = vmatpush3.bf16.msra.mxu1 %v2866_v44  ;;  %v1709_v13 = vshrl.u32 %v4661_v56, 16  ;;  %v811_v41 = vld [vmem:[#allocation2 + $0xb4] sm:$0xf] }
  0xb5   : > { %2512 = vrot.lane.b32.xlu1 %v2476_v17, %s3903_s11  ;;  %v4654_v11 = vpop.permute.xlu0 %1470  ;;  %v1437_v30 = vsel %vm1419_vm6, %v1435_v59, %v1436_v4  ;;  %v1713_v59 = vrot.slane %v1711_v48, 1  ;;  %v637_v31 = vshll.u32 %v3647_v54, 16  ;;  %v1716_v51 = vshll.u32 %v4687_v45, 16  ;;  %v4826_v16 = vld [vmem:[#allocation2 + $0xb0] ss:$0 sps:$4 sm:$0x11]  }
  0xb6   : > { %v4709_v5 = vcombine.low %v913_v57, %v4695_v60  ;;  %v1458_v32 = vsel %vm1419_vm6, %v1456_v19, %v1457_v40  ;;  %v1723_v37 = vshll.u32 %v4693_v1, 16  ;;  %v4721_v57 = vld [vmem:[#allocation2 + $0xac] sm:$0xf]  ;;  %v1721_v44 = vshrl.u32 %v4693_v1, 16 }
  0xb7   : > { %v4658_v42 = vpop.permute.xlu1 %1484  ;;  %1349 = vrot.lane.b32.xlu0 %v1218_v50, %s3897_s23  ;;  %v504_v50 = vsel %vm4017_vm7, %v496_v7, %v503_v61  ;;  %v629_v7 = vshll.u32 %v3646_v24, 16  ;;  %v1460_v61 = vrot.slane %v4625_v6, 1  ;;  %v1714_v19 = vor.u32 %v1713_v59, %v1709_v13 }
  0xb8   : > { %758 = vst.msk [vmem:[#allocation2 + $0x58] sm:$0xf] %vm200_vm0, %v504_v50  ;;  %v1718_v6 = vrot.slane %v1716_v51, 1  ;;  %v1807_v40 = vshll.u32 %v4709_v5, 16  ;;  %v962_v51 = vld [vmem:[#allocation2 + $0x48] sm:$0xf] }
  0xb9   : > { %1363 = vrot.lane.b32.xlu1 %v1302_v18, %s3897_s23  ;;  %v4673_v17 = vpop.permute.xlu0 %1980  ;;  %v505_v18 = vrot.slane %v500_v15, 4  ;;  %v628_v15 = vrot.slane %v626_v3, 7  ;;  %v4729_v3 = vld [vmem:[#allocation2 + $0xa4] ss:$0 sps:$4 sm:$0x11]  }
  0xbb   : > { %v4679_v26 = vpop.permute.xlu1 %1486  ;;  %1476 = vrot.lane.b32.xlu0 %v1434_v33, %s3896_s22  ;;  %v760_v4 = vsel %vm4074_vm9, %v505_v18, %v759_v52  ;;  %v636_v33 = vrot.slane %v634_v43, 7  ;;  %v1459_v52 = vrot.slane %v3461_v62, 1  ;;  %v631_v24 = vor.u32 %v629_v7, %v628_v15 }
  0xbc   : > { %761 = vst [vmem:[#allocation2 + $0x5c] sm:$0x1] %v760_v4  ;;  %v632_v54 = vrot.slane %v628_v15, 4  ;;  %v1725_v18 = vrot.slane %v1723_v37, 1  ;;  %v815_v4 = vld [vmem:[#allocation2 + $0xbc] sm:$0x1]  ;;  %v1719_v37 = vsel %vm1146_vm4, %v1714_v19, %v1718_v6 }
  0xbd   : > { %2514 = vrot.lane.b32.xlu1 %v2479_v58, %s3903_s11  ;;  %v4698_v25 = vpop.permute.xlu0 %1355  ;;  %v4715_v58 = vld [vmem:[#allocation2 + $0x50] ss:$0 sps:$4 sm:$0x11]   ;;  %v639_v48 = vor.u32 %v637_v31, %v636_v33  ;;  %v812_v43 = vsel %vm4026_vm8, %v631_v24, %v811_v41  ;;  %v1461_v13 = vsel %vm1419_vm6, %v1459_v52, %v1460_v61  ;;  %v4744_v15 = vld [vmem:[#allocation2 + $0x4c] sm:$0xf]  ;;  %v1805_v52 = vshrl.u32 %v4709_v5, 16 }
  0xbe   : > { %v1728_v62 = vshll.u32 %v4715_v58, 16  ;;  %813 = vst [vmem:[#allocation2 + $0xb4] sm:$0xf] %v812_v43  ;;  %v949_v61 = vld [vmem:[#allocation2 + $0x9c] sm:$0xe]  ;;  %v641_v24 = vrot.slane %v636_v33, 4 }
  0xbf   : > { %v4701_v49 = vpop.permute.xlu1 %1996  ;;  %1478 = vrot.lane.b32.xlu0 %v1437_v30, %s3896_s22  ;;  %v915_v30 = vld [vmem:[#allocation2 + $0xa8] sm:$0xf]  ;;  %v640_v7 = vsel %vm4017_vm7, %v632_v54, %v639_v48  ;;  %v1726_v48 = vor.u32 %v1725_v18, %v1721_v44  ;;  %v1945_v18 = vrot.slane %v4687_v45, 1  ;;  %v4797_v27 = vld [vmem:[#allocation2 + $0x58] sm:$0xf] }
  0xc0   : > { %v4739_v59 = vcombine.low %v915_v30, %v4721_v57  ;;  %814 = vst.msk [vmem:[#allocation2 + $0xb8] sm:$0xf] %vm200_vm0, %v640_v7  ;;  %v942_v54 = vld [vmem:[#allocation2 + $0x48] sm:$0xe]  ;;  %v1730_v41 = vrot.slane %v1728_v62, 1  ;;  %v1809_v30 = vrot.slane %v1807_v40, 1  ;;  %v816_v33 = vsel %vm4074_vm9, %v641_v24, %v815_v4 }
  0xc1   : > { %1365 = vrot.lane.b32.xlu1 %v1314_v20, %s3897_s23  ;;  %v4717_v21 = vpop.permute.xlu0 %1852  ;;  %v941_v20 = vld [vmem:[#allocation2 + $0x3c] sm:$0xe]  ;;  %v1812_v7 = vshll.u32 %v4729_v3, 16  ;;  %817 = vst [vmem:[#allocation2 + $0xbc] sm:$0x1] %v816_v33  ;;  %v3501_v6 = vcombine.low %v942_v54, %v4676_v46  ;;  %v3508_v40 = vcombine.low %v949_v61, %v4695_v60 }
  0xc2   : > { %v978_v62 = vld [vmem:[#allocation2 + $0xa8] sm:$0xf]  ;;  %v1731_v4 = vsel %vm1146_vm4, %v1726_v48, %v1730_v41  ;;  %v4774_v33 = vld [vmem:[#allocation2 + $0x50] ss:$0 sps:$4 sm:$0x11]   ;;  %v1817_v60 = vshrl.u32 %v4739_v59, 16 }
  0xc3   : > { %v4719_v50 = vpop.permute.xlu1 %1341  ;;  %1588 = vrot.lane.b32.xlu0 %v4661_v56, %s3898_s24  ;;  %v1814_v24 = vrot.slane %v1812_v7, 1  ;;  %v1947_v41 = vrot.slane %v3501_v6, 1  ;;  %v1969_v7 = vrot.slane %v4729_v3, 1 }
  0xc5   : > { %1492 = vrot.lane.b32.xlu1 %v1458_v32, %s3896_s22  ;;  %v4735_v56 = vpop.permute.xlu0 %1854  ;;  %v3500_v32 = vcombine.low %v941_v20, %v4650_v29  ;;  %v1819_v29 = vshll.u32 %v4739_v59, 16  ;;  %v4756_v20 = vld [vmem:[#allocation2 + $0xb0] ss:$0 sps:$4 sm:$0x11]  }
  0xc6   : > { %v1824_v45 = vshll.u32 %v4756_v20, 16 }
  0xc7   : > { %v4742_v31 = vpop.permute.xlu1 %1357  ;;  %1590 = vrot.lane.b32.xlu0 %v4693_v1, %s3898_s24  ;;  %v4759_v1 = vcombine.low %v962_v51, %v4744_v15  ;;  %v1944_v44 = vrot.slane %v3500_v32, 1  ;;  %v1810_v51 = vor.u32 %v1809_v30, %v1805_v52  ;;  %v1821_v32 = vrot.slane %v1819_v29, 1 }
  0xc8   : > { %v1968_v30 = vrot.slane %v3508_v40, 1  ;;  %v1826_v3 = vrot.slane %v1824_v45, 1  ;;  %v287_v45 = vld [vmem:[%s4005_s21 + $0xf8] sm:$0xff] }
  0xc9   : > { %1494 = vrot.lane.b32.xlu1 %v1461_v13, %s3896_s22  ;;  %v4753_v43 = vpop.permute.xlu0 %1982  ;;  %v4769_v13 = vld [vmem:[#allocation2 + $0xac] sm:$0xf]  ;;  %v2223_v61 = vshll.u32 %v4759_v1, 16  ;;  %v1946_v48 = vsel %vm1419_vm6, %v1944_v44, %v1945_v18  ;;  %v2221_v44 = vshrl.u32 %v4759_v1, 16  ;;  %v1822_v40 = vor.u32 %v1821_v32, %v1817_v60 }
  0xca   : > { %v4787_v54 = vcombine.low %v978_v62, %v4769_v13  ;;  %v964_v62 = vld [vmem:[#allocation2 + $0x54] sm:$0xf]  ;;  %v1970_v60 = vsel %vm1419_vm6, %v1968_v30, %v1969_v7 }
  0xcb   : > { %v4763_v19 = vpop.permute.xlu1 %1868  ;;  %1860 = vrot.lane.b32.xlu0 %v1719_v37, %s3900_s26  ;;  %v950_v37 = vld [vmem:[#allocation2 + $0xa8] sm:$0xe]  ;;  %v2225_v18 = vrot.slane %v2223_v61, 1  ;;  %v4814_v32 = vcombine.low %v964_v62, %v4797_v27  ;;  %v1827_v30 = vsel %vm1146_vm4, %v1822_v40, %v1826_v3  ;;  %v4843_v40 = vld [vmem:[#allocation2 + $0x5c] ss:$0 sps:$4 sm:$0x11]  }
  0xcc   : > { %v3509_v29 = vcombine.low %v950_v37, %v4721_v57  ;;  %v2228_v57 = vshll.u32 %v4774_v33, 16  ;;  %v1006_v37 = vld [vmem:[#allocation2 + $0x48] sm:$0xe] }
  0xcd   : > { %1604 = vrot.lane.b32.xlu1 %v4709_v5, %s3898_s24  ;;  %v4776_v46 = vpop.permute.xlu0 %2092  ;;  %v2526_v5 = vsel %vm2524_vm11, %v4010_v12, %v4584_v63  ;;  %v1815_v12 = vsel %vm1146_vm4, %v1810_v51, %v1814_v24  ;;  %v1948_v63 = vrot.slane %v4715_v58, 1  ;;  %v2319_v58 = vshll.u32 %v4787_v54, 16 }
  0xce   : > { %v2226_v7 = vor.u32 %v2225_v18, %v2221_v44  ;;  %v2230_v62 = vrot.slane %v2228_v57, 1  ;;  %v2235_v44 = vshll.u32 %v4814_v32, 16 }
  0xcf   : > { %v4784_v52 = vpop.permute.xlu1 %1870  ;;  %1862 = vrot.lane.b32.xlu0 %v1731_v4, %s3900_s26  ;;  %v286_v4 = vld [vmem:[%s4005_s21 + $0xf0] sm:$0xff]  ;;  %v1949_v61 = vsel %vm1419_vm6, %v1947_v41, %v1948_v63  ;;  %v4836_v41 = vld [vmem:[#allocation2 + $0xa8] sm:$0xe]  ;;  %s5364_s21 = scalar_lea.vmem %s5595_s4, %s3617_s3 }
  0xd0   : > { %v4828_v22 = vpack.c.bf16 %v286_v4, %v286_v4  ;;  %v2231_v57 = vsel %vm1146_vm4, %v2226_v7, %v2230_v62  ;;  %v818_v4 = vld [vmem:[#allocation2 + $0xc0] sm:$0xf] }
  0xd1   : > { %1606 = vrot.lane.b32.xlu1 %v4739_v59, %s3898_s24  ;;  %v4800_v6 = vpop.permute.xlu0 %2094  ;;  %v2559_v59 = vsel %vm2557_vm12, %v2526_v5, %v4550_v38  ;;  %v2542_v38 = vsel %vm2524_vm11, %v4129_v39, %v4698_v25  ;;  %v1971_v5 = vrot.slane %v3509_v29, 1  ;;  %v2528_v39 = vsel %vm2524_vm11, %v4109_v9, %v4719_v50 }
  0xd2   : > { %v2592_v24 = vsel %vm2590_vm13, %v2559_v59, %v4606_v2  ;;  %v1972_v2 = vrot.slane %v4756_v20, 1  ;;  %v4823_v59 = vld [vmem:[#allocation2 + $0x4c] sm:$0xf]  ;;  %v3548_v20 = vcombine.low %v1006_v37, %v4744_v15  ;;  %v2317_v29 = vshrl.u32 %v4787_v54, 16  ;;  %v4861_v37 = vld [vmem:[#allocation2 + $0xb8] sm:$0xf] }
  0xd3   : > { %v4806_v51 = vpop.permute.xlu1 %1998  ;;  %1988 = vrot.lane.b32.xlu0 %v1946_v48, %s3899_s25  ;;  %v837_v48 = vld [vmem:[#allocation2 + $0x48] sm:$0xf]  ;;  %v2575_v63 = vsel %vm2557_vm12, %v2542_v38, %v4658_v42  ;;  %v4848_v50 = vpack.c.bf16 %v287_v45, %v287_v45  ;;  %v2625_v15 = vsel %vm2623_vm14, %v2592_v24, %v4717_v21  ;;  %v2561_v3 = vsel %vm2557_vm12, %v2528_v39, %v4654_v11  ;;  %v4868_v38 = vld [vmem:[#allocation2 + $0x54] sm:$0xe] }
  0xd4   : > { %v4846_v9 = vcombine.low %v837_v48, %v4823_v59  ;;  %v1973_v42 = vsel %vm1419_vm6, %v1971_v5, %v1972_v2  ;;  %v2324_v21 = vshll.u32 %v4826_v16, 16  ;;  %v2608_v24 = vsel %vm2590_vm13, %v2575_v63, %v4600_v47 }
  0xd5   : > { %1876 = vrot.lane.b32.xlu1 %v1815_v12, %s3900_s26  ;;  %v2365_v35 = vpop.permute.xlu0 %2364  ;;  %v2321_v12 = vrot.slane %v2319_v58, 1  ;;  %v980_v58 = vld [vmem:[#allocation2 + $0xb4] sm:$0xf]  ;;  %v4870_v11 = vrot.slane %v3548_v20, 1  ;;  %v2658_v2 = vsel %vm2656_vm15, %v2625_v15, %v4673_v17  ;;  %v2233_v48 = vshrl.u32 %v4814_v32, 16 }
  0xd6   : > { %v2240_v47 = vshll.u32 %v4843_v40, 16  ;;  %v2594_v7 = vsel %vm2590_vm13, %v2561_v3, %v4637_v14  ;;  %v2691_v62 = vsel %vm2689_vm1, %v2658_v2, %v4776_v46  ;;  %v4887_v39 = vcombine.low %v980_v58, %v4861_v37  ;;  %v4889_v17 = vld [vmem:[#allocation2 + $0x50] ss:$0 sps:$4 sm:$0x11]   ;;  %v839_v46 = vld [vmem:[#allocation2 + $0x54] sm:$0xf] }
  0xd7   : > { %v4833_v25 = vpop.permute.xlu1 %2108  ;;  %1990 = vrot.lane.b32.xlu0 %v1949_v61, %s3899_s25  ;;  %v4873_v5 = vor.u32 %v2321_v12, %v2317_v29  ;;  %v2724_v20 = vsel %vm2722_vm2, %v2691_v62, %v2365_v35  ;;  %v4895_v63 = vrot.slane %v2324_v21, 1  ;;  %v1222_v14 = vshll.u32 %v4846_v9, 16  ;;  %v4899_v15 = vld [vmem:[#allocation2 + $0x58] sm:$0xf]  ;;  %v4913_v12 = vld [vmem:[#allocation2 + $0xac] sm:$0xf] }
  0xd8   : > { %v643_v3 = vshrl.u32 %v4828_v22, 16  ;;  %v646_v58 = vshll.u32 %v4828_v22, 16  ;;  %v651_v35 = vshrl.u32 %v4848_v50, 16  ;;  %v2627_v2 = vsel %vm2623_vm14, %v2594_v7, %v4735_v56 }
  0xd9   : > { %1878 = vrot.lane.b32.xlu1 %v1827_v30, %s3900_s26  ;;  %v4856_v18 = vpop.permute.xlu0 %2366  ;;  %v2237_v30 = vrot.slane %v2235_v44, 1  ;;  %v2641_v21 = vsel %vm2623_vm14, %v2608_v24, %v4763_v19  ;;  %v2331_v22 = vshll.u32 %v4887_v39, 16  ;;  %v654_v7 = vshll.u32 %v4848_v50, 16 }
  0xda   : > { %v645_v61 = vrot.slane %v643_v3, 7  ;;  %v653_v56 = vrot.slane %v651_v35, 7  ;;  %v2544_v19 = vsel %vm2524_vm11, %v4111_v10, %v4742_v31  ;;  %v1224_v24 = vrot.slane %v1222_v14, 1 }
  0xdb   : > { %v4866_v45 = vpop.permute.xlu1 %2110  ;;  %2100 = vrot.lane.b32.xlu0 %v4759_v1, %s3901_s5  ;;  %v1220_v1 = vshrl.u32 %v4846_v9, 16  ;;  %v2238_v62 = vor.u32 %v2237_v30, %v2233_v48  ;;  %v1227_v48 = vshll.u32 %v4889_v17, 16  ;;  %v4922_v30 = vld [vmem:[#allocation2 + $0xbc] ss:$0 sps:$4 sm:$0x11]   ;;  %v2674_v10 = vsel %vm2656_vm15, %v2641_v21, %v4701_v49 }
  0xdc   : > { %v648_v50 = vor.u32 %v646_v58, %v645_v61  ;;  %v649_v3 = vrot.slane %v645_v61, 4  ;;  %v656_v35 = vor.u32 %v654_v7, %v653_v56  ;;  %v2329_v14 = vshrl.u32 %v4887_v39, 16  ;;  %v4972_v7 = vld [vmem:[#allocation2 + $0xb0] ss:$0 sps:$4 sm:$0x11]  }
  0xdd   : > { %2004 = vrot.lane.b32.xlu1 %v1970_v60, %s3899_s25  ;;  %v2493_v29 = vpop.permute.xlu0 %2492  ;;  %v2333_v61 = vrot.slane %v2331_v22, 1  ;;  %v4960_v22 = vld [vmem:[#allocation2 + $0x5c] ss:$0 sps:$4 sm:$0x11]   ;;  %v2327_v36 = vsel %vm1146_vm4, %v4873_v5, %v4895_v63  ;;  %v855_v5 = vld [vmem:[#allocation2 + $0xb4] sm:$0xf] }
  0xde   : > { %v2757_v60 = vsel %vm2755_vm3, %v2724_v20, %v2493_v29  ;;  %v2242_v20 = vrot.slane %v2240_v47, 1  ;;  %v853_v29 = vld [vmem:[#allocation2 + $0xa8] sm:$0xf]  ;;  %v2660_v47 = vsel %vm2656_vm15, %v2627_v2, %v4753_v43  ;;  %v657_v58 = vsel %vm4017_vm7, %v649_v3, %v656_v35  ;;  %v4992_v63 = vld [vmem:[#allocation2 + $0xb8] sm:$0xf] }
  0xdf   : > { %v2381_v44 = vpop.permute.xlu1 %2380  ;;  %2102 = vrot.lane.b32.xlu0 %v4814_v32, %s3901_s5  ;;  %3681 = vmatprep.mubr.msk.bf16.mxu0 %vm2831_vm5, %v2757_v60  ;;  %v2693_v43 = vsel %vm2689_vm1, %v2660_v47, %v4800_v6  ;;  %v819_v49 = vsel %vm4026_vm8, %v648_v50, %v818_v4  ;;  %v2707_v2 = vsel %vm2689_vm1, %v2674_v10, %v4833_v25  ;;  %v2336_v6 = vshll.u32 %v4922_v30, 16 }
  0xe0   : > { %v2243_v31 = vsel %vm1146_vm4, %v2238_v62, %v2242_v20  ;;  %v2726_v21 = vsel %vm2722_vm2, %v2693_v43, %v4856_v18  ;;  %820 = vst [vmem:[#allocation2 + $0xc0] sm:$0xf] %v819_v49  ;;  %821 = vst.msk [vmem:[#allocation2 + $0xc4] sm:$0xf] %vm200_vm0, %v657_v58  ;;  %v2740_v23 = vsel %vm2722_vm2, %v2707_v2, %v2381_v44  ;;  %v2460_v35 = vrot.slane %v4843_v40, 1 }
  0xe1   : > { %2006 = vrot.lane.b32.xlu1 %v1973_v42, %s3899_s25  ;;  %v4919_v32 = vpop.permute.xlu0 %1343  ;;  %v4925_v42 = vcombine.low %v839_v46, %v4899_v15  ;;  %v4937_v46 = vcombine.low %v853_v29, %v4913_v12  ;;  %v1225_v4 = vor.u32 %v1224_v24, %v1220_v1  ;;  %v1229_v29 = vrot.slane %v1227_v48, 1  ;;  %v879_v43 = vld [vmem:[#allocation2 + $0x48] sm:$0xe] }
  0xe2   : > { %v2577_v25 = vsel %vm2557_vm12, %v2544_v19, %v4679_v26  ;;  %v5610_v1 = vrot.slane %v4774_v33, 1  ;;  %v2338_v48 = vrot.slane %v2336_v6, 1  ;;  %v5611_v33 = vcombine.low %v4868_v38, %v4797_v27 }
  0xe3   : > { %v4929_v60 = vpop.permute.xlu1 %2382  ;;  %2372 = vrot.lane.b32.xlu0 %v2231_v57, %s3902_s6  ;;  %v822_v57 = vld [vmem:[#allocation2 + $0xc8] sm:$0x1]  ;;  %v1234_v44 = vshll.u32 %v4925_v42, 16  ;;  %v1318_v19 = vshll.u32 %v4937_v46, 16  ;;  %v1230_v3 = vsel %vm1146_vm4, %v1225_v4, %v1229_v29  ;;  %v5612_v10 = vcombine.low %v4836_v41, %v4769_v13  ;;  %v1015_v13 = vld [vmem:[#allocation2 + $0xb4] sm:$0xe] }
  0xe4   : > { %v2458_v26 = vsel %vm1419_vm6, %v4870_v11, %v5610_v1  ;;  %v2459_v47 = vrot.slane %v5611_v33, 1  ;;  %v2610_v11 = vsel %vm2590_vm13, %v2577_v25, %v4628_v8  ;;  %v1232_v8 = vshrl.u32 %v4925_v42, 16  ;;  %v5025_v25 = vld [vmem:[#allocation2 + $0xbc] ss:$0 sps:$4 sm:$0x11]  }
  0xe5   : > { %2116 = vrot.lane.b32.xlu1 %v4787_v54, %s3901_s5  ;;  %v2495_v62 = vpop.permute.xlu0 %2494  ;;  %v658_v54 = vrot.slane %v653_v56, 4  ;;  %v2643_v27 = vsel %vm2623_vm14, %v2610_v11, %v4784_v52  ;;  %v1239_v38 = vshll.u32 %v4960_v22, 16  ;;  %v1236_v41 = vrot.slane %v1234_v44, 1 }
  0xe6   : > { %v2759_v20 = vsel %vm2755_vm3, %v2726_v21, %v2495_v62  ;;  %v2676_v40 = vsel %vm2656_vm15, %v2643_v27, %v4806_v51  ;;  %v1323_v58 = vshll.u32 %v4972_v7, 16  ;;  %v2481_v2 = vrot.slane %v4826_v16, 1 }
  0xe7   : > { %v2509_v28 = vpop.permute.xlu1 %2508  ;;  %2374 = vrot.lane.b32.xlu0 %v2243_v31, %s3902_s6  ;;  %3682 = vmatmul.mubr.msk.bf16.vlgmr.msra.gmra.mrb[0].mxu0 %vm2831_vm5, %v2759_v20  ;;  %v823_v56 = vsel %vm4074_vm9, %v658_v54, %v822_v57  ;;  %v2480_v31 = vrot.slane %v5612_v10, 1  ;;  %v2709_v52 = vsel %vm2689_vm1, %v2676_v40, %v4866_v45  ;;  %v5011_v21 = vcombine.low %v855_v5, %v4992_v63  ;;  %v887_v10 = vld [vmem:[#allocation2 + $0xa8] sm:$0xe]  ;;  %v903_v40 = vld [vmem:[#allocation2 + $0x60] sm:$0xf] }
  0xe8   : > { %v2773_v18 = vsel %vm2755_vm3, %v2740_v23, %v2509_v28  ;;  %824 = vst [vmem:[#allocation2 + $0xc8] sm:$0x1] %v823_v56  ;;  %v2742_v51 = vsel %vm2722_vm2, %v2709_v52, %v4929_v60  ;;  %v3557_v6 = vcombine.low %v1015_v13, %v4861_v37  ;;  %v2461_v45 = vsel %vm1419_vm6, %v2459_v47, %v2460_v35  ;;  %v880_v60 = vld [vmem:[#allocation2 + $0x54] sm:$0xe]  ;;  %v5054_v13 = vld [vmem:[#allocation2 + $0x64] sm:$0xf] }
  0xe9   : > { %2118 = vrot.lane.b32.xlu1 %v4887_v39, %s3901_s5  ;;  %3697 = vmatprep.mubr.msk.bf16.mxu1 %vm2831_vm5, %v2773_v18  ;;  %v4975_v24 = vpop.permute.xlu0 %1345  ;;  %v2334_v39 = vor.u32 %v2333_v61, %v2329_v14  ;;  %v1316_v14 = vshrl.u32 %v4937_v46, 16  ;;  %v1320_v61 = vrot.slane %v1318_v19, 1  ;;  %v3454_v23 = vcombine.low %v879_v43, %v4823_v59 }
  0xea   : > { %v1237_v16 = vor.u32 %v1236_v41, %v1232_v8  ;;  %v1241_v20 = vrot.slane %v1239_v38, 1  ;;  %v1325_v4 = vrot.slane %v1323_v58, 1  ;;  %v2482_v37 = vsel %vm1419_vm6, %v2480_v31, %v2481_v2  ;;  %v5059_v58 = vld [vmem:[#allocation2 + $0x5c] ss:$0 sps:$4 sm:$0x11]  }
  0xeb   : > { %v4985_v50 = vpop.permute.xlu1 %1359  ;;  %2500 = vrot.lane.b32.xlu0 %v2458_v26, %s3903_s11  ;;  %v2339_v57 = vsel %vm1146_vm4, %v2334_v39, %v2338_v48  ;;  %v1321_v28 = vor.u32 %v1320_v61, %v1316_v14  ;;  %v1330_v18 = vshll.u32 %v5011_v21, 16  ;;  %v1438_v59 = vrot.slane %v3454_v23, 1  ;;  %v901_v39 = vld [vmem:[#allocation2 + $0x54] sm:$0xf]  ;;  %v5036_v48 = vld [vmem:[#allocation2 + $0x58] sm:$0xf] }
  0xec   : > { %v3455_v1 = vcombine.low %v880_v60, %v4899_v15  ;;  %v1242_v26 = vsel %vm1146_vm4, %v1237_v16, %v1241_v20  ;;  %v1439_v19 = vrot.slane %v4889_v17, 1  ;;  %v2484_v47 = vrot.slane %v4922_v30, 1  ;;  %v888_v61 = vld [vmem:[#allocation2 + $0xb4] sm:$0xe] }
  0xed   : > { %2388 = vrot.lane.b32.xlu1 %v2327_v36, %s3902_s6  ;;  %v5006_v49 = vpop.permute.xlu0 %1472  ;;  %v1326_v44 = vsel %vm1146_vm4, %v1321_v28, %v1325_v4  ;;  %v2483_v36 = vrot.slane %v3557_v6, 1  ;;  %v1328_v11 = vshrl.u32 %v5011_v21, 16  ;;  %v1335_v15 = vshll.u32 %v5025_v25, 16  ;;  %v5075_v4 = vld [vmem:[#allocation2 + $0x68] ss:$0 sps:$4 sm:$0x11]  }
  0xee   : > { %v3470_v17 = vcombine.low %v901_v39, %v5036_v48  ;;  %v1440_v31 = vsel %vm1419_vm6, %v1438_v59, %v1439_v19  ;;  %v1441_v5 = vrot.slane %v3455_v1, 1  ;;  %v1442_v27 = vrot.slane %v4960_v22, 1 }
  0xef   : > { %v2511_v62 = vpop.permute.xlu1 %2510  ;;  %1351 = vrot.lane.b32.xlu0 %v1230_v3, %s3897_s23  ;;  %v1332_v3 = vrot.slane %v1330_v18, 1  ;;  %v2485_v8 = vsel %vm1419_vm6, %v2483_v36, %v2484_v47  ;;  %v1337_v14 = vrot.slane %v1335_v15, 1  ;;  %v3462_v43 = vcombine.low %v887_v10, %v4913_v12 }
  0xf0   : > { %v2775_v54 = vsel %vm2755_vm3, %v2742_v51, %v2511_v62  ;;  %v1735_v52 = vshll.u32 %v3470_v17, 16  ;;  %v1443_v22 = vsel %vm1419_vm6, %v1441_v5, %v1442_v27  ;;  %v1463_v62 = vrot.slane %v4972_v7, 1  ;;  %v5094_v5 = vld [vmem:[#allocation2 + $0xbc] ss:$0 sps:$4 sm:$0x11]  }
  0xf1   : > { %2390 = vrot.lane.b32.xlu1 %v2339_v57, %s3902_s6  ;;  %3698 = vmatmul.mubr.msk.bf16.vlgmr.msra.gmra.mrb[0].mxu1 %vm2831_vm5, %v2775_v54  ;;  %v5022_v29 = vpop.permute.xlu0 %1474  ;;  %v1333_v38 = vor.u32 %v1332_v3, %v1328_v11  ;;  %v3471_v57 = vcombine.low %v903_v40, %v5054_v13  ;;  %v1462_v51 = vrot.slane %v3462_v43, 1  ;;  %v3463_v6 = vcombine.low %v888_v61, %v4992_v63  ;;  %v917_v54 = vld [vmem:[#allocation2 + $0xb4] sm:$0xf]  ;;  %v944_v61 = vld [vmem:[#allocation2 + $0x60] sm:$0xe] }
  0xf2   : > { %v1733_v16 = vshrl.u32 %v3470_v17, 16  ;;  %v1737_v20 = vrot.slane %v1735_v52, 1  ;;  %v1740_v28 = vshll.u32 %v5059_v58, 16  ;;  %v1466_v59 = vrot.slane %v5025_v25, 1 }
  0xf3   : > { %v5028_v56 = vpop.permute.xlu1 %1361  ;;  %2502 = vrot.lane.b32.xlu0 %v2461_v45, %s3903_s11  ;;  %v1338_v12 = vsel %vm1146_vm4, %v1333_v38, %v1337_v14  ;;  %v5069_v45 = vld [vmem:[#allocation2 + $0xb8] sm:$0xf]  ;;  %v1747_v7 = vshll.u32 %v3471_v57, 16  ;;  %v1464_v63 = vsel %vm1419_vm6, %v1462_v51, %v1463_v62  ;;  %v1465_v18 = vrot.slane %v3463_v6, 1 }
  0xf4   : > { %v3478_v60 = vcombine.low %v917_v54, %v5069_v45  ;;  %v1738_v19 = vor.u32 %v1737_v20, %v1733_v16  ;;  %v1742_v36 = vrot.slane %v1740_v28, 1  ;;  %v1752_v39 = vshll.u32 %v5075_v4, 16  ;;  %v966_v20 = vld [vmem:[#allocation2 + $0x60] sm:$0xf]  ;;  %v5114_v28 = vld [vmem:[#allocation2 + $0x64] sm:$0xf] }
  0xf5   : > { %2516 = vrot.lane.b32.xlu1 %v2482_v37, %s3903_s11  ;;  %v5038_v33 = vpop.permute.xlu0 %1584  ;;  %v1745_v47 = vshrl.u32 %v3471_v57, 16  ;;  %v1749_v11 = vrot.slane %v1747_v7, 1  ;;  %v1467_v25 = vsel %vm1419_vm6, %v1465_v18, %v1466_v59  ;;  %v1951_v54 = vrot.slane %v5059_v58, 1 }
  0xf6   : > { %v1831_v3 = vshll.u32 %v3478_v60, 16  ;;  %v1829_v43 = vshrl.u32 %v3478_v60, 16 }
  0xf7   : > { %v5043_v35 = vpop.permute.xlu1 %1488  ;;  %1353 = vrot.lane.b32.xlu0 %v1242_v26, %s3897_s23  ;;  %v919_v26 = vld [vmem:[#allocation2 + $0xc0] sm:$0xf]  ;;  %v1750_v38 = vor.u32 %v1749_v11, %v1745_v47  ;;  %v968_v47 = vld [vmem:[#allocation2 + $0x6c] sm:$0xf]  ;;  %v5126_v11 = vld [vmem:[#allocation2 + $0x70] sm:$0xf] }
  0xf8   : > { %v1833_v40 = vrot.slane %v1831_v3, 1 }
  0xf9   : > { %1367 = vrot.lane.b32.xlu1 %v1326_v44, %s3897_s23  ;;  %v5050_v30 = vpop.permute.xlu0 %1586  ;;  %v5085_v44 = vld [vmem:[#allocation2 + $0xc4] sm:$0xf] }
  0xfa   : > { %v3479_v10 = vcombine.low %v919_v26, %v5085_v44  ;;  %v1834_v16 = vor.u32 %v1833_v40, %v1829_v43  ;;  %v5136_v43 = vld [vmem:[#allocation2 + $0x68] ss:$0 sps:$4 sm:$0x11]  }
  0xfb   : > { %v5056_v41 = vpop.permute.xlu1 %1490  ;;  %1480 = vrot.lane.b32.xlu0 %v1440_v31, %s3896_s22  ;;  %v943_v31 = vld [vmem:[#allocation2 + $0x54] sm:$0xe] }
  0xfc   : > { %v3502_v14 = vcombine.low %v943_v31, %v5036_v48  ;;  %v1843_v51 = vshll.u32 %v3479_v10, 16  ;;  %v1841_v18 = vshrl.u32 %v3479_v10, 16 }
  0xfd   : > { %2518 = vrot.lane.b32.xlu1 %v2485_v8, %s3903_s11  ;;  %v5064_v2 = vpop.permute.xlu0 %1856  ;;  %v1754_v8 = vrot.slane %v1752_v39, 1  ;;  %v1954_v39 = vrot.slane %v5075_v4, 1 }
  0xfe   : > { %v1950_v6 = vrot.slane %v3502_v14, 1  ;;  %v1845_v59 = vrot.slane %v1843_v51, 1  ;;  %v952_v14 = vld [vmem:[#allocation2 + $0xc0] sm:$0xe] }
  0xff   : > { %v5071_v23 = vpop.permute.xlu1 %1600  ;;  %1482 = vrot.lane.b32.xlu0 %v1443_v22, %s3896_s22  ;;  %v1836_v22 = vshll.u32 %v5094_v5, 16  ;;  %v1755_v48 = vsel %vm1146_vm4, %v1750_v38, %v1754_v8 }
 0x100   : > { %v1952_v58 = vsel %vm1419_vm6, %v1950_v6, %v1951_v54  ;;  %v1846_v31 = vor.u32 %v1845_v59, %v1841_v18  ;;  %v5143_v6 = vld [vmem:[#allocation2 + $0xc4] sm:$0xf]  ;;  %v2530_v54 = vsel %vm2524_vm11, %v4247_v53, %v4919_v32  ;;  %v2252_v59 = vshll.u32 %v5136_v43, 16 }
 0x101   : > { %1369 = vrot.lane.b32.xlu1 %v1338_v12, %s3897_s23  ;;  %v5079_v37 = vpop.permute.xlu0 %1858  ;;  %v5105_v12 = vld [vmem:[#allocation2 + $0xc8] ss:$0 sps:$4 sm:$0x11]  }
 0x102   : > { %v1848_v26 = vshll.u32 %v5105_v12, 16 }
 0x103   : > { %v5083_v1 = vpop.permute.xlu1 %1602  ;;  %1592 = vrot.lane.b32.xlu0 %v3470_v17, %s3898_s24  ;;  %v1743_v17 = vsel %vm1146_vm4, %v1738_v19, %v1742_v36 }
 0x105   : > { %1496 = vrot.lane.b32.xlu1 %v1464_v63, %s3896_s22  ;;  %v5090_v15 = vpop.permute.xlu0 %1984  ;;  %v1838_v63 = vrot.slane %v1836_v22, 1 }
 0x107   : > { %v5096_v27 = vpop.permute.xlu1 %1872  ;;  %1594 = vrot.lane.b32.xlu0 %v3471_v57, %s3898_s24  ;;  %v3503_v57 = vcombine.low %v944_v61, %v5054_v13  ;;  %v951_v13 = vld [vmem:[#allocation2 + $0xb4] sm:$0xe] }
 0x108   : > { %v3510_v8 = vcombine.low %v951_v13, %v5069_v45  ;;  %v1975_v45 = vrot.slane %v5094_v5, 1 }
 0x109   : > { %1498 = vrot.lane.b32.xlu1 %v1467_v25, %s3896_s22  ;;  %v5102_v52 = vpop.permute.xlu0 %1986  ;;  %v1953_v36 = vrot.slane %v3503_v57, 1  ;;  %v1839_v25 = vsel %vm1146_vm4, %v1834_v16, %v1838_v63  ;;  %v3511_v57 = vcombine.low %v952_v14, %v5085_v44  ;;  %v2563_v44 = vsel %vm2557_vm12, %v2530_v54, %v5006_v49 }
 0x10a   : > { %v1974_v51 = vrot.slane %v3510_v8, 1  ;;  %v2596_v53 = vsel %vm2590_vm13, %v2563_v44, %v5038_v33  ;;  %v1008_v8 = vld [vmem:[#allocation2 + $0x60] sm:$0xe] }
 0x10b   : > { %v5107_v62 = vpop.permute.xlu1 %1874  ;;  %1864 = vrot.lane.b32.xlu0 %v1743_v17, %s3900_s26  ;;  %v1850_v17 = vrot.slane %v1848_v26, 1  ;;  %v1955_v40 = vsel %vm1419_vm6, %v1953_v36, %v1954_v39  ;;  %v1978_v36 = vrot.slane %v5105_v12, 1  ;;  %v984_v39 = vld [vmem:[#allocation2 + $0xcc] sm:$0xf] }
 0x10c   : > { %v1976_v13 = vsel %vm1419_vm6, %v1974_v51, %v1975_v45 }
 0x10d   : > { %1608 = vrot.lane.b32.xlu1 %v3478_v60, %s3898_s24  ;;  %v5116_v7 = vpop.permute.xlu0 %2096  ;;  %v3518_v60 = vcombine.low %v966_v20, %v5114_v28  ;;  %v1851_v22 = vsel %vm1146_vm4, %v1846_v31, %v1850_v17  ;;  %v5150_v20 = vld [vmem:[#allocation2 + $0x74] ss:$0 sps:$4 sm:$0x11]   ;;  %v5169_v17 = vld [vmem:[#allocation2 + $0xd0] sm:$0xf] }
 0x10e   : > { %v2264_v31 = vshll.u32 %v5150_v20, 16 }
 0x10f   : > { %v5119_v19 = vpop.permute.xlu1 %2000  ;;  %1866 = vrot.lane.b32.xlu0 %v1755_v48, %s3900_s26  ;;  %v2247_v4 = vshll.u32 %v3518_v60, 16  ;;  %v982_v48 = vld [vmem:[#allocation2 + $0xc0] sm:$0xf]  ;;  %v2245_v63 = vshrl.u32 %v3518_v60, 16 }
 0x110   : > { %v3526_v26 = vcombine.low %v982_v48, %v5143_v6  ;;  %v2532_v48 = vsel %vm2524_vm11, %v4276_v34, %v4975_v24 }
 0x111   : > { %1610 = vrot.lane.b32.xlu1 %v3479_v10, %s3898_s24  ;;  %v5128_v3 = vpop.permute.xlu0 %2098  ;;  %v3519_v10 = vcombine.low %v968_v47, %v5126_v11  ;;  %v2249_v18 = vrot.slane %v2247_v4, 1  ;;  %v2629_v47 = vsel %vm2623_vm14, %v2596_v53, %v5064_v2  ;;  %v2254_v4 = vrot.slane %v2252_v59, 1  ;;  %v5177_v2 = vld [vmem:[#allocation2 + $0xc8] ss:$0 sps:$4 sm:$0x11]  }
 0x112   : > { %v2662_v33 = vsel %vm2656_vm15, %v2629_v47, %v5090_v15  ;;  %v3527_v15 = vcombine.low %v984_v39, %v5169_v17  ;;  %v2266_v59 = vrot.slane %v2264_v31, 1  ;;  %v2341_v34 = vshrl.u32 %v3526_v26, 16 }
 0x113   : > { %v5132_v38 = vpop.permute.xlu1 %2002  ;;  %1992 = vrot.lane.b32.xlu0 %v1952_v58, %s3899_s25  ;;  %v2259_v5 = vshll.u32 %v3519_v10, 16  ;;  %v1977_v58 = vrot.slane %v3511_v57, 1  ;;  %v2257_v49 = vshrl.u32 %v3519_v10, 16  ;;  %v2250_v14 = vor.u32 %v2249_v18, %v2245_v63 }
 0x114   : > { %v2546_v63 = vsel %vm2524_vm11, %v4302_v55, %v4985_v50  ;;  %v2348_v44 = vshll.u32 %v5177_v2, 16  ;;  %v2463_v47 = vrot.slane %v5136_v43, 1 }
 0x115   : > { %1880 = vrot.lane.b32.xlu1 %v1839_v25, %s3900_s26  ;;  %v2369_v61 = vpop.permute.xlu0 %2368  ;;  %v2261_v12 = vrot.slane %v2259_v5, 1  ;;  %v1979_v57 = vsel %vm1419_vm6, %v1977_v58, %v1978_v36  ;;  %v2565_v5 = vsel %vm2557_vm12, %v2532_v48, %v5022_v29  ;;  %v2579_v55 = vsel %vm2557_vm12, %v2546_v63, %v5043_v35 }
 0x116   : > { %v2598_v50 = vsel %vm2590_vm13, %v2565_v5, %v5050_v30  ;;  %v2355_v58 = vshll.u32 %v3527_v15, 16  ;;  %v2612_v29 = vsel %vm2590_vm13, %v2579_v55, %v5071_v23  ;;  %v2350_v43 = vrot.slane %v2348_v44, 1 }
 0x117   : > { %v5148_v16 = vpop.permute.xlu1 %2112  ;;  %1994 = vrot.lane.b32.xlu0 %v1955_v40, %s3899_s25  ;;  %v2695_v40 = vsel %vm2689_vm1, %v2662_v33, %v5116_v7  ;;  %v2262_v18 = vor.u32 %v2261_v12, %v2257_v49  ;;  %v2631_v36 = vsel %vm2623_vm14, %v2598_v50, %v5079_v37  ;;  %v2645_v30 = vsel %vm2623_vm14, %v2612_v29, %v5096_v27  ;;  %v1016_v12 = vld [vmem:[#allocation2 + $0xc0] sm:$0xe] }
 0x118   : > { %v2728_v51 = vsel %vm2722_vm2, %v2695_v40, %v2369_v61  ;;  %v2255_v61 = vsel %vm1146_vm4, %v2250_v14, %v2254_v4  ;;  %v2664_v49 = vsel %vm2656_vm15, %v2631_v36, %v5102_v52  ;;  %v2678_v23 = vsel %vm2656_vm15, %v2645_v30, %v5119_v19 }
 0x119   : > { %1882 = vrot.lane.b32.xlu1 %v1851_v22, %s3900_s26  ;;  %v5160_v32 = vpop.permute.xlu0 %2370  ;;  %v2343_v22 = vshll.u32 %v3526_v26, 16  ;;  %v2267_v31 = vsel %vm1146_vm4, %v2262_v18, %v2266_v59  ;;  %v2697_v37 = vsel %vm2689_vm1, %v2664_v49, %v5128_v3  ;;  %v2711_v27 = vsel %vm2689_vm1, %v2678_v23, %v5148_v16 }
 0x11a   : > { %v2730_v52 = vsel %vm2722_vm2, %v2697_v37, %v5160_v32  ;;  %v2357_v14 = vrot.slane %v2355_v58, 1  ;;  %v2548_v32 = vsel %vm2524_vm11, %v4342_v0, %v5028_v56  ;;  %v1017_v0 = vld [vmem:[#allocation2 + $0xcc] sm:$0xe] }
 0x11b   : > { %v5166_v25 = vpop.permute.xlu1 %2114  ;;  %2104 = vrot.lane.b32.xlu0 %v3518_v60, %s3901_s5  ;;  %v3550_v60 = vcombine.low %v1008_v8, %v5114_v28  ;;  %v1009_v28 = vld [vmem:[#allocation2 + $0x6c] sm:$0xe]  ;;  %v2345_v24 = vrot.slane %v2343_v22, 1  ;;  %v2353_v8 = vshrl.u32 %v3527_v15, 16 }
 0x11c   : > { %v3551_v35 = vcombine.low %v1009_v28, %v5126_v11 }
 0x11d   : > { %2008 = vrot.lane.b32.xlu1 %v1976_v13, %s3899_s25  ;;  %v2497_v45 = vpop.permute.xlu0 %2496  ;;  %v2462_v53 = vrot.slane %v3550_v60, 1  ;;  %v5203_v13 = vld [vmem:[#allocation2 + $0xd4] ss:$0 sps:$4 sm:$0x11]   ;;  %v2346_v11 = vor.u32 %v2345_v24, %v2341_v34 }
 0x11e   : > { %v2761_v7 = vsel %vm2755_vm3, %v2728_v51, %v2497_v45  ;;  %v2360_v4 = vshll.u32 %v5203_v13, 16  ;;  %v2465_v16 = vrot.slane %v3551_v35, 1  ;;  %v2466_v51 = vrot.slane %v5150_v20, 1 }
 0x11f   : > { %v2385_v54 = vpop.permute.xlu1 %2384  ;;  %2106 = vrot.lane.b32.xlu0 %v3519_v10, %s3901_s5  ;;  %3685 = vmatprep.mubr.msk.bf16.mxu0 %vm2831_vm5, %v2761_v7  ;;  %v2464_v22 = vsel %vm1419_vm6, %v2462_v53, %v2463_v47  ;;  %v3558_v45 = vcombine.low %v1016_v12, %v5143_v6  ;;  %v2351_v48 = vsel %vm1146_vm4, %v2346_v11, %v2350_v43  ;;  %v2490_v24 = vrot.slane %v5203_v13, 1 }
 0x120   : > { %v2744_v19 = vsel %vm2722_vm2, %v2711_v27, %v2385_v54  ;;  %v2358_v7 = vor.u32 %v2357_v14, %v2353_v8  ;;  %v2362_v54 = vrot.slane %v2360_v4, 1  ;;  %v3559_v20 = vcombine.low %v1017_v0, %v5169_v17  ;;  %v5613_v27 = vld [vmem:[#allocation4_spill] sm:$0xff] }
 0x121   : > { %2010 = vrot.lane.b32.xlu1 %v1979_v57, %s3899_s25  ;;  %v5201_v10 = vpop.permute.xlu0 %1347  ;;  %v2581_v57 = vsel %vm2557_vm12, %v2548_v32, %v5056_v41  ;;  %v2467_v41 = vsel %vm1419_vm6, %v2465_v16, %v2466_v51  ;;  %v2486_v59 = vrot.slane %v3558_v45, 1  ;;  %v5615_v45 = vld [vmem:[#allocation6_spill] sm:$0xff] }
 0x122   : > { %v2614_v56 = vsel %vm2590_vm13, %v2581_v57, %v5083_v1  ;;  %v2363_v1 = vsel %vm1146_vm4, %v2358_v7, %v2362_v54  ;;  %v2489_v34 = vrot.slane %v3559_v20, 1 }
 0x123   : > { %v2387_v39 = vpop.permute.xlu1 %2386  ;;  %2376 = vrot.lane.b32.xlu0 %v2255_v61, %s3902_s6  ;;  %v2647_v63 = vsel %vm2623_vm14, %v2614_v56, %v5107_v62  ;;  %v2487_v62 = vrot.slane %v5177_v2, 1 }
 0x124   : > { %v2680_v6 = vsel %vm2656_vm15, %v2647_v63, %v5132_v38  ;;  %v2491_v55 = vsel %vm1419_vm6, %v2489_v34, %v2490_v24 }
 0x125   : > { %2120 = vrot.lane.b32.xlu1 %v3526_v26, %s3901_s5  ;;  %v2499_v33 = vpop.permute.xlu0 %2498  ;;  %v2713_v61 = vsel %vm2689_vm1, %v2680_v6, %v5166_v25  ;;  %v2488_v25 = vsel %vm1419_vm6, %v2486_v59, %v2487_v62 }
 0x126   : > { %v2763_v40 = vsel %vm2755_vm3, %v2730_v52, %v2499_v33  ;;  %v2746_v28 = vsel %vm2722_vm2, %v2713_v61, %v2387_v39  ;;  %v2534_v52 = vsel %vm2524_vm11, %v5613_v27, %v5201_v10  ;;  %v5614_v10 = vld [vmem:[#allocation5_spill] sm:$0xff] }
 0x127   : > { %v2513_v3 = vpop.permute.xlu1 %2512  ;;  %2378 = vrot.lane.b32.xlu0 %v2267_v31, %s3902_s6  ;;  %3686 = vmatmul.mubr.msk.bf16.gmra.mrb[4].mxu0 %vm2831_vm5, %v2763_v40 }
 0x128   : > { %v2777_v26 = vsel %vm2755_vm3, %v2744_v19, %v2513_v3 }
 0x129   : > { %2122 = vrot.lane.b32.xlu1 %v3527_v15, %s3901_s5  ;;  %3701 = vmatprep.mubr.msk.bf16.mxu1 %vm2831_vm5, %v2777_v26  ;;  %v5242_v60 = vpop.permute.xlu0 %1349 }
 0x12a   : > { %v2536_v51 = vsel %vm2524_vm11, %v5614_v10, %v5242_v60 }
 0x12b   : > { %v1364_v15 = vpop.permute.xlu1 %1363  ;;  %2504 = vrot.lane.b32.xlu0 %v2464_v22, %s3903_s11 }
 0x12c   : > { %v2550_v57 = vsel %vm2524_vm11, %v5615_v45, %v1364_v15 }
 0x12d   : > { %2392 = vrot.lane.b32.xlu1 %v2351_v48, %s3902_s6  ;;  %v1477_v18 = vpop.permute.xlu0 %1476 }
 0x12e   : > { %v2567_v33 = vsel %vm2557_vm12, %v2534_v52, %v1477_v18 }
 0x12f   : > { %v2515_v5 = vpop.permute.xlu1 %2514  ;;  %2506 = vrot.lane.b32.xlu0 %v2467_v41, %s3903_s11 }
 0x130   : > { %v2779_v38 = vsel %vm2755_vm3, %v2746_v28, %v2515_v5 }
 0x131   : > { %2394 = vrot.lane.b32.xlu1 %v2363_v1, %s3902_s6  ;;  %3702 = vmatmul.mubr.msk.bf16.gmra.mrb[4].mxu1 %vm2831_vm5, %v2779_v38  ;;  %v1479_v17 = vpop.permute.xlu0 %1478  ;;  %v5616_v38 = vld [vmem:[#allocation7_spill] sm:$0xff] }
 0x132   : > { %v2569_v48 = vsel %vm2557_vm12, %v2536_v51, %v1479_v17 }
 0x133   : > { %v1366_v44 = vpop.permute.xlu1 %1365 }
 0x134   : > { %v2552_v17 = vsel %vm2524_vm11, %v5616_v38, %v1366_v44 }
 0x135   : > { %2520 = vrot.lane.b32.xlu1 %v2488_v25, %s3903_s11  ;;  %v1589_v2 = vpop.permute.xlu0 %1588 }
 0x136   : > { %v2600_v14 = vsel %vm2590_vm13, %v2567_v33, %v1589_v2 }
 0x137   : > { %v1493_v50 = vpop.permute.xlu1 %1492 }
 0x138   : > { %v2583_v7 = vsel %vm2557_vm12, %v2550_v57, %v1493_v50 }
 0x139   : > { %2522 = vrot.lane.b32.xlu1 %v2491_v55, %s3903_s11  ;;  %v1591_v53 = vpop.permute.xlu0 %1590 }
 0x13a   : > { %v2602_v54 = vsel %vm2590_vm13, %v2569_v48, %v1591_v53 }
 0x13b   : > { %v1495_v58 = vpop.permute.xlu1 %1494 }
 0x13c   : > { %v2585_v25 = vsel %vm2557_vm12, %v2552_v17, %v1495_v58 }
 0x13d   : > { %v1861_v29 = vpop.permute.xlu0 %1860 }
 0x13e   : > { %v2633_v12 = vsel %vm2623_vm14, %v2600_v14, %v1861_v29 }
 0x13f   : > { %v1605_v36 = vpop.permute.xlu1 %1604 }
 0x140   : > { %v2616_v56 = vsel %vm2590_vm13, %v2583_v7, %v1605_v36 }
 0x141   : > { %v1863_v39 = vpop.permute.xlu0 %1862 }
 0x142   : > { %v2635_v63 = vsel %vm2623_vm14, %v2602_v54, %v1863_v39 }
 0x143   : > { %v1607_v47 = vpop.permute.xlu1 %1606 }
 0x144   : > { %v2618_v24 = vsel %vm2590_vm13, %v2585_v25, %v1607_v47 }
 0x145   : > { %v1989_v35 = vpop.permute.xlu0 %1988 }
 0x146   : > { %v2666_v40 = vsel %vm2656_vm15, %v2633_v12, %v1989_v35 }
 0x147   : > { %v1877_v30 = vpop.permute.xlu1 %1876 }
 0x148   : > { %v2649_v41 = vsel %vm2623_vm14, %v2616_v56, %v1877_v30 }
 0x149   : > { %v1991_v49 = vpop.permute.xlu0 %1990 }
 0x14a   : > { %v2668_v60 = vsel %vm2656_vm15, %v2635_v63, %v1991_v49 }
 0x14b   : > { %v1879_v31 = vpop.permute.xlu1 %1878 }
 0x14c   : > { %v2651_v55 = vsel %vm2623_vm14, %v2618_v24, %v1879_v31 }
 0x14d   : > { %v2101_v13 = vpop.permute.xlu0 %2100 }
 0x14e   : > { %v2699_v3 = vsel %vm2689_vm1, %v2666_v40, %v2101_v13 }
 0x14f   : > { %v2005_v8 = vpop.permute.xlu1 %2004 }
 0x150   : > { %v2682_v20 = vsel %vm2656_vm15, %v2649_v41, %v2005_v8 }
 0x151   : > { %v2103_v23 = vpop.permute.xlu0 %2102 }
 0x152   : > { %v2701_v15 = vsel %vm2689_vm1, %v2668_v60, %v2103_v23 }
 0x153   : > { %v2007_v37 = vpop.permute.xlu1 %2006 }
 0x154   : > { %v2684_v50 = vsel %vm2656_vm15, %v2651_v55, %v2007_v37 }
 0x155   : > { %v2373_v11 = vpop.permute.xlu0 %2372 }
 0x156   : > { %v2732_v26 = vsel %vm2722_vm2, %v2699_v3, %v2373_v11 }
 0x157   : > { %v2117_v43 = vpop.permute.xlu1 %2116 }
 0x158   : > { %v2715_v61 = vsel %vm2689_vm1, %v2682_v20, %v2117_v43 }
 0x159   : > { %v2375_v4 = vpop.permute.xlu0 %2374 }
 0x15a   : > { %v2734_v18 = vsel %vm2722_vm2, %v2701_v15, %v2375_v4 }
 0x15b   : > { %v2119_v19 = vpop.permute.xlu1 %2118 }
 0x15c   : > { %v2717_v53 = vsel %vm2689_vm1, %v2684_v50, %v2119_v19 }
 0x15d   : > { %v2501_v16 = vpop.permute.xlu0 %2500 }
 0x15e   : > { %v2765_v32 = vsel %vm2755_vm3, %v2732_v26, %v2501_v16 }
 0x15f   : > { %v2389_v22 = vpop.permute.xlu1 %2388  ;;  %3689 = vmatprep.mubr.msk.bf16.mxu0 %vm2831_vm5, %v2765_v32 }
 0x160   : > { %v2748_v59 = vsel %vm2722_vm2, %v2715_v61, %v2389_v22 }
 0x161   : > { %v1352_v0 = vpop.permute.xlu0 %1351 }
 0x162   : > { %v2538_v3 = vsel %vm2524_vm11, %v4846_v9, %v1352_v0 }
 0x163   : > { %v2391_v6 = vpop.permute.xlu1 %2390 }
 0x164   : > { %v2750_v36 = vsel %vm2722_vm2, %v2717_v53, %v2391_v6 }
 0x165   : > { %v2503_v1 = vpop.permute.xlu0 %2502 }
 0x166   : > { %v2767_v62 = vsel %vm2755_vm3, %v2734_v18, %v2503_v1 }
 0x167   : > { %v2517_v28 = vpop.permute.xlu1 %2516  ;;  %3690 = vmatmul.mubr.msk.bf16.gmra.mrb[8].mxu0 %vm2831_vm5, %v2767_v62 }
 0x168   : > { %v2781_v5 = vsel %vm2755_vm3, %v2748_v59, %v2517_v28 }
 0x169   : > { %3705 = vmatprep.mubr.msk.bf16.mxu1 %vm2831_vm5, %v2781_v5  ;;  %v1354_v34 = vpop.permute.xlu0 %1353 }
 0x16a   : > { %v2540_v51 = vsel %vm2524_vm11, %v4925_v42, %v1354_v34 }
 0x16b   : > { %v1368_v2 = vpop.permute.xlu1 %1367 }
 0x16c   : > { %v2554_v42 = vsel %vm2524_vm11, %v4937_v46, %v1368_v2 }
 0x16d   : > { %v1481_v29 = vpop.permute.xlu0 %1480 }
 0x16e   : > { %v2571_v26 = vsel %vm2557_vm12, %v2538_v3, %v1481_v29  ;;  %v5354_v29 = vld [vmem:[%s5593_s2] ss:$0 sm:$0xff] }
 0x16f   : > { %v2519_v39 = vpop.permute.xlu1 %2518 }
 0x170   : > { %v2783_v44 = vsel %vm2755_vm3, %v2750_v36, %v2519_v39  ;;  %v5357_v39 = vstv %s3029_s14 }
 0x171   : > { %3706 = vmatmul.mubr.msk.bf16.gmra.mrb[8].mxu1 %vm2831_vm5, %v2783_v44  ;;  %v1483_v35 = vpop.permute.xlu0 %1482 }
 0x172   : > { %v2573_v57 = vsel %vm2557_vm12, %v2540_v51, %v1483_v35 }
 0x173   : > { %v1370_v58 = vpop.permute.xlu1 %1369 }
 0x174   : > { %v2556_v62 = vsel %vm2524_vm11, %v5011_v21, %v1370_v58 }
 0x175   : > { %v1593_v30 = vpop.permute.xlu0 %1592 }
 0x176   : > { %v2604_v16 = vsel %vm2590_vm13, %v2571_v26, %v1593_v30 }
 0x177   : > { %v1497_v49 = vpop.permute.xlu1 %1496 }
 0x178   : > { %v2587_v60 = vsel %vm2557_vm12, %v2554_v42, %v1497_v49 }
 0x179   : > { %v1595_v47 = vpop.permute.xlu0 %1594 }
 0x17a   : > { %v2606_v7 = vsel %vm2590_vm13, %v2573_v57, %v1595_v47 }
 0x17b   : > { %v1499_v13 = vpop.permute.xlu1 %1498 }
 0x17c   : > { %v2589_v28 = vsel %vm2557_vm12, %v2556_v62, %v1499_v13 }
 0x17d   : > { %v1865_v8 = vpop.permute.xlu0 %1864 }
 0x17e   : > { %v2637_v22 = vsel %vm2623_vm14, %v2604_v16, %v1865_v8 }
 0x17f   : > { %v1609_v31 = vpop.permute.xlu1 %1608 }
 0x180   : > { %v2620_v61 = vsel %vm2590_vm13, %v2587_v60, %v1609_v31 }
 0x181   : > { %v1867_v23 = vpop.permute.xlu0 %1866 }
 0x182   : > { %v2639_v0 = vsel %vm2623_vm14, %v2606_v7, %v1867_v23 }
 0x183   : > { %v1611_v37 = vpop.permute.xlu1 %1610 }
 0x184   : > { %v2622_v38 = vsel %vm2590_vm13, %v2589_v28, %v1611_v37 }
 0x185   : > { %v1993_v11 = vpop.permute.xlu0 %1992 }
 0x186   : > { %v2670_v45 = vsel %vm2656_vm15, %v2637_v22, %v1993_v11 }
 0x187   : > { %v1881_v43 = vpop.permute.xlu1 %1880 }
 0x188   : > { %v2653_v59 = vsel %vm2623_vm14, %v2620_v61, %v1881_v43 }
 0x189   : > { %v1995_v27 = vpop.permute.xlu0 %1994 }
 0x18a   : > { %v2672_v6 = vsel %vm2656_vm15, %v2639_v0, %v1995_v27 }
 0x18b   : > { %v1883_v52 = vpop.permute.xlu1 %1882 }
 0x18c   : > { %v2655_v34 = vsel %vm2623_vm14, %v2622_v38, %v1883_v52 }
 0x18d   : > { %v2105_v33 = vpop.permute.xlu0 %2104 }
 0x18e   : > { %v2703_v48 = vsel %vm2689_vm1, %v2670_v45, %v2105_v33 }
 0x18f   : > { %v2009_v14 = vpop.permute.xlu1 %2008 }
 0x190   : > { %v2686_v46 = vsel %vm2656_vm15, %v2653_v59, %v2009_v14 }
 0x191   : > { %v2107_v4 = vpop.permute.xlu0 %2106 }
 0x192   : > { %v2705_v41 = vsel %vm2689_vm1, %v2672_v6, %v2107_v4 }
 0x193   : > { %v2011_v12 = vpop.permute.xlu1 %2010 }
 0x194   : > { %v2688_v2 = vsel %vm2656_vm15, %v2655_v34, %v2011_v12 }
 0x195   : > { %v2377_v19 = vpop.permute.xlu0 %2376 }
 0x196   : > { %v2736_v9 = vsel %vm2722_vm2, %v2703_v48, %v2377_v19 }
 0x197   : > { %v2121_v40 = vpop.permute.xlu1 %2120 }
 0x198   : > { %v2719_v5 = vsel %vm2689_vm1, %v2686_v46, %v2121_v40 }
 0x199   : > { %v2379_v32 = vpop.permute.xlu0 %2378 }
 0x19a   : > { %v2738_v20 = vsel %vm2722_vm2, %v2705_v41, %v2379_v32 }
 0x19b   : > { %v2123_v10 = vpop.permute.xlu1 %2122 }
 0x19c   : > { %v2721_v21 = vsel %vm2689_vm1, %v2688_v2, %v2123_v10 }
 0x19d   : > { %v2505_v54 = vpop.permute.xlu0 %2504 }
 0x19e   : > { %v2769_v56 = vsel %vm2755_vm3, %v2736_v9, %v2505_v54 }
 0x19f   : > { %v2393_v63 = vpop.permute.xlu1 %2392  ;;  %3693 = vmatprep.mubr.msk.bf16.mxu0 %vm2831_vm5, %v2769_v56 }
 0x1a0   : > { %v2752_v17 = vsel %vm2722_vm2, %v2719_v5, %v2393_v63 }
 0x1a1   : > { %v2507_v15 = vpop.permute.xlu0 %2506 }
 0x1a2   : > { %v2771_v18 = vsel %vm2755_vm3, %v2738_v20, %v2507_v15 }
 0x1a3   : > { %v2395_v1 = vpop.permute.xlu1 %2394  ;;  %3694 = vmatmul.mubr.msk.bf16.gmra.mrb[12].mxu0 %vm2831_vm5, %v2771_v18 }
 0x1a4   : > { %v2754_v55 = vsel %vm2722_vm2, %v2721_v21, %v2395_v1 }
 0x1a7   : > { %v2521_v25 = vpop.permute.xlu1 %2520 }
 0x1a8   : > { %v2785_v24 = vsel %vm2755_vm3, %v2752_v17, %v2521_v25 }
 0x1a9   : > { %3709 = vmatprep.mubr.msk.bf16.mxu1 %vm2831_vm5, %v2785_v24 }
 0x1ab   : > { %v2523_v50 = vpop.permute.xlu1 %2522 }
 0x1ac   : > { %v2787_v53 = vsel %vm2755_vm3, %v2754_v55, %v2523_v50 }
 0x1ad   : > { %3710 = vmatmul.mubr.msk.bf16.gmra.mrb[12].mxu1 %vm2831_vm5, %v2787_v53 }
 0x1ba   : > { %v3683_v36 = vpop.f32.mrb[0].mxu0 }
 0x1bb   : > { %v2911_v44 = vadd.f32 %v3683_v36, %v5354_v29  ;;  %v2902_v35 = vpop.f32.mrb[1].mxu0 }
 0x1bc   : > { %v2903_v58 = vadd.f32 %v5354_v29, %v2902_v35  ;;  %v3684_v30 = vpop.f32.mrb[2].mxu0 }
 0x1bd   : > { %vm3032_vm0 = vcmp.ge.f32.partialorder %v2911_v44, 0.0  ;;  %v3065_v49 = vmul.f32 %v5357_v39, %v2911_v44  ;;  %v2914_v47 = vadd.f32 %v3684_v30, %v5354_v29  ;;  %v2905_v13 = vpop.f32.mrb[3].mxu0 }
 0x1be   : > { %vm3030_vm4 = vcmp.ge.f32.partialorder %v2903_v58, 0.0  ;;  %v3063_v8 = vmul.f32 %v5357_v39, %v2903_v58  ;;  %v2906_v31 = vadd.f32 %v5354_v29, %v2905_v13 }
 0x1bf   : > { %vm3033_vm6 = vcmp.ge.f32.partialorder %v2914_v47, 0.0  ;;  %v3066_v23 = vmul.f32 %v5357_v39, %v2914_v47  ;;  %v3097_v37 = vsel %vm3032_vm0, %v2911_v44, %v3065_v49 }
 0x1c0   : > { %vm3031_vm7 = vcmp.ge.f32.partialorder %v2906_v31, 0.0  ;;  %v3064_v11 = vmul.f32 %v5357_v39, %v2906_v31  ;;  %3195 = vrot.lane.b32.xlu0 %v3097_v37, %s3904_s18  ;;  %3129 = vst.msk [vmem:[%s5364_s21 + $0x20] sm:$0xff] %vm2524_vm11, %v3097_v37  ;;  %v3095_v43 = vsel %vm3030_vm4, %v2903_v58, %v3063_v8 }
 0x1c1   : > { %v3098_v27 = vsel %vm3033_vm6, %v2914_v47, %v3066_v23  ;;  %3127 = vst.msk [vmem:[%s5364_s21] sm:$0xff] %vm2524_vm11, %v3095_v43 }
 0x1c2   : > { %3130 = vst.msk [vmem:[%s5364_s21 + $0x28] sm:$0xff] %vm2524_vm11, %v3098_v27  ;;  %3197 = vrot.lane.b32.xlu1 %v3098_v27, %s3904_s18  ;;  %v3096_v52 = vsel %vm3031_vm7, %v2906_v31, %v3064_v11 }
 0x1c3   : > { %3128 = vst.msk [vmem:[%s5364_s21 + $0x8] sm:$0xff] %vm2524_vm11, %v3096_v52 }
 0x1c4   : > { %v3699_v33 = vpop.f32.mrb[0].mxu1  ;;  %3191 = vrot.lane.b32.xlu0 %v3095_v43, %s3904_s18 }
 0x1c5   : > { %v2975_v14 = vadd.f32 %v3699_v33, %v5354_v29  ;;  %v2966_v4 = vpop.f32.mrb[1].mxu1 }
 0x1c6   : > { %v2967_v12 = vadd.f32 %v5354_v29, %v2966_v4  ;;  %v3700_v19 = vpop.f32.mrb[2].mxu1  ;;  %3193 = vrot.lane.b32.xlu1 %v3096_v52, %s3904_s18 }
 0x1c7   : > { %vm3048_vm8 = vcmp.ge.f32.partialorder %v2975_v14, 0.0  ;;  %v3081_v40 = vmul.f32 %v5357_v39, %v2975_v14  ;;  %v2978_v3 = vadd.f32 %v3700_v19, %v5354_v29  ;;  %v2969_v26 = vpop.f32.mrb[3].mxu1 }
 0x1c8   : > { %vm3046_vm9 = vcmp.ge.f32.partialorder %v2967_v12, 0.0  ;;  %v3079_v16 = vmul.f32 %v5357_v39, %v2967_v12  ;;  %v2970_v32 = vadd.f32 %v5354_v29, %v2969_v26 }
 0x1c9   : > { %vm3049_vm10 = vcmp.ge.f32.partialorder %v2978_v3, 0.0  ;;  %v3082_v22 = vmul.f32 %v5357_v39, %v2978_v3  ;;  %v3113_v10 = vsel %vm3048_vm8, %v2975_v14, %v3081_v40 }
 0x1ca   : > { %vm3047_vm12 = vcmp.ge.f32.partialorder %v2970_v32, 0.0  ;;  %v3080_v51 = vmul.f32 %v5357_v39, %v2970_v32  ;;  %3227 = vrot.lane.b32.xlu0 %v3113_v10, %s3904_s18  ;;  %3145 = vst.msk [vmem:[%s5364_s21 + $0x120] sm:$0xff] %vm2524_vm11, %v3113_v10  ;;  %v3111_v45 = vsel %vm3046_vm9, %v2967_v12, %v3079_v16 }
 0x1cb   : > { %v3114_v57 = vsel %vm3049_vm10, %v2978_v3, %v3082_v22  ;;  %3143 = vst.msk [vmem:[%s5364_s21 + $0x100] sm:$0xff] %vm2524_vm11, %v3111_v45 }
 0x1cc   : > { %3146 = vst.msk [vmem:[%s5364_s21 + $0x128] sm:$0xff] %vm2524_vm11, %v3114_v57  ;;  %3229 = vrot.lane.b32.xlu1 %v3114_v57, %s3904_s18  ;;  %v3112_v48 = vsel %vm3047_vm12, %v2970_v32, %v3080_v51 }
 0x1cd   : > { %3144 = vst.msk [vmem:[%s5364_s21 + $0x108] sm:$0xff] %vm2524_vm11, %v3112_v48 }
 0x1ce   : > { %3223 = vrot.lane.b32.xlu0 %v3111_v45, %s3904_s18 }
 0x1d0   : > { %3225 = vrot.lane.b32.xlu1 %v3112_v48, %s3904_s18 }
 0x1fa   : > { %v3687_v7 = vpop.f32.mrb[4].mxu0 }
 0x1fb   : > { %v2927_v9 = vadd.f32 %v3687_v7, %v5354_v29  ;;  %v2918_v54 = vpop.f32.mrb[5].mxu0 }
 0x1fc   : > { %v2919_v0 = vadd.f32 %v5354_v29, %v2918_v54  ;;  %v3688_v56 = vpop.f32.mrb[6].mxu0 }
 0x1fd   : > { %vm3036_vm13 = vcmp.ge.f32.partialorder %v2927_v9, 0.0  ;;  %v3069_v63 = vmul.f32 %v5357_v39, %v2927_v9  ;;  %v2930_v6 = vadd.f32 %v3688_v56, %v5354_v29  ;;  %v2921_v42 = vpop.f32.mrb[7].mxu0 }
 0x1fe   : > { %vm3034_vm14 = vcmp.ge.f32.partialorder %v2919_v0, 0.0  ;;  %v3067_v41 = vmul.f32 %v5357_v39, %v2919_v0  ;;  %v2922_v60 = vadd.f32 %v5354_v29, %v2921_v42 }
 0x1ff   : > { %vm3037_vm15 = vcmp.ge.f32.partialorder %v2930_v6, 0.0  ;;  %v3070_v20 = vmul.f32 %v5357_v39, %v2930_v6  ;;  %v3101_v15 = vsel %vm3036_vm13, %v2927_v9, %v3069_v63 }
 0x200   : > { %vm3035_vm1 = vcmp.ge.f32.partialorder %v2922_v60, 0.0  ;;  %v3068_v61 = vmul.f32 %v5357_v39, %v2922_v60  ;;  %3133 = vst.msk [vmem:[%s5364_s21 + $0x60] sm:$0xff] %vm2524_vm11, %v3101_v15  ;;  %3203 = vrot.lane.b32.xlu0 %v3101_v15, %s3904_s18  ;;  %v3099_v18 = vsel %vm3034_vm14, %v2919_v0, %v3067_v41 }
 0x201   : > { %v3102_v1 = vsel %vm3037_vm15, %v2930_v6, %v3070_v20  ;;  %3131 = vst.msk [vmem:[%s5364_s21 + $0x40] sm:$0xff] %vm2524_vm11, %v3099_v18 }
 0x202   : > { %3134 = vst.msk [vmem:[%s5364_s21 + $0x68] sm:$0xff] %vm2524_vm11, %v3102_v1  ;;  %3205 = vrot.lane.b32.xlu1 %v3102_v1, %s3904_s18  ;;  %v3100_v59 = vsel %vm3035_vm1, %v2922_v60, %v3068_v61 }
 0x203   : > { %3132 = vst.msk [vmem:[%s5364_s21 + $0x48] sm:$0xff] %vm2524_vm11, %v3100_v59 }
 0x204   : > { %v3703_v62 = vpop.f32.mrb[4].mxu1  ;;  %3199 = vrot.lane.b32.xlu0 %v3099_v18, %s3904_s18 }
 0x205   : > { %v2991_v46 = vadd.f32 %v3703_v62, %v5354_v29  ;;  %v2982_v28 = vpop.f32.mrb[5].mxu1 }
 0x206   : > { %v2983_v5 = vadd.f32 %v5354_v29, %v2982_v28  ;;  %v3704_v38 = vpop.f32.mrb[6].mxu1  ;;  %3201 = vrot.lane.b32.xlu1 %v3100_v59, %s3904_s18 }
 0x207   : > { %vm3052_vm2 = vcmp.ge.f32.partialorder %v2991_v46, 0.0  ;;  %v3085_v17 = vmul.f32 %v5357_v39, %v2991_v46  ;;  %v2994_v25 = vadd.f32 %v3704_v38, %v5354_v29  ;;  %v2985_v34 = vpop.f32.mrb[7].mxu1 }
 0x208   : > { %vm3050_vm3 = vcmp.ge.f32.partialorder %v2983_v5, 0.0  ;;  %v3083_v24 = vmul.f32 %v5357_v39, %v2983_v5  ;;  %v2986_v2 = vadd.f32 %v5354_v29, %v2985_v34 }
 0x209   : > { %vm3053_vm5 = vcmp.ge.f32.partialorder %v2994_v25, 0.0  ;;  %v3086_v21 = vmul.f32 %v5357_v39, %v2994_v25  ;;  %v3117_v55 = vsel %vm3052_vm2, %v2991_v46, %v3085_v17 }
 0x20a   : > { %vm3051_vm0 = vcmp.ge.f32.partialorder %v2986_v2, 0.0  ;;  %v3084_v50 = vmul.f32 %v5357_v39, %v2986_v2  ;;  %3235 = vrot.lane.b32.xlu0 %v3117_v55, %s3904_s18  ;;  %3149 = vst.msk [vmem:[%s5364_s21 + $0x160] sm:$0xff] %vm2524_vm11, %v3117_v55  ;;  %v3115_v53 = vsel %vm3050_vm3, %v2983_v5, %v3083_v24 }
 0x20b   : > { %v3118_v36 = vsel %vm3053_vm5, %v2994_v25, %v3086_v21  ;;  %3147 = vst.msk [vmem:[%s5364_s21 + $0x140] sm:$0xff] %vm2524_vm11, %v3115_v53 }
 0x20c   : > { %3237 = vrot.lane.b32.xlu1 %v3118_v36, %s3904_s18  ;;  %3150 = vst.msk [vmem:[%s5364_s21 + $0x168] sm:$0xff] %vm2524_vm11, %v3118_v36  ;;  %v3116_v44 = vsel %vm3051_vm0, %v2986_v2, %v3084_v50 }
 0x20d   : > { %3148 = vst.msk [vmem:[%s5364_s21 + $0x148] sm:$0xff] %vm2524_vm11, %v3116_v44 }
 0x20e   : > { %3231 = vrot.lane.b32.xlu0 %v3115_v53, %s3904_s18 }
 0x210   : > { %3233 = vrot.lane.b32.xlu1 %v3116_v44, %s3904_s18 }
 0x232   : > { %v3196_v35 = vpop.permute.xlu0 %3195 }
 0x233   : > { %3584 = vst.msk [vmem:[%s5364_s21 + $0x30] sm:$0xff] %vm2524_vm11, %v3196_v35 }
 0x234   : > { %v3198_v58 = vpop.permute.xlu1 %3197 }
 0x235   : > { %3585 = vst.msk [vmem:[%s5364_s21 + $0x38] sm:$0xff] %vm2524_vm11, %v3198_v58 }
 0x236   : > { %v3192_v30 = vpop.permute.xlu0 %3191 }
 0x237   : > { %3582 = vst.msk [vmem:[%s5364_s21 + $0x10] sm:$0xff] %vm2524_vm11, %v3192_v30 }
 0x238   : > { %v3194_v49 = vpop.permute.xlu1 %3193 }
 0x239   : > { %3583 = vst.msk [vmem:[%s5364_s21 + $0x18] sm:$0xff] %vm2524_vm11, %v3194_v49 }
 0x23a   : > { %v3691_v47 = vpop.f32.mrb[8].mxu0 }
 0x23b   : > { %v2943_v13 = vadd.f32 %v3691_v47, %v5354_v29  ;;  %v2934_v31 = vpop.f32.mrb[9].mxu0 }
 0x23c   : > { %v3228_v8 = vpop.permute.xlu0 %3227  ;;  %v2935_v23 = vadd.f32 %v5354_v29, %v2934_v31  ;;  %v3692_v37 = vpop.f32.mrb[10].mxu0 }
 0x23d   : > { %3600 = vst.msk [vmem:[%s5364_s21 + $0x130] sm:$0xff] %vm2524_vm11, %v3228_v8  ;;  %vm3040_vm4 = vcmp.ge.f32.partialorder %v2943_v13, 0.0  ;;  %v3073_v11 = vmul.f32 %v5357_v39, %v2943_v13  ;;  %v2946_v43 = vadd.f32 %v3692_v37, %v5354_v29  ;;  %v2937_v52 = vpop.f32.mrb[11].mxu0 }
 0x23e   : > { %v3230_v27 = vpop.permute.xlu1 %3229  ;;  %vm3038_vm6 = vcmp.ge.f32.partialorder %v2935_v23, 0.0  ;;  %v3071_v33 = vmul.f32 %v5357_v39, %v2935_v23  ;;  %v2938_v14 = vadd.f32 %v5354_v29, %v2937_v52 }
 0x23f   : > { %3601 = vst.msk [vmem:[%s5364_s21 + $0x138] sm:$0xff] %vm2524_vm11, %v3230_v27  ;;  %vm3041_vm7 = vcmp.ge.f32.partialorder %v2946_v43, 0.0  ;;  %v3074_v4 = vmul.f32 %v5357_v39, %v2946_v43  ;;  %v3105_v19 = vsel %vm3040_vm4, %v2943_v13, %v3073_v11 }
 0x240   : > { %v3224_v12 = vpop.permute.xlu0 %3223  ;;  %vm3039_vm8 = vcmp.ge.f32.partialorder %v2938_v14, 0.0  ;;  %v3072_v40 = vmul.f32 %v5357_v39, %v2938_v14  ;;  %3137 = vst.msk [vmem:[%s5364_s21 + $0xa0] sm:$0xff] %vm2524_vm11, %v3105_v19  ;;  %3211 = vrot.lane.b32.xlu0 %v3105_v19, %s3904_s18  ;;  %v3103_v3 = vsel %vm3038_vm6, %v2935_v23, %v3071_v33 }
 0x241   : > { %3598 = vst.msk [vmem:[%s5364_s21 + $0x110] sm:$0xff] %vm2524_vm11, %v3224_v12  ;;  %v3106_v16 = vsel %vm3041_vm7, %v2946_v43, %v3074_v4  ;;  %3135 = vst.msk [vmem:[%s5364_s21 + $0x80] sm:$0xff] %vm2524_vm11, %v3103_v3 }
 0x242   : > { %v3226_v26 = vpop.permute.xlu1 %3225  ;;  %3138 = vst.msk [vmem:[%s5364_s21 + $0xa8] sm:$0xff] %vm2524_vm11, %v3106_v16  ;;  %3213 = vrot.lane.b32.xlu1 %v3106_v16, %s3904_s18  ;;  %v3104_v32 = vsel %vm3039_vm8, %v2938_v14, %v3072_v40 }
 0x243   : > { %3599 = vst.msk [vmem:[%s5364_s21 + $0x118] sm:$0xff] %vm2524_vm11, %v3226_v26  ;;  %3136 = vst.msk [vmem:[%s5364_s21 + $0x88] sm:$0xff] %vm2524_vm11, %v3104_v32 }
 0x244   : > { %v3707_v22 = vpop.f32.mrb[8].mxu1  ;;  %3207 = vrot.lane.b32.xlu0 %v3103_v3, %s3904_s18 }
 0x245   : > { %v3007_v10 = vadd.f32 %v3707_v22, %v5354_v29  ;;  %v2998_v51 = vpop.f32.mrb[9].mxu1 }
 0x246   : > { %v2999_v45 = vadd.f32 %v5354_v29, %v2998_v51  ;;  %v3708_v57 = vpop.f32.mrb[10].mxu1  ;;  %3209 = vrot.lane.b32.xlu1 %v3104_v32, %s3904_s18 }
 0x247   : > { %vm3056_vm9 = vcmp.ge.f32.partialorder %v3007_v10, 0.0  ;;  %v3089_v48 = vmul.f32 %v5357_v39, %v3007_v10  ;;  %v3010_v7 = vadd.f32 %v3708_v57, %v5354_v29  ;;  %v3001_v9 = vpop.f32.mrb[11].mxu1 }
 0x248   : > { %vm3054_vm10 = vcmp.ge.f32.partialorder %v2999_v45, 0.0  ;;  %v3087_v54 = vmul.f32 %v5357_v39, %v2999_v45  ;;  %v3002_v0 = vadd.f32 %v5354_v29, %v3001_v9 }
 0x249   : > { %vm3057_vm12 = vcmp.ge.f32.partialorder %v3010_v7, 0.0  ;;  %v3090_v56 = vmul.f32 %v5357_v39, %v3010_v7  ;;  %v3121_v63 = vsel %vm3056_vm9, %v3007_v10, %v3089_v48 }
 0x24a   : > { %vm3055_vm13 = vcmp.ge.f32.partialorder %v3002_v0, 0.0  ;;  %v3088_v6 = vmul.f32 %v5357_v39, %v3002_v0  ;;  %3243 = vrot.lane.b32.xlu0 %v3121_v63, %s3904_s18  ;;  %3153 = vst.msk [vmem:[%s5364_s21 + $0x1a0] sm:$0xff] %vm2524_vm11, %v3121_v63  ;;  %v3119_v42 = vsel %vm3054_vm10, %v2999_v45, %v3087_v54 }
 0x24b   : > { %v3122_v41 = vsel %vm3057_vm12, %v3010_v7, %v3090_v56  ;;  %3151 = vst.msk [vmem:[%s5364_s21 + $0x180] sm:$0xff] %vm2524_vm11, %v3119_v42 }
 0x24c   : > { %3245 = vrot.lane.b32.xlu1 %v3122_v41, %s3904_s18  ;;  %3154 = vst.msk [vmem:[%s5364_s21 + $0x1a8] sm:$0xff] %vm2524_vm11, %v3122_v41  ;;  %v3120_v60 = vsel %vm3055_vm13, %v3002_v0, %v3088_v6 }
 0x24d   : > { %3152 = vst.msk [vmem:[%s5364_s21 + $0x188] sm:$0xff] %vm2524_vm11, %v3120_v60 }
 0x24e   : > { %3239 = vrot.lane.b32.xlu0 %v3119_v42, %s3904_s18 }
 0x250   : > { %3241 = vrot.lane.b32.xlu1 %v3120_v60, %s3904_s18 }
 0x272   : > { %v3204_v20 = vpop.permute.xlu0 %3203 }
 0x273   : > { %3588 = vst.msk [vmem:[%s5364_s21 + $0x70] sm:$0xff] %vm2524_vm11, %v3204_v20 }
 0x274   : > { %v3206_v15 = vpop.permute.xlu1 %3205 }
 0x275   : > { %3589 = vst.msk [vmem:[%s5364_s21 + $0x78] sm:$0xff] %vm2524_vm11, %v3206_v15 }
 0x276   : > { %v3695_v61 = vpop.f32.mrb[12].mxu0  ;;  %v3200_v18 = vpop.permute.xlu0 %3199 }
 0x277   : > { %v2959_v1 = vadd.f32 %v3695_v61, %v5354_v29  ;;  %3586 = vst.msk [vmem:[%s5364_s21 + $0x50] sm:$0xff] %vm2524_vm11, %v3200_v18  ;;  %v2950_v59 = vpop.f32.mrb[13].mxu0 }
 0x278   : > { %v2951_v62 = vadd.f32 %v5354_v29, %v2950_v59  ;;  %v3696_v46 = vpop.f32.mrb[14].mxu0  ;;  %v3202_v28 = vpop.permute.xlu1 %3201 }
 0x279   : > { %vm3044_vm14 = vcmp.ge.f32.partialorder %v2959_v1, 0.0  ;;  %v3077_v5 = vmul.f32 %v5357_v39, %v2959_v1  ;;  %v2962_v38 = vadd.f32 %v3696_v46, %v5354_v29  ;;  %3587 = vst.msk [vmem:[%s5364_s21 + $0x58] sm:$0xff] %vm2524_vm11, %v3202_v28  ;;  %v2953_v17 = vpop.f32.mrb[15].mxu0 }
 0x27a   : > { %vm3042_vm15 = vcmp.ge.f32.partialorder %v2951_v62, 0.0  ;;  %v3075_v25 = vmul.f32 %v5357_v39, %v2951_v62  ;;  %v2954_v34 = vadd.f32 %v5354_v29, %v2953_v17 }
 0x27b   : > { %vm3045_vm1 = vcmp.ge.f32.partialorder %v2962_v38, 0.0  ;;  %v3078_v24 = vmul.f32 %v5357_v39, %v2962_v38  ;;  %v3109_v21 = vsel %vm3044_vm14, %v2959_v1, %v3077_v5 }
 0x27c   : > { %v3236_v2 = vpop.permute.xlu0 %3235  ;;  %vm3043_vm2 = vcmp.ge.f32.partialorder %v2954_v34, 0.0  ;;  %v3076_v55 = vmul.f32 %v5357_v39, %v2954_v34  ;;  %3141 = vst.msk [vmem:[%s5364_s21 + $0xe0] sm:$0xff] %vm2524_vm11, %v3109_v21  ;;  %3219 = vrot.lane.b32.xlu0 %v3109_v21, %s3904_s18  ;;  %v3107_v50 = vsel %vm3042_vm15, %v2951_v62, %v3075_v25 }
 0x27d   : > { %3604 = vst.msk [vmem:[%s5364_s21 + $0x170] sm:$0xff] %vm2524_vm11, %v3236_v2  ;;  %v3110_v36 = vsel %vm3045_vm1, %v2962_v38, %v3078_v24  ;;  %3139 = vst.msk [vmem:[%s5364_s21 + $0xc0] sm:$0xff] %vm2524_vm11, %v3107_v50 }
 0x27e   : > { %v3238_v53 = vpop.permute.xlu1 %3237  ;;  %3142 = vst.msk [vmem:[%s5364_s21 + $0xe8] sm:$0xff] %vm2524_vm11, %v3110_v36  ;;  %3221 = vrot.lane.b32.xlu1 %v3110_v36, %s3904_s18  ;;  %v3108_v44 = vsel %vm3043_vm2, %v2954_v34, %v3076_v55 }
 0x27f   : > { %3605 = vst.msk [vmem:[%s5364_s21 + $0x178] sm:$0xff] %vm2524_vm11, %v3238_v53  ;;  %3140 = vst.msk [vmem:[%s5364_s21 + $0xc8] sm:$0xff] %vm2524_vm11, %v3108_v44 }
 0x280   : > { %v3232_v35 = vpop.permute.xlu0 %3231  ;;  %v3711_v58 = vpop.f32.mrb[12].mxu1  ;;  %3215 = vrot.lane.b32.xlu0 %v3107_v50, %s3904_s18 }
 0x281   : > { %3602 = vst.msk [vmem:[%s5364_s21 + $0x150] sm:$0xff] %vm2524_vm11, %v3232_v35  ;;  %v3023_v30 = vadd.f32 %v3711_v58, %v5354_v29  ;;  %v3014_v49 = vpop.f32.mrb[13].mxu1 }
 0x282   : > { %v3015_v47 = vadd.f32 %v5354_v29, %v3014_v49  ;;  %v3712_v13 = vpop.f32.mrb[14].mxu1  ;;  %v3234_v8 = vpop.permute.xlu1 %3233  ;;  %3217 = vrot.lane.b32.xlu1 %v3108_v44, %s3904_s18 }
 0x283   : > { %vm3060_vm3 = vcmp.ge.f32.partialorder %v3023_v30, 0.0  ;;  %v3093_v31 = vmul.f32 %v5357_v39, %v3023_v30  ;;  %v3026_v23 = vadd.f32 %v3712_v13, %v5354_v29  ;;  %3603 = vst.msk [vmem:[%s5364_s21 + $0x158] sm:$0xff] %vm2524_vm11, %v3234_v8  ;;  %v3017_v37 = vpop.f32.mrb[15].mxu1 }
 0x284   : > { %vm3058_vm5 = vcmp.ge.f32.partialorder %v3015_v47, 0.0  ;;  %v3091_v11 = vmul.f32 %v5357_v39, %v3015_v47  ;;  %v3018_v43 = vadd.f32 %v5354_v29, %v3017_v37 }
 0x285   : > { %vm3061_vm0 = vcmp.ge.f32.partialorder %v3026_v23, 0.0  ;;  %v3094_v27 = vmul.f32 %v5357_v39, %v3026_v23  ;;  %v3125_v52 = vsel %vm3060_vm3, %v3023_v30, %v3093_v31 }
 0x286   : > { %vm3059_vm4 = vcmp.ge.f32.partialorder %v3018_v43, 0.0  ;;  %v3092_v33 = vmul.f32 %v5357_v39, %v3018_v43  ;;  %v3123_v14 = vsel %vm3058_vm5, %v3015_v47, %v3091_v11  ;;  %3157 = vst.msk [vmem:[%s5364_s21 + $0x1e0] sm:$0xff] %vm2524_vm11, %v3125_v52 }
 0x287   : > { %3247 = vrot.lane.b32.xlu0 %v3123_v14, %s3904_s18  ;;  %3155 = vst.msk [vmem:[%s5364_s21 + $0x1c0] sm:$0xff] %vm2524_vm11, %v3123_v14  ;;  %v3126_v4 = vsel %vm3061_vm0, %v3026_v23, %v3094_v27 }
 0x288   : > { %v3124_v29 = vsel %vm3059_vm4, %v3018_v43, %v3092_v33  ;;  %3158 = vst.msk [vmem:[%s5364_s21 + $0x1e8] sm:$0xff] %vm2524_vm11, %v3126_v4 }
 0x289   : > { %3249 = vrot.lane.b32.xlu1 %v3124_v29, %s3904_s18  ;;  %3156 = vst.msk [vmem:[%s5364_s21 + $0x1c8] sm:$0xff] %vm2524_vm11, %v3124_v29 }
 0x28b   : > { %3251 = vrot.lane.b32.xlu0 %v3125_v52, %s3904_s18 }
 0x28d   : > { %3253 = vrot.lane.b32.xlu1 %v3126_v4, %s3904_s18 }
 0x2b2   : > { %v3212_v39 = vpop.permute.xlu0 %3211 }
 0x2b3   : > { %3592 = vst.msk [vmem:[%s5364_s21 + $0xb0] sm:$0xff] %vm2524_vm11, %v3212_v39 }
 0x2b4   : > { %v3214_v12 = vpop.permute.xlu1 %3213 }
 0x2b5   : > { %3593 = vst.msk [vmem:[%s5364_s21 + $0xb8] sm:$0xff] %vm2524_vm11, %v3214_v12 }
 0x2b6   : > { %v3208_v19 = vpop.permute.xlu0 %3207 }
 0x2b7   : > { %3590 = vst.msk [vmem:[%s5364_s21 + $0x90] sm:$0xff] %vm2524_vm11, %v3208_v19 }
 0x2b8   : > { %v3210_v40 = vpop.permute.xlu1 %3209 }
 0x2b9   : > { %3591 = vst.msk [vmem:[%s5364_s21 + $0x98] sm:$0xff] %vm2524_vm11, %v3210_v40 }
 0x2bc   : > { %v3244_v3 = vpop.permute.xlu0 %3243 }
 0x2bd   : > { %3608 = vst.msk [vmem:[%s5364_s21 + $0x1b0] sm:$0xff] %vm2524_vm11, %v3244_v3 }
 0x2be   : > { %v3246_v26 = vpop.permute.xlu1 %3245 }
 0x2bf   : > { %3609 = vst.msk [vmem:[%s5364_s21 + $0x1b8] sm:$0xff] %vm2524_vm11, %v3246_v26 }
 0x2c0   : > { %v3240_v16 = vpop.permute.xlu0 %3239 }
 0x2c1   : > { %3606 = vst.msk [vmem:[%s5364_s21 + $0x190] sm:$0xff] %vm2524_vm11, %v3240_v16 }
 0x2c2   : > { %v3242_v32 = vpop.permute.xlu1 %3241 }
 0x2c3   : > { %3607 = vst.msk [vmem:[%s5364_s21 + $0x198] sm:$0xff] %vm2524_vm11, %v3242_v32 }
 0x2ee   : > { %v3220_v22 = vpop.permute.xlu0 %3219 }
 0x2ef   : > { %3596 = vst.msk [vmem:[%s5364_s21 + $0xf0] sm:$0xff] %vm2524_vm11, %v3220_v22 }
 0x2f0   : > { %v3222_v10 = vpop.permute.xlu1 %3221 }
 0x2f1   : > { %3597 = vst.msk [vmem:[%s5364_s21 + $0xf8] sm:$0xff] %vm2524_vm11, %v3222_v10 }
 0x2f2   : > { %v3216_v51 = vpop.permute.xlu0 %3215 }
 0x2f3   : > { %3594 = vst.msk [vmem:[%s5364_s21 + $0xd0] sm:$0xff] %vm2524_vm11, %v3216_v51 }
 0x2f4   : > { %v3218_v45 = vpop.permute.xlu1 %3217 }
 0x2f5   : > { %3595 = vst.msk [vmem:[%s5364_s21 + $0xd8] sm:$0xff] %vm2524_vm11, %v3218_v45 }
 0x2f9   : > { %v3248_v57 = vpop.permute.xlu0 %3247 }
 0x2fa   : > { %3610 = vst.msk [vmem:[%s5364_s21 + $0x1d0] sm:$0xff] %vm2524_vm11, %v3248_v57 }
 0x2fb   : > { %v3250_v48 = vpop.permute.xlu1 %3249 }
 0x2fc   : > { %3611 = vst.msk [vmem:[%s5364_s21 + $0x1d8] sm:$0xff] %vm2524_vm11, %v3250_v48 }
 0x2fd   : > { %v3252_v7 = vpop.permute.xlu0 %3251 }
 0x2fe   : > { %3612 = vst.msk [vmem:[%s5364_s21 + $0x1f0] sm:$0xff] %vm2524_vm11, %v3252_v7 }
 0x2ff   : > { %v3254_v9 = vpop.permute.xlu1 %3253 }
 0x300   : > { %3613 = vst.msk [vmem:[%s5364_s21 + $0x1f8] sm:$0xff] %vm2524_vm11, %v3254_v9 }
 0x301 PF: > { %s15_s17 = sadd.s32 1, %s3893_s17  }
 0x302   : > { %p12_p4 = scmp.ge.s32.totalorder %s15_s17, 4  }
 0x304   :  { %14 = sbr.rel (!%p12_p4) target bundleno = 2 (0x2), region = 69 }

// kernel: encoder_mdcblock1_iter1.7
= control target key start
LH: loop header
LB: loop body
LE: loop exit
PB: predicated region body
PF: predicated region fallthrough
CT: control target
= control target key end

     0   :  { %s3378_s0 = inlined_call_operand.vmem [shape: f32[2,8,2,8,16], index: 0, kind: input, shape index: {}]   ;;  %s3379_s1 = inlined_call_operand.vmem [shape: f32[2,8,2,8,16], index: 1, kind: input, shape index: {}]   ;;  %s3380_s2 = inlined_call_operand.vmem [shape: f32[2,8,8,16], index: 2, kind: input, shape index: {}]   ;;  %s3381_s3 = inlined_call_operand.vmem [shape: bf16[192,16], index: 3, kind: input, shape index: {}]   ;;  %s3382_s4 = inlined_call_operand.vmem [shape: f32[1,16], index: 4, kind: input, shape index: {}]   ;;  %s3383_s5 = inlined_call_operand.<no memory space> [shape: f32[1], index: 5, kind: input, shape index: {}]   ;;  %s3384_s6 = inlined_call_operand.hbm [shape: f32[2,8,8,16], index: 6, kind: output, shape index: {}]  }
   0x1   :  { %11 = sst [smem:[#allocation4]] %s3383_s5 }
   0x2   :  { %12 = vsyncpa [#allocation6], 0 }
   0x3   :  { %14 = vsyncpa [#allocation6 + $0x1], 0  ;;  %s2510_s23 = smov 0   ;;  %s2512_s24 = smov 0  }
   0x4   :  { %s2514_s25 = smov 0   ;;  %s2516_s26 = smov 0  }
   0x5 LB: > { %s2531_s5 = sadd.s32 4294967295, %s2459_s26   ;;  %s2055_s27 = sadd.s32 4294967294, %s2459_s26   ;;  %s2459_s26 = sphi %s2516_s26, %s3394_s26   ;;  %s2455_s25 = sphi %s2514_s25, %s3393_s25   ;;  %s2451_s24 = sphi %s2512_s24, %s3392_s24   ;;  %s2447_s23 = sphi %s2510_s23, %s3391_s23  }
   0x6   : > { %s2535_s28 = sadd.s32 1, %s2459_s26   ;;  %s168_s29 = sadd.s32 1, %s2455_s25 }
   0x7   : > { %s165_s30 = ssub.s32 %s2459_s26, %s2535_s28  ;;  %p178_p0 = scmp.ne.s32.totalorder %s2455_s25, %s2451_s24 }
   0x8   : > { %p166_p1 = scmp.eq.s32.totalorder %s165_s30, 0  ;;  %p179_p2 = scmp.eq.s32.totalorder %s2531_s5, 1 }
   0x9   : > { %p184_p3 = scmp.ne.s32.totalorder %s2451_s24, %s2447_s23  ;;  %p185_p4 = scmp.eq.s32.totalorder %s2055_s27, 1 }
   0xa   : > { %s2546_s7 = scalar_select %p166_p1, %s2455_s25, %s168_s29  }
   0xb   : > { %p2548_p5 = por %p179_p2, %p178_p0  ;;  %p2552_p6 = por %p185_p4, %p184_p3 }
   0xc   : > { %p2058_p7 = scmp.ge.s32.totalorder %s2459_s26, 1  ;;  %p236_p8 = scmp.lt.s32.totalorder %s2459_s26, 3 }
   0xe   : > { %p237_p9 = pnand %p2058_p7, %p236_p8 }
   0xf   : > { %vm356_vm0 = vcmask (!%p237_p9), 125952   ;;  %vm358_vm1 = vcmask (!%p237_p9), 122880   ;;  %v2461_v0 = vmov (!%p237_p9), 0   ;;  %p276_p10 = scmp.lt.s32.totalorder (!%p237_p9), %s2531_s5, 1  ;;  %vm500_vm2 = vsmask.f32 (!%p237_p9), 7938 }
  0x10   : > { %240 = sbr.rel (%p237_p9) target bundleno = 564 (0x234), region = 44  ;;  %357 = vst.msk [vmem:[#allocation2] sm:$0xf] (!%p237_p9), %vm356_vm0, %v2461_v0  ;;  %360 = vst.msk [vmem:[#allocation2 + $0x8] sm:$0xf] (!%p237_p9), %vm356_vm0, %v2461_v0  ;;  %1840 = vmatprep.subr.bf16.mxu0 (!%p237_p9), %v2461_v0  ;;  %2220 = vmatprep.subr.bf16.mxu1 (!%p237_p9), %v2461_v0  ;;  %s2462_s18 = smov (!%p237_p9), 32  }
  0x11   : > { %359 = vst.msk [vmem:[#allocation2 + $0x4] sm:$0x1] (!%p237_p9), %vm358_vm1, %v2461_v0  ;;  %361 = vst.msk [vmem:[#allocation2 + $0xc] sm:$0x1] (!%p237_p9), %vm358_vm1, %v2461_v0  ;;  %vm506_vm3 = vsmask.f32 (!%p237_p9), 256 }
  0x12   : > { %362 = vst.msk [vmem:[#allocation2 + $0x10] sm:$0xf] (!%p237_p9), %vm356_vm0, %v2461_v0  ;;  %364 = vst.msk [vmem:[#allocation2 + $0x18] sm:$0xf] (!%p237_p9), %vm356_vm0, %v2461_v0  ;;  %s2463_s19 = smov (!%p237_p9), 16   ;;  %s2464_s20 = smov (!%p237_p9), 48  }
  0x13   : > { %363 = vst.msk [vmem:[#allocation2 + $0x14] sm:$0x1] (!%p237_p9), %vm358_vm1, %v2461_v0  ;;  %365 = vst.msk [vmem:[#allocation2 + $0x1c] sm:$0x1] (!%p237_p9), %vm358_vm1, %v2461_v0  ;;  %s2465_s27 = smov (!%p237_p9), 64   ;;  %s2466_s22 = smov (!%p237_p9), 80  }
  0x14   : > { %366 = vst.msk [vmem:[#allocation2 + $0x20] sm:$0xf] (!%p237_p9), %vm356_vm0, %v2461_v0  ;;  %368 = vst.msk [vmem:[#allocation2 + $0x28] sm:$0xf] (!%p237_p9), %vm356_vm0, %v2461_v0  ;;  %s2467_s29 = smov (!%p237_p9), 96   ;;  %s2468_s15 = smov (!%p237_p9), 112  }
  0x15   : > { %367 = vst.msk [vmem:[#allocation2 + $0x24] sm:$0x1] (!%p237_p9), %vm358_vm1, %v2461_v0  ;;  %369 = vst.msk [vmem:[#allocation2 + $0x2c] sm:$0x1] (!%p237_p9), %vm358_vm1, %v2461_v0  ;;  %vm1498_vm6 = vcmask (!%p237_p9), 130048   ;;  %vm1523_vm7 = vcmask (!%p237_p9), 261120  }
  0x16   : > { %370 = vst.msk [vmem:[#allocation2 + $0x30] sm:$0xf] (!%p237_p9), %vm356_vm0, %v2461_v0  ;;  %372 = vst.msk [vmem:[#allocation2 + $0x38] sm:$0xf] (!%p237_p9), %vm356_vm0, %v2461_v0  ;;  %vm1540_vm8 = vcmask (!%p237_p9), 392192   ;;  %vm1557_vm9 = vcmask (!%p237_p9), 523264  }
  0x17   : > { %371 = vst.msk [vmem:[#allocation2 + $0x34] sm:$0x1] %vm358_vm1, %v2461_v0  ;;  %373 = vst.msk [vmem:[#allocation2 + $0x3c] sm:$0x1] %vm358_vm1, %v2461_v0  ;;  %s2634_s10 = scalar_select %p276_p10, %s2531_s5, 1  ;;  %vm1574_vm10 = vcmask 654336  }
  0x18   : > { %374 = vst.msk [vmem:[#allocation2 + $0x40] sm:$0xf] %vm356_vm0, %v2461_v0  ;;  %376 = vst.msk [vmem:[#allocation3] sm:$0xf] %vm356_vm0, %v2461_v0  ;;  %v713_v4 = vld [vmem:[#allocation2 + $0x4] sm:$0x1] }
  0x19   : > { %375 = vst.msk [vmem:[#allocation2 + $0x44] sm:$0x1] %vm358_vm1, %v2461_v0  ;;  %377 = vst.msk [vmem:[#allocation3 + $0x4] sm:$0x1] %vm358_vm1, %v2461_v0  ;;  %s2200_s11 = sshll.u32 %s2634_s10, 7  ;;  %vm1591_vm11 = vcmask 785408  }
  0x1a   : > { %378 = vst.msk [vmem:[#allocation3 + $0x8] sm:$0xf] %vm356_vm0, %v2461_v0  ;;  %380 = vst.msk [vmem:[#allocation3 + $0x10] sm:$0xf] %vm356_vm0, %v2461_v0  ;;  %s2640_s14 = scalar_lea.vmem %s3378_s0, %s2200_s11  ;;  %s2645_s17 = scalar_lea.vmem %s3379_s1, %s2200_s11  ;;  %v721_v5 = vld [vmem:[#allocation2] sm:$0xe] }
  0x1b   : > { %379 = vst.msk [vmem:[#allocation3 + $0xc] sm:$0x1] %vm358_vm1, %v2461_v0  ;;  %381 = vst.msk [vmem:[#allocation3 + $0x14] sm:$0x1] %vm358_vm1, %v2461_v0  ;;  %v294_v1 = vld [vmem:[%s2640_s14 + $0x10] sm:$0xff]  ;;  %v292_v3 = vld [vmem:[%s2640_s14] sm:$0xff]  ;;  %v2090_v8 = vcombine.low %v721_v5, %v713_v4 }
  0x1c   : > { %382 = vst.msk [vmem:[#allocation3 + $0x18] sm:$0xf] %vm356_vm0, %v2461_v0  ;;  %384 = vst.msk [vmem:[#allocation3 + $0x20] sm:$0xf] %vm356_vm0, %v2461_v0  ;;  %v310_v2 = vld [vmem:[%s2645_s17 + $0x10] sm:$0xff]  ;;  %v308_v10 = vld [vmem:[%s2645_s17] sm:$0xff] }
  0x1d   : > { %383 = vst.msk [vmem:[#allocation3 + $0x1c] sm:$0x1] %vm358_vm1, %v2461_v0  ;;  %385 = vst.msk [vmem:[#allocation3 + $0x24] sm:$0x1] %vm358_vm1, %v2461_v0  ;;  %v705_v6 = vld [vmem:[#allocation2] sm:$0xf]  ;;  %v326_v7 = vsub.f32 %v294_v1, %v310_v2  ;;  %v324_v12 = vsub.f32 %v292_v3, %v308_v10 }
  0x1e   : > { %386 = vst.msk [vmem:[#allocation3 + $0x28] sm:$0xf] %vm356_vm0, %v2461_v0  ;;  %388 = vst.msk [vmem:[#allocation3 + $0x30] sm:$0xf] %vm356_vm0, %v2461_v0  ;;  %v2082_v9 = vcombine.low %v705_v6, %v713_v4  ;;  %v302_v13 = vld [vmem:[%s2640_s14 + $0x50] sm:$0xff]  ;;  %v938_v14 = vrot.slane %v2090_v8, 1 }
  0x1f   : > { %387 = vst.msk [vmem:[#allocation3 + $0x2c] sm:$0x1] %vm358_vm1, %v2461_v0  ;;  %389 = vst.msk [vmem:[#allocation3 + $0x34] sm:$0x1] %vm358_vm1, %v2461_v0  ;;  %v2212_v11 = vpack.c.bf16 %v326_v7, %v326_v7  ;;  %v318_v17 = vld [vmem:[%s2645_s17 + $0x50] sm:$0xff]  ;;  %v2211_v20 = vpack.c.bf16 %v324_v12, %v324_v12  ;;  %v300_v22 = vld [vmem:[%s2640_s14 + $0x40] sm:$0xff] }
  0x20   : > { %390 = vst.msk [vmem:[#allocation3 + $0x38] sm:$0xf] %vm356_vm0, %v2461_v0  ;;  %392 = vst.msk [vmem:[#allocation3 + $0x40] sm:$0xf] %vm356_vm0, %v2461_v0  ;;  %v845_v15 = vshll.u32 %v2082_v9, 16  ;;  %v843_v16 = vshrl.u32 %v2082_v9, 16  ;;  %v334_v21 = vsub.f32 %v302_v13, %v318_v17  ;;  %946 = vrot.lane.b32.xlu0 %v938_v14, %s2462_s18 }
  0x21   : > { %391 = vst.msk [vmem:[#allocation3 + $0x3c] sm:$0x1] %vm358_vm1, %v2461_v0  ;;  %393 = vst.msk [vmem:[#allocation3 + $0x44] sm:$0x1] %vm358_vm1, %v2461_v0  ;;  %v586_v18 = vshrl.u32 %v2212_v11, 16  ;;  %v589_v19 = vshll.u32 %v2212_v11, 16 }
  0x22   : > { %v316_v23 = vld [vmem:[%s2645_s17 + $0x40] sm:$0xff]  ;;  %v847_v24 = vrot.slane %v845_v15, 1  ;;  %vm2658_vm4 = vmand %vm356_vm0, %vm500_vm2  ;;  %v578_v29 = vshrl.u32 %v2211_v20, 16  ;;  %v581_v30 = vshll.u32 %v2211_v20, 16  ;;  %v2216_v31 = vpack.c.bf16 %v334_v21, %v334_v21  ;;  %v663_v34 = vld [vmem:[#allocation3 + $0x8] sm:$0xf] }
  0x23   : > { %v332_v25 = vsub.f32 %v300_v22, %v316_v23  ;;  %v296_v26 = vld [vmem:[%s2640_s14 + $0x20] sm:$0xff]  ;;  %v588_v28 = vrot.slane %v586_v18, 7  ;;  %v666_v35 = vld [vmem:[#allocation3 + $0xc] sm:$0x1]  ;;  %v657_v36 = vld [vmem:[#allocation3] sm:$0xf] }
  0x24   : > { %v312_v32 = vld [vmem:[%s2645_s17 + $0x20] sm:$0xff]  ;;  %v848_v33 = vor.u32 %v847_v24, %v843_v16  ;;  %vm2665_vm5 = vmand %vm358_vm1, %vm506_vm3  ;;  %v580_v42 = vrot.slane %v578_v29, 7  ;;  %v660_v43 = vld [vmem:[#allocation3 + $0x4] sm:$0x1]  ;;  %v618_v44 = vshrl.u32 %v2216_v31, 16  ;;  %v621_v46 = vshll.u32 %v2216_v31, 16 }
  0x25   : > { %v2215_v37 = vpack.c.bf16 %v332_v25, %v332_v25  ;;  %v328_v38 = vsub.f32 %v296_v26, %v312_v32  ;;  %v591_v40 = vor.u32 %v589_v19, %v588_v28  ;;  %v592_v41 = vrot.slane %v588_v28, 4  ;;  %v293_v45 = vld [vmem:[%s2640_s14 + $0x8] sm:$0xff]  ;;  %v299_v51 = vld [vmem:[%s2640_s14 + $0x38] sm:$0xff]  ;;  %v687_v57 = vld [vmem:[#allocation3 + $0x28] sm:$0xf]  ;;  %s2219_s11 = sshll.u32 %s2531_s5, 10 }
  0x26   : > { %898 = vrot.lane.b32.xlu0 %v848_v33, %s2463_s19  ;;  %v309_v50 = vld [vmem:[%s2645_s17 + $0x8] sm:$0xff]  ;;  %v315_v52 = vld [vmem:[%s2645_s17 + $0x38] sm:$0xff]  ;;  %v583_v55 = vor.u32 %v581_v30, %v580_v42  ;;  %v584_v56 = vrot.slane %v580_v42, 4  ;;  %v620_v58 = vrot.slane %v618_v44, 7  ;;  %v690_v3 = vld [vmem:[#allocation3 + $0x2c] sm:$0x1] }
  0x27   : > { %v610_v47 = vshrl.u32 %v2215_v37, 16  ;;  %v613_v48 = vshll.u32 %v2215_v37, 16  ;;  %v2213_v49 = vpack.c.bf16 %v328_v38, %v328_v38  ;;  %v664_v53 = vsel %vm2658_vm4, %v591_v40, %v663_v34  ;;  %v301_v62 = vld [vmem:[%s2640_s14 + $0x48] sm:$0xff]  ;;  %v669_v20 = vld [vmem:[#allocation3 + $0x10] sm:$0xf]  ;;  %v304_v37 = vld [vmem:[%s2640_s14 + $0x60] sm:$0xff] }
  0x28   : > { %v667_v54 = vsel %vm2665_vm5, %v592_v41, %v666_v35  ;;  %665 = vst [vmem:[#allocation3 + $0x8] sm:$0xf] %v664_v53  ;;  %v317_v63 = vld [vmem:[%s2645_s17 + $0x48] sm:$0xff]  ;;  %v658_v1 = vsel %vm2658_vm4, %v583_v55, %v657_v36  ;;  %v661_v2 = vsel %vm2665_vm5, %v584_v56, %v660_v43  ;;  %v325_v6 = vsub.f32 %v293_v45, %v309_v50  ;;  %v672_v21 = vld [vmem:[#allocation3 + $0x14] sm:$0x1]  ;;  %v320_v38 = vld [vmem:[%s2645_s17 + $0x60] sm:$0xff] }
  0x29   : > { %668 = vst [vmem:[#allocation3 + $0xc] sm:$0x1] %v667_v54  ;;  %v612_v59 = vrot.slane %v610_v47, 7  ;;  %v594_v60 = vshrl.u32 %v2213_v49, 16  ;;  %v597_v61 = vshll.u32 %v2213_v49, 16  ;;  %v331_v7 = vsub.f32 %v299_v51, %v315_v52 }
  0x2a   : > { %v681_v4 = vld [vmem:[#allocation3 + $0x20] sm:$0xf]  ;;  %v684_v5 = vld [vmem:[#allocation3 + $0x24] sm:$0x1]  ;;  %659 = vst [vmem:[#allocation3] sm:$0xf] %v658_v1  ;;  %v623_v8 = vor.u32 %v621_v46, %v620_v58  ;;  %v2203_v13 = vpack.c.bf16 %v325_v6, %v325_v6  ;;  %v333_v15 = vsub.f32 %v301_v62, %v317_v63  ;;  %v336_v52 = vsub.f32 %v304_v37, %v320_v38 }
  0x2b   : > { %662 = vst [vmem:[#allocation3 + $0x4] sm:$0x1] %v661_v2  ;;  %v624_v9 = vrot.slane %v620_v58, 4  ;;  %v615_v10 = vor.u32 %v613_v48, %v612_v59  ;;  %v616_v11 = vrot.slane %v612_v59, 4  ;;  %v596_v12 = vrot.slane %v594_v60, 7 }
  0x2c   : > { %v2206_v14 = vpack.c.bf16 %v331_v7, %v331_v7  ;;  %v688_v16 = vsel %vm2658_vm4, %v623_v8, %v687_v57  ;;  %v419_v24 = vshrl.u32 %v2203_v13, 16  ;;  %v2207_v26 = vpack.c.bf16 %v333_v15, %v333_v15  ;;  %v502_v41 = vld [vmem:[#allocation2 + $0x8] sm:$0xf]  ;;  %v508_v42 = vld [vmem:[#allocation2 + $0xc] sm:$0x1]  ;;  %v319_v15 = vld [vmem:[%s2645_s17 + $0x58] sm:$0xff] }
  0x2d   : > { %v691_v17 = vsel %vm2665_vm5, %v624_v9, %v690_v3  ;;  %v682_v18 = vsel %vm2658_vm4, %v615_v10, %v681_v4  ;;  %v685_v19 = vsel %vm2665_vm5, %v616_v11, %v684_v5  ;;  %689 = vst [vmem:[#allocation3 + $0x28] sm:$0xf] %v688_v16  ;;  %v599_v22 = vor.u32 %v597_v61, %v596_v12  ;;  %v523_v48 = vld [vmem:[#allocation2 + $0x20] sm:$0xf]  ;;  %v526_v49 = vld [vmem:[#allocation2 + $0x24] sm:$0x1] }
  0x2e   : > { %692 = vst [vmem:[#allocation3 + $0x2c] sm:$0x1] %v691_v17  ;;  %683 = vst [vmem:[#allocation3 + $0x20] sm:$0xf] %v682_v18  ;;  %v600_v23 = vrot.slane %v596_v12, 4  ;;  %v443_v25 = vshrl.u32 %v2206_v14, 16  ;;  %v2217_v6 = vpack.c.bf16 %v336_v52, %v336_v52 }
  0x2f   : > { %686 = vst [vmem:[#allocation3 + $0x24] sm:$0x1] %v685_v19  ;;  %v2692_v28 = vld [vmem:[#allocation3 + $0x8] sm:$0xf]  ;;  %v670_v29 = vsel %vm2658_vm4, %v599_v22, %v669_v20  ;;  %v422_v31 = vshll.u32 %v2203_v13, 16  ;;  %v446_v32 = vshll.u32 %v2206_v14, 16 }
  0x30   : > { %v673_v30 = vsel %vm2665_vm5, %v600_v23, %v672_v21  ;;  %v2099_v33 = vcombine.low %v2692_v28, %v2692_v28  ;;  %671 = vst [vmem:[#allocation3 + $0x10] sm:$0xf] %v670_v29  ;;  %v421_v34 = vrot.slane %v419_v24, 7  ;;  %v445_v36 = vrot.slane %v443_v25, 7  ;;  %v2710_v56 = vld [vmem:[#allocation3 + $0x8] sm:$0xf] }
  0x31   : > { %674 = vst [vmem:[#allocation3 + $0x14] sm:$0x1] %v673_v30  ;;  %v729_v35 = vld [vmem:[#allocation3] sm:$0xf]  ;;  %v451_v43 = vshrl.u32 %v2207_v26, 16  ;;  %v454_v63 = vshll.u32 %v2207_v26, 16  ;;  %v2146_v3 = vcombine.low %v2710_v56, %v2710_v56 }
  0x32   : > { %988 = vrot.lane.b32.xlu1 %v2099_v33, %s2464_s20  ;;  %v2098_v40 = vcombine.low %v729_v35, %v729_v35  ;;  %v424_v44 = vor.u32 %v422_v31, %v421_v34  ;;  %v425_v45 = vrot.slane %v421_v34, 4  ;;  %v448_v46 = vor.u32 %v446_v32, %v445_v36  ;;  %v2706_v53 = vld [vmem:[#allocation3 + $0x4] sm:$0x1]  ;;  %v529_v4 = vld [vmem:[#allocation2 + $0x28] sm:$0xf]  ;;  %v295_v10 = vld [vmem:[%s2640_s14 + $0x18] sm:$0xff] }
  0x33   : > { %v449_v47 = vrot.slane %v445_v36, 4  ;;  %v453_v62 = vrot.slane %v451_v43, 7  ;;  %v2724_v1 = vcombine.low %v729_v35, %v2706_v53  ;;  %v532_v5 = vld [vmem:[#allocation2 + $0x2c] sm:$0x1]  ;;  %v311_v13 = vld [vmem:[%s2645_s17 + $0x18] sm:$0xff]  ;;  %v626_v18 = vshrl.u32 %v2217_v6, 16 }
  0x34   : > { %986 = vrot.lane.b32.xlu0 %v2098_v40, %s2464_s20  ;;  %v2704_v50 = vld [vmem:[#allocation3 + $0x28] sm:$0xf]  ;;  %v503_v57 = vsel %vm2658_vm4, %v424_v44, %v502_v41  ;;  %v509_v58 = vsel %vm2665_vm5, %v425_v45, %v508_v42  ;;  %v524_v59 = vsel %vm2658_vm4, %v448_v46, %v523_v48  ;;  %v303_v14 = vld [vmem:[%s2640_s14 + $0x58] sm:$0xff]  ;;  %v629_v21 = vshll.u32 %v2217_v6, 16  ;;  %v2747_v34 = vld [vmem:[#allocation3 + $0xc] sm:$0x1] }
  0x35   : > { %v733_v51 = vld [vmem:[#allocation3 + $0x20] sm:$0xf]  ;;  %v2103_v54 = vcombine.low %v2704_v50, %v2704_v50  ;;  %504 = vst [vmem:[#allocation2 + $0x8] sm:$0xf] %v503_v57  ;;  %v527_v60 = vsel %vm2665_vm5, %v449_v47, %v526_v49  ;;  %510 = vst [vmem:[#allocation2 + $0xc] sm:$0x1] %v509_v58  ;;  %v456_v8 = vor.u32 %v454_v63, %v453_v62 }
  0x36   : > { %v2102_v55 = vcombine.low %v733_v51, %v733_v51  ;;  %525 = vst [vmem:[#allocation2 + $0x20] sm:$0xf] %v524_v59  ;;  %528 = vst [vmem:[#allocation2 + $0x24] sm:$0x1] %v527_v60  ;;  %v2731_v7 = vld [vmem:[#allocation3 + $0x24] sm:$0x1]  ;;  %v327_v25 = vsub.f32 %v295_v10, %v311_v13  ;;  %v335_v26 = vsub.f32 %v303_v14, %v319_v15 }
  0x37   : > { %996 = vrot.lane.b32.xlu1 %v2103_v54, %s2464_s20  ;;  %v2721_v61 = vld [vmem:[#allocation3 + $0x10] sm:$0xf]  ;;  %v457_v9 = vrot.slane %v453_v62, 4  ;;  %v530_v11 = vsel %vm2658_vm4, %v456_v8, %v529_v4  ;;  %v2743_v16 = vcombine.low %v733_v51, %v2731_v7  ;;  %v1029_v17 = vshll.u32 %v2724_v1, 16  ;;  %v696_v49 = vld [vmem:[#allocation3 + $0x34] sm:$0x1] }
  0x38   : > { %994 = vrot.lane.b32.xlu0 %v2102_v55, %s2464_s20  ;;  %v2147_v2 = vcombine.low %v2721_v61, %v2721_v61  ;;  %531 = vst [vmem:[#allocation2 + $0x28] sm:$0xf] %v530_v11  ;;  %v628_v33 = vrot.slane %v626_v18, 7  ;;  %v1027_v36 = vshrl.u32 %v2724_v1, 16  ;;  %v693_v44 = vld [vmem:[#allocation3 + $0x30] sm:$0xf]  ;;  %v2753_v51 = vcombine.low %v2692_v28, %v2747_v34 }
  0x39   : > { %v533_v12 = vsel %vm2665_vm5, %v457_v9, %v532_v5  ;;  %v1031_v37 = vrot.slane %v1029_v17, 1  ;;  %v1057_v38 = vshll.u32 %v2743_v16, 16  ;;  %v2756_v57 = vld [vmem:[#allocation3 + $0x2c] sm:$0x1]  ;;  %v2204_v1 = vpack.c.bf16 %v327_v25, %v327_v25  ;;  %v297_v10 = vld [vmem:[%s2640_s14 + $0x28] sm:$0xff] }
  0x3a   : > { %534 = vst [vmem:[#allocation2 + $0x2c] sm:$0x1] %v533_v12  ;;  %v631_v47 = vor.u32 %v629_v21, %v628_v33  ;;  %v632_v48 = vrot.slane %v628_v33, 4  ;;  %v2208_v4 = vpack.c.bf16 %v335_v26, %v335_v26  ;;  %v1036_v5 = vshll.u32 %v2753_v51, 16  ;;  %v313_v11 = vld [vmem:[%s2645_s17 + $0x28] sm:$0xff]  ;;  %v2374_v12 = vld [vmem:[%s3381_s3] sm:$0xff]  }
  0x3b   : > { %1340 = vrot.lane.b32.xlu1 %v2147_v2, %s2463_s19  ;;  %v2766_v6 = vcombine.low %v2704_v50, %v2756_v57  ;;  %v1055_v9 = vshrl.u32 %v2743_v16, 16  ;;  %v1032_v14 = vor.u32 %v1031_v37, %v1027_v36  ;;  %v1059_v17 = vrot.slane %v1057_v38, 1  ;;  %1841 = vmatpush1.bf16.msra.mxu0 %v2374_v12  ;;  %v2776_v16 = vld [vmem:[#allocation3 + $0xc] sm:$0x1]  ;;  %v782_v33 = vld [vmem:[#allocation3 + $0x28] sm:$0xf] }
  0x3c   : > { %1338 = vrot.lane.b32.xlu0 %v2146_v3, %s2463_s19  ;;  %v722_v19 = vld [vmem:[#allocation2 + $0x8] sm:$0xe]  ;;  %v714_v22 = vld [vmem:[#allocation2 + $0xc] sm:$0x1]  ;;  %v694_v63 = vsel %vm2658_vm4, %v631_v47, %v693_v44  ;;  %v697_v28 = vsel %vm2665_vm5, %v632_v48, %v696_v49  ;;  %v427_v50 = vshrl.u32 %v2204_v1, 16  ;;  %2232 = vmatpush1.bf16.msra.mxu1 %v2374_v12  ;;  %v1034_v25 = vshrl.u32 %v2753_v51, 16 }
  0x3d   : > { %v706_v20 = vld [vmem:[#allocation2 + $0x8] sm:$0xf]  ;;  %v709_v23 = vld [vmem:[#allocation2 + $0x20] sm:$0xf]  ;;  %v717_v24 = vld [vmem:[#allocation2 + $0x24] sm:$0x1]  ;;  %v2091_v29 = vcombine.low %v722_v19, %v714_v22  ;;  %1842 = vmatprep.subr.bf16.mxu0 %v2461_v0  ;;  %2221 = vmatprep.subr.bf16.mxu1 %v2461_v0  ;;  %v2789_v38 = vcombine.low %v2710_v56, %v2776_v16  ;;  %v2150_v56 = vcombine.low %v782_v33, %v782_v33 }
  0x3e   : > { %v2083_v30 = vcombine.low %v706_v20, %v714_v22  ;;  %v725_v31 = vld [vmem:[#allocation2 + $0x20] sm:$0xe]  ;;  %v2086_v32 = vcombine.low %v709_v23, %v717_v24  ;;  %695 = vst [vmem:[#allocation3 + $0x30] sm:$0xf] %v694_v63  ;;  %698 = vst [vmem:[#allocation3 + $0x34] sm:$0x1] %v697_v28 }
  0x3f   : > { %v2094_v35 = vcombine.low %v725_v31, %v717_v24  ;;  %v939_v40 = vrot.slane %v2091_v29, 1  ;;  %v710_v52 = vld [vmem:[#allocation2 + $0x28] sm:$0xf]  ;;  %v430_v19 = vshll.u32 %v2204_v1, 16  ;;  %v511_v20 = vld [vmem:[#allocation2 + $0x10] sm:$0xf]  ;;  %v329_v24 = vsub.f32 %v297_v10, %v313_v11 }
  0x40   : > { %v850_v41 = vshrl.u32 %v2083_v30, 16  ;;  %v852_v42 = vshll.u32 %v2083_v30, 16  ;;  %v871_v43 = vshrl.u32 %v2086_v32, 16  ;;  %v873_v46 = vshll.u32 %v2086_v32, 16  ;;  %v726_v55 = vld [vmem:[#allocation2 + $0x28] sm:$0xe] }
  0x41   : > { %v942_v45 = vrot.slane %v2094_v35, 1  ;;  %948 = vrot.lane.b32.xlu1 %v939_v40, %s2462_s18  ;;  %v718_v54 = vld [vmem:[#allocation2 + $0x2c] sm:$0x1]  ;;  %v514_v21 = vld [vmem:[#allocation2 + $0x14] sm:$0x1]  ;;  %v459_v22 = vshrl.u32 %v2208_v4, 16  ;;  %v1060_v32 = vor.u32 %v1059_v17, %v1055_v9  ;;  %v2205_v47 = vpack.c.bf16 %v329_v24, %v329_v24 }
  0x42   : > { %v2087_v58 = vcombine.low %v710_v52, %v718_v54  ;;  %v2095_v59 = vcombine.low %v726_v55, %v718_v54  ;;  %v854_v60 = vrot.slane %v852_v42, 1  ;;  %v875_v62 = vrot.slane %v873_v46, 1  ;;  %v745_v29 = vld [vmem:[#allocation3] sm:$0xe]  ;;  %v535_v42 = vld [vmem:[#allocation2 + $0x30] sm:$0xf] }
  0x43   : > { %954 = vrot.lane.b32.xlu0 %v942_v45, %s2462_s18  ;;  %v462_v23 = vshll.u32 %v2208_v4, 16  ;;  %v1038_v26 = vrot.slane %v1036_v5, 1  ;;  %v429_v30 = vrot.slane %v427_v50, 7  ;;  %v1064_v35 = vshll.u32 %v2766_v6, 16  ;;  %v2376_v37 = vld [vmem:[%s3381_s3 + $0x8] sm:$0xff]   ;;  %v2379_v48 = vld [vmem:[%s3381_s3 + $0x10] sm:$0xff]  }
  0x44   : > { %v943_v2 = vrot.slane %v2095_v59, 1  ;;  %v855_v3 = vor.u32 %v854_v60, %v850_v41  ;;  %v880_v8 = vshll.u32 %v2087_v58, 16  ;;  %v876_v13 = vor.u32 %v875_v62, %v871_v43  ;;  %v538_v43 = vld [vmem:[#allocation2 + $0x34] sm:$0x1]  ;;  %1843 = vmatpush1.bf16.msra.mxu0 %v2376_v37  ;;  %2233 = vmatpush1.bf16.msra.mxu1 %v2376_v37  ;;  %v305_v54 = vld [vmem:[%s2640_s14 + $0x68] sm:$0xff]  ;;  %v2380_v9 = vld [vmem:[%s3381_s3 + $0x18] sm:$0xff]  }
  0x45   : > { %v878_v15 = vshrl.u32 %v2087_v58, 16  ;;  %v461_v36 = vrot.slane %v459_v22, 7  ;;  %v432_v40 = vor.u32 %v430_v19, %v429_v30  ;;  %v433_v41 = vrot.slane %v429_v30, 4  ;;  %v2795_v49 = vld [vmem:[#allocation3 + $0x2c] sm:$0x1]  ;;  %v321_v55 = vld [vmem:[%s2645_s17 + $0x68] sm:$0xff]  ;;  %1844 = vmatprep.subr.bf16.mxu0 %v2461_v0  ;;  %2222 = vmatprep.subr.bf16.mxu1 %v2461_v0 }
  0x46   : > { %956 = vrot.lane.b32.xlu1 %v943_v2, %s2462_s18  ;;  %v882_v18 = vrot.slane %v880_v8, 1  ;;  %v2114_v44 = vcombine.low %v745_v29, %v2706_v53  ;;  %v1062_v51 = vshrl.u32 %v2766_v6, 16  ;;  %v1039_v58 = vor.u32 %v1038_v26, %v1034_v25  ;;  %v749_v60 = vld [vmem:[#allocation3 + $0x20] sm:$0xe]  ;;  %v746_v28 = vld [vmem:[#allocation3 + $0x8] sm:$0xe] }
  0x47   : > { %900 = vrot.lane.b32.xlu0 %v855_v3, %s2463_s19  ;;  %v464_v45 = vor.u32 %v462_v23, %v461_v36  ;;  %v465_v46 = vrot.slane %v461_v36, 4  ;;  %v512_v52 = vsel %vm2658_vm4, %v432_v40, %v511_v20  ;;  %v515_v53 = vsel %vm2665_vm5, %v433_v41, %v514_v21  ;;  %v298_v1 = vld [vmem:[%s2640_s14 + $0x30] sm:$0xff]  ;;  %v2814_v3 = vld [vmem:[#allocation3 + $0x14] sm:$0x1]  ;;  %v517_v12 = vld [vmem:[#allocation2 + $0x18] sm:$0xf] }
  0x48   : > { %v883_v31 = vor.u32 %v882_v18, %v878_v15  ;;  %v1066_v59 = vrot.slane %v1064_v35, 1  ;;  %513 = vst [vmem:[#allocation2 + $0x10] sm:$0xf] %v512_v52  ;;  %516 = vst [vmem:[#allocation2 + $0x14] sm:$0x1] %v515_v53  ;;  %v314_v2 = vld [vmem:[%s2645_s17 + $0x30] sm:$0xff]  ;;  %v337_v6 = vsub.f32 %v305_v54, %v321_v55  ;;  %1845 = vmatpush1.bf16.msra.mxu0 %v2379_v48  ;;  %2234 = vmatpush1.bf16.msra.mxu1 %v2379_v48 }
  0x49   : > { %v536_v62 = vsel %vm2658_vm4, %v464_v45, %v535_v42  ;;  %v539_v63 = vsel %vm2665_vm5, %v465_v46, %v538_v43  ;;  %v435_v4 = vshrl.u32 %v2205_v47, 16  ;;  %v438_v5 = vshll.u32 %v2205_v47, 16  ;;  %v306_v8 = vld [vmem:[%s2640_s14 + $0x70] sm:$0xff]  ;;  %1846 = vmatprep.subr.bf16.mxu0 %v2461_v0  ;;  %2223 = vmatprep.subr.bf16.mxu1 %v2461_v0  ;;  %v783_v50 = vld [vmem:[#allocation3 + $0x30] sm:$0xf]  ;;  %v2381_v25 = vld [vmem:[%s3381_s3 + $0x20] sm:$0xff]  }
  0x4a   : > { %906 = vrot.lane.b32.xlu1 %v876_v13, %s2463_s19  ;;  %537 = vst [vmem:[#allocation2 + $0x30] sm:$0xf] %v536_v62  ;;  %540 = vst [vmem:[#allocation2 + $0x34] sm:$0x1] %v539_v63  ;;  %v1122_v10 = vrot.slane %v2114_v44, 1  ;;  %v2118_v11 = vcombine.low %v749_v60, %v2731_v7  ;;  %v322_v13 = vld [vmem:[%s2645_s17 + $0x70] sm:$0xff]  ;;  %v1067_v15 = vor.u32 %v1066_v59, %v1062_v51 }
  0x4b   : > { %1082 = vrot.lane.b32.xlu0 %v1032_v14, %s2465_s27  ;;  %v2826_v14 = vcombine.low %v782_v33, %v2795_v49  ;;  %v1381_v17 = vshll.u32 %v2789_v38, 16  ;;  %v437_v18 = vrot.slane %v435_v4, 7  ;;  %v520_v19 = vld [vmem:[#allocation2 + $0x1c] sm:$0x1]  ;;  %v2209_v7 = vpack.c.bf16 %v337_v6, %v337_v6  ;;  %v750_v21 = vld [vmem:[#allocation3 + $0x28] sm:$0xe] }
  0x4c   : > { %v2115_v20 = vcombine.low %v746_v28, %v2747_v34  ;;  %v330_v24 = vsub.f32 %v298_v1, %v314_v2  ;;  %1847 = vmatpush1.bf16.msra.mxu0 %v2380_v9  ;;  %2235 = vmatpush1.bf16.msra.mxu1 %v2380_v9  ;;  %v2836_v26 = vcombine.low %v2721_v61, %v2814_v3  ;;  %v1126_v29 = vrot.slane %v2118_v11, 1  ;;  %v2845_v61 = vld [vmem:[#allocation3 + $0x34] sm:$0x1]  ;;  %v541_v47 = vld [vmem:[#allocation2 + $0x38] sm:$0xf]  ;;  %v2382_v48 = vld [vmem:[%s3381_s3 + $0x28] sm:$0xff]  }
  0x4d   : > { %v440_v22 = vor.u32 %v438_v5, %v437_v18  ;;  %v441_v23 = vrot.slane %v437_v18, 4  ;;  %v1379_v30 = vshrl.u32 %v2789_v38, 16  ;;  %1848 = vmatprep.subr.bf16.mxu0 %v2461_v0  ;;  %v2151_v34 = vcombine.low %v783_v50, %v783_v50  ;;  %2224 = vmatprep.subr.bf16.mxu1 %v2461_v0  ;;  %v544_v52 = vld [vmem:[#allocation2 + $0x3c] sm:$0x1]  ;;  %v753_v28 = vld [vmem:[#allocation2 + $0x8] sm:$0xf] }
  0x4e   : > { %908 = vrot.lane.b32.xlu1 %v883_v31, %s2463_s19  ;;  %v338_v31 = vsub.f32 %v306_v8, %v322_v13  ;;  %v1409_v33 = vshll.u32 %v2826_v14, 16  ;;  %v2119_v36 = vcombine.low %v750_v21, %v2756_v57  ;;  %v467_v38 = vshrl.u32 %v2209_v7, 16  ;;  %v675_v8 = vld [vmem:[#allocation3 + $0x18] sm:$0xf]  ;;  %v678_v11 = vld [vmem:[#allocation3 + $0x1c] sm:$0x1] }
  0x4f   : > { %1090 = vrot.lane.b32.xlu0 %v1060_v32, %s2465_s27  ;;  %v1383_v32 = vrot.slane %v1381_v17, 1  ;;  %v518_v35 = vsel %vm2658_vm4, %v440_v22, %v517_v12  ;;  %v521_v37 = vsel %vm2665_vm5, %v441_v23, %v520_v19  ;;  %v2214_v40 = vpack.c.bf16 %v330_v24, %v330_v24  ;;  %v2384_v12 = vld [vmem:[%s3381_s3 + $0x38] sm:$0xff]   ;;  %v794_v19 = vld [vmem:[#allocation3 + $0x8] sm:$0xe]  ;;  %v757_v21 = vld [vmem:[#allocation2 + $0x28] sm:$0xf] }
  0x50   : > { %519 = vst [vmem:[#allocation2 + $0x18] sm:$0xf] %v518_v35  ;;  %522 = vst [vmem:[#allocation2 + $0x1c] sm:$0x1] %v521_v37  ;;  %1849 = vmatpush1.bf16.msra.mxu0 %v2381_v25  ;;  %2236 = vmatpush1.bf16.msra.mxu1 %v2381_v25  ;;  %v1123_v41 = vrot.slane %v2115_v20, 1  ;;  %v1388_v42 = vshll.u32 %v2836_v26, 16  ;;  %v2855_v57 = vcombine.low %v783_v50, %v2845_v61 }
  0x51   : > { %v470_v43 = vshll.u32 %v2209_v7, 16  ;;  %1850 = vmatprep.subr.bf16.mxu0 %v2461_v0  ;;  %2225 = vmatprep.subr.bf16.mxu1 %v2461_v0  ;;  %v1384_v44 = vor.u32 %v1383_v32, %v1379_v30  ;;  %v1407_v45 = vshrl.u32 %v2826_v14, 16  ;;  %v1411_v46 = vrot.slane %v1409_v33, 1  ;;  %v2886_v20 = vld [vmem:[#allocation2 + $0xc] sm:$0x1] }
  0x52   : > { %1084 = vrot.lane.b32.xlu1 %v1039_v58, %s2465_s27  ;;  %v469_v51 = vrot.slane %v467_v38, 7  ;;  %v1386_v53 = vshrl.u32 %v2836_v26, 16  ;;  %v602_v54 = vshrl.u32 %v2214_v40, 16  ;;  %v605_v55 = vshll.u32 %v2214_v40, 16  ;;  %v2383_v58 = vld [vmem:[%s3381_s3 + $0x30] sm:$0xff]   ;;  %v2385_v26 = vld [vmem:[%s3381_s3 + $0x40] sm:$0xff]  }
  0x53   : > { %1346 = vrot.lane.b32.xlu0 %v2150_v56, %s2463_s19  ;;  %v1127_v56 = vrot.slane %v2119_v36, 1  ;;  %v1390_v59 = vrot.slane %v1388_v42, 1  ;;  %v1412_v63 = vor.u32 %v1411_v46, %v1407_v45  ;;  %v1416_v1 = vshll.u32 %v2855_v57, 16  ;;  %v699_v24 = vld [vmem:[#allocation3 + $0x38] sm:$0xf]  ;;  %v2386_v42 = vld [vmem:[%s3381_s3 + $0x48] sm:$0xff]  }
  0x54   : > { %1851 = vmatpush1.bf16.msra.mxu0 %v2382_v48  ;;  %2237 = vmatpush1.bf16.msra.mxu1 %v2382_v48  ;;  %v472_v60 = vor.u32 %v470_v43, %v469_v51  ;;  %v473_v62 = vrot.slane %v469_v51, 4  ;;  %v604_v2 = vrot.slane %v602_v54, 7  ;;  %v2218_v4 = vpack.c.bf16 %v338_v31, %v338_v31  ;;  %v702_v25 = vld [vmem:[#allocation3 + $0x3c] sm:$0x1]  ;;  %v798_v36 = vld [vmem:[#allocation3 + $0x28] sm:$0xe] }
  0x55   : > { %1852 = vmatprep.subr.bf16.mxu0 %v2461_v0  ;;  %2226 = vmatprep.subr.bf16.mxu1 %v2461_v0  ;;  %v2122_v13 = vcombine.low %v753_v28, %v753_v28  ;;  %v1391_v17 = vor.u32 %v1390_v59, %v1386_v53  ;;  %v1414_v18 = vshrl.u32 %v2855_v57, 16  ;;  %v1418_v50 = vrot.slane %v1416_v1, 1  ;;  %v754_v37 = vld [vmem:[#allocation2 + $0x10] sm:$0xf]  ;;  %v2916_v43 = vld [vmem:[#allocation2 + $0x14] sm:$0x1] }
  0x56   : > { %1092 = vrot.lane.b32.xlu1 %v1067_v15, %s2465_s27  ;;  %v542_v5 = vsel %vm2658_vm4, %v472_v60, %v541_v47  ;;  %v545_v6 = vsel %vm2665_vm5, %v473_v62, %v544_v52  ;;  %v607_v9 = vor.u32 %v605_v55, %v604_v2  ;;  %v634_v14 = vshrl.u32 %v2218_v4, 16  ;;  %v795_v45 = vld [vmem:[#allocation3 + $0x10] sm:$0xe]  ;;  %v758_v46 = vld [vmem:[#allocation2 + $0x30] sm:$0xf] }
  0x57   : > { %1130 = vrot.lane.b32.xlu0 %v1122_v10, %s2466_s22  ;;  %543 = vst [vmem:[#allocation2 + $0x38] sm:$0xf] %v542_v5  ;;  %546 = vst [vmem:[#allocation2 + $0x3c] sm:$0x1] %v545_v6  ;;  %v608_v10 = vrot.slane %v604_v2, 4  ;;  %v637_v15 = vshll.u32 %v2218_v4, 16  ;;  %v2162_v30 = vcombine.low %v794_v19, %v2776_v16  ;;  %v2900_v32 = vcombine.low %v753_v28, %v2886_v20 }
  0x58   : > { %1853 = vmatpush1.bf16.msra.mxu0 %v2383_v58  ;;  %2238 = vmatpush1.bf16.msra.mxu1 %v2383_v58  ;;  %v676_v7 = vsel %vm2658_vm4, %v607_v9, %v675_v8  ;;  %v636_v23 = vrot.slane %v634_v14, 7  ;;  %v1419_v33 = vor.u32 %v1418_v50, %v1414_v18  ;;  %v2126_v35 = vcombine.low %v757_v21, %v757_v21  ;;  %v2919_v47 = vld [vmem:[#allocation2 + $0x10] sm:$0xf]  ;;  %v2921_v48 = vld [vmem:[#allocation2 + $0x14] sm:$0x1]  ;;  %v307_v51 = vld [vmem:[%s2640_s14 + $0x78] sm:$0xff] }
  0x59   : > { %1854 = vmatprep.subr.bf16.mxu0 %v2461_v0  ;;  %2227 = vmatprep.subr.bf16.mxu1 %v2461_v0  ;;  %677 = vst [vmem:[#allocation3 + $0x18] sm:$0xf] %v676_v7  ;;  %v679_v22 = vsel %vm2665_vm5, %v608_v10, %v678_v11  ;;  %v2123_v57 = vcombine.low %v754_v37, %v754_v37  ;;  %v323_v52 = vld [vmem:[%s2645_s17 + $0x78] sm:$0xff]  ;;  %v2387_v53 = vld [vmem:[%s3381_s3 + $0x50] sm:$0xff]   ;;  %vm1608_vm12 = vcmask 916480   ;;  %s3327_s17 = scalar_lea.hbm %s3384_s6, %s2219_s11 }
  0x5a   : > { %1348 = vrot.lane.b32.xlu1 %v2151_v34, %s2463_s19  ;;  %680 = vst [vmem:[#allocation3 + $0x1c] sm:$0x1] %v679_v22  ;;  %v639_v31 = vor.u32 %v637_v15, %v636_v23  ;;  %v640_v34 = vrot.slane %v636_v23, 4  ;;  %v2131_v54 = vcombine.low %v754_v37, %v2916_v43  ;;  %v2163_v58 = vcombine.low %v795_v45, %v2814_v3  ;;  %v799_v59 = vld [vmem:[#allocation3 + $0x30] sm:$0xe] }
  0x5b   : > { %1138 = vrot.lane.b32.xlu0 %v1126_v29, %s2466_s22  ;;  %v2893_v29 = vld [vmem:[#allocation2 + $0x2c] sm:$0x1]  ;;  %v2934_v60 = vld [vmem:[#allocation2 + $0x34] sm:$0x1]  ;;  %v2127_v62 = vcombine.low %v758_v46, %v758_v46  ;;  %v2084_v1 = vcombine.low %v2919_v47, %v2921_v48  ;;  %v2939_v2 = vld [vmem:[#allocation2 + $0x30] sm:$0xf]  ;;  %v339_v4 = vsub.f32 %v307_v51, %v323_v52  ;;  %v2167_v5 = vcombine.low %v799_v59, %v2845_v61 }
  0x5c   : > { %1855 = vmatpush1.bf16.msra.mxu0 %v2384_v12  ;;  %2239 = vmatpush1.bf16.msra.mxu1 %v2384_v12  ;;  %v700_v16 = vsel %vm2658_vm4, %v639_v31, %v699_v24  ;;  %v703_v38 = vsel %vm2665_vm5, %v640_v34, %v702_v25  ;;  %v2134_v40 = vcombine.low %v757_v21, %v2893_v29  ;;  %v2941_v3 = vld [vmem:[#allocation2 + $0x34] sm:$0x1]  ;;  %v2388_v9 = vld [vmem:[%s3381_s3 + $0x58] sm:$0xff]   ;;  %v1220_v11 = vshll.u32 %v2131_v54, 16  ;;  %v727_v59 = vld [vmem:[#allocation2 + $0x30] sm:$0xe] }
  0x5d   : > { %1856 = vmatprep.subr.bf16.mxu0 %v2461_v0  ;;  %2228 = vmatprep.subr.bf16.mxu1 %v2461_v0  ;;  %701 = vst [vmem:[#allocation3 + $0x38] sm:$0xf] %v700_v16  ;;  %704 = vst [vmem:[#allocation3 + $0x3c] sm:$0x1] %v703_v38  ;;  %v2135_v10 = vcombine.low %v758_v46, %v2934_v60  ;;  %v1475_v61 = vrot.slane %v2163_v58, 1  ;;  %v2088_v14 = vcombine.low %v2939_v2, %v2941_v3 }
  0x5e   : > { %1132 = vrot.lane.b32.xlu1 %v1123_v41, %s2466_s22  ;;  %v2166_v41 = vcombine.low %v798_v36, %v2795_v49  ;;  %v1213_v49 = vshll.u32 %v2900_v32, 16  ;;  %v1239_v6 = vshrl.u32 %v2134_v40, 16  ;;  %v2954_v15 = vld [vmem:[#allocation2 + $0x18] sm:$0xf]  ;;  %v1479_v18 = vrot.slane %v2167_v5, 1 }
  0x5f   : > { %1434 = vrot.lane.b32.xlu0 %v1384_v44, %s2462_s18  ;;  %v1474_v44 = vrot.slane %v2162_v30, 1  ;;  %v1218_v19 = vshrl.u32 %v2131_v54, 16  ;;  %v1248_v7 = vshll.u32 %v2135_v10, 16  ;;  %v2210_v21 = vpack.c.bf16 %v339_v4, %v339_v4  ;;  %v2964_v30 = vld [vmem:[#allocation2 + $0x3c] sm:$0x1] }
  0x60   : > { %1857 = vmatpush1.bf16.msra.mxu0 %v2385_v26  ;;  %2240 = vmatpush1.bf16.msra.mxu1 %v2385_v26  ;;  %v1478_v55 = vrot.slane %v2166_v41, 1  ;;  %v1215_v28 = vrot.slane %v1213_v49, 1  ;;  %v857_v22 = vshrl.u32 %v2084_v1, 16  ;;  %v887_v24 = vshll.u32 %v2088_v14, 16  ;;  %v2962_v26 = vld [vmem:[#allocation2 + $0x38] sm:$0xf] }
  0x61   : > { %1858 = vmatprep.subr.bf16.mxu0 %v2461_v0  ;;  %2229 = vmatprep.subr.bf16.mxu1 %v2461_v0  ;;  %v475_v31 = vshrl.u32 %v2210_v21, 16  ;;  %v478_v34 = vshll.u32 %v2210_v21, 16  ;;  %v885_v36 = vshrl.u32 %v2088_v14, 16  ;;  %v547_v16 = vld [vmem:[#allocation2 + $0x40] sm:$0xf] }
  0x62   : > { %1140 = vrot.lane.b32.xlu1 %v1127_v56, %s2466_s22  ;;  %v1241_v56 = vshll.u32 %v2134_v40, 16  ;;  %v889_v40 = vrot.slane %v887_v24, 1  ;;  %v731_v4 = vld [vmem:[#allocation3 + $0x10] sm:$0xf] }
  0x63   : > { %1442 = vrot.lane.b32.xlu0 %v1412_v63, %s2462_s18  ;;  %v1211_v63 = vshrl.u32 %v2900_v32, 16  ;;  %v1246_v32 = vshrl.u32 %v2135_v10, 16  ;;  %v477_v37 = vrot.slane %v475_v31, 7  ;;  %v2986_v10 = vld [vmem:[#allocation3 + $0x34] sm:$0x1] }
  0x64   : > { %1859 = vmatpush1.bf16.msra.mxu0 %v2386_v42  ;;  %2241 = vmatpush1.bf16.msra.mxu1 %v2386_v42  ;;  %v1243_v8 = vrot.slane %v1241_v56, 1  ;;  %v723_v42 = vld [vmem:[#allocation2 + $0x10] sm:$0xe]  ;;  %v2997_v24 = vld [vmem:[#allocation3 + $0x3c] sm:$0x1] }
  0x65   : > { %1860 = vmatprep.subr.bf16.mxu0 %v2461_v0  ;;  %2230 = vmatprep.subr.bf16.mxu1 %v2461_v0  ;;  %v1216_v12 = vor.u32 %v1215_v28, %v1211_v63  ;;  %v480_v45 = vor.u32 %v478_v34, %v477_v37  ;;  %v481_v49 = vrot.slane %v477_v37, 4  ;;  %v2092_v56 = vcombine.low %v723_v42, %v2921_v48  ;;  %v724_v28 = vld [vmem:[#allocation2 + $0x18] sm:$0xe] }
  0x66   : > { %1436 = vrot.lane.b32.xlu1 %v1391_v17, %s2462_s18  ;;  %v2956_v17 = vld [vmem:[#allocation2 + $0x1c] sm:$0x1]  ;;  %v1244_v50 = vor.u32 %v1243_v8, %v1239_v6  ;;  %v2096_v63 = vcombine.low %v727_v59, %v2941_v3  ;;  %v781_v59 = vld [vmem:[#allocation3 + $0x20] sm:$0xf] }
  0x67   : > { %1170 = vrot.lane.b32.xlu0 %v2122_v13, %s2467_s29  ;;  %v859_v13 = vshll.u32 %v2084_v1, 16  ;;  %v2085_v25 = vcombine.low %v2954_v15, %v2956_v17  ;;  %v548_v51 = vsel %vm2658_vm4, %v480_v45, %v547_v16  ;;  %v2980_v1 = vld [vmem:[#allocation3 + $0x14] sm:$0x1]  ;;  %v2093_v8 = vcombine.low %v724_v28, %v2956_v17 }
  0x68   : > { %1861 = vmatpush1.bf16.msra.mxu0 %v2387_v53  ;;  %2242 = vmatpush1.bf16.msra.mxu1 %v2387_v53  ;;  %v890_v53 = vor.u32 %v889_v40, %v885_v36  ;;  %549 = vst [vmem:[#allocation2 + $0x40] sm:$0xf] %v548_v51  ;;  %v944_v6 = vrot.slane %v2096_v63, 1  ;;  %v784_v51 = vld [vmem:[#allocation3 + $0x38] sm:$0xf] }
  0x69   : > { %1862 = vmatprep.subr.bf16.mxu0 %v2461_v0  ;;  %2231 = vmatprep.subr.bf16.mxu1 %v2461_v0  ;;  %v1222_v0 = vrot.slane %v1220_v11, 1  ;;  %v861_v23 = vrot.slane %v859_v13, 1  ;;  %v866_v41 = vshll.u32 %v2085_v25, 16  ;;  %v864_v54 = vshrl.u32 %v2085_v25, 16  ;;  %v728_v11 = vld [vmem:[#allocation2 + $0x38] sm:$0xe] }
  0x6a   : > { %1444 = vrot.lane.b32.xlu1 %v1419_v33, %s2462_s18  ;;  %v2100_v13 = vcombine.low %v731_v4, %v731_v4  ;;  %v2097_v14 = vcombine.low %v728_v11, %v2964_v30  ;;  %v736_v25 = vld [vmem:[#allocation3 + $0x38] sm:$0xf] }
  0x6b   : > { %1178 = vrot.lane.b32.xlu0 %v2126_v35, %s2467_s29  ;;  %v1223_v33 = vor.u32 %v1222_v0, %v1218_v19  ;;  %v1250_v35 = vrot.slane %v1248_v7, 1  ;;  %v862_v38 = vor.u32 %v861_v23, %v857_v22  ;;  %v732_v19 = vld [vmem:[#allocation3 + $0x18] sm:$0xf]  ;;  %v2105_v37 = vcombine.low %v736_v25, %v736_v25 }
  0x6c   : > { %1863 = vmatpush1.bf16.msra.mxu0 %v2388_v9  ;;  %2243 = vmatpush1.bf16.msra.mxu1 %v2388_v9  ;;  %v2108_v9 = vcombine.low %v731_v4, %v2980_v1  ;;  %v945_v7 = vrot.slane %v2097_v14, 1  ;;  %v2101_v34 = vcombine.low %v732_v19, %v732_v19  ;;  %v785_v4 = vld [vmem:[#allocation3 + $0x40] sm:$0xf] }
  0x6d   : > { %v1251_v46 = vor.u32 %v1250_v35, %v1246_v32 }
  0x6e   : > { %1172 = vrot.lane.b32.xlu1 %v2123_v57, %s2467_s29  ;;  %v2089_v57 = vcombine.low %v2962_v26, %v2964_v30  ;;  %v1041_v22 = vshrl.u32 %v2108_v9, 16 }
  0x6f   : > { %1482 = vrot.lane.b32.xlu0 %v1474_v44, %s2464_s20  ;;  %v550_v44 = vld [vmem:[#allocation2 + $0x44] sm:$0x1] }
  0x70   : > { %v551_v52 = vsel %vm2665_vm5, %v481_v49, %v550_v44  ;;  %v894_v58 = vshll.u32 %v2089_v57, 16  ;;  %v892_v48 = vshrl.u32 %v2089_v57, 16 }
  0x71   : > { %552 = vst [vmem:[#allocation2 + $0x44] sm:$0x1] %v551_v52 }
  0x72   : > { %1180 = vrot.lane.b32.xlu1 %v2127_v62, %s2467_s29  ;;  %v940_v62 = vrot.slane %v2092_v56, 1  ;;  %v896_v39 = vrot.slane %v894_v58, 1  ;;  %v3008_v56 = vld [vmem:[#allocation3 + $0x1c] sm:$0x1] }
  0x73   : > { %1490 = vrot.lane.b32.xlu0 %v1478_v55, %s2464_s20  ;;  %v868_v55 = vrot.slane %v866_v41, 1  ;;  %v780_v41 = vld [vmem:[#allocation3 + $0x18] sm:$0xf] }
  0x74   : > { %v897_v5 = vor.u32 %v896_v39, %v892_v48  ;;  %v2148_v44 = vcombine.low %v780_v41, %v780_v41  ;;  %v3018_v48 = vld [vmem:[#allocation3 + $0x24] sm:$0x1]  ;;  %v2149_v39 = vcombine.low %v781_v59, %v781_v59 }
  0x75   : > { %v869_v27 = vor.u32 %v868_v55, %v864_v54  ;;  %v2152_v55 = vcombine.low %v784_v51, %v784_v51  ;;  %v2157_v11 = vcombine.low %v781_v59, %v3018_v48  ;;  %v756_v59 = vld [vmem:[#allocation2 + $0x20] sm:$0xf] }
  0x76   : > { %1484 = vrot.lane.b32.xlu1 %v1475_v61, %s2464_s20  ;;  %v735_v61 = vld [vmem:[#allocation3 + $0x30] sm:$0xf] }
  0x77   : > { %1266 = vrot.lane.b32.xlu0 %v1216_v12, %s2468_s15  ;;  %v2112_v3 = vcombine.low %v735_v61, %v2986_v10  ;;  %v941_v12 = vrot.slane %v2093_v8, 1  ;;  %v2104_v17 = vcombine.low %v735_v61, %v735_v61  ;;  %v2153_v61 = vcombine.low %v785_v4, %v785_v4 }
  0x79   : > { %v1071_v0 = vshll.u32 %v2112_v3, 16  ;;  %v1069_v31 = vshrl.u32 %v2112_v3, 16 }
  0x7a   : > { %1492 = vrot.lane.b32.xlu1 %v1479_v18, %s2464_s20  ;;  %v1043_v18 = vshll.u32 %v2108_v9, 16 }
  0x7b   : > { %1274 = vrot.lane.b32.xlu0 %v1244_v50, %s2468_s15  ;;  %v2992_v50 = vld [vmem:[#allocation3 + $0x1c] sm:$0x1]  ;;  %v1073_v30 = vrot.slane %v1071_v0, 1 }
  0x7c   : > { %v2109_v21 = vcombine.low %v732_v19, %v2992_v50  ;;  %v1045_v23 = vrot.slane %v1043_v18, 1  ;;  %v752_v19 = vld [vmem:[#allocation3 + $0x38] sm:$0xe] }
  0x7d   : > { %v1074_v36 = vor.u32 %v1073_v30, %v1069_v31 }
  0x7e   : > { %1268 = vrot.lane.b32.xlu1 %v1223_v33, %s2468_s15  ;;  %v1046_v32 = vor.u32 %v1045_v23, %v1041_v22  ;;  %v2113_v33 = vcombine.low %v736_v25, %v2997_v24  ;;  %v1050_v35 = vshll.u32 %v2109_v21, 16  ;;  %v1048_v16 = vshrl.u32 %v2109_v21, 16 }
  0x7f   : > { %902 = vrot.lane.b32.xlu0 %v862_v38, %s2463_s19  ;;  %v1402_v22 = vshll.u32 %v2157_v11, 16  ;;  %v2121_v23 = vcombine.low %v752_v19, %v2997_v24 }
  0x80   : > { %v1052_v38 = vrot.slane %v1050_v35, 1  ;;  %v1078_v40 = vshll.u32 %v2113_v33, 16  ;;  %v1076_v45 = vshrl.u32 %v2113_v33, 16 }
  0x81   : > { %v1129_v33 = vrot.slane %v2121_v23, 1 }
  0x82   : > { %1276 = vrot.lane.b32.xlu1 %v1251_v46, %s2468_s15  ;;  %v1053_v57 = vor.u32 %v1052_v38, %v1048_v16  ;;  %v1080_v49 = vrot.slane %v1078_v40, 1  ;;  %v747_v46 = vld [vmem:[#allocation3 + $0x10] sm:$0xe]  ;;  %v3050_v38 = vld [vmem:[#allocation2 + $0x1c] sm:$0x1] }
  0x83   : > { %910 = vrot.lane.b32.xlu0 %v890_v53, %s2463_s19  ;;  %v2116_v52 = vcombine.low %v747_v46, %v2980_v1  ;;  %v2156_v53 = vcombine.low %v780_v41, %v3008_v56  ;;  %v755_v16 = vld [vmem:[#allocation2 + $0x18] sm:$0xf] }
  0x84   : > { %v1081_v54 = vor.u32 %v1080_v49, %v1076_v45  ;;  %v2124_v40 = vcombine.low %v755_v16, %v755_v16  ;;  %v759_v45 = vld [vmem:[#allocation2 + $0x38] sm:$0xf]  ;;  %v796_v49 = vld [vmem:[#allocation3 + $0x18] sm:$0xe] }
  0x85   : > { %v1124_v28 = vrot.slane %v2116_v52, 1  ;;  %v1395_v8 = vshll.u32 %v2156_v53, 16  ;;  %v1393_v14 = vshrl.u32 %v2156_v53, 16  ;;  %v3059_v53 = vld [vmem:[#allocation2 + $0x3c] sm:$0x1] }
  0x86   : > { %904 = vrot.lane.b32.xlu1 %v869_v27, %s2463_s19  ;;  %v751_v27 = vld [vmem:[#allocation3 + $0x30] sm:$0xe] }
  0x87   : > { %950 = vrot.lane.b32.xlu0 %v940_v62, %s2462_s18  ;;  %v3016_v62 = vld [vmem:[#allocation3 + $0x3c] sm:$0x1]  ;;  %v1397_v18 = vrot.slane %v1395_v8, 1 }
  0x88   : > { %v2160_v63 = vcombine.low %v784_v51, %v3016_v62  ;;  %v2132_v51 = vcombine.low %v755_v16, %v3050_v38 }
  0x8a   : > { %912 = vrot.lane.b32.xlu1 %v897_v5, %s2463_s19  ;;  %v2120_v5 = vcombine.low %v751_v27, %v2986_v10  ;;  %v1421_v25 = vshrl.u32 %v2160_v63, 16  ;;  %v800_v27 = vld [vmem:[#allocation3 + $0x38] sm:$0xe] }
  0x8b   : > { %958 = vrot.lane.b32.xlu0 %v944_v6, %s2462_s18  ;;  %v748_v6 = vld [vmem:[#allocation3 + $0x18] sm:$0xe]  ;;  %v2168_v8 = vcombine.low %v800_v27, %v3016_v62  ;;  %v801_v62 = vld [vmem:[#allocation3 + $0x40] sm:$0xe] }
  0x8c   : > { %v2117_v3 = vcombine.low %v748_v6, %v2992_v50  ;;  %v1398_v50 = vor.u32 %v1397_v18, %v1393_v14 }
  0x8e   : > { %952 = vrot.lane.b32.xlu1 %v941_v12, %s2462_s18  ;;  %v3032_v12 = vld [vmem:[#allocation3 + $0x44] sm:$0x1]  ;;  %v1125_v21 = vrot.slane %v2117_v3, 1 }
  0x8f   : > { %990 = vrot.lane.b32.xlu0 %v2100_v13, %s2464_s20  ;;  %v1128_v13 = vrot.slane %v2120_v5, 1  ;;  %v2125_v5 = vcombine.low %v756_v59, %v756_v59 }
  0x92   : > { %960 = vrot.lane.b32.xlu1 %v945_v7, %s2462_s18  ;;  %v3004_v42 = vpop.permute.xlu0 %946  ;;  %v2161_v7 = vcombine.low %v785_v4, %v3032_v12  ;;  %v3069_v4 = vld [vmem:[#allocation2 + $0x24] sm:$0x1] }
  0x93   : > { %998 = vrot.lane.b32.xlu0 %v2104_v17, %s2464_s20  ;;  %v1423_v17 = vshll.u32 %v2160_v63, 16  ;;  %v2133_v14 = vcombine.low %v756_v59, %v3069_v4 }
  0x94   : > { %v1428_v41 = vshrl.u32 %v2161_v7, 16 }
  0x95   : > { %v1425_v31 = vrot.slane %v1423_v17, 1  ;;  %v1225_v17 = vshrl.u32 %v2132_v51, 16 }
  0x96   : > { %992 = vrot.lane.b32.xlu1 %v2101_v34, %s2464_s20  ;;  %v1400_v34 = vshrl.u32 %v2157_v11, 16  ;;  %v797_v11 = vld [vmem:[#allocation3 + $0x20] sm:$0xe] }
  0x97   : > { %1086 = vrot.lane.b32.xlu0 %v1046_v32, %s2465_s27  ;;  %v1426_v35 = vor.u32 %v1425_v31, %v1421_v25  ;;  %v2165_v18 = vcombine.low %v797_v11, %v3018_v48 }
  0x98   : > { %v3014_v58 = vpop.permute.xlu0 %898 }
  0x99   : > { %v1477_v31 = vrot.slane %v2165_v18, 1  ;;  %v769_v18 = vld [vmem:[#allocation2 + $0x8] sm:$0xe] }
  0x9a   : > { %1000 = vrot.lane.b32.xlu1 %v2105_v37, %s2464_s20  ;;  %v1430_v37 = vshll.u32 %v2161_v7, 16  ;;  %v1480_v7 = vrot.slane %v2168_v8, 1 }
  0x9b   : > { %1094 = vrot.lane.b32.xlu0 %v1074_v36, %s2465_s27  ;;  %v1404_v36 = vrot.slane %v1402_v22, 1 }
  0x9d   : > { %v1405_v24 = vor.u32 %v1404_v36, %v1400_v34  ;;  %v2169_v34 = vcombine.low %v801_v62, %v3032_v12  ;;  %v773_v62 = vld [vmem:[#allocation2 + $0x28] sm:$0xe] }
  0x9e   : > { %1088 = vrot.lane.b32.xlu1 %v1053_v57, %s2465_s27  ;;  %v1432_v57 = vrot.slane %v1430_v37, 1  ;;  %v1234_v37 = vshll.u32 %v2133_v14, 16 }
  0x9f   : > { %1342 = vrot.lane.b32.xlu0 %v2148_v44, %s2463_s19 }
  0xa0   : > { %v1433_v52 = vor.u32 %v1432_v57, %v1428_v41  ;;  %v1232_v41 = vshrl.u32 %v2133_v14, 16  ;;  %v1236_v57 = vrot.slane %v1234_v37, 1  ;;  %v770_v14 = vld [vmem:[#allocation2 + $0x10] sm:$0xe] }
  0xa2   : > { %1096 = vrot.lane.b32.xlu1 %v1081_v54, %s2465_s27  ;;  %v2128_v54 = vcombine.low %v759_v45, %v759_v45 }
  0xa3   : > { %1350 = vrot.lane.b32.xlu0 %v2152_v55, %s2463_s19  ;;  %v2164_v55 = vcombine.low %v796_v49, %v3008_v56  ;;  %v1227_v56 = vshll.u32 %v2132_v51, 16 }
  0xa4   : > { %v3023_v1 = vpop.permute.xlu1 %988 }
  0xa5   : > { %v1476_v6 = vrot.slane %v2164_v55, 1 }
  0xa6   : > { %v3026_v9 = vpop.permute.xlu0 %986  ;;  %1344 = vrot.lane.b32.xlu1 %v2149_v39, %s2463_s19 }
  0xa7   : > { %1134 = vrot.lane.b32.xlu0 %v1124_v28, %s2466_s22  ;;  %v2136_v28 = vcombine.low %v759_v45, %v3059_v53 }
  0xa9   : > { %v3034_v10 = vpop.permute.xlu1 %996  ;;  %v1255_v22 = vshll.u32 %v2136_v28, 16  ;;  %v1253_v48 = vshrl.u32 %v2136_v28, 16 }
  0xaa   : > { %v3036_v0 = vpop.permute.xlu0 %994  ;;  %1352 = vrot.lane.b32.xlu1 %v2153_v61, %s2463_s19  ;;  %v760_v61 = vld [vmem:[#allocation2 + $0x40] sm:$0xf]  ;;  %s2202_s19 = sshll.u32 %s2634_s10, 6 }
  0xab   : > { %1142 = vrot.lane.b32.xlu0 %v1128_v13, %s2466_s22  ;;  %v2129_v19 = vcombine.low %v760_v61, %v760_v61  ;;  %v1257_v36 = vrot.slane %v1255_v22, 1  ;;  %v774_v22 = vld [vmem:[#allocation2 + $0x30] sm:$0xe] }
  0xad   : > { %v3042_v30 = vpop.permute.xlu1 %1340  ;;  %v1258_v12 = vor.u32 %v1257_v36, %v1253_v48  ;;  %v2142_v48 = vcombine.low %v773_v62, %v2893_v29 }
  0xae   : > { %1136 = vrot.lane.b32.xlu1 %v1125_v21, %s2466_s22  ;;  %v3046_v32 = vpop.permute.xlu0 %1338  ;;  %v1229_v21 = vrot.slane %v1227_v56, 1 }
  0xaf   : > { %1438 = vrot.lane.b32.xlu0 %v1398_v50, %s2462_s18  ;;  %v3080_v50 = vld [vmem:[#allocation2 + $0x44] sm:$0x1] }
  0xb2   : > { %1144 = vrot.lane.b32.xlu1 %v1129_v33, %s2466_s22  ;;  %v2137_v33 = vcombine.low %v760_v61, %v3080_v50  ;;  %s273_s22 = sand.u32 1, %s2451_s24  }
  0xb3   : > { %1446 = vrot.lane.b32.xlu0 %v1426_v35, %s2462_s18  ;;  %v3052_v44 = vpop.permute.xlu1 %948  ;;  %v1230_v35 = vor.u32 %v1229_v21, %v1225_v17  ;;  %v2138_v21 = vcombine.low %v769_v18, %v2886_v20  ;;  %s2059_s10 = sshll.u32 %s273_s22, 6  ;;  %s3337_s5 = scalar_lea.sflag [#allocation6], %s273_s22 }
  0xb4   : > { %v1262_v45 = vshll.u32 %v2137_v33, 16  ;;  %s3294_s30 = scalar_lea.vmem [#allocation5], %s2059_s10 }
  0xb5   : > { %v3054_v46 = vpop.permute.xlu0 %954  ;;  %v1306_v36 = vrot.slane %v2138_v21, 1  ;;  %s1969_s12 = sshll.u32 %s3294_s30, 4  ;;  %s3329_s12 = int_to_ptr.vmem [resolvable:$true] %s1969_s12 }
  0xb6   : > { %1440 = vrot.lane.b32.xlu1 %v1405_v24, %s2462_s18  ;;  %v1264_v55 = vrot.slane %v1262_v45, 1 }
  0xb7   : > { %1174 = vrot.lane.b32.xlu0 %v2124_v40, %s2467_s29  ;;  %v1481_v40 = vrot.slane %v2169_v34, 1  ;;  %v1627_v29 = vsel %vm1498_vm6, %v1306_v36, %v3046_v32 }
  0xb8   : > { %v3062_v39 = vpop.permute.xlu1 %956 }
  0xb9   : > { %v3064_v63 = vpop.permute.xlu0 %900 }
  0xba   : > { %1448 = vrot.lane.b32.xlu1 %v1433_v52, %s2462_s18  ;;  %v1237_v52 = vor.u32 %v1236_v57, %v1232_v41  ;;  %s1905_s18 = sld [smem:[#allocation4]] }
  0xbb   : > { %1182 = vrot.lane.b32.xlu0 %v2128_v54, %s2467_s29  ;;  %v1260_v54 = vshrl.u32 %v2137_v33, 16  ;;  %v2143_v33 = vcombine.low %v774_v22, %v2934_v60  ;;  %v2394_v60 = vld [vmem:[#allocation2 + $0x8] sm:$0xf] }
  0xbc   : > { %v3072_v3 = vpop.permute.xlu1 %906  ;;  %v1504_v45 = vsel %vm1498_vm6, %v2394_v60, %v3064_v63 }
  0xbd   : > { %v3074_v13 = vpop.permute.xlu0 %1082  ;;  %v1265_v28 = vor.u32 %v1264_v55, %v1260_v54  ;;  %v1311_v41 = vrot.slane %v2143_v33, 1  ;;  %v1527_v63 = vsel %vm1523_vm7, %v1504_v45, %v3052_v44 }
  0xbe   : > { %1176 = vrot.lane.b32.xlu1 %v2125_v5, %s2467_s29 }
  0xbf   : > { %1486 = vrot.lane.b32.xlu0 %v1476_v6, %s2464_s20 }
  0xc0   : > { %v3082_v23 = vpop.permute.xlu1 %908 }
  0xc1   : > { %v3084_v25 = vpop.permute.xlu0 %1090 }
  0xc2   : > { %1184 = vrot.lane.b32.xlu1 %v2129_v19, %s2467_s29  ;;  %s3278_s29 = scalar_lea.vmem %s3380_s2, %s2202_s19 }
  0xc3   : > { %1494 = vrot.lane.b32.xlu0 %v1480_v7, %s2464_s20  ;;  %v2139_v7 = vcombine.low %v770_v14, %v2916_v43  ;;  %v2393_v43 = vld [vmem:[#allocation2] sm:$0xf] }
  0xc4   : > { %v3090_v16 = vpop.permute.xlu1 %1084  ;;  %v1501_v20 = vsel %vm1498_vm6, %v2393_v43, %v3014_v58  ;;  %v2395_v14 = vld [vmem:[#allocation2 + $0x20] sm:$0xf] }
  0xc5   : > { %v3092_v24 = vpop.permute.xlu0 %1346  ;;  %v1513_v58 = vsel %vm1498_vm6, %v2395_v14, %v3072_v3  ;;  %v1525_v18 = vsel %vm1523_vm7, %v1501_v20, %v3004_v42 }
  0xc6   : > { %1488 = vrot.lane.b32.xlu1 %v1477_v31, %s2464_s20  ;;  %v1533_v62 = vsel %vm1523_vm7, %v1513_v58, %v3054_v46 }
  0xc7   : > { %1270 = vrot.lane.b32.xlu0 %v1230_v35, %s2468_s15  ;;  %v1307_v35 = vrot.slane %v2139_v7, 1 }
  0xc8   : > { %v3096_v49 = vpop.permute.xlu1 %1092 }
  0xc9   : > { %v3098_v51 = vpop.permute.xlu0 %1130  ;;  %v1630_v57 = vsel %vm1498_vm6, %v1307_v35, %v3042_v30 }
  0xca   : > { %1496 = vrot.lane.b32.xlu1 %v1481_v40, %s2464_s20 }
  0xcb   : > { %1278 = vrot.lane.b32.xlu0 %v1258_v12, %s2468_s15  ;;  %v1310_v12 = vrot.slane %v2142_v48, 1 }
  0xcc   : > { %v1349_v59 = vpop.permute.xlu1 %1348 }
  0xcd   : > { %v3102_v27 = vpop.permute.xlu0 %1138  ;;  %v1639_v3 = vsel %vm1498_vm6, %v1310_v12, %v3092_v24  ;;  %v1642_v21 = vsel %vm1498_vm6, %v1311_v41, %v1349_v59  ;;  %v1544_v24 = vsel %vm1540_vm8, %v1527_v63, %v3023_v1 }
  0xce   : > { %1272 = vrot.lane.b32.xlu1 %v1237_v52, %s2468_s15 }
  0xd0   : > { %v3105_v5 = vpop.permute.xlu1 %1132 }
  0xd1   : > { %v1435_v6 = vpop.permute.xlu0 %1434 }
  0xd2   : > { %1280 = vrot.lane.b32.xlu1 %v1265_v28, %s2468_s15  ;;  %v1650_v52 = vsel %vm1523_vm7, %v1627_v29, %v1435_v6  ;;  %s2397_s15 = scalar_lea.vmem %s3329_s12, 1024 }
  0xd3   : > { %p2398_p11 = scmp.ne.s32.totalorder %s3329_s12, %s2397_s15 }
  0xd4   : > { %v3108_v8 = vpop.permute.xlu1 %1140 }
  0xd5   : > { %v1443_v11 = vpop.permute.xlu0 %1442  ;;  %p2399_p12 = pnand %p2398_p11, %p2548_p5 }
  0xd6   : > { %v1658_v42 = vsel %vm1523_vm7, %v1639_v3, %v1443_v11 }
  0xd7   : > { %p2400_p13 = pneg %p2399_p12 }
  0xd8   : > { %v1437_v56 = vpop.permute.xlu1 %1436 }
  0xd9   : > { %v3110_v61 = vpop.permute.xlu0 %1170  ;;  %v1652_v54 = vsel %vm1523_vm7, %v1630_v57, %v1437_v56  ;;  %v2396_v56 = vld [vmem:[#allocation2 + $0x28] sm:$0xf] }
  0xda   : > { %v1516_v7 = vsel %vm1498_vm6, %v2396_v56, %v3082_v23  ;;  %v1542_v23 = vsel %vm1540_vm8, %v1525_v18, %v3026_v9  ;;  %v1550_v9 = vsel %vm1540_vm8, %v1533_v62, %v3036_v0 }
  0xdb   : > { %v1559_v46 = vsel %vm1557_vm9, %v1542_v23, %v3074_v13  ;;  %v1535_v11 = vsel %vm1523_vm7, %v1516_v7, %v3062_v39  ;;  %v771_v23 = vld [vmem:[#allocation2 + $0x18] sm:$0xe] }
  0xdc   : > { %v1445_v17 = vpop.permute.xlu1 %1444  ;;  %v1576_v1 = vsel %vm1574_vm10, %v1559_v46, %v3098_v51  ;;  %v2140_v46 = vcombine.low %v771_v23, %v3050_v38 }
  0xdd   : > { %v3112_v19 = vpop.permute.xlu0 %1178  ;;  %v1660_v22 = vsel %vm1523_vm7, %v1642_v21, %v1445_v17  ;;  %v1561_v17 = vsel %vm1557_vm9, %v1544_v24, %v3090_v16  ;;  %v1593_v36 = vsel %vm1591_vm11, %v1576_v1, %v3110_v61  ;;  %v1552_v16 = vsel %vm1540_vm8, %v1535_v11, %v3034_v10  ;;  %v772_v24 = vld [vmem:[#allocation2 + $0x20] sm:$0xe] }
  0xde   : > { %v1578_v35 = vsel %vm1574_vm10, %v1561_v17, %v3105_v5  ;;  %v1567_v5 = vsel %vm1557_vm9, %v1550_v9, %v3084_v25  ;;  %v1569_v61 = vsel %vm1557_vm9, %v1552_v16, %v3096_v49  ;;  %v2141_v11 = vcombine.low %v772_v24, %v3069_v4  ;;  %v775_v17 = vld [vmem:[#allocation2 + $0x38] sm:$0xe] }
  0xdf   : > { %v1586_v41 = vsel %vm1574_vm10, %v1569_v61, %v3108_v8 }
  0xe0   : > { %v1173_v31 = vpop.permute.xlu1 %1172 }
  0xe1   : > { %v1483_v34 = vpop.permute.xlu0 %1482  ;;  %v1595_v13 = vsel %vm1591_vm11, %v1578_v35, %v1173_v31  ;;  %v1584_v31 = vsel %vm1574_vm10, %v1567_v5, %v3102_v27  ;;  %v1308_v35 = vrot.slane %v2140_v46, 1 }
  0xe2   : > { %v1666_v30 = vsel %vm1540_vm8, %v1650_v52, %v1483_v34  ;;  %v1601_v10 = vsel %vm1591_vm11, %v1584_v31, %v3112_v19 }
  0xe4   : > { %v3118_v37 = vpop.permute.xlu1 %1180 }
  0xe5   : > { %v1491_v40 = vpop.permute.xlu0 %1490  ;;  %v1603_v43 = vsel %vm1591_vm11, %v1586_v41, %v3118_v37 }
  0xe6   : > { %v1674_v59 = vsel %vm1540_vm8, %v1658_v42, %v1491_v40 }
  0xe8   : > { %v1485_v55 = vpop.permute.xlu1 %1484 }
  0xe9   : > { %v1267_v28 = vpop.permute.xlu0 %1266  ;;  %v1668_v32 = vsel %vm1540_vm8, %v1652_v54, %v1485_v55 }
  0xea   : > { %v2172_v6 = vcombine.low %v1666_v30, %v1668_v32  ;;  %v1610_v0 = vsel %vm1608_vm12, %v1593_v36, %v1267_v28  ;;  %v2144_v36 = vcombine.low %v775_v17, %v3059_v53 }
  0xec   : > { %v1493_v44 = vpop.permute.xlu1 %1492  ;;  %2191 = vmatprep.mubr.msk.bf16.mxu0 %vm1557_vm9, %v2172_v6  ;;  %v1312_v5 = vrot.slane %v2144_v36, 1  ;;  %v1931_v36 = vld [vmem:[%s3278_s29] sm:$0xff] }
  0xed   : > { %v1275_v34 = vpop.permute.xlu0 %1274  ;;  %v1676_v48 = vsel %vm1540_vm8, %v1660_v22, %v1493_v44 }
  0xee   : > { %v2176_v33 = vcombine.low %v1674_v59, %v1676_v48  ;;  %v1618_v25 = vsel %vm1608_vm12, %v1601_v10, %v1275_v34 }
  0xf0   : > { %v1269_v40 = vpop.permute.xlu1 %1268  ;;  %2193 = vmatprep.mubr.msk.bf16.mxu1 %vm1557_vm9, %v2176_v33  ;;  %v776_v33 = vld [vmem:[#allocation2 + $0x40] sm:$0xe] }
  0xf1   : > { %v3170_v39 = vpop.permute.xlu0 %902  ;;  %v1612_v51 = vsel %vm1608_vm12, %v1595_v13, %v1269_v40  ;;  %v1309_v13 = vrot.slane %v2141_v11, 1  ;;  %v2145_v40 = vcombine.low %v776_v33, %v3080_v50 }
  0xf2   : > { %v2171_v12 = vcombine.low %v1610_v0, %v1612_v51  ;;  %v1507_v53 = vsel %vm1498_vm6, %v2919_v47, %v3170_v39 }
  0xf3   : > { %v1313_v38 = vrot.slane %v2145_v40, 1 }
  0xf4   : > { %v1277_v20 = vpop.permute.xlu1 %1276  ;;  %1873 = vmatmul.mubr.bf16.vlgmr.msra.gmra.mrb[0].mxu0 %v2171_v12 }
  0xf5   : > { %v911_v57 = vpop.permute.xlu0 %910  ;;  %v1620_v49 = vsel %vm1608_vm12, %v1603_v43, %v1277_v20 }
  0xf6   : > { %v2175_v29 = vcombine.low %v1618_v25, %v1620_v49  ;;  %v1519_v43 = vsel %vm1498_vm6, %v2939_v2, %v911_v57 }
  0xf8   : > { %v905_v60 = vpop.permute.xlu1 %904  ;;  %1889 = vmatmul.mubr.bf16.vlgmr.msra.gmra.mrb[0].mxu1 %v2175_v29 }
  0xf9   : > { %v951_v27 = vpop.permute.xlu0 %950  ;;  %v1510_v20 = vsel %vm1498_vm6, %v2954_v15, %v905_v60 }
  0xfa   : > { %v1529_v29 = vsel %vm1523_vm7, %v1507_v53, %v951_v27 }
  0xfc   : > { %v3190_v45 = vpop.permute.xlu1 %912 }
  0xfd   : > { %v3192_v8 = vpop.permute.xlu0 %958 }
 0x100   : > { %v953_v52 = vpop.permute.xlu1 %952 }
 0x101   : > { %v991_v19 = vpop.permute.xlu0 %990 }
 0x102   : > { %v1546_v2 = vsel %vm1540_vm8, %v1529_v29, %v991_v19  ;;  %v1537_v19 = vsel %vm1523_vm7, %v1519_v43, %v3192_v8 }
 0x104   : > { %v3194_v54 = vpop.permute.xlu1 %960 }
 0x105   : > { %v3196_v37 = vpop.permute.xlu0 %998 }
 0x108   : > { %v993_v55 = vpop.permute.xlu1 %992 }
 0x109   : > { %v1087_v28 = vpop.permute.xlu0 %1086 }
 0x10a   : > { %v1563_v27 = vsel %vm1557_vm9, %v1546_v2, %v1087_v28 }
 0x10c   : > { %v3198_v14 = vpop.permute.xlu1 %1000 }
 0x10d   : > { %v3200_v58 = vpop.permute.xlu0 %1094 }
 0x110   : > { %v1089_v30 = vpop.permute.xlu1 %1088 }
 0x111   : > { %v1343_v32 = vpop.permute.xlu0 %1342 }
 0x112   : > { %v1633_v51 = vsel %vm1498_vm6, %v1308_v35, %v1343_v32  ;;  %v1531_v32 = vsel %vm1523_vm7, %v1510_v20, %v953_v52 }
 0x113   : > { %v1548_v15 = vsel %vm1540_vm8, %v1531_v32, %v993_v55 }
 0x114   : > { %v3202_v18 = vpop.permute.xlu1 %1096  ;;  %v1565_v52 = vsel %vm1557_vm9, %v1548_v15, %v1089_v30 }
 0x115   : > { %v1351_v63 = vpop.permute.xlu0 %1350 }
 0x116   : > { %v1645_v25 = vsel %vm1498_vm6, %v1312_v5, %v1351_v63  ;;  %v1932_v5 = vld [vmem:[%s3278_s29 + $0x8] sm:$0xff] }
 0x118   : > { %v1345_v6 = vpop.permute.xlu1 %1344 }
 0x119   : > { %v1135_v56 = vpop.permute.xlu0 %1134  ;;  %v1636_v61 = vsel %vm1498_vm6, %v1309_v13, %v1345_v6 }
 0x11c   : > { %v1353_v7 = vpop.permute.xlu1 %1352 }
 0x11d   : > { %v3204_v3 = vpop.permute.xlu0 %1142  ;;  %v1648_v49 = vsel %vm1498_vm6, %v1313_v38, %v1353_v7  ;;  %v1522_v7 = vsel %vm1498_vm6, %v2962_v26, %v3190_v45  ;;  %v1554_v26 = vsel %vm1540_vm8, %v1537_v19, %v3196_v37 }
 0x11e   : > { %v1539_v55 = vsel %vm1523_vm7, %v1522_v7, %v3194_v54  ;;  %v1571_v54 = vsel %vm1557_vm9, %v1554_v26, %v3200_v58  ;;  %v1937_v26 = vld [vmem:[%s3278_s29 + $0x30] sm:$0xff] }
 0x11f   : > { %v1556_v45 = vsel %vm1540_vm8, %v1539_v55, %v3198_v14  ;;  %v1588_v37 = vsel %vm1574_vm10, %v1571_v54, %v3204_v3  ;;  %v3272_v3 = vld [vmem:[%s3382_s4] ss:$0 sm:$0xff] }
 0x120   : > { %v1137_v21 = vpop.permute.xlu1 %1136 }
 0x121   : > { %v1439_v62 = vpop.permute.xlu0 %1438 }
 0x122   : > { %v1654_v4 = vsel %vm1523_vm7, %v1633_v51, %v1439_v62 }
 0x124   : > { %v3206_v42 = vpop.permute.xlu1 %1144 }
 0x125   : > { %v1447_v22 = vpop.permute.xlu0 %1446 }
 0x126   : > { %v1662_v47 = vsel %vm1523_vm7, %v1645_v25, %v1447_v22  ;;  %v1580_v22 = vsel %vm1574_vm10, %v1563_v27, %v1135_v56 }
 0x128   : > { %v1441_v44 = vpop.permute.xlu1 %1440 }
 0x129   : > { %v1175_v34 = vpop.permute.xlu0 %1174  ;;  %v1656_v12 = vsel %vm1523_vm7, %v1636_v61, %v1441_v44  ;;  %v1582_v44 = vsel %vm1574_vm10, %v1565_v52, %v1137_v21  ;;  %v1573_v21 = vsel %vm1557_vm9, %v1556_v45, %v3202_v18 }
 0x12a   : > { %v1597_v23 = vsel %vm1591_vm11, %v1580_v22, %v1175_v34  ;;  %v1590_v14 = vsel %vm1574_vm10, %v1573_v21, %v3206_v42  ;;  %v1934_v22 = vld [vmem:[%s3278_s29 + $0x18] sm:$0xff] }
 0x12c   : > { %v1449_v59 = vpop.permute.xlu1 %1448 }
 0x12d   : > { %v1183_v48 = vpop.permute.xlu0 %1182  ;;  %v1664_v39 = vsel %vm1523_vm7, %v1648_v49, %v1449_v59  ;;  %v1936_v49 = vld [vmem:[%s3278_s29 + $0x28] sm:$0xff] }
 0x12e   : > { %v1605_v59 = vsel %vm1591_vm11, %v1588_v37, %v1183_v48  ;;  %v3280_v48 = vstv %s1905_s18  ;;  %s2469_s18 = smov [#allocation5]  }
 0x12f   : > { %s2401_s19 = sshll.u32 %s2469_s18, 4  ;;  %s2402_s19 = int_to_ptr.vmem [resolvable:$false] %s2401_s19 }
 0x130   : > { %v1177_v9 = vpop.permute.xlu1 %1176  ;;  %s2403_s20 = scalar_lea.vmem %s2402_s19, 2048  ;;  %p2404_p0 = scmp.lt.s32.totalorder %s3329_s12, %s2402_s19 }
 0x131   : > { %v1487_v1 = vpop.permute.xlu0 %1486  ;;  %v1599_v28 = vsel %vm1591_vm11, %v1582_v44, %v1177_v9  ;;  %p2405_p1 = scmp.lt.s32.totalorder %s2403_s20, %s2397_s15 }
 0x132   : > { %v1670_v41 = vsel %vm1540_vm8, %v1654_v4, %v1487_v1 }
 0x133   : > { %p2406_p2 = por %p2405_p1, %p2404_p0 }
 0x134   : > { %v1185_v16 = vpop.permute.xlu1 %1184 }
 0x135   : > { %v1495_v0 = vpop.permute.xlu0 %1494  ;;  %v1607_v46 = vsel %vm1591_vm11, %v1590_v14, %v1185_v16  ;;  %p2407_p3 = pnand %p2406_p2, %p2400_p13 }
 0x136   : > { %v1678_v57 = vsel %vm1540_vm8, %v1662_v47, %v1495_v0 }
 0x138   : > { %v1489_v31 = vpop.permute.xlu1 %1488 }
 0x139   : > { %v1672_v50 = vsel %vm1540_vm8, %v1656_v12, %v1489_v31  ;;  %v1271_v6 = vpop.permute.xlu0 %1270 }
 0x13a   : > { %v2174_v10 = vcombine.low %v1670_v41, %v1672_v50  ;;  %v1614_v56 = vsel %vm1608_vm12, %v1597_v23, %v1271_v6  ;;  %v1935_v41 = vld [vmem:[%s3278_s29 + $0x20] sm:$0xff] }
 0x13c   : > { %v1497_v62 = vpop.permute.xlu1 %1496  ;;  %2192 = vmatprep.mubr.msk.bf16.mxu0 %vm1557_vm9, %v2174_v10 }
 0x13d   : > { %v1680_v60 = vsel %vm1540_vm8, %v1664_v39, %v1497_v62  ;;  %v1279_v34 = vpop.permute.xlu0 %1278 }
 0x13e   : > { %v2178_v63 = vcombine.low %v1678_v57, %v1680_v60  ;;  %v1622_v58 = vsel %vm1608_vm12, %v1605_v59, %v1279_v34  ;;  %v1933_v57 = vld [vmem:[%s3278_s29 + $0x10] sm:$0xff]  ;;  %v1938_v34 = vld [vmem:[%s3278_s29 + $0x38] sm:$0xff] }
 0x140   : > { %v1273_v30 = vpop.permute.xlu1 %1272  ;;  %2194 = vmatprep.mubr.msk.bf16.mxu1 %vm1557_vm9, %v2178_v63 }
 0x141   : > { %v1616_v8 = vsel %vm1608_vm12, %v1599_v28, %v1273_v30 }
 0x142   : > { %v2173_v24 = vcombine.low %v1614_v56, %v1616_v8 }
 0x144   : > { %v1281_v11 = vpop.permute.xlu1 %1280  ;;  %1881 = vmatmul.mubr.bf16.gmra.mrb[4].mxu0 %v2173_v24 }
 0x145   : > { %v1624_v18 = vsel %vm1608_vm12, %v1607_v46, %v1281_v11 }
 0x146   : > { %v2177_v17 = vcombine.low %v1622_v58, %v1624_v18 }
 0x148   : > { %1897 = vmatmul.mubr.bf16.gmra.mrb[4].mxu1 %v2177_v17 }
 0x1c7   : > { %v1874_v42 = vpop.f32.mrb[0].mxu0 }
 0x1c8   : > { %v1875_v33 = vadd.f32 %v3272_v3, %v1874_v42  ;;  %v1876_v9 = vpop.f32.mrb[1].mxu0 }
 0x1c9   : > { %v1877_v1 = vpop.f32.mrb[2].mxu0 }
 0x1ca   : > { %vm1906_vm13 = vcmp.ge.f32.partialorder %v1875_v33, 0.0  ;;  %v1915_v35 = vmul.f32 %v3280_v48, %v1875_v33  ;;  %v1878_v13 = vadd.f32 %v3272_v3, %v1877_v1  ;;  %v1879_v40 = vpop.f32.mrb[3].mxu0 }
 0x1cb   : > { %v1890_v16 = vpop.f32.mrb[0].mxu1 }
 0x1cc   : > { %v1923_v0 = vsel %vm1906_vm13, %v1875_v33, %v1915_v35  ;;  %vm1907_vm14 = vcmp.ge.f32.partialorder %v1878_v13, 0.0  ;;  %v1916_v51 = vmul.f32 %v3280_v48, %v1878_v13  ;;  %v1891_v61 = vadd.f32 %v3272_v3, %v1890_v16  ;;  %v1892_v38 = vpop.f32.mrb[1].mxu1 }
 0x1cd   : > { %v1939_v4 = vadd.f32 %v1931_v36, %v1923_v0  ;;  %v1893_v12 = vpop.f32.mrb[2].mxu1 }
 0x1ce   : > { %v1924_v31 = vsel %vm1907_vm14, %v1878_v13, %v1916_v51  ;;  %vm1910_vm15 = vcmp.ge.f32.partialorder %v1891_v61, 0.0  ;;  %v1919_v53 = vmul.f32 %v3280_v48, %v1891_v61  ;;  %v1894_v50 = vadd.f32 %v3272_v3, %v1893_v12  ;;  %v1895_v10 = vpop.f32.mrb[3].mxu1 }
 0x1cf   : > { %1947 = vst.msk [vmem:[%s3294_s30] sm:$0xff] %vm1498_vm6, %v1939_v4  ;;  %v1940_v43 = vadd.f32 %v1932_v5, %v1924_v31 }
 0x1d0   : > { %v1927_v20 = vsel %vm1910_vm15, %v1891_v61, %v1919_v53  ;;  %vm1911_vm0 = vcmp.ge.f32.partialorder %v1894_v50, 0.0  ;;  %v1920_v25 = vmul.f32 %v3280_v48, %v1894_v50 }
 0x1d1   : > { %1948 = vst.msk [vmem:[%s3294_s30 + $0x8] sm:$0xff] %vm1498_vm6, %v1940_v43  ;;  %v1943_v29 = vadd.f32 %v1935_v41, %v1927_v20 }
 0x1d2   : > { %v1928_v32 = vsel %vm1911_vm0, %v1894_v50, %v1920_v25 }
 0x1d3   : > { %1951 = vst.msk [vmem:[%s3294_s30 + $0x20] sm:$0xff] %vm1498_vm6, %v1943_v29  ;;  %v1944_v47 = vadd.f32 %v1936_v49, %v1928_v32 }
 0x1d5   : > { %1952 = vst.msk [vmem:[%s3294_s30 + $0x28] sm:$0xff] %vm1498_vm6, %v1944_v47 }
 0x217   : > { %v1882_v39 = vpop.f32.mrb[4].mxu0 }
 0x218   : > { %v1883_v6 = vadd.f32 %v3272_v3, %v1882_v39  ;;  %v1884_v62 = vpop.f32.mrb[5].mxu0 }
 0x219   : > { %v1885_v2 = vpop.f32.mrb[6].mxu0 }
 0x21a   : > { %vm1908_vm1 = vcmp.ge.f32.partialorder %v1883_v6, 0.0  ;;  %v1917_v15 = vmul.f32 %v3280_v48, %v1883_v6  ;;  %v1886_v60 = vadd.f32 %v3272_v3, %v1885_v2  ;;  %v1887_v27 = vpop.f32.mrb[7].mxu0 }
 0x21b   : > { %v1898_v52 = vpop.f32.mrb[4].mxu1 }
 0x21c   : > { %v1925_v63 = vsel %vm1908_vm1, %v1883_v6, %v1917_v15  ;;  %vm1909_vm2 = vcmp.ge.f32.partialorder %v1886_v60, 0.0  ;;  %v1918_v7 = vmul.f32 %v3280_v48, %v1886_v60  ;;  %v1899_v44 = vadd.f32 %v3272_v3, %v1898_v52  ;;  %v1900_v19 = vpop.f32.mrb[5].mxu1 }
 0x21d   : > { %v1941_v55 = vadd.f32 %v1933_v57, %v1925_v63  ;;  %v1901_v23 = vpop.f32.mrb[6].mxu1 }
 0x21e   : > { %v1926_v28 = vsel %vm1909_vm2, %v1886_v60, %v1918_v7  ;;  %vm1912_vm3 = vcmp.ge.f32.partialorder %v1899_v44, 0.0  ;;  %v1921_v30 = vmul.f32 %v3280_v48, %v1899_v44  ;;  %v1902_v45 = vadd.f32 %v3272_v3, %v1901_v23  ;;  %v1903_v56 = vpop.f32.mrb[7].mxu1 }
 0x21f   : > { %1949 = vst.msk [vmem:[%s3294_s30 + $0x10] sm:$0xff] %vm1498_vm6, %v1941_v55  ;;  %v1942_v8 = vadd.f32 %v1934_v22, %v1926_v28 }
 0x220   : > { %v1929_v54 = vsel %vm1912_vm3, %v1899_v44, %v1921_v30  ;;  %vm1913_vm4 = vcmp.ge.f32.partialorder %v1902_v45, 0.0  ;;  %v1922_v21 = vmul.f32 %v3280_v48, %v1902_v45 }
 0x221   : > { %1950 = vst.msk [vmem:[%s3294_s30 + $0x18] sm:$0xff] %vm1498_vm6, %v1942_v8  ;;  %v1945_v24 = vadd.f32 %v1937_v26, %v1929_v54 }
 0x222   : > { %v1930_v37 = vsel %vm1913_vm4, %v1902_v45, %v1922_v21 }
 0x223   : > { %1953 = vst.msk [vmem:[%s3294_s30 + $0x30] sm:$0xff] %vm1498_vm6, %v1945_v24  ;;  %v1946_v14 = vadd.f32 %v1938_v34, %v1930_v37 }
 0x225   : > { %1954 = vst.msk [vmem:[%s3294_s30 + $0x38] sm:$0xff] %vm1498_vm6, %v1946_v14 }
 0x226   : > { %2410 = shalt.err (!%p2407_p3)
}
 0x227   : > { %s2411_s27 = scalar_lea.hbm %s3327_s17, 1024  ;;  %s2415_s21 = scalar_lea.hbm %s3384_s6, 2048 }
 0x228   : > { %p2412_p4 = scmp.ne.s32.totalorder %s3327_s17, %s2411_s27  ;;  %p2416_p9 = scmp.lt.u32.totalorder %s3327_s17, %s3384_s6 }
 0x229   : > { %p2417_p10 = scmp.lt.u32.totalorder %s2415_s21, %s2411_s27  ;;  %p2419_p12 = scmp.lt.u32.totalorder %s2411_s27, %s3327_s17 }
 0x22a   : > { %p2413_p7 = pnand %p2412_p4, %p2548_p5 }
 0x22b   : > { %p2418_p11 = por %p2417_p10, %p2416_p9 }
 0x22c   : > { %p2414_p8 = pneg %p2413_p7 }
 0x22d   : > { %p2420_p13 = por %p2419_p12, %p2418_p11 }
 0x22f   : > { %p2421_p0 = pnand %p2420_p13, %p2414_p8 }
 0x231   : > { %2424 = shalt.err (!%p2421_p0)
}
 0x232   : > { %s2470_s30 = smov 128   ;;  %s2471_s11 = smov 8  }
 0x233   : > { %2244 = dma.vmem_to_hbm [thread:$0]  (%p2548_p5), %s3329_s12, 1024, %s3327_s17, %s3337_s5, %s2470_s30, %s2470_s30, %s2471_s11  }
 0x234 PF: > { %p2250_p1 = scmp.ge.s32.totalorder %s2459_s26, 2  ;;  %s1984_s13 = sand.u32 1, %s2447_s23  }
 0x235   : > { %s1985_s14 = scalar_lea.sflag [#allocation6], %s1984_s13 }
 0x236   : > { %p2247_p2 = pnand %p2250_p1, %p2552_p6 }
 0x238   : > { %2442 = dma.done.wait (!%p2247_p2), %s1985_s14, 1024  }
 0x239   : > { %2444 = vsyncadd (!%p2247_p2), %s1985_s14, 4294966272  ;;  %p17_p3 = scmp.ge.s32.totalorder %s2535_s28, 4   ;;  %s3391_s23 = smov %s2451_s24 }
 0x23a   : > { %s3392_s24 = smov %s2455_s25  ;;  %s3393_s25 = smov %s2546_s7 }
 0x23b   : > { %s3394_s26 = smov %s2535_s28  ;;  %19 = sbr.rel (!%p17_p3) target bundleno = 5 (0x5), region = 87 }
 0x242   :  { %1990 = vsyncpa [#allocation6], 1 }
 0x243   :  { %1992 = vsyncpa [#allocation6 + $0x1], 1 }

// kernel: encoder_mdcblock1_iter1.6
= control target key start
LH: loop header
LB: loop body
LE: loop exit
PB: predicated region body
PF: predicated region fallthrough
CT: control target
= control target key end

     0   :  { %s5526_s23 = smov 0   ;;  %s7884_s0 = inlined_call_operand.vmem [shape: f32[2,16,2,16,8], index: 0, kind: input, shape index: {}]   ;;  %s7885_s1 = inlined_call_operand.vmem [shape: f32[2,16,2,16,8], index: 1, kind: input, shape index: {}]   ;;  %s7886_s2 = inlined_call_operand.vmem [shape: f32[2,16,16,8], index: 2, kind: input, shape index: {}]   ;;  %s7887_s3 = inlined_call_operand.vmem [shape: bf16[96,8], index: 3, kind: input, shape index: {}]   ;;  %s7888_s4 = inlined_call_operand.vmem [shape: f32[1,8], index: 4, kind: input, shape index: {}]   ;;  %s7889_s5 = inlined_call_operand.<no memory space> [shape: f32[1], index: 5, kind: input, shape index: {}]   ;;  %s7890_s6 = inlined_call_operand.vmem [shape: f32[2,16,16,8], index: 6, kind: output, shape index: {}]  }
   0x1   :  { %11 = sst [smem:[#allocation4]] %s7889_s5 }
   0x2 LB: > { %s4815_s24 = sadd.s32 4294967295, %s5474_s23   ;;  %p4819_p0 = scmp.ge.s32.totalorder %s5474_s23, 1  ;;  %s5474_s23 = sphi %s5526_s23, %s17_s23  }
   0x3   : > { %p233_p1 = scmp.lt.s32.totalorder %s5474_s23, 3 }
   0x5   : > { %p234_p2 = pnand %p4819_p0, %p233_p1 }
   0x7   : > { %237 = sbr.rel (%p234_p2) target bundleno = 831 (0x33f), region = 44 }
   0xe   : > { %vm7906_vm0 = vcmask 60416   ;;  %vm521_vm1 = vcmask 57344   ;;  %v5476_v0 = vmov 0   ;;  %p273_p3 = scmp.lt.s32.totalorder %s4815_s24, 1  ;;  %vm2313_vm2 = vcmask 1046528   ;;  %s5477_s7 = smov 16  }
   0xf   : > { %519 = vst.msk [vmem:[#allocation2] sm:$0xf] %vm7906_vm0, %v5476_v0  ;;  %520 = vst.msk [vmem:[#allocation2 + $0x4] sm:$0xf] %vm7906_vm0, %v5476_v0  ;;  %vm2040_vm3 = vsmask.f32 7424 }
  0x10   : > { %522 = vst.msk [vmem:[#allocation2 + $0x8] sm:$0x1] %vm521_vm1, %v5476_v0  ;;  %525 = vst.msk [vmem:[#allocation2 + $0x14] sm:$0x1] %vm521_vm1, %v5476_v0  ;;  %s8061_s24 = smov (!%p273_p3, %s4815_s24), 1  ;;  %s5478_s8 = smov 8  }
  0x11   : > { %523 = vst.msk [vmem:[#allocation2 + $0xc] sm:$0xf] %vm7906_vm0, %v5476_v0  ;;  %524 = vst.msk [vmem:[#allocation2 + $0x10] sm:$0xf] %vm7906_vm0, %v5476_v0  ;;  %s5109_s5 = sshll.u32 %s8061_s24, 9  ;;  %s5479_s9 = smov 24  }
  0x12   : > { %526 = vst.msk [vmem:[#allocation2 + $0x18] sm:$0xf] %vm7906_vm0, %v5476_v0  ;;  %527 = vst.msk [vmem:[#allocation2 + $0x1c] sm:$0xf] %vm7906_vm0, %v5476_v0  ;;  %s5748_s27 = scalar_lea.vmem %s7884_s0, %s5109_s5  ;;  %s5753_s30 = scalar_lea.vmem %s7885_s1, %s5109_s5  ;;  %vm702_vm4 = vsmask.f32 256 }
  0x13   : > { %528 = vst.msk [vmem:[#allocation2 + $0x20] sm:$0x1] %vm521_vm1, %v5476_v0  ;;  %531 = vst.msk [vmem:[#allocation2 + $0x2c] sm:$0x1] %vm521_vm1, %v5476_v0  ;;  %v296_v1 = vld [vmem:[%s5748_s27 + $0x10] sm:$0xff]  ;;  %v297_v2 = vld [vmem:[%s5748_s27 + $0x18] sm:$0xff] }
  0x14   : > { %529 = vst.msk [vmem:[#allocation2 + $0x24] sm:$0xf] %vm7906_vm0, %v5476_v0  ;;  %530 = vst.msk [vmem:[#allocation2 + $0x28] sm:$0xf] %vm7906_vm0, %v5476_v0  ;;  %v360_v3 = vld [vmem:[%s5753_s30 + $0x10] sm:$0xff]  ;;  %v361_v10 = vld [vmem:[%s5753_s30 + $0x18] sm:$0xff] }
  0x15   : > { %532 = vst.msk [vmem:[#allocation2 + $0x30] sm:$0xf] %vm7906_vm0, %v5476_v0  ;;  %533 = vst.msk [vmem:[#allocation2 + $0x34] sm:$0xf] %vm7906_vm0, %v5476_v0  ;;  %v424_v6 = vsub.f32 %v296_v1, %v360_v3  ;;  %v425_v12 = vsub.f32 %v297_v2, %v361_v10  ;;  %vm703_vm5 = vsmask.f32 4368 }
  0x16   : > { %534 = vst.msk [vmem:[#allocation2 + $0x38] sm:$0x1] %vm521_vm1, %v5476_v0  ;;  %537 = vst.msk [vmem:[#allocation2 + $0x44] sm:$0x1] %vm521_vm1, %v5476_v0  ;;  %v1656_v4 = vld [vmem:[#allocation2 + $0x4] sm:$0xf] }
  0x17   : > { %535 = vst.msk [vmem:[#allocation2 + $0x3c] sm:$0xf] %vm7906_vm0, %v5476_v0  ;;  %536 = vst.msk [vmem:[#allocation2 + $0x40] sm:$0xf] %vm7906_vm0, %v5476_v0  ;;  %v1703_v5 = vld [vmem:[#allocation2] sm:$0xe]  ;;  %v5113_v13 = vpack.c.bf16 %v424_v6, %v424_v6  ;;  %v5114_v21 = vpack.c.bf16 %v425_v12, %v425_v12 }
  0x18   : > { %538 = vst.msk [vmem:[#allocation2 + $0x48] sm:$0xf] %vm7906_vm0, %v5476_v0  ;;  %539 = vst.msk [vmem:[#allocation2 + $0x4c] sm:$0xf] %vm7906_vm0, %v5476_v0  ;;  %v4924_v8 = vcombine.low %v1703_v5, %v1656_v4  ;;  %v1655_v9 = vld [vmem:[#allocation2] sm:$0xf] }
  0x19   : > { %540 = vst.msk [vmem:[#allocation2 + $0x50] sm:$0x1] %vm521_vm1, %v5476_v0  ;;  %543 = vst.msk [vmem:[#allocation2 + $0x5c] sm:$0x1] %vm521_vm1, %v5476_v0  ;;  %v5759_v11 = vcombine.low %v1655_v9, %v1656_v4  ;;  %v300_v14 = vld [vmem:[%s5748_s27 + $0x30] sm:$0xff]  ;;  %v706_v22 = vshrl.u32 %v5113_v13, 16 }
  0x1a   : > { %541 = vst.msk [vmem:[#allocation2 + $0x54] sm:$0xf] %vm7906_vm0, %v5476_v0  ;;  %542 = vst.msk [vmem:[#allocation2 + $0x58] sm:$0xf] %vm7906_vm0, %v5476_v0  ;;  %v2314_v15 = vrot.slane %v4924_v8, 1  ;;  %v364_v18 = vld [vmem:[%s5753_s30 + $0x30] sm:$0xff] }
  0x1b   : > { %544 = vst.msk [vmem:[#allocation2 + $0x60] sm:$0xf] %vm7906_vm0, %v5476_v0  ;;  %545 = vst.msk [vmem:[#allocation2 + $0x64] sm:$0xf] %vm7906_vm0, %v5476_v0  ;;  %vm1027_vm6 = vsmask.f32 7938  ;;  %v428_v29 = vsub.f32 %v300_v14, %v364_v18 }
  0x1c   : > { %546 = vst.msk [vmem:[#allocation2 + $0x68] sm:$0x1] %vm521_vm1, %v5476_v0  ;;  %549 = vst.msk [vmem:[#allocation2 + $0x74] sm:$0x1] %vm521_vm1, %v5476_v0  ;;  %v2042_v19 = vshrl.u32 %v5759_v11, 16  ;;  %v2044_v20 = vshll.u32 %v5759_v11, 16 }
  0x1d   : > { %547 = vst.msk [vmem:[#allocation2 + $0x6c] sm:$0xf] %vm7906_vm0, %v5476_v0  ;;  %548 = vst.msk [vmem:[#allocation2 + $0x70] sm:$0xf] %vm7906_vm0, %v5476_v0  ;;  %v301_v23 = vld [vmem:[%s5748_s27 + $0x38] sm:$0xff]  ;;  %v304_v25 = vld [vmem:[%s5748_s27 + $0x50] sm:$0xff]  ;;  %v5115_v40 = vpack.c.bf16 %v428_v29, %v428_v29 }
  0x1e   : > { %550 = vst.msk [vmem:[#allocation2 + $0x78] sm:$0xf] %vm7906_vm0, %v5476_v0  ;;  %551 = vst.msk [vmem:[#allocation2 + $0x7c] sm:$0xf] %vm7906_vm0, %v5476_v0  ;;  %v365_v24 = vld [vmem:[%s5753_s30 + $0x38] sm:$0xff]  ;;  %v709_v28 = vshll.u32 %v5113_v13, 16 }
  0x1f   : > { %552 = vst.msk [vmem:[#allocation2 + $0x80] sm:$0x1] %vm521_vm1, %v5476_v0  ;;  %555 = vst.msk [vmem:[#allocation2 + $0x8c] sm:$0x1] %vm521_vm1, %v5476_v0  ;;  %v305_v30 = vld [vmem:[%s5748_s27 + $0x58] sm:$0xff]  ;;  %v368_v31 = vld [vmem:[%s5753_s30 + $0x50] sm:$0xff]  ;;  %v429_v39 = vsub.f32 %v301_v23, %v365_v24 }
  0x20   : > { %553 = vst.msk [vmem:[#allocation2 + $0x84] sm:$0xf] %vm7906_vm0, %v5476_v0  ;;  %554 = vst.msk [vmem:[#allocation2 + $0x88] sm:$0xf] %vm7906_vm0, %v5476_v0  ;;  %v2046_v32 = vrot.slane %v2044_v20, 1  ;;  %v708_v33 = vrot.slane %v706_v22, 7  ;;  %v432_v41 = vsub.f32 %v304_v25, %v368_v31 }
  0x21   : > { %556 = vst.msk [vmem:[#allocation2 + $0x90] sm:$0xf] %vm7906_vm0, %v5476_v0  ;;  %557 = vst.msk [vmem:[#allocation2 + $0x94] sm:$0xf] %vm7906_vm0, %v5476_v0  ;;  %v714_v34 = vshrl.u32 %v5114_v21, 16  ;;  %v717_v35 = vshll.u32 %v5114_v21, 16  ;;  %v5116_v50 = vpack.c.bf16 %v429_v39, %v429_v39 }
  0x22   : > { %558 = vst.msk [vmem:[#allocation2 + $0x98] sm:$0x1] %vm521_vm1, %v5476_v0  ;;  %561 = vst.msk [vmem:[#allocation2 + $0xa4] sm:$0x1] %vm521_vm1, %v5476_v0  ;;  %v369_v36 = vld [vmem:[%s5753_s30 + $0x58] sm:$0xff]  ;;  %v2047_v43 = vor.u32 %v2046_v32, %v2042_v19  ;;  %v711_v44 = vor.u32 %v709_v28, %v708_v33  ;;  %v712_v45 = vrot.slane %v708_v33, 4  ;;  %v5117_v53 = vpack.c.bf16 %v432_v41, %v432_v41 }
  0x23   : > { %559 = vst.msk [vmem:[#allocation2 + $0x9c] sm:$0xf] %vm7906_vm0, %v5476_v0  ;;  %560 = vst.msk [vmem:[#allocation2 + $0xa0] sm:$0xf] %vm7906_vm0, %v5476_v0  ;;  %v1029_v38 = vld [vmem:[#allocation2 + $0xc] sm:$0xf]  ;;  %v433_v42 = vsub.f32 %v305_v30, %v369_v36 }
  0x24   : > { %562 = vst.msk [vmem:[#allocation2 + $0xa8] sm:$0xf] %vm7906_vm0, %v5476_v0  ;;  %563 = vst.msk [vmem:[#allocation2 + $0xac] sm:$0xf] %vm7906_vm0, %v5476_v0  ;;  %v716_v46 = vrot.slane %v714_v34, 7  ;;  %v723_v51 = vshrl.u32 %v5115_v40, 16 }
  0x25   : > { %564 = vst.msk [vmem:[#allocation2 + $0xb0] sm:$0x1] %vm521_vm1, %v5476_v0  ;;  %567 = vst.msk [vmem:[#allocation2 + $0xbc] sm:$0x1] %vm521_vm1, %v5476_v0  ;;  %v1035_v49 = vld [vmem:[#allocation2 + $0x14] sm:$0x1]  ;;  %v5118_v62 = vpack.c.bf16 %v433_v42, %v433_v42 }
  0x26   : > { %565 = vst.msk [vmem:[#allocation2 + $0xb4] sm:$0xf] %vm7906_vm0, %v5476_v0  ;;  %566 = vst.msk [vmem:[#allocation2 + $0xb8] sm:$0xf] %vm7906_vm0, %v5476_v0  ;;  %v726_v52 = vshll.u32 %v5115_v40, 16  ;;  %v719_v55 = vor.u32 %v717_v35, %v716_v46  ;;  %v721_v56 = vrot.slane %v716_v46, 4 }
  0x27   : > { %568 = vst.msk [vmem:[#allocation2 + $0xc0] sm:$0xf] %vm7906_vm0, %v5476_v0  ;;  %569 = vst.msk [vmem:[#allocation2 + $0xc4] sm:$0xf] %vm7906_vm0, %v5476_v0  ;;  %v308_v58 = vld [vmem:[%s5748_s27 + $0x70] sm:$0xff]  ;;  %v725_v59 = vrot.slane %v723_v51, 7 }
  0x28   : > { %570 = vst.msk [vmem:[#allocation2 + $0xc8] sm:$0x1] %vm521_vm1, %v5476_v0  ;;  %573 = vst.msk [vmem:[#allocation3 + $0x8] sm:$0x1] %vm521_vm1, %v5476_v0  ;;  %v731_v60 = vshrl.u32 %v5116_v50, 16  ;;  %v734_v61 = vshll.u32 %v5116_v50, 16 }
  0x29   : > { %571 = vst.msk [vmem:[#allocation3] sm:$0xf] %vm7906_vm0, %v5476_v0  ;;  %572 = vst.msk [vmem:[#allocation3 + $0x4] sm:$0xf] %vm7906_vm0, %v5476_v0  ;;  %v309_v63 = vld [vmem:[%s5748_s27 + $0x78] sm:$0xff]  ;;  %v740_v5 = vshrl.u32 %v5117_v53, 16 }
  0x2a   : > { %574 = vst.msk [vmem:[#allocation3 + $0xc] sm:$0xf] %vm7906_vm0, %v5476_v0  ;;  %575 = vst.msk [vmem:[#allocation3 + $0x10] sm:$0xf] %vm7906_vm0, %v5476_v0  ;;  %v373_v1 = vld [vmem:[%s5753_s30 + $0x78] sm:$0xff]  ;;  %v743_v6 = vshll.u32 %v5117_v53, 16 }
  0x2b   : > { %576 = vst.msk [vmem:[#allocation3 + $0x14] sm:$0x1] %vm521_vm1, %v5476_v0  ;;  %579 = vst.msk [vmem:[#allocation3 + $0x20] sm:$0x1] %vm521_vm1, %v5476_v0  ;;  %v1038_v4 = vld [vmem:[#allocation2 + $0x18] sm:$0xf] }
  0x2c   : > { %577 = vst.msk [vmem:[#allocation3 + $0x18] sm:$0xf] %vm7906_vm0, %v5476_v0  ;;  %578 = vst.msk [vmem:[#allocation3 + $0x1c] sm:$0xf] %vm7906_vm0, %v5476_v0  ;;  %v729_v8 = vrot.slane %v725_v59, 4  ;;  %v733_v9 = vrot.slane %v731_v60, 7 }
  0x2d   : > { %580 = vst.msk [vmem:[#allocation3 + $0x24] sm:$0xf] %vm7906_vm0, %v5476_v0  ;;  %581 = vst.msk [vmem:[#allocation3 + $0x28] sm:$0xf] %vm7906_vm0, %v5476_v0  ;;  %v748_v10 = vshrl.u32 %v5118_v62, 16  ;;  %v742_v13 = vrot.slane %v740_v5, 7 }
  0x2e   : > { %582 = vst.msk [vmem:[#allocation3 + $0x2c] sm:$0x1] %vm521_vm1, %v5476_v0  ;;  %585 = vst.msk [vmem:[#allocation3 + $0x38] sm:$0x1] %vm521_vm1, %v5476_v0  ;;  %v1042_v12 = vld [vmem:[#allocation2 + $0x20] sm:$0x1]  ;;  %v736_v18 = vor.u32 %v734_v61, %v733_v9 }
  0x2f   : > { %583 = vst.msk [vmem:[#allocation3 + $0x30] sm:$0xf] %vm7906_vm0, %v5476_v0  ;;  %584 = vst.msk [vmem:[#allocation3 + $0x34] sm:$0xf] %vm7906_vm0, %v5476_v0  ;;  %v751_v14 = vshll.u32 %v5118_v62, 16  ;;  %v738_v19 = vrot.slane %v733_v9, 4  ;;  %v745_v25 = vor.u32 %v743_v6, %v742_v13 }
  0x30   : > { %586 = vst.msk [vmem:[#allocation3 + $0x3c] sm:$0xf] %vm7906_vm0, %v5476_v0  ;;  %587 = vst.msk [vmem:[#allocation3 + $0x40] sm:$0xf] %vm7906_vm0, %v5476_v0  ;;  %v750_v21 = vrot.slane %v748_v10, 7  ;;  %v312_v23 = vld [vmem:[%s5748_s27 + $0x90] sm:$0xff] }
  0x31   : > { %588 = vst.msk [vmem:[#allocation3 + $0x44] sm:$0x1] %vm521_vm1, %v5476_v0  ;;  %591 = vst.msk [vmem:[#allocation3 + $0x50] sm:$0x1] %vm521_vm1, %v5476_v0  ;;  %v1049_v22 = vld [vmem:[#allocation2 + $0x2c] sm:$0x1] }
  0x32   : > { %589 = vst.msk [vmem:[#allocation3 + $0x48] sm:$0xf] %vm7906_vm0, %v5476_v0  ;;  %590 = vst.msk [vmem:[#allocation3 + $0x4c] sm:$0xf] %vm7906_vm0, %v5476_v0  ;;  %v376_v24 = vld [vmem:[%s5753_s30 + $0x90] sm:$0xff]  ;;  %v313_v29 = vld [vmem:[%s5748_s27 + $0x98] sm:$0xff]  ;;  %v753_v34 = vor.u32 %v751_v14, %v750_v21 }
  0x33   : > { %592 = vst.msk [vmem:[#allocation3 + $0x54] sm:$0xf] %vm7906_vm0, %v5476_v0  ;;  %593 = vst.msk [vmem:[#allocation3 + $0x58] sm:$0xf] %vm7906_vm0, %v5476_v0  ;;  %v377_v30 = vld [vmem:[%s5753_s30 + $0x98] sm:$0xff]  ;;  %v316_v31 = vld [vmem:[%s5748_s27 + $0xb0] sm:$0xff] }
  0x34   : > { %594 = vst.msk [vmem:[#allocation3 + $0x5c] sm:$0x1] %vm521_vm1, %v5476_v0  ;;  %597 = vst.msk [vmem:[#allocation3 + $0x68] sm:$0x1] %vm521_vm1, %v5476_v0  ;;  %v755_v35 = vrot.slane %v750_v21, 4  ;;  %v317_v36 = vld [vmem:[%s5748_s27 + $0xb8] sm:$0xff] }
  0x35   : > { %595 = vst.msk [vmem:[#allocation3 + $0x60] sm:$0xf] %vm7906_vm0, %v5476_v0  ;;  %596 = vst.msk [vmem:[#allocation3 + $0x64] sm:$0xf] %vm7906_vm0, %v5476_v0  ;;  %v381_v39 = vld [vmem:[%s5753_s30 + $0xb8] sm:$0xff]  ;;  %s5480_s10 = smov 32  }
  0x36   : > { %598 = vst.msk [vmem:[#allocation3 + $0x6c] sm:$0xf] %vm7906_vm0, %v5476_v0  ;;  %599 = vst.msk [vmem:[#allocation3 + $0x70] sm:$0xf] %vm7906_vm0, %v5476_v0  ;;  %v1052_v61 = vld [vmem:[#allocation2 + $0x30] sm:$0xf]  ;;  %v445_v62 = vsub.f32 %v317_v36, %v381_v39 }
  0x37   : > { %600 = vst.msk [vmem:[#allocation3 + $0x74] sm:$0x1] %vm521_vm1, %v5476_v0  ;;  %603 = vst.msk [vmem:[#allocation3 + $0x80] sm:$0x1] %vm521_vm1, %v5476_v0  ;;  %s5481_s11 = smov 40   ;;  %s5482_s12 = smov 48  }
  0x38   : > { %601 = vst.msk [vmem:[#allocation3 + $0x78] sm:$0xf] %vm7906_vm0, %v5476_v0  ;;  %602 = vst.msk [vmem:[#allocation3 + $0x7c] sm:$0xf] %vm7906_vm0, %v5476_v0  ;;  %s5483_s13 = smov 56   ;;  %s5484_s14 = smov 64  }
  0x39   : > { %604 = vst.msk [vmem:[#allocation3 + $0x84] sm:$0xf] %vm7906_vm0, %v5476_v0  ;;  %605 = vst.msk [vmem:[#allocation3 + $0x88] sm:$0xf] %vm7906_vm0, %v5476_v0  ;;  %s5485_s15 = smov 72   ;;  %s5486_s18 = smov 80  }
  0x3a   : > { %606 = vst.msk [vmem:[#allocation3 + $0x8c] sm:$0x1] %vm521_vm1, %v5476_v0  ;;  %609 = vst.msk [vmem:[#allocation3 + $0x98] sm:$0x1] %vm521_vm1, %v5476_v0  ;;  %s5487_s29 = smov 88   ;;  %vm7903_vm10 = vcmask 64512  }
  0x3b   : > { %607 = vst.msk [vmem:[#allocation3 + $0x90] sm:$0xf] %vm7906_vm0, %v5476_v0  ;;  %608 = vst.msk [vmem:[#allocation3 + $0x94] sm:$0xf] %vm7906_vm0, %v5476_v0  ;;  %vm3963_vm11 = vcmask 130048   ;;  %vm7904_vm12 = vcmask 195584  }
  0x3c   : > { %610 = vst.msk [vmem:[#allocation3 + $0x9c] sm:$0xf] %vm7906_vm0, %v5476_v0  ;;  %611 = vst.msk [vmem:[#allocation3 + $0xa0] sm:$0xf] %vm7906_vm0, %v5476_v0  ;;  %vm4029_vm13 = vcmask 261120   ;;  %vm4062_vm14 = vcmask 326656  }
  0x3d   : > { %612 = vst.msk [vmem:[#allocation3 + $0xa4] sm:$0x1] %vm521_vm1, %v5476_v0  ;;  %615 = vst.msk [vmem:[#allocation3 + $0xb0] sm:$0x1] %vm521_vm1, %v5476_v0  ;;  %vm4095_vm15 = vcmask 392192  }
  0x3e   : > { %613 = vst.msk [vmem:[#allocation3 + $0xa8] sm:$0xf] %vm7906_vm0, %v5476_v0  ;;  %614 = vst.msk [vmem:[#allocation3 + $0xac] sm:$0xf] %vm7906_vm0, %v5476_v0 }
  0x3f   : > { %616 = vst.msk [vmem:[#allocation3 + $0xb4] sm:$0xf] %vm7906_vm0, %v5476_v0  ;;  %617 = vst.msk [vmem:[#allocation3 + $0xb8] sm:$0xf] %vm7906_vm0, %v5476_v0 }
  0x40   : > { %618 = vst.msk [vmem:[#allocation3 + $0xbc] sm:$0x1] %vm521_vm1, %v5476_v0  ;;  %621 = vst.msk [vmem:[#allocation3 + $0xc8] sm:$0x1] %vm521_vm1, %v5476_v0 }
  0x41   : > { %619 = vst.msk [vmem:[#allocation3 + $0xc0] sm:$0xf] %vm7906_vm0, %v5476_v0  ;;  %620 = vst.msk [vmem:[#allocation3 + $0xc4] sm:$0xf] %vm7906_vm0, %v5476_v0  ;;  %v372_v0 = vld [vmem:[%s5753_s30 + $0x70] sm:$0xff] }
  0x42   : > { %v5275_v7 = vld [vmem:[#allocation2 + $0x8] ss:$0 sps:$4 sm:$0x11]   ;;  %vm5775_vm7 = vmand %vm7906_vm0, %vm1027_vm6  ;;  %vm7905_vm6 = vcmask 654336  }
  0x43   : > { %v2315_v16 = vrot.slane %v5275_v7, 1  ;;  %v2049_v17 = vshll.u32 %v5275_v7, 16  ;;  %vm5781_vm8 = vmand %vm521_vm1, %vm702_vm4  ;;  %v1030_v57 = vsel %vm5775_vm7, %v711_v44, %v1029_v38  ;;  %v728_v7 = vor.u32 %v726_v52, %v725_v59  ;;  %v380_v38 = vld [vmem:[%s5753_s30 + $0xb0] sm:$0xff] }
  0x44   : > { %vm5787_vm9 = vmor %vm702_vm4, %vm703_vm5  ;;  %1031 = vst [vmem:[#allocation2 + $0xc] sm:$0xf] %v1030_v57  ;;  %v1036_v3 = vsel %vm5781_vm8, %v721_v56, %v1035_v49  ;;  %v1043_v33 = vsel %vm5781_vm8, %v738_v19, %v1042_v12  ;;  %v1050_v49 = vsel %vm5781_vm8, %v755_v35, %v1049_v22  ;;  %v444_v56 = vsub.f32 %v316_v31, %v380_v38 }
  0x45   : > { %v2316_v26 = vsel %vm2313_vm2, %v2314_v15, %v2315_v16  ;;  %v2051_v27 = vrot.slane %v2049_v17, 1  ;;  %v720_v2 = vsel %vm5787_vm9, %v712_v45, %v719_v55  ;;  %1037 = vst [vmem:[#allocation2 + $0x14] sm:$0x1] %v1036_v3  ;;  %v1045_v15 = vld [vmem:[#allocation2 + $0x24] sm:$0xf]  ;;  %v436_v16 = vsub.f32 %v308_v58, %v372_v0 }
  0x46   : > { %2362 = vrot.lane.b32.xlu0 %v2316_v26, %s5477_s7  ;;  %1032 = vst.msk [vmem:[#allocation2 + $0x10] sm:$0xf] %vm7906_vm0, %v720_v2  ;;  %v437_v17 = vsub.f32 %v309_v63, %v373_v1  ;;  %v1039_v20 = vsel %vm5775_vm7, %v728_v7, %v1038_v4  ;;  %v746_v26 = vrot.slane %v742_v13, 4  ;;  %v737_v32 = vsel %vm5787_vm9, %v729_v8, %v736_v18  ;;  %v1056_v1 = vld [vmem:[#allocation2 + $0x38] sm:$0x1] }
  0x47   : > { %v2052_v54 = vsel %vm2040_vm3, %v2047_v43, %v2051_v27  ;;  %1040 = vst [vmem:[#allocation2 + $0x18] sm:$0xf] %v1039_v20  ;;  %v5119_v27 = vpack.c.bf16 %v436_v16, %v436_v16  ;;  %1041 = vst.msk [vmem:[#allocation2 + $0x1c] sm:$0xf] %vm7906_vm0, %v737_v32  ;;  %v1046_v42 = vsel %vm5775_vm7, %v745_v25, %v1045_v15  ;;  %v1059_v25 = vld [vmem:[#allocation2 + $0x3c] sm:$0xf] }
  0x48   : > { %v5120_v28 = vpack.c.bf16 %v437_v17, %v437_v17  ;;  %1044 = vst [vmem:[#allocation2 + $0x20] sm:$0x1] %v1043_v33  ;;  %v440_v45 = vsub.f32 %v312_v23, %v376_v24  ;;  %v754_v46 = vsel %vm5787_vm9, %v746_v26, %v753_v34  ;;  %1047 = vst [vmem:[#allocation2 + $0x24] sm:$0xf] %v1046_v42  ;;  %vm4128_vm1 = vcmask 457728  }
  0x49   : > { %v757_v43 = vshrl.u32 %v5119_v27, 16  ;;  %v760_v44 = vshll.u32 %v5119_v27, 16  ;;  %1048 = vst.msk [vmem:[#allocation2 + $0x28] sm:$0xf] %vm7906_vm0, %v754_v46  ;;  %1051 = vst [vmem:[#allocation2 + $0x2c] sm:$0x1] %v1050_v49  ;;  %v5123_v18 = vpack.c.bf16 %v444_v56, %v444_v56 }
  0x4a   : > { %2233 = vrot.lane.b32.xlu0 %v2052_v54, %s5478_s8  ;;  %v765_v50 = vshrl.u32 %v5120_v28, 16  ;;  %v768_v51 = vshll.u32 %v5120_v28, 16  ;;  %v441_v54 = vsub.f32 %v313_v29, %v377_v30  ;;  %v5121_v55 = vpack.c.bf16 %v440_v45, %v440_v45 }
  0x4b   : > { %v1704_v40 = vld [vmem:[#allocation2 + $0xc] sm:$0xe]  ;;  %v759_v53 = vrot.slane %v757_v43, 7  ;;  %v5124_v30 = vpack.c.bf16 %v445_v62, %v445_v62  ;;  %vm4161_vm4 = vcmask 523264   ;;  %vm4194_vm5 = vcmask 588800  }
  0x4c   : > { %v1657_v41 = vld [vmem:[#allocation2 + $0xc] sm:$0xf]  ;;  %v5278_v57 = vld [vmem:[#allocation2 + $0x14] ss:$0 sps:$4 sm:$0x11]   ;;  %v767_v60 = vrot.slane %v765_v50, 7  ;;  %v5122_v2 = vpack.c.bf16 %v441_v54, %v441_v54 }
  0x4d   : > { %v1658_v52 = vld [vmem:[#allocation2 + $0x10] sm:$0xf]  ;;  %v762_v63 = vor.u32 %v760_v44, %v759_v53  ;;  %v763_v0 = vrot.slane %v759_v53, 4  ;;  %v774_v3 = vshrl.u32 %v5121_v55, 16  ;;  %v2318_v5 = vrot.slane %v5278_v57, 1 }
  0x4e   : > { %v4925_v58 = vcombine.low %v1704_v40, %v1658_v52  ;;  %v5826_v59 = vcombine.low %v1657_v41, %v1658_v52  ;;  %v1659_v6 = vld [vmem:[#allocation2 + $0x18] sm:$0xf]  ;;  %v2061_v9 = vshll.u32 %v5278_v57, 16  ;;  %v770_v10 = vor.u32 %v768_v51, %v767_v60  ;;  %v5833_v15 = vld [vmem:[#allocation2 + $0x1c] sm:$0xf] }
  0x4f   : > { %v772_v12 = vrot.slane %v767_v60, 4  ;;  %v1053_v13 = vsel %vm5775_vm7, %v762_v63, %v1052_v61  ;;  %v776_v17 = vrot.slane %v774_v3, 7  ;;  %v5837_v19 = vcombine.low %v1659_v6, %v5833_v15  ;;  %v5839_v20 = vld [vmem:[#allocation2 + $0x20] ss:$0 sps:$4 sm:$0x11]   ;;  %v385_v3 = vld [vmem:[%s5753_s30 + $0xd8] sm:$0xff] }
  0x50   : > { %v2317_v4 = vrot.slane %v4925_v58, 1  ;;  %v2054_v7 = vshrl.u32 %v5826_v59, 16  ;;  %v2056_v8 = vshll.u32 %v5826_v59, 16  ;;  %1054 = vst [vmem:[#allocation2 + $0x30] sm:$0xf] %v1053_v13  ;;  %v2063_v21 = vrot.slane %v2061_v9, 1 }
  0x51   : > { %7913 = vst [vmem:[#allocation5_spill] sm:$0xff] %v5837_v19  ;;  %v1661_v22 = vld [vmem:[#allocation2 + $0x24] sm:$0xf]  ;;  %v771_v23 = vsel %vm5787_vm9, %v763_v0, %v770_v10  ;;  %v1057_v24 = vsel %vm5781_vm8, %v772_v12, %v1056_v1  ;;  %v1662_v27 = vld [vmem:[#allocation2 + $0x28] sm:$0xf]  ;;  %v777_v28 = vshll.u32 %v5121_v55, 16 }
  0x52   : > { %v2319_v14 = vsel %vm2313_vm2, %v2317_v4, %v2318_v5  ;;  %v2058_v16 = vrot.slane %v2056_v8, 1  ;;  %1055 = vst.msk [vmem:[#allocation2 + $0x34] sm:$0xf] %vm7906_vm0, %v771_v23  ;;  %1058 = vst [vmem:[#allocation2 + $0x38] sm:$0x1] %v1057_v24  ;;  %v780_v29 = vrot.slane %v776_v17, 4  ;;  %v5849_v34 = vcombine.low %v1661_v22, %v1662_v27 }
  0x53   : > { %2364 = vrot.lane.b32.xlu1 %v2319_v14, %s5477_s7  ;;  %v2066_v31 = vshrl.u32 %v5837_v19, 16  ;;  %v2068_v32 = vshll.u32 %v5837_v19, 16  ;;  %v2073_v33 = vshll.u32 %v5839_v20, 16  ;;  %v5284_v35 = vld [vmem:[#allocation2 + $0x2c] ss:$0 sps:$4 sm:$0x11]   ;;  %v779_v38 = vor.u32 %v777_v28, %v776_v17 }
  0x54   : > { %v2059_v26 = vor.u32 %v2058_v16, %v2054_v7  ;;  %7914 = vst [vmem:[#allocation6_spill] sm:$0xff] %v5849_v34  ;;  %v782_v39 = vshrl.u32 %v5122_v2, 16  ;;  %v785_v40 = vshll.u32 %v5122_v2, 16  ;;  %v2078_v43 = vshrl.u32 %v5849_v34, 16  ;;  %v1063_v50 = vld [vmem:[#allocation2 + $0x44] sm:$0x1] }
  0x55   : > { %v2070_v41 = vrot.slane %v2068_v32, 1  ;;  %v2075_v42 = vrot.slane %v2073_v33, 1  ;;  %v2080_v44 = vshll.u32 %v5849_v34, 16  ;;  %v2085_v45 = vshll.u32 %v5284_v35, 16  ;;  %v1066_v57 = vld [vmem:[#allocation2 + $0x48] sm:$0xf] }
  0x56   : > { %v2064_v36 = vsel %vm2040_vm3, %v2059_v26, %v2063_v21  ;;  %v784_v46 = vrot.slane %v782_v39, 7  ;;  %v1060_v49 = vsel %vm5775_vm7, %v779_v38, %v1059_v25  ;;  %v791_v51 = vshrl.u32 %v5123_v18, 16  ;;  %v1070_v63 = vld [vmem:[#allocation2 + $0x50] sm:$0x1]  ;;  %v321_v1 = vld [vmem:[%s5748_s27 + $0xd8] sm:$0xff] }
  0x57   : > { %2235 = vrot.lane.b32.xlu0 %v2064_v36, %s5478_s8  ;;  %v2071_v52 = vor.u32 %v2070_v41, %v2066_v31  ;;  %v2082_v53 = vrot.slane %v2080_v44, 1  ;;  %v1663_v54 = vld [vmem:[#allocation2 + $0x30] sm:$0xf]  ;;  %1061 = vst [vmem:[#allocation2 + $0x3c] sm:$0xf] %v1060_v49  ;;  %v794_v55 = vshll.u32 %v5123_v18, 16  ;;  %v449_v39 = vsub.f32 %v321_v1, %v385_v3 }
  0x58   : > { %v799_v56 = vshrl.u32 %v5124_v30, 16  ;;  %v2087_v58 = vrot.slane %v2085_v45, 1  ;;  %v787_v60 = vor.u32 %v785_v40, %v784_v46  ;;  %v789_v61 = vrot.slane %v784_v46, 4  ;;  %v320_v0 = vld [vmem:[%s5748_s27 + $0xd0] sm:$0xff]  ;;  %v325_v17 = vld [vmem:[%s5748_s27 + $0xf8] sm:$0xff] }
  0x59   : > { %v793_v62 = vrot.slane %v791_v51, 7  ;;  %v384_v2 = vld [vmem:[%s5753_s30 + $0xd0] sm:$0xff]  ;;  %v2076_v4 = vsel %vm2040_vm3, %v2071_v52, %v2075_v42  ;;  %v2083_v5 = vor.u32 %v2082_v53, %v2078_v43  ;;  %v802_v8 = vshll.u32 %v5124_v30, 16  ;;  %v5286_v10 = vld [vmem:[#allocation2 + $0x38] ss:$0 sps:$4 sm:$0x11]  }
  0x5a   : > { %v1664_v6 = vld [vmem:[#allocation2 + $0x34] sm:$0xf]  ;;  %v801_v7 = vrot.slane %v799_v56, 7  ;;  %2237 = vrot.lane.b32.xlu1 %v2076_v4, %s5478_s8  ;;  %v788_v12 = vsel %vm5787_vm9, %v780_v29, %v787_v60  ;;  %v1064_v13 = vsel %vm5781_vm8, %v789_v61, %v1063_v50  ;;  %v389_v25 = vld [vmem:[%s5753_s30 + $0xf8] sm:$0xff]  ;;  %v2097_v29 = vshll.u32 %v5286_v10, 16 }
  0x5b   : > { %v5863_v9 = vcombine.low %v1663_v54, %v1664_v6  ;;  %v796_v14 = vor.u32 %v794_v55, %v793_v62  ;;  %v324_v16 = vld [vmem:[%s5748_s27 + $0xf0] sm:$0xff]  ;;  %v2088_v18 = vsel %vm2040_vm3, %v2083_v5, %v2087_v58  ;;  %1062 = vst.msk [vmem:[#allocation2 + $0x40] sm:$0xf] %vm7906_vm0, %v788_v12  ;;  %1065 = vst [vmem:[#allocation2 + $0x44] sm:$0x1] %v1064_v13  ;;  %v797_v21 = vrot.slane %v793_v62, 4 }
  0x5c   : > { %v804_v22 = vor.u32 %v802_v8, %v801_v7  ;;  %v806_v23 = vrot.slane %v801_v7, 4  ;;  %v388_v24 = vld [vmem:[%s5753_s30 + $0xf0] sm:$0xff]  ;;  %v329_v31 = vld [vmem:[%s5748_s27 + $0x118] sm:$0xff]  ;;  %v448_v38 = vsub.f32 %v320_v0, %v384_v2  ;;  %v2099_v43 = vrot.slane %v2097_v29, 1 }
  0x5d   : > { %7915 = vst [vmem:[#allocation7_spill] sm:$0xff] %v5863_v9  ;;  %v328_v26 = vld [vmem:[%s5748_s27 + $0x110] sm:$0xff]  ;;  %v2090_v27 = vshrl.u32 %v5863_v9, 16  ;;  %v2092_v28 = vshll.u32 %v5863_v9, 16  ;;  %v1067_v30 = vsel %vm5775_vm7, %v796_v14, %v1066_v57  ;;  %v393_v33 = vld [vmem:[%s5753_s30 + $0x118] sm:$0xff]  ;;  %v452_v44 = vsub.f32 %v324_v16, %v388_v24  ;;  %v351_v9 = vld [vmem:[%s5748_s27 + $0x1c8] sm:$0xff] }
  0x5e   : > { %v392_v32 = vld [vmem:[%s5753_s30 + $0x110] sm:$0xff]  ;;  %v805_v35 = vsel %vm5787_vm9, %v797_v21, %v804_v22  ;;  %1068 = vst [vmem:[#allocation2 + $0x48] sm:$0xf] %v1067_v30  ;;  %v1071_v36 = vsel %vm5781_vm8, %v806_v23, %v1070_v63  ;;  %2239 = vrot.lane.b32.xlu1 %v2088_v18, %s5478_s8  ;;  %v453_v45 = vsub.f32 %v325_v17, %v389_v25  ;;  %v1665_v53 = vld [vmem:[#allocation2 + $0x3c] sm:$0xf] }
  0x5f   : > { %v332_v40 = vld [vmem:[%s5748_s27 + $0x130] sm:$0xff]  ;;  %v2094_v42 = vrot.slane %v2092_v28, 1  ;;  %1069 = vst.msk [vmem:[#allocation2 + $0x4c] sm:$0xf] %vm7906_vm0, %v805_v35  ;;  %1072 = vst [vmem:[#allocation2 + $0x50] sm:$0x1] %v1071_v36  ;;  %v5125_v46 = vpack.c.bf16 %v448_v38, %v448_v38  ;;  %v5126_v49 = vpack.c.bf16 %v449_v39, %v449_v39  ;;  %v456_v50 = vsub.f32 %v328_v26, %v392_v32 }
  0x60   : > { %v396_v41 = vld [vmem:[%s5753_s30 + $0x130] sm:$0xff]  ;;  %v457_v51 = vsub.f32 %v329_v31, %v393_v33  ;;  %v5127_v54 = vpack.c.bf16 %v452_v44, %v452_v44  ;;  %v5128_v55 = vpack.c.bf16 %v453_v45, %v453_v45  ;;  %v1077_v12 = vld [vmem:[#allocation2 + $0x5c] sm:$0x1]  ;;  %v1080_v35 = vld [vmem:[#allocation2 + $0x60] sm:$0xf] }
  0x61   : > { %v2095_v52 = vor.u32 %v2094_v42, %v2090_v27  ;;  %v5891_v56 = vsub.f32 %v332_v40, %v396_v41  ;;  %v808_v57 = vshrl.u32 %v5125_v46, 16  ;;  %v811_v58 = vshll.u32 %v5125_v46, 16  ;;  %v1073_v0 = vld [vmem:[#allocation2 + $0x54] sm:$0xf]  ;;  %v1084_v45 = vld [vmem:[#allocation2 + $0x68] sm:$0x1] }
  0x62   : > { %v816_v60 = vshrl.u32 %v5126_v49, 16  ;;  %v819_v61 = vshll.u32 %v5126_v49, 16  ;;  %v1666_v63 = vld [vmem:[#allocation2 + $0x40] sm:$0xf]  ;;  %v825_v1 = vshrl.u32 %v5127_v54, 16  ;;  %v828_v2 = vshll.u32 %v5127_v54, 16 }
  0x63   : > { %v2100_v62 = vsel %vm2040_vm3, %v2095_v52, %v2099_v43  ;;  %v5894_v3 = vpack.c.bf16 %v456_v50, %v456_v50  ;;  %v5897_v4 = vcombine.low %v1665_v53, %v1666_v63  ;;  %v5288_v5 = vld [vmem:[#allocation2 + $0x44] ss:$0 sps:$4 sm:$0x11]   ;;  %v810_v6 = vrot.slane %v808_v57, 7  ;;  %v1087_v52 = vld [vmem:[#allocation2 + $0x6c] sm:$0xf] }
  0x64   : > { %2241 = vrot.lane.b32.xlu0 %v2100_v62, %s5478_s8  ;;  %v818_v7 = vrot.slane %v816_v60, 7  ;;  %v833_v8 = vshrl.u32 %v5128_v55, 16  ;;  %v827_v13 = vrot.slane %v825_v1, 7  ;;  %v836_v14 = vshll.u32 %v5128_v55, 16  ;;  %v333_v53 = vld [vmem:[%s5748_s27 + $0x138] sm:$0xff]  ;;  %v400_v63 = vld [vmem:[%s5753_s30 + $0x150] sm:$0xff] }
  0x65   : > { %7916 = vst [vmem:[#allocation8_spill] sm:$0xff] %v5897_v4  ;;  %v1667_v10 = vld [vmem:[#allocation2 + $0x48] sm:$0xf]  ;;  %v5899_v16 = vpack.c.bf16 %v457_v51, %v457_v51  ;;  %v842_v17 = vshrl.u32 %v5894_v3, 16  ;;  %v2102_v18 = vshrl.u32 %v5897_v4, 16  ;;  %v2104_v21 = vshll.u32 %v5897_v4, 16 }
  0x66   : > { %v2109_v22 = vshll.u32 %v5288_v5, 16  ;;  %v1668_v23 = vld [vmem:[#allocation2 + $0x4c] sm:$0xf]  ;;  %v813_v24 = vor.u32 %v811_v58, %v810_v6  ;;  %v5290_v26 = vld [vmem:[#allocation2 + $0x50] ss:$0 sps:$4 sm:$0x11]   ;;  %v821_v28 = vor.u32 %v819_v61, %v818_v7  ;;  %v830_v29 = vor.u32 %v828_v2, %v827_v13 }
  0x67   : > { %v5904_v25 = vcombine.low %v1667_v10, %v1668_v23  ;;  %v814_v27 = vrot.slane %v810_v6, 4  ;;  %v2106_v30 = vrot.slane %v2104_v21, 1  ;;  %v823_v32 = vrot.slane %v818_v7, 4  ;;  %v397_v54 = vld [vmem:[%s5753_s30 + $0x138] sm:$0xff]  ;;  %v336_v61 = vld [vmem:[%s5748_s27 + $0x150] sm:$0xff] }
  0x68   : > { %v2111_v31 = vrot.slane %v2109_v22, 1  ;;  %v1074_v33 = vsel %vm5775_vm7, %v813_v24, %v1073_v0  ;;  %v2121_v39 = vshll.u32 %v5290_v26, 16  ;;  %v831_v43 = vrot.slane %v827_v13, 4  ;;  %v337_v62 = vld [vmem:[%s5748_s27 + $0x158] sm:$0xff]  ;;  %v340_v7 = vld [vmem:[%s5748_s27 + $0x170] sm:$0xff] }
  0x69   : > { %7917 = vst [vmem:[#allocation9_spill] sm:$0xff] %v5904_v25  ;;  %v2114_v36 = vshrl.u32 %v5904_v25, 16  ;;  %v2116_v38 = vshll.u32 %v5904_v25, 16  ;;  %v822_v40 = vsel %vm5787_vm9, %v814_v27, %v821_v28  ;;  %1075 = vst [vmem:[#allocation2 + $0x54] sm:$0xf] %v1074_v33  ;;  %v2107_v41 = vor.u32 %v2106_v30, %v2102_v18  ;;  %v401_v6 = vld [vmem:[%s5753_s30 + $0x158] sm:$0xff] }
  0x6a   : > { %1076 = vst.msk [vmem:[#allocation2 + $0x58] sm:$0xf] %vm7906_vm0, %v822_v40  ;;  %v1078_v42 = vsel %vm5781_vm8, %v823_v32, %v1077_v12  ;;  %v835_v44 = vrot.slane %v833_v8, 7  ;;  %v2123_v49 = vrot.slane %v2121_v39, 1  ;;  %v1081_v50 = vsel %vm5775_vm7, %v830_v29, %v1080_v35  ;;  %v404_v8 = vld [vmem:[%s5753_s30 + $0x170] sm:$0xff] }
  0x6b   : > { %v2118_v46 = vrot.slane %v2116_v38, 1  ;;  %1079 = vst [vmem:[#allocation2 + $0x5c] sm:$0x1] %v1078_v42  ;;  %v844_v51 = vrot.slane %v842_v17, 7  ;;  %v2112_v55 = vsel %vm2040_vm3, %v2107_v41, %v2111_v31  ;;  %1082 = vst [vmem:[#allocation2 + $0x60] sm:$0xf] %v1081_v50  ;;  %v461_v13 = vsub.f32 %v333_v53, %v397_v54 }
  0x6c   : > { %v838_v57 = vor.u32 %v836_v14, %v835_v44  ;;  %v840_v58 = vrot.slane %v835_v44, 4  ;;  %v845_v60 = vshll.u32 %v5894_v3, 16  ;;  %2243 = vrot.lane.b32.xlu1 %v2112_v55, %s5478_s8  ;;  %v850_v2 = vshrl.u32 %v5899_v16, 16  ;;  %v1091_v23 = vld [vmem:[#allocation2 + $0x74] sm:$0x1]  ;;  %v341_v44 = vld [vmem:[%s5748_s27 + $0x178] sm:$0xff] }
  0x6d   : > { %v2119_v0 = vor.u32 %v2118_v46, %v2114_v36  ;;  %v848_v1 = vrot.slane %v844_v51, 4  ;;  %v853_v5 = vshll.u32 %v5899_v16, 16  ;;  %v5131_v16 = vpack.c.bf16 %v5891_v56, %v5891_v56  ;;  %v1098_v55 = vld [vmem:[#allocation2 + $0x80] sm:$0x1] }
  0x6e   : > { %v839_v10 = vsel %vm5787_vm9, %v831_v43, %v838_v57  ;;  %v1085_v3 = vsel %vm5781_vm8, %v840_v58, %v1084_v45  ;;  %v847_v12 = vor.u32 %v845_v60, %v844_v51  ;;  %v852_v17 = vrot.slane %v850_v2, 7  ;;  %v1094_v43 = vld [vmem:[#allocation2 + $0x78] sm:$0xf] }
  0x6f   : > { %v2124_v14 = vsel %vm2040_vm3, %v2119_v0, %v2123_v49  ;;  %1083 = vst.msk [vmem:[#allocation2 + $0x64] sm:$0xf] %vm7906_vm0, %v839_v10  ;;  %1086 = vst [vmem:[#allocation2 + $0x68] sm:$0x1] %v1085_v3  ;;  %v464_v18 = vsub.f32 %v336_v61, %v400_v63  ;;  %v5132_v24 = vpack.c.bf16 %v461_v13, %v461_v13  ;;  %v859_v31 = vshrl.u32 %v5131_v16, 16  ;;  %v405_v45 = vld [vmem:[%s5753_s30 + $0x178] sm:$0xff] }
  0x70   : > { %2245 = vrot.lane.b32.xlu0 %v2124_v14, %s5478_s8  ;;  %v1669_v21 = vld [vmem:[#allocation2 + $0x54] sm:$0xf]  ;;  %v1088_v22 = vsel %vm5775_vm7, %v847_v12, %v1087_v52  ;;  %v465_v26 = vsub.f32 %v337_v62, %v401_v6  ;;  %v468_v27 = vsub.f32 %v340_v7, %v404_v8  ;;  %v855_v29 = vor.u32 %v853_v5, %v852_v17  ;;  %v1101_v13 = vld [vmem:[#allocation2 + $0x84] sm:$0xf] }
  0x71   : > { %v1670_v28 = vld [vmem:[#allocation2 + $0x58] sm:$0xf]  ;;  %v857_v30 = vrot.slane %v852_v17, 4  ;;  %1089 = vst [vmem:[#allocation2 + $0x6c] sm:$0xf] %v1088_v22  ;;  %v862_v32 = vshll.u32 %v5131_v16, 16  ;;  %v5133_v36 = vpack.c.bf16 %v464_v18, %v464_v18  ;;  %v469_v0 = vsub.f32 %v341_v44, %v405_v45 }
  0x72   : > { %v5941_v56 = vcombine.low %v1669_v21, %v1670_v28  ;;  %v5292_v33 = vld [vmem:[#allocation2 + $0x5c] ss:$0 sps:$4 sm:$0x11]   ;;  %v867_v35 = vshrl.u32 %v5132_v24, 16  ;;  %v5134_v38 = vpack.c.bf16 %v465_v26, %v465_v26  ;;  %v856_v39 = vsel %vm5787_vm9, %v848_v1, %v855_v29  ;;  %v1671_v51 = vld [vmem:[#allocation2 + $0x60] sm:$0xf] }
  0x73   : > { %v1092_v40 = vsel %vm5781_vm8, %v857_v30, %v1091_v23  ;;  %v861_v41 = vrot.slane %v859_v31, 7  ;;  %v870_v42 = vshll.u32 %v5132_v24, 16  ;;  %v2133_v50 = vshll.u32 %v5292_v33, 16  ;;  %1090 = vst.msk [vmem:[#allocation2 + $0x70] sm:$0xf] %vm7906_vm0, %v856_v39  ;;  %v408_v45 = vld [vmem:[%s5753_s30 + $0x190] sm:$0xff] }
  0x74   : > { %7918 = vst [vmem:[#allocation10_spill] sm:$0xff] %v5941_v56  ;;  %v2126_v46 = vshrl.u32 %v5941_v56, 16  ;;  %v2128_v49 = vshll.u32 %v5941_v56, 16  ;;  %1093 = vst [vmem:[#allocation2 + $0x74] sm:$0x1] %v1092_v40  ;;  %v869_v52 = vrot.slane %v867_v35, 7  ;;  %v5135_v31 = vpack.c.bf16 %v468_v27, %v468_v27 }
  0x75   : > { %v864_v53 = vor.u32 %v862_v32, %v861_v41  ;;  %v865_v54 = vrot.slane %v861_v41, 4  ;;  %v876_v57 = vshrl.u32 %v5133_v36, 16  ;;  %v879_v58 = vshll.u32 %v5133_v36, 16  ;;  %v1105_v40 = vld [vmem:[#allocation2 + $0x8c] sm:$0x1]  ;;  %v344_v27 = vld [vmem:[%s5748_s27 + $0x190] sm:$0xff] }
  0x76   : > { %v2130_v60 = vrot.slane %v2128_v49, 1  ;;  %v2135_v61 = vrot.slane %v2133_v50, 1  ;;  %v5952_v62 = vld [vmem:[#allocation2 + $0x64] sm:$0xf]  ;;  %v872_v63 = vor.u32 %v870_v42, %v869_v52  ;;  %v874_v5 = vrot.slane %v869_v52, 4 }
  0x77   : > { %v5955_v1 = vcombine.low %v1671_v51, %v5952_v62  ;;  %v5957_v2 = vld [vmem:[#allocation2 + $0x68] ss:$0 sps:$4 sm:$0x11]   ;;  %v1095_v6 = vsel %vm5775_vm7, %v864_v53, %v1094_v43  ;;  %v878_v7 = vrot.slane %v876_v57, 7  ;;  %v884_v3 = vshrl.u32 %v5134_v38, 16  ;;  %v345_v53 = vld [vmem:[%s5748_s27 + $0x198] sm:$0xff] }
  0x78   : > { %v2131_v8 = vor.u32 %v2130_v60, %v2126_v46  ;;  %v873_v10 = vsel %vm5787_vm9, %v865_v54, %v872_v63  ;;  %1096 = vst [vmem:[#allocation2 + $0x78] sm:$0xf] %v1095_v6  ;;  %v887_v12 = vshll.u32 %v5134_v38, 16  ;;  %v2145_v16 = vshll.u32 %v5957_v2, 16  ;;  %v1673_v18 = vld [vmem:[#allocation2 + $0x6c] sm:$0xf] }
  0x79   : > { %v2138_v14 = vshrl.u32 %v5955_v1, 16  ;;  %v2140_v17 = vshll.u32 %v5955_v1, 16  ;;  %1097 = vst.msk [vmem:[#allocation2 + $0x7c] sm:$0xf] %vm7906_vm0, %v873_v10  ;;  %v1099_v21 = vsel %vm5781_vm8, %v874_v5, %v1098_v55  ;;  %v881_v23 = vor.u32 %v879_v58, %v878_v7  ;;  %v1108_v52 = vld [vmem:[#allocation2 + $0x90] sm:$0xf] }
  0x7a   : > { %v2136_v22 = vsel %vm2040_vm3, %v2131_v8, %v2135_v61  ;;  %1100 = vst [vmem:[#allocation2 + $0x80] sm:$0x1] %v1099_v21  ;;  %v882_v24 = vrot.slane %v878_v7, 4  ;;  %v886_v26 = vrot.slane %v884_v3, 7  ;;  %v2147_v29 = vrot.slane %v2145_v16, 1  ;;  %v409_v54 = vld [vmem:[%s5753_s30 + $0x198] sm:$0xff] }
  0x7b   : > { %2247 = vrot.lane.b32.xlu1 %v2136_v22, %s5478_s8  ;;  %v2142_v28 = vrot.slane %v2140_v17, 1  ;;  %v5971_v30 = vld [vmem:[#allocation2 + $0x70] sm:$0xf]  ;;  %v5136_v32 = vpack.c.bf16 %v469_v0, %v469_v0  ;;  %v5976_v35 = vld [vmem:[#allocation2 + $0x74] ss:$0 sps:$4 sm:$0x11]   ;;  %v1102_v39 = vsel %vm5775_vm7, %v881_v23, %v1101_v13  ;;  %v472_v8 = vsub.f32 %v344_v27, %v408_v45 }
  0x7c   : > { %v5974_v33 = vcombine.low %v1673_v18, %v5971_v30  ;;  %v889_v36 = vor.u32 %v887_v12, %v886_v26  ;;  %v891_v38 = vrot.slane %v886_v26, 4  ;;  %1103 = vst [vmem:[#allocation2 + $0x84] sm:$0xf] %v1102_v39  ;;  %v893_v42 = vshrl.u32 %v5135_v31, 16  ;;  %v1112_v63 = vld [vmem:[#allocation2 + $0x98] sm:$0x1] }
  0x7d   : > { %v2143_v41 = vor.u32 %v2142_v28, %v2138_v14  ;;  %v896_v43 = vshll.u32 %v5135_v31, 16  ;;  %v901_v44 = vshrl.u32 %v5136_v32, 16  ;;  %v2157_v50 = vshll.u32 %v5976_v35, 16  ;;  %v348_v17 = vld [vmem:[%s5748_s27 + $0x1b0] sm:$0xff]  ;;  %v349_v23 = vld [vmem:[%s5748_s27 + $0x1b8] sm:$0xff] }
  0x7e   : > { %v2150_v46 = vshrl.u32 %v5974_v33, 16  ;;  %v2152_v49 = vshll.u32 %v5974_v33, 16  ;;  %v890_v51 = vsel %vm5787_vm9, %v882_v24, %v889_v36  ;;  %v1106_v58 = vsel %vm5781_vm8, %v891_v38, %v1105_v40  ;;  %v412_v24 = vld [vmem:[%s5753_s30 + $0x1b0] sm:$0xff]  ;;  %v413_v26 = vld [vmem:[%s5753_s30 + $0x1b8] sm:$0xff] }
  0x7f   : > { %v2148_v55 = vsel %vm2040_vm3, %v2143_v41, %v2147_v29  ;;  %v1675_v57 = vld [vmem:[#allocation2 + $0x78] sm:$0xf]  ;;  %1104 = vst.msk [vmem:[#allocation2 + $0x88] sm:$0xf] %vm7906_vm0, %v890_v51  ;;  %v895_v60 = vrot.slane %v893_v42, 7  ;;  %v903_v61 = vrot.slane %v901_v44, 7  ;;  %v473_v14 = vsub.f32 %v345_v53, %v409_v54 }
  0x80   : > { %2249 = vrot.lane.b32.xlu0 %v2148_v55, %s5478_s8  ;;  %v2154_v0 = vrot.slane %v2152_v49, 1  ;;  %v2159_v5 = vrot.slane %v2157_v50, 1  ;;  %v1676_v6 = vld [vmem:[#allocation2 + $0x7c] sm:$0xf]  ;;  %1107 = vst [vmem:[#allocation2 + $0x8c] sm:$0x1] %v1106_v58  ;;  %v5137_v22 = vpack.c.bf16 %v472_v8, %v472_v8  ;;  %v476_v54 = vsub.f32 %v348_v17, %v412_v24 }
  0x81   : > { %v904_v7 = vshll.u32 %v5136_v32, 16  ;;  %v5994_v10 = vcombine.low %v1675_v57, %v1676_v6  ;;  %v5298_v3 = vld [vmem:[#allocation2 + $0x80] ss:$0 sps:$4 sm:$0x11]   ;;  %v898_v12 = vor.u32 %v896_v43, %v895_v60  ;;  %v899_v13 = vrot.slane %v895_v60, 4  ;;  %v352_v36 = vld [vmem:[%s5748_s27 + $0x1d0] sm:$0xff] }
  0x82   : > { %v2155_v16 = vor.u32 %v2154_v0, %v2150_v46  ;;  %v908_v21 = vrot.slane %v903_v61, 4  ;;  %v2169_v31 = vshll.u32 %v5298_v3, 16  ;;  %v353_v38 = vld [vmem:[%s5748_s27 + $0x1d8] sm:$0xff]  ;;  %v416_v39 = vld [vmem:[%s5753_s30 + $0x1d0] sm:$0xff]  ;;  %v5138_v44 = vpack.c.bf16 %v473_v14, %v473_v14  ;;  %v1119_v17 = vld [vmem:[#allocation2 + $0xa4] sm:$0x1] }
  0x83   : > { %7919 = vst [vmem:[#allocation11_spill] sm:$0xff] %v5994_v10  ;;  %v906_v18 = vor.u32 %v904_v7, %v903_v61  ;;  %v2162_v28 = vshrl.u32 %v5994_v10, 16  ;;  %v2164_v29 = vshll.u32 %v5994_v10, 16  ;;  %v1109_v32 = vsel %vm5775_vm7, %v898_v12, %v1108_v52  ;;  %v1677_v41 = vld [vmem:[#allocation2 + $0x84] sm:$0xf]  ;;  %v417_v27 = vld [vmem:[%s5753_s30 + $0x1d8] sm:$0xff] }
  0x84   : > { %v2160_v40 = vsel %vm2040_vm3, %v2155_v16, %v2159_v5  ;;  %1110 = vst [vmem:[#allocation2 + $0x90] sm:$0xf] %v1109_v32  ;;  %v1113_v43 = vsel %vm5781_vm8, %v908_v21, %v1112_v63  ;;  %v2171_v46 = vrot.slane %v2169_v31, 1  ;;  %v910_v49 = vshrl.u32 %v5137_v22, 16  ;;  %v1115_v5 = vld [vmem:[#allocation2 + $0x9c] sm:$0xf] }
  0x85   : > { %v907_v42 = vsel %vm5787_vm9, %v899_v13, %v906_v18  ;;  %2251 = vrot.lane.b32.xlu1 %v2160_v40, %s5478_s8  ;;  %v2166_v45 = vrot.slane %v2164_v29, 1  ;;  %1114 = vst [vmem:[#allocation2 + $0x98] sm:$0x1] %v1113_v43  ;;  %v913_v50 = vshll.u32 %v5137_v22, 16  ;;  %v918_v52 = vshrl.u32 %v5138_v44, 16 }
  0x86   : > { %1111 = vst.msk [vmem:[#allocation2 + $0x94] sm:$0xf] %vm7906_vm0, %v907_v42  ;;  %v1678_v51 = vld [vmem:[#allocation2 + $0x88] sm:$0xf]  ;;  %v921_v53 = vshll.u32 %v5138_v44, 16  ;;  %v477_v55 = vsub.f32 %v349_v23, %v413_v26  ;;  %v912_v61 = vrot.slane %v910_v49, 7  ;;  %v480_v63 = vsub.f32 %v352_v36, %v416_v39 }
  0x87   : > { %v2167_v57 = vor.u32 %v2166_v45, %v2162_v28  ;;  %v6015_v58 = vcombine.low %v1677_v41, %v1678_v51  ;;  %v5300_v60 = vld [vmem:[#allocation2 + $0x8c] ss:$0 sps:$4 sm:$0x11]   ;;  %v920_v0 = vrot.slane %v918_v52, 7  ;;  %v5139_v6 = vpack.c.bf16 %v476_v54, %v476_v54  ;;  %v1705_v23 = vld [vmem:[#allocation2 + $0x18] sm:$0xe] }
  0x88   : > { %v5140_v7 = vpack.c.bf16 %v477_v55, %v477_v55  ;;  %v481_v8 = vsub.f32 %v353_v38, %v417_v27  ;;  %v2181_v14 = vshll.u32 %v5300_v60, 16  ;;  %v915_v16 = vor.u32 %v913_v50, %v912_v61  ;;  %v1710_v37 = vld [vmem:[#allocation2 + $0x54] sm:$0xe] }
  0x89   : > { %7920 = vst [vmem:[#allocation12_spill] sm:$0xff] %v6015_v58  ;;  %v2172_v3 = vsel %vm2040_vm3, %v2167_v57, %v2171_v46  ;;  %v2174_v12 = vshrl.u32 %v6015_v58, 16  ;;  %v2176_v13 = vshll.u32 %v6015_v58, 16  ;;  %v916_v18 = vrot.slane %v912_v61, 4  ;;  %v1122_v46 = vld [vmem:[#allocation2 + $0xa8] sm:$0xf] }
  0x8a   : > { %2253 = vrot.lane.b32.xlu0 %v2172_v3, %s5478_s8  ;;  %v923_v21 = vor.u32 %v921_v53, %v920_v0  ;;  %v925_v22 = vrot.slane %v920_v0, 4  ;;  %v2183_v26 = vrot.slane %v2181_v14, 1  ;;  %v927_v29 = vshrl.u32 %v5139_v6, 16  ;;  %v1126_v57 = vld [vmem:[#allocation2 + $0xb0] sm:$0x1] }
  0x8b   : > { %v2178_v24 = vrot.slane %v2176_v13, 1  ;;  %v1679_v28 = vld [vmem:[#allocation2 + $0x90] sm:$0xf]  ;;  %v930_v31 = vshll.u32 %v5139_v6, 16  ;;  %v1116_v38 = vsel %vm5775_vm7, %v915_v16, %v1115_v5  ;;  %v935_v40 = vshrl.u32 %v5140_v7, 16  ;;  %v326_v6 = vld [vmem:[%s5748_s27 + $0x100] sm:$0xff] }
  0x8c   : > { %v924_v36 = vsel %vm5787_vm9, %v916_v18, %v923_v21  ;;  %v1120_v39 = vsel %vm5781_vm8, %v925_v22, %v1119_v17  ;;  %v5302_v43 = vld [vmem:[#allocation2 + $0x98] ss:$0 sps:$4 sm:$0x11]   ;;  %1117 = vst [vmem:[#allocation2 + $0x9c] sm:$0xf] %v1116_v38  ;;  %v929_v44 = vrot.slane %v927_v29, 7  ;;  %v5141_v49 = vpack.c.bf16 %v480_v63, %v480_v63 }
  0x8d   : > { %v1680_v32 = vld [vmem:[#allocation2 + $0x94] sm:$0xf]  ;;  %v2179_v41 = vor.u32 %v2178_v24, %v2174_v12  ;;  %1118 = vst.msk [vmem:[#allocation2 + $0xa0] sm:$0xf] %vm7906_vm0, %v924_v36  ;;  %1121 = vst [vmem:[#allocation2 + $0xa4] sm:$0x1] %v1120_v39  ;;  %v5142_v50 = vpack.c.bf16 %v481_v8, %v481_v8  ;;  %v4926_v51 = vcombine.low %v1705_v23, %v5833_v15 }
  0x8e   : > { %v6027_v42 = vcombine.low %v1679_v28, %v1680_v32  ;;  %v938_v27 = vshll.u32 %v5140_v7, 16  ;;  %v937_v45 = vrot.slane %v935_v40, 7  ;;  %v2193_v55 = vshll.u32 %v5302_v43, 16  ;;  %v1711_v63 = vld [vmem:[#allocation2 + $0x60] sm:$0xe]  ;;  %v327_v21 = vld [vmem:[%s5748_s27 + $0x108] sm:$0xff] }
  0x8f   : > { %v2184_v52 = vsel %vm2040_vm3, %v2179_v41, %v2183_v26  ;;  %v932_v60 = vor.u32 %v930_v31, %v929_v44  ;;  %v933_v61 = vrot.slane %v929_v44, 4  ;;  %v390_v7 = vld [vmem:[%s5753_s30 + $0x100] sm:$0xff]  ;;  %v944_v3 = vshrl.u32 %v5141_v49, 16  ;;  %v1712_v13 = vld [vmem:[#allocation2 + $0x6c] sm:$0xe] }
  0x90   : > { %7921 = vst [vmem:[#allocation13_spill] sm:$0xff] %v6027_v42  ;;  %v2186_v53 = vshrl.u32 %v6027_v42, 16  ;;  %v2188_v54 = vshll.u32 %v6027_v42, 16  ;;  %2255 = vrot.lane.b32.xlu1 %v2184_v52, %s5478_s8  ;;  %v940_v0 = vor.u32 %v938_v27, %v937_v45  ;;  %v942_v5 = vrot.slane %v937_v45, 4  ;;  %v391_v22 = vld [vmem:[%s5753_s30 + $0x108] sm:$0xff] }
  0x91   : > { %v2195_v8 = vrot.slane %v2193_v55, 1  ;;  %v947_v12 = vshll.u32 %v5141_v49, 16  ;;  %v1123_v17 = vsel %vm5775_vm7, %v932_v60, %v1122_v46  ;;  %v952_v18 = vshrl.u32 %v5142_v50, 16  ;;  %v1129_v28 = vld [vmem:[#allocation2 + $0xb4] sm:$0xf]  ;;  %v294_v60 = vld [vmem:[%s5748_s27] sm:$0xff] }
  0x92   : > { %v2190_v15 = vrot.slane %v2188_v54, 1  ;;  %v941_v14 = vsel %vm5787_vm9, %v933_v61, %v940_v0  ;;  %v1127_v16 = vsel %vm5781_vm8, %v942_v5, %v1126_v57  ;;  %1124 = vst [vmem:[#allocation2 + $0xa8] sm:$0xf] %v1123_v17  ;;  %v946_v24 = vrot.slane %v944_v3, 7  ;;  %v358_v61 = vld [vmem:[%s5753_s30] sm:$0xff] }
  0x93   : > { %1125 = vst.msk [vmem:[#allocation2 + $0xac] sm:$0xf] %vm7906_vm0, %v941_v14  ;;  %1128 = vst [vmem:[#allocation2 + $0xb0] sm:$0x1] %v1127_v16  ;;  %v955_v26 = vshll.u32 %v5142_v50, 16  ;;  %v2320_v29 = vrot.slane %v4926_v51, 1  ;;  %v4932_v36 = vcombine.low %v1711_v63, %v5952_v62  ;;  %v4933_v38 = vcombine.low %v1712_v13, %v5971_v30 }
  0x94   : > { %v2191_v23 = vor.u32 %v2190_v15, %v2186_v53  ;;  %v1681_v31 = vld [vmem:[#allocation2 + $0x9c] sm:$0xf]  ;;  %v1682_v32 = vld [vmem:[#allocation2 + $0xa0] sm:$0xf]  ;;  %v454_v39 = vsub.f32 %v326_v6, %v390_v7  ;;  %v949_v44 = vor.u32 %v947_v12, %v946_v24  ;;  %v455_v27 = vsub.f32 %v327_v21, %v391_v22  ;;  %v295_v7 = vld [vmem:[%s5748_s27 + $0x8] sm:$0xff] }
  0x95   : > { %v6049_v41 = vcombine.low %v1681_v31, %v1682_v32  ;;  %v5304_v43 = vld [vmem:[#allocation2 + $0xa4] ss:$0 sps:$4 sm:$0x11]   ;;  %v950_v45 = vrot.slane %v946_v24, 4  ;;  %v954_v46 = vrot.slane %v952_v18, 7  ;;  %v2321_v49 = vrot.slane %v5839_v20, 1 }
  0x96   : > { %v2196_v40 = vsel %vm2040_vm3, %v2191_v23, %v2195_v8  ;;  %v6053_v50 = vrot.slane %v4932_v36, 1  ;;  %v2205_v51 = vshll.u32 %v5304_v43, 16  ;;  %v1130_v52 = vsel %vm5775_vm7, %v949_v44, %v1129_v28  ;;  %v1133_v53 = vld [vmem:[#allocation2 + $0xbc] sm:$0x1]  ;;  %v359_v15 = vld [vmem:[%s5753_s30 + $0x8] sm:$0xff]  ;;  %v330_v23 = vld [vmem:[%s5748_s27 + $0x120] sm:$0xff] }
  0x97   : > { %7922 = vst [vmem:[#allocation14_spill] sm:$0xff] %v6049_v41  ;;  %2257 = vrot.lane.b32.xlu0 %v2196_v40, %s5478_s8  ;;  %v2198_v62 = vshrl.u32 %v6049_v41, 16  ;;  %v2200_v30 = vshll.u32 %v6049_v41, 16  ;;  %v957_v54 = vor.u32 %v955_v26, %v954_v46  ;;  %v959_v55 = vrot.slane %v954_v46, 4  ;;  %1131 = vst [vmem:[#allocation2 + $0xb4] sm:$0xf] %v1130_v52 }
  0x98   : > { %v6060_v57 = vsel %vm2313_vm2, %v2320_v29, %v2321_v49  ;;  %v2339_v20 = vrot.slane %v5957_v2, 1  ;;  %v2207_v5 = vrot.slane %v2205_v51, 1  ;;  %v2341_v63 = vrot.slane %v4933_v38, 1  ;;  %v331_v24 = vld [vmem:[%s5748_s27 + $0x128] sm:$0xff]  ;;  %v394_v32 = vld [vmem:[%s5753_s30 + $0x120] sm:$0xff] }
  0x99   : > { %v2202_v0 = vrot.slane %v2200_v30, 1  ;;  %v2342_v6 = vrot.slane %v5976_v35, 1  ;;  %v1683_v8 = vld [vmem:[#allocation2 + $0xa8] sm:$0xf]  ;;  %v958_v12 = vsel %vm5787_vm9, %v950_v45, %v957_v54  ;;  %v1134_v13 = vsel %vm5781_vm8, %v959_v55, %v1133_v53  ;;  %v1599_v30 = vld [vmem:[#allocation3 + $0x60] sm:$0xf] }
  0x9a   : > { %v1684_v3 = vld [vmem:[#allocation2 + $0xac] sm:$0xf]  ;;  %v5161_v14 = vpack.c.bf16 %v454_v39, %v454_v39  ;;  %v5162_v17 = vpack.c.bf16 %v455_v27, %v455_v27  ;;  %v5306_v35 = vld [vmem:[#allocation2 + $0xb0] ss:$0 sps:$4 sm:$0x11]   ;;  %v422_v22 = vsub.f32 %v294_v60, %v358_v61  ;;  %v423_v45 = vsub.f32 %v295_v7, %v359_v15  ;;  %v362_v7 = vld [vmem:[%s5753_s30 + $0x20] sm:$0xff] }
  0x9b   : > { %v2203_v16 = vor.u32 %v2202_v0, %v2198_v62  ;;  %v6072_v18 = vcombine.low %v1683_v8, %v1684_v3  ;;  %1132 = vst.msk [vmem:[#allocation2 + $0xb8] sm:$0xf] %vm7906_vm0, %v958_v12  ;;  %1135 = vst [vmem:[#allocation2 + $0xbc] sm:$0x1] %v1134_v13  ;;  %v6076_v21 = vsel %vm2313_vm2, %v2341_v63, %v2342_v6  ;;  %v395_v36 = vld [vmem:[%s5753_s30 + $0x128] sm:$0xff]  ;;  %v2217_v43 = vshll.u32 %v5306_v35, 16 }
  0x9c   : > { %v1360_v26 = vshrl.u32 %v5161_v14, 16  ;;  %v1363_v28 = vshll.u32 %v5161_v14, 16  ;;  %v1368_v29 = vshrl.u32 %v5162_v17, 16  ;;  %v1371_v31 = vshll.u32 %v5162_v17, 16  ;;  %v298_v8 = vld [vmem:[%s5748_s27 + $0x20] sm:$0xff] }
  0x9d   : > { %7923 = vst [vmem:[#allocation15_spill] sm:$0xff] %v6072_v18  ;;  %v2208_v38 = vsel %vm2040_vm3, %v2203_v16, %v2207_v5  ;;  %v2210_v39 = vshrl.u32 %v6072_v18, 16  ;;  %v2212_v40 = vshll.u32 %v6072_v18, 16  ;;  %v5145_v46 = vpack.c.bf16 %v422_v22, %v422_v22  ;;  %v6579_v41 = vld [vmem:[#allocation2 + $0x98] ss:$0 sps:$4 sm:$0x11]  }
  0x9e   : > { %2259 = vrot.lane.b32.xlu1 %v2208_v38, %s5478_s8  ;;  %v1362_v44 = vrot.slane %v1360_v26, 7  ;;  %v6086_v27 = vrot.slane %v1368_v29, 7  ;;  %v2219_v62 = vrot.slane %v2217_v43, 1  ;;  %v458_v51 = vsub.f32 %v330_v23, %v394_v32  ;;  %v1685_v53 = vld [vmem:[#allocation2 + $0xb4] sm:$0xf] }
  0x9f   : > { %v2214_v49 = vrot.slane %v2212_v40, 1  ;;  %v459_v52 = vsub.f32 %v331_v24, %v395_v36  ;;  %v5146_v61 = vpack.c.bf16 %v423_v45, %v423_v45  ;;  %v1224_v5 = vshrl.u32 %v5145_v46, 16  ;;  %v1543_v26 = vld [vmem:[#allocation3] sm:$0xf]  ;;  %v5458_v4 = vld [vmem:[#allocation2 + $0xa0] sm:$0xf] }
  0xa0   : > { %v1365_v54 = vor.u32 %v1363_v28, %v1362_v44  ;;  %v1366_v55 = vrot.slane %v1362_v44, 4  ;;  %v1373_v60 = vor.u32 %v1371_v31, %v6086_v27  ;;  %v1227_v63 = vshll.u32 %v5145_v46, 16  ;;  %v299_v46 = vld [vmem:[%s5748_s27 + $0x28] sm:$0xff] }
  0xa1   : > { %v2215_v0 = vor.u32 %v2214_v49, %v2210_v39  ;;  %v5163_v6 = vpack.c.bf16 %v458_v51, %v458_v51  ;;  %v1232_v13 = vshrl.u32 %v5146_v61, 16  ;;  %v1235_v14 = vshll.u32 %v5146_v61, 16  ;;  %v363_v49 = vld [vmem:[%s5753_s30 + $0x28] sm:$0xff] }
  0xa2   : > { %v1686_v15 = vld [vmem:[#allocation2 + $0xb8] sm:$0xf]  ;;  %v1374_v3 = vsel %vm5787_vm9, %v1366_v55, %v1373_v60  ;;  %v1600_v12 = vsel %vm5775_vm7, %v1365_v54, %v1599_v30  ;;  %v5308_v35 = vld [vmem:[#allocation2 + $0xbc] ss:$0 sps:$4 sm:$0x11]   ;;  %v1226_v22 = vrot.slane %v1224_v5, 7  ;;  %v5164_v23 = vpack.c.bf16 %v459_v52, %v459_v52 }
  0xa3   : > { %v2220_v17 = vsel %vm2040_vm3, %v2215_v0, %v2219_v62  ;;  %v6096_v16 = vcombine.low %v1685_v53, %v1686_v15  ;;  %1601 = vst [vmem:[#allocation3 + $0x60] sm:$0xf] %v1600_v12  ;;  %1602 = vst.msk [vmem:[#allocation3 + $0x64] sm:$0xf] %vm7906_vm0, %v1374_v3  ;;  %v6100_v24 = vrot.slane %v1232_v13, 7  ;;  %v1377_v28 = vshrl.u32 %v5163_v6, 16 }
  0xa4   : > { %2261 = vrot.lane.b32.xlu0 %v2220_v17, %s5478_s8  ;;  %v1380_v29 = vshll.u32 %v5163_v6, 16  ;;  %v426_v31 = vsub.f32 %v298_v8, %v362_v7  ;;  %v2229_v38 = vshll.u32 %v5308_v35, 16  ;;  %v1229_v39 = vor.u32 %v1227_v63, %v1226_v22  ;;  %v1606_v53 = vld [vmem:[#allocation3 + $0x6c] sm:$0xf]  ;;  %v1603_v8 = vld [vmem:[#allocation3 + $0x68] sm:$0x1] }
  0xa5   : > { %7924 = vst [vmem:[#allocation16_spill] sm:$0xff] %v6096_v16  ;;  %v2222_v32 = vshrl.u32 %v6096_v16, 16  ;;  %v2224_v36 = vshll.u32 %v6096_v16, 16  ;;  %v1230_v40 = vrot.slane %v1226_v22, 4  ;;  %v1237_v43 = vor.u32 %v1235_v14, %v6100_v24 }
  0xa6   : > { %v1379_v44 = vrot.slane %v1377_v28, 7  ;;  %v1385_v45 = vshrl.u32 %v5164_v23, 16  ;;  %v2231_v30 = vrot.slane %v2229_v38, 1  ;;  %v1544_v51 = vsel %vm5775_vm7, %v1229_v39, %v1543_v26 }
  0xa7   : > { %v2226_v62 = vrot.slane %v2224_v36, 1  ;;  %v1388_v52 = vshll.u32 %v5164_v23, 16  ;;  %v1238_v54 = vsel %vm5787_vm9, %v1230_v40, %v1237_v43  ;;  %1545 = vst [vmem:[#allocation3] sm:$0xf] %v1544_v51  ;;  %v427_v5 = vsub.f32 %v299_v46, %v363_v49 }
  0xa8   : > { %2366 = vrot.lane.b32.xlu0 %v6060_v57, %s5477_s7  ;;  %v1382_v55 = vor.u32 %v1380_v29, %v1379_v44  ;;  %v1383_v60 = vrot.slane %v1379_v44, 4  ;;  %v1387_v61 = vrot.slane %v1385_v45, 7  ;;  %1546 = vst.msk [vmem:[#allocation3 + $0x4] sm:$0xf] %vm7906_vm0, %v1238_v54  ;;  %v5147_v63 = vpack.c.bf16 %v426_v31, %v426_v31  ;;  %v1550_v29 = vld [vmem:[#allocation3 + $0xc] sm:$0xf] }
  0xa9   : > { %v2227_v0 = vor.u32 %v2226_v62, %v2222_v32  ;;  %v1375_v6 = vrot.slane %v6086_v27, 4  ;;  %v5148_v14 = vpack.c.bf16 %v427_v5, %v427_v5  ;;  %v2340_v23 = vsel %vm2313_vm2, %v6053_v50, %v2339_v20  ;;  %v1610_v31 = vld [vmem:[#allocation3 + $0x74] sm:$0x1] }
  0xaa   : > { %v1735_v7 = vld [vmem:[#allocation3 + $0x60] sm:$0xf]  ;;  %v6115_v15 = vld [vmem:[#allocation3 + $0x64] sm:$0xf]  ;;  %v1390_v3 = vor.u32 %v1388_v52, %v1387_v61  ;;  %v1607_v57 = vsel %vm5775_vm7, %v1382_v55, %v1606_v53  ;;  %v1241_v17 = vshrl.u32 %v5147_v63, 16  ;;  %v1244_v35 = vshll.u32 %v5147_v63, 16 }
  0xab   : > { %v2232_v12 = vsel %vm2040_vm3, %v2227_v0, %v2231_v30  ;;  %v4948_v13 = vcombine.low %v1735_v7, %v6115_v15  ;;  %1608 = vst [vmem:[#allocation3 + $0x6c] sm:$0xf] %v1607_v57  ;;  %v1604_v22 = vsel %vm5781_vm8, %v1375_v6, %v1603_v8  ;;  %v1249_v26 = vshrl.u32 %v5148_v14, 16  ;;  %v1554_v44 = vld [vmem:[#allocation3 + $0x14] sm:$0x1] }
  0xac   : > { %2263 = vrot.lane.b32.xlu1 %v2232_v12, %s5478_s8  ;;  %2380 = vrot.lane.b32.xlu0 %v6076_v21, %s5477_s7  ;;  %v1391_v27 = vsel %vm5787_vm9, %v1383_v60, %v1390_v3  ;;  %v1252_v28 = vshll.u32 %v5148_v14, 16  ;;  %1605 = vst [vmem:[#allocation3 + $0x68] sm:$0x1] %v1604_v22  ;;  %v1547_v21 = vld [vmem:[#allocation3 + $0x8] sm:$0x1]  ;;  %v1243_v36 = vrot.slane %v1241_v17, 7 }
  0xad   : > { %1609 = vst.msk [vmem:[#allocation3 + $0x70] sm:$0xf] %vm7906_vm0, %v1391_v27  ;;  %v2653_v32 = vshll.u32 %v4948_v13, 16  ;;  %v1239_v38 = vrot.slane %v6100_v24, 4  ;;  %v1392_v39 = vrot.slane %v1387_v61, 4  ;;  %v1251_v43 = vrot.slane %v1249_v26, 7 }
  0xae   : > { %v1719_v40 = vld [vmem:[#allocation3] sm:$0xf]  ;;  %v1246_v50 = vor.u32 %v1244_v35, %v1243_v36  ;;  %v1247_v20 = vrot.slane %v1243_v36, 4  ;;  %v2651_v51 = vshrl.u32 %v4948_v13, 16  ;;  %v6155_v22 = vld [vmem:[#allocation2 + $0x70] sm:$0xf] }
  0xaf   : > { %v6136_v2 = vld [vmem:[#allocation3 + $0x4] sm:$0xf]  ;;  %v1548_v45 = vsel %vm5781_vm8, %v1239_v38, %v1547_v21  ;;  %v1611_v46 = vsel %vm5781_vm8, %v1392_v39, %v1610_v31  ;;  %v1254_v49 = vor.u32 %v1252_v28, %v1251_v43  ;;  %v2655_v52 = vrot.slane %v2653_v32, 1  ;;  %v1775_v63 = vld [vmem:[#allocation3 + $0x60] sm:$0xe] }
  0xb0   : > { %2378 = vrot.lane.b32.xlu1 %v2340_v23, %s5477_s7  ;;  %2490 = vrot.lane.b32.xlu0 %v4948_v13, %s5479_s9  ;;  %v4940_v24 = vcombine.low %v1719_v40, %v6136_v2  ;;  %1549 = vst [vmem:[#allocation3 + $0x8] sm:$0x1] %v1548_v45  ;;  %1612 = vst [vmem:[#allocation3 + $0x74] sm:$0x1] %v1611_v46  ;;  %v1551_v30 = vsel %vm5775_vm7, %v1246_v50, %v1550_v29  ;;  %v1256_v53 = vrot.slane %v1251_v43, 4 }
  0xb1   : > { %v1255_v55 = vsel %vm5787_vm9, %v1247_v20, %v1254_v49  ;;  %1552 = vst [vmem:[#allocation3 + $0xc] sm:$0xf] %v1551_v30  ;;  %v2656_v6 = vor.u32 %v2655_v52, %v2651_v51  ;;  %v4980_v14 = vcombine.low %v1775_v63, %v6115_v15  ;;  %v1799_v35 = vld [vmem:[#allocation2 + $0x6c] sm:$0xf] }
  0xb2   : > { %v1737_v62 = vld [vmem:[#allocation3 + $0x6c] sm:$0xf]  ;;  %v2557_v54 = vshll.u32 %v4940_v24, 16  ;;  %1553 = vst.msk [vmem:[#allocation3 + $0x10] sm:$0xf] %vm7906_vm0, %v1255_v55  ;;  %v1555_v61 = vsel %vm5781_vm8, %v1256_v53, %v1554_v44  ;;  %v2555_v3 = vshrl.u32 %v4940_v24, 16 }
  0xb3   : > { %v5317_v5 = vld [vmem:[#allocation3 + $0x68] ss:$0 sps:$4 sm:$0x11]   ;;  %1556 = vst [vmem:[#allocation3 + $0x14] sm:$0x1] %v1555_v61  ;;  %v2850_v20 = vrot.slane %v4980_v14, 1 }
  0xb4   : > { %2474 = vrot.lane.b32.xlu1 %v4940_v24, %s5479_s9  ;;  %v1738_v60 = vld [vmem:[#allocation3 + $0x70] sm:$0xf]  ;;  %v2658_v7 = vshll.u32 %v5317_v5, 16  ;;  %v2559_v57 = vrot.slane %v2557_v54, 1  ;;  %v1776_v23 = vld [vmem:[#allocation3 + $0x6c] sm:$0xe] }
  0xb5   : > { %v4949_v0 = vcombine.low %v1737_v62, %v1738_v60  ;;  %v1767_v21 = vld [vmem:[#allocation3] sm:$0xe]  ;;  %v4981_v44 = vcombine.low %v1776_v23, %v1738_v60  ;;  %v2851_v45 = vrot.slane %v5317_v5, 1  ;;  %v6168_v62 = vcombine.low %v1799_v35, %v6155_v22  ;;  %v6174_v61 = vld [vmem:[#allocation2 + $0x10] sm:$0xf] }
  0xb6   : > { %v2660_v27 = vrot.slane %v2658_v7, 1  ;;  %v2560_v36 = vor.u32 %v2559_v57, %v2555_v3  ;;  %v4972_v30 = vcombine.low %v1767_v21, %v6136_v2  ;;  %v1783_v60 = vld [vmem:[#allocation2 + $0xc] sm:$0xf]  ;;  %v1801_v2 = vld [vmem:[#allocation2 + $0x78] sm:$0xf] }
  0xb7   : > { %v2665_v8 = vshll.u32 %v4949_v0, 16  ;;  %2492 = vrot.lane.b32.xlu0 %v4949_v0, %s5479_s9  ;;  %v6152_v12 = vld [vmem:[#allocation3 + $0x8] ss:$0 sps:$4 sm:$0x11]   ;;  %v2663_v13 = vshrl.u32 %v4949_v0, 16  ;;  %v302_v0 = vld [vmem:[%s5748_s27 + $0x40] sm:$0xff]  ;;  %v2852_v5 = vsel %vm2313_vm2, %v2850_v20, %v2851_v45 }
  0xb8   : > { %v5319_v17 = vld [vmem:[#allocation3 + $0x74] ss:$0 sps:$4 sm:$0x11]   ;;  %v1721_v26 = vld [vmem:[#allocation3 + $0xc] sm:$0xf]  ;;  %v2562_v28 = vshll.u32 %v6152_v12, 16  ;;  %v2661_v32 = vsel %vm2040_vm3, %v2656_v6, %v2660_v27 }
  0xb9   : > { %v2667_v29 = vrot.slane %v2665_v8, 1  ;;  %v6158_v31 = vld [vmem:[#allocation3 + $0x10] sm:$0xf]  ;;  %v2670_v38 = vshll.u32 %v5319_v17, 16  ;;  %v1768_v53 = vld [vmem:[#allocation3 + $0xc] sm:$0xe] }
  0xba   : > { %v4941_v39 = vcombine.low %v1721_v26, %v6158_v31  ;;  %v2564_v15 = vrot.slane %v2562_v28, 1  ;;  %v6163_v43 = vld [vmem:[#allocation3 + $0x14] ss:$0 sps:$4 sm:$0x11]   ;;  %v2853_v63 = vrot.slane %v4981_v44, 1  ;;  %v2854_v6 = vrot.slane %v5319_v17, 1 }
  0xbb   : > { %2762 = vrot.lane.b32.xlu0 %v2661_v32, %s5480_s10  ;;  %v2668_v40 = vor.u32 %v2667_v29, %v2663_v13  ;;  %v2672_v50 = vrot.slane %v2670_v38, 1  ;;  %v2574_v49 = vshll.u32 %v6163_v43, 16  ;;  %v6178_v8 = vld [vmem:[#allocation2 + $0x7c] sm:$0xf]  ;;  %v303_v7 = vld [vmem:[%s5748_s27 + $0x48] sm:$0xff]  ;;  %v3165_v57 = vshll.u32 %v6168_v62, 16 }
  0xbc   : > { %v2569_v46 = vshll.u32 %v4941_v39, 16  ;;  %2476 = vrot.lane.b32.xlu1 %v4941_v39, %s5479_s9  ;;  %v2567_v24 = vshrl.u32 %v4941_v39, 16  ;;  %v2565_v51 = vsel %vm2040_vm3, %v2560_v36, %v2564_v15  ;;  %v1785_v13 = vld [vmem:[#allocation2 + $0x18] sm:$0xf]  ;;  %v6183_v14 = vld [vmem:[#allocation2 + $0x1c] sm:$0xf]  ;;  %v4973_v35 = vcombine.low %v1768_v53, %v6158_v31 }
  0xbd   : > { %v2673_v52 = vsel %vm2040_vm3, %v2668_v40, %v2672_v50  ;;  %v2576_v55 = vrot.slane %v2574_v49, 1  ;;  %v366_v27 = vld [vmem:[%s5753_s30 + $0x40] sm:$0xff]  ;;  %v2826_v23 = vrot.slane %v4972_v30, 1  ;;  %v2827_v26 = vrot.slane %v6152_v12, 1  ;;  %v367_v28 = vld [vmem:[%s5753_s30 + $0x48] sm:$0xff] }
  0xbe   : > { %v2571_v54 = vrot.slane %v2569_v46, 1  ;;  %v6188_v17 = vld [vmem:[#allocation2 + $0x74] ss:$0 sps:$4 sm:$0x11]   ;;  %v4997_v21 = vcombine.low %v1801_v2, %v6178_v8  ;;  %v2855_v32 = vsel %vm2313_vm2, %v2853_v63, %v2854_v6  ;;  %v6196_v36 = vcombine.low %v1783_v60, %v6174_v61  ;;  %v6199_v12 = vld [vmem:[#allocation2 + $0x6c] sm:$0xe] }
  0xbf   : > { %2764 = vrot.lane.b32.xlu0 %v2673_v52, %s5480_s10  ;;  %v430_v31 = vsub.f32 %v302_v0, %v366_v27  ;;  %v6202_v38 = vcombine.low %v1785_v13, %v6183_v14  ;;  %v3163_v39 = vshrl.u32 %v6168_v62, 16  ;;  %v3167_v15 = vrot.slane %v3165_v57, 1  ;;  %v334_v44 = vld [vmem:[%s5748_s27 + $0x140] sm:$0xff]  ;;  %v6211_v30 = vld [vmem:[#allocation2 + $0x14] ss:$0 sps:$4 sm:$0x11]  }
  0xc0   : > { %2746 = vrot.lane.b32.xlu1 %v2565_v51, %s5480_s10  ;;  %v2572_v3 = vor.u32 %v2571_v54, %v2567_v24  ;;  %v431_v40 = vsub.f32 %v303_v7, %v367_v28  ;;  %v398_v50 = vld [vmem:[%s5753_s30 + $0x140] sm:$0xff]  ;;  %v2828_v20 = vsel %vm2313_vm2, %v2826_v23, %v2827_v26  ;;  %v2829_v45 = vrot.slane %v4973_v35, 1  ;;  %v399_v63 = vld [vmem:[%s5753_s30 + $0x148] sm:$0xff] }
  0xc1   : > { %v2830_v46 = vrot.slane %v6163_v43, 1  ;;  %v3170_v24 = vshll.u32 %v6188_v17, 16  ;;  %v3177_v49 = vshll.u32 %v4997_v21, 16  ;;  %v6213_v51 = vld [vmem:[#allocation2 + $0x80] ss:$0 sps:$4 sm:$0x11]   ;;  %v5028_v52 = vcombine.low %v6199_v12, %v6155_v22 }
  0xc2   : > { %v2577_v29 = vsel %vm2040_vm3, %v2572_v3, %v2576_v55  ;;  %v5149_v53 = vpack.c.bf16 %v430_v31, %v430_v31  ;;  %v462_v54 = vsub.f32 %v334_v44, %v398_v50  ;;  %v3069_v55 = vshll.u32 %v6196_v36, 16  ;;  %v6230_v44 = vld [vmem:[#allocation2 + $0x20] ss:$0 sps:$4 sm:$0x11]   ;;  %v1617_v12 = vld [vmem:[#allocation3 + $0x80] sm:$0x1] }
  0xc3   : > { %2890 = vrot.lane.b32.xlu0 %v2852_v5, %s5481_s11  ;;  %v3081_v43 = vshll.u32 %v6202_v38, 16  ;;  %v3168_v60 = vor.u32 %v3167_v15, %v3163_v39  ;;  %v5150_v0 = vpack.c.bf16 %v431_v40, %v431_v40  ;;  %v335_v5 = vld [vmem:[%s5748_s27 + $0x148] sm:$0xff]  ;;  %v2831_v6 = vsel %vm2313_vm2, %v2829_v45, %v2830_v46  ;;  %v1557_v40 = vld [vmem:[#allocation3 + $0x18] sm:$0xf] }
  0xc4   : > { %2748 = vrot.lane.b32.xlu1 %v2577_v29, %s5480_s10  ;;  %v3172_v2 = vrot.slane %v3170_v24, 1  ;;  %v1258_v7 = vshrl.u32 %v5149_v53, 16  ;;  %v1261_v3 = vshll.u32 %v5149_v53, 16  ;;  %v3175_v57 = vshrl.u32 %v4997_v21, 16 }
  0xc5   : > { %v3179_v13 = vrot.slane %v3177_v49, 1  ;;  %v1266_v27 = vshrl.u32 %v5150_v0, 16  ;;  %v1269_v35 = vshll.u32 %v5150_v0, 16  ;;  %v3182_v23 = vshll.u32 %v6213_v51, 16 }
  0xc6   : > { %v1260_v26 = vrot.slane %v1258_v7, 7  ;;  %v463_v28 = vsub.f32 %v335_v5, %v399_v63  ;;  %v5165_v29 = vpack.c.bf16 %v462_v54, %v462_v54  ;;  %v3071_v31 = vrot.slane %v3069_v55, 1  ;;  %v1840_v54 = vld [vmem:[#allocation2 + $0x78] sm:$0xe] }
  0xc7   : > { %2892 = vrot.lane.b32.xlu0 %v2855_v32, %s5481_s11  ;;  %v3067_v32 = vshrl.u32 %v6196_v36, 16  ;;  %v3074_v39 = vshll.u32 %v6211_v30, 16  ;;  %v1268_v15 = vrot.slane %v1266_v27, 7  ;;  %v3180_v46 = vor.u32 %v3179_v13, %v3175_v57  ;;  %v6239_v57 = vld [vmem:[#allocation2 + $0x18] sm:$0xe] }
  0xc8   : > { %2874 = vrot.lane.b32.xlu1 %v2828_v20, %s5481_s11  ;;  %v1263_v50 = vor.u32 %v1261_v3, %v1260_v26  ;;  %v1264_v20 = vrot.slane %v1260_v26, 4  ;;  %v5166_v45 = vpack.c.bf16 %v463_v28, %v463_v28  ;;  %v1394_v49 = vshrl.u32 %v5165_v29, 16  ;;  %v1613_v3 = vld [vmem:[#allocation3 + $0x78] sm:$0xf] }
  0xc9   : > { %v1271_v24 = vor.u32 %v1269_v35, %v1268_v15  ;;  %v1397_v53 = vshll.u32 %v5165_v29, 16  ;;  %v3184_v0 = vrot.slane %v3182_v23, 1  ;;  %v3079_v13 = vshrl.u32 %v6202_v38, 16  ;;  %v1561_v23 = vld [vmem:[#allocation3 + $0x20] sm:$0x1]  ;;  %v306_v26 = vld [vmem:[%s5748_s27 + $0x60] sm:$0xff] }
  0xca   : > { %v1558_v55 = vsel %vm5775_vm7, %v1263_v50, %v1557_v40  ;;  %v1402_v5 = vshrl.u32 %v5166_v45, 16  ;;  %v1405_v63 = vshll.u32 %v5166_v45, 16  ;;  %v1396_v7 = vrot.slane %v1394_v49, 7  ;;  %v370_v40 = vld [vmem:[%s5753_s30 + $0x60] sm:$0xff]  ;;  %v371_v50 = vld [vmem:[%s5753_s30 + $0x68] sm:$0xff] }
  0xcb   : > { %3002 = vrot.lane.b32.xlu0 %v6168_v62, %s5482_s12  ;;  %v3173_v62 = vsel %vm2040_vm3, %v3168_v60, %v3172_v2  ;;  %v1831_v60 = vld [vmem:[#allocation2 + $0xc] sm:$0xe]  ;;  %v3076_v2 = vrot.slane %v3074_v39, 1  ;;  %1559 = vst [vmem:[#allocation3 + $0x18] sm:$0xf] %v1558_v55  ;;  %v3083_v27 = vrot.slane %v3081_v43, 1  ;;  %v5029_v28 = vcombine.low %v1840_v54, %v6178_v8 }
  0xcc   : > { %2876 = vrot.lane.b32.xlu1 %v2831_v6, %s5481_s11  ;;  %v3072_v6 = vor.u32 %v3071_v31, %v3067_v32  ;;  %v3086_v35 = vshll.u32 %v6230_v44, 16  ;;  %v1399_v29 = vor.u32 %v1397_v53, %v1396_v7  ;;  %v1400_v32 = vrot.slane %v1396_v7, 4  ;;  %v307_v39 = vld [vmem:[%s5748_s27 + $0x68] sm:$0xff]  ;;  %v6255_v49 = vld [vmem:[#allocation3 + $0x10] sm:$0xf] }
  0xcd   : > { %v1273_v31 = vrot.slane %v1268_v15, 4  ;;  %v3185_v43 = vsel %vm2040_vm3, %v3180_v46, %v3184_v0  ;;  %v3363_v45 = vrot.slane %v6188_v17, 1  ;;  %v434_v0 = vsub.f32 %v306_v26, %v370_v40  ;;  %v6280_v7 = vld [vmem:[#allocation3 + $0x70] sm:$0xf]  ;;  %v403_v26 = vld [vmem:[%s5753_s30 + $0x168] sm:$0xff] }
  0xce   : > { %v3077_v15 = vsel %vm2040_vm3, %v3072_v6, %v3076_v2  ;;  %v1614_v46 = vsel %vm5775_vm7, %v1399_v29, %v1613_v3  ;;  %v3088_v17 = vrot.slane %v3086_v35, 1  ;;  %v435_v55 = vsub.f32 %v307_v39, %v371_v50  ;;  %v1713_v50 = vld [vmem:[#allocation2 + $0x78] sm:$0xe] }
  0xcf   : > { %3004 = vrot.lane.b32.xlu0 %v4997_v21, %s5482_s12  ;;  %v1272_v21 = vsel %vm5787_vm9, %v1264_v20, %v1271_v24  ;;  %v3362_v20 = vrot.slane %v5028_v52, 1  ;;  %v1848_v24 = vld [vmem:[#allocation3 + $0xc] sm:$0xf]  ;;  %v1562_v22 = vsel %vm5781_vm8, %v1273_v31, %v1561_v23  ;;  %v3084_v52 = vor.u32 %v3083_v27, %v3079_v13  ;;  %1615 = vst [vmem:[#allocation3 + $0x78] sm:$0xf] %v1614_v46  ;;  %v338_v27 = vld [vmem:[%s5748_s27 + $0x160] sm:$0xff] }
  0xd0   : > { %2986 = vrot.lane.b32.xlu1 %v6196_v36, %s5482_s12  ;;  %1560 = vst.msk [vmem:[#allocation3 + $0x1c] sm:$0xf] %vm7906_vm0, %v1272_v21  ;;  %v1404_v36 = vrot.slane %v1402_v5, 7  ;;  %1563 = vst [vmem:[#allocation3 + $0x20] sm:$0x1] %v1562_v22  ;;  %v6271_v54 = vcombine.low %v1848_v24, %v6255_v49  ;;  %v3339_v2 = vrot.slane %v6211_v30, 1  ;;  %v5151_v3 = vpack.c.bf16 %v434_v0, %v434_v0 }
  0xd1   : > { %v3364_v5 = vsel %vm2313_vm2, %v3362_v20, %v3363_v45  ;;  %v1864_v21 = vld [vmem:[#allocation3 + $0x6c] sm:$0xf]  ;;  %v3089_v13 = vsel %vm2040_vm3, %v3084_v52, %v3088_v17  ;;  %v402_v23 = vld [vmem:[%s5753_s30 + $0x160] sm:$0xff]  ;;  %v3342_v40 = vrot.slane %v6230_v44, 1  ;;  %v5446_v52 = vld [vmem:[#allocation2 + $0x7c] sm:$0xf] }
  0xd2   : > { %v1407_v8 = vor.u32 %v1405_v63, %v1404_v36  ;;  %v3365_v63 = vrot.slane %v5029_v28, 1  ;;  %v3581_v35 = vshll.u32 %v6271_v54, 16  ;;  %v6293_v28 = vcombine.low %v1864_v21, %v6280_v7  ;;  %v1850_v22 = vld [vmem:[#allocation3 + $0x18] sm:$0xf] }
  0xd3   : > { %3274 = vrot.lane.b32.xlu0 %v3173_v62, %s5483_s13  ;;  %v5020_v62 = vcombine.low %v1831_v60, %v6174_v61  ;;  %v1409_v61 = vrot.slane %v1404_v36, 4  ;;  %v3366_v60 = vrot.slane %v6213_v51, 1  ;;  %v339_v51 = vld [vmem:[%s5748_s27 + $0x168] sm:$0xff]  ;;  %v6287_v36 = vld [vmem:[#allocation3 + $0x14] ss:$0 sps:$4 sm:$0x11]   ;;  %v466_v20 = vsub.f32 %v338_v27, %v402_v23 }
  0xd4   : > { %2988 = vrot.lane.b32.xlu1 %v6202_v38, %s5482_s12  ;;  %v1408_v53 = vsel %vm5787_vm9, %v1400_v32, %v1407_v8  ;;  %v5021_v38 = vcombine.low %v6239_v57, %v6183_v14  ;;  %v5152_v57 = vpack.c.bf16 %v435_v55, %v435_v55  ;;  %v1275_v31 = vshrl.u32 %v5151_v3, 16  ;;  %v1564_v55 = vld [vmem:[#allocation3 + $0x24] sm:$0xf]  ;;  %v5448_v27 = vld [vmem:[#allocation2 + $0x80] ss:$0 sps:$4 sm:$0x11]  }
  0xd5   : > { %1616 = vst.msk [vmem:[#allocation3 + $0x7c] sm:$0xf] %vm7906_vm0, %v1408_v53  ;;  %v1618_v6 = vsel %vm5781_vm8, %v1409_v61, %v1617_v12  ;;  %v3338_v14 = vrot.slane %v5020_v62, 1  ;;  %v3367_v30 = vsel %vm2313_vm2, %v3365_v63, %v3366_v60  ;;  %v467_v45 = vsub.f32 %v339_v51, %v403_v26  ;;  %v1706_v62 = vld [vmem:[#allocation2 + $0x24] sm:$0xe] }
  0xd6   : > { %1619 = vst [vmem:[#allocation3 + $0x80] sm:$0x1] %v1618_v6  ;;  %v3341_v32 = vrot.slane %v5021_v38, 1  ;;  %v1283_v39 = vshrl.u32 %v5152_v57, 16  ;;  %v3583_v24 = vrot.slane %v3581_v35, 1  ;;  %v3586_v8 = vshll.u32 %v6287_v36, 16  ;;  %v6315_v35 = vpop.permute.xlu0 %2362 }
  0xd7   : > { %3276 = vrot.lane.b32.xlu0 %v3185_v43, %s5483_s13  ;;  %v3340_v29 = vsel %vm2313_vm2, %v3338_v14, %v3339_v2  ;;  %v3579_v43 = vshrl.u32 %v6271_v54, 16  ;;  %v1286_v46 = vshll.u32 %v5152_v57, 16  ;;  %v6301_v12 = vld [vmem:[#allocation3 + $0x1c] sm:$0xf]  ;;  %v4934_v44 = vcombine.low %v1713_v50, %v5446_v52 }
  0xd8   : > { %3258 = vrot.lane.b32.xlu1 %v3077_v15, %s5483_s13  ;;  %v1278_v15 = vshll.u32 %v5151_v3, 16  ;;  %v1277_v17 = vrot.slane %v1275_v31, 7  ;;  %v6304_v53 = vrot.slane %v1283_v39, 7  ;;  %v3343_v61 = vsel %vm2313_vm2, %v3341_v32, %v3342_v40  ;;  %v5447_v38 = vld [vmem:[#allocation2 + $0x28] sm:$0xf] }
  0xd9   : > { %v4927_v0 = vcombine.low %v1706_v62, %v5447_v38  ;;  %v5168_v63 = vpack.c.bf16 %v467_v45, %v467_v45  ;;  %v6310_v60 = vcombine.low %v1850_v22, %v6301_v12  ;;  %v3677_v21 = vshll.u32 %v6293_v28, 16  ;;  %v5449_v40 = vld [vmem:[#allocation2 + $0x2c] ss:$0 sps:$4 sm:$0x11]   ;;  %v1866_v38 = vld [vmem:[#allocation3 + $0x78] sm:$0xf] }
  0xda   : > { %v1280_v6 = vor.u32 %v1278_v15, %v1277_v17  ;;  %v1281_v14 = vrot.slane %v1277_v17, 4  ;;  %v1288_v2 = vor.u32 %v1286_v46, %v6304_v53  ;;  %v3584_v3 = vor.u32 %v3583_v24, %v3579_v43  ;;  %v1620_v17 = vld [vmem:[#allocation3 + $0x84] sm:$0xf] }
  0xdb   : > { %3402 = vrot.lane.b32.xlu0 %v3364_v5, %s5484_s14  ;;  %v5167_v5 = vpack.c.bf16 %v466_v20, %v466_v20  ;;  %v3588_v57 = vrot.slane %v3586_v8, 1  ;;  %v2345_v51 = vrot.slane %v5448_v27, 1  ;;  %v1419_v31 = vshrl.u32 %v5168_v63, 16  ;;  %v5391_v20 = vld [vmem:[%s7887_s3] sm:$0xff]  }
  0xdc   : > { %3260 = vrot.lane.b32.xlu1 %v3089_v13, %s5483_s13  ;;  %v2344_v13 = vrot.slane %v4934_v44, 1  ;;  %v1289_v23 = vsel %vm5787_vm9, %v1281_v14, %v1288_v2  ;;  %v1565_v26 = vsel %vm5775_vm7, %v1280_v6, %v1564_v55  ;;  %v2323_v39 = vrot.slane %v4927_v0, 1  ;;  %v6331_v8 = vld [vmem:[#allocation3 + $0x20] ss:$0 sps:$4 sm:$0x11]   ;;  %5199 = vmatprep.subr.bf16.mxu0 %v5391_v20  ;;  %v6343_v2 = vpop.permute.xlu0 %2233 }
  0xdd   : > { %1566 = vst [vmem:[#allocation3 + $0x24] sm:$0xf] %v1565_v26  ;;  %1567 = vst.msk [vmem:[#allocation3 + $0x28] sm:$0xf] %vm7906_vm0, %v1289_v23  ;;  %v1414_v32 = vshll.u32 %v5167_v5, 16  ;;  %v2324_v50 = vrot.slane %v5449_v40, 1  ;;  %v3589_v24 = vsel %vm2040_vm3, %v3584_v3, %v3588_v57  ;;  %5200 = vmatpush3.bf16.msra.mxu0 %v5391_v20  ;;  %5243 = vmatprep.subr.bf16.mxu1 %v5391_v20  ;;  %v6360_v26 = vpop.permute.xlu1 %2364 }
  0xde   : > { %v1422_v43 = vshll.u32 %v5168_v63, 16  ;;  %v3593_v45 = vshll.u32 %v6310_v60, 16  ;;  %v1421_v15 = vrot.slane %v1419_v31, 7  ;;  %v2346_v46 = vsel %vm2313_vm2, %v2344_v13, %v2345_v51  ;;  %v1714_v44 = vld [vmem:[#allocation2 + $0x84] sm:$0xe]  ;;  %v5392_v3 = vld [vmem:[%s7887_s3 + $0x8] sm:$0xff]   ;;  %5249 = vmatpush3.bf16.msra.mxu1 %v5391_v20 }
  0xdf   : > { %3404 = vrot.lane.b32.xlu0 %v3367_v30, %s5484_s14  ;;  %v6321_v30 = vld [vmem:[#allocation3 + $0x74] ss:$0 sps:$4 sm:$0x11]   ;;  %v3675_v22 = vshrl.u32 %v6293_v28, 16  ;;  %v3679_v52 = vrot.slane %v3677_v21, 1  ;;  %v3591_v14 = vshrl.u32 %v6310_v60, 16  ;;  %5201 = vmatprep.subr.bf16.mxu0 %v5392_v3 }
  0xe0   : > { %3386 = vrot.lane.b32.xlu1 %v3340_v29, %s5484_s14  ;;  %v1411_v29 = vshrl.u32 %v5167_v5, 16  ;;  %v6337_v0 = vld [vmem:[#allocation3 + $0x7c] sm:$0xf]  ;;  %v3682_v55 = vshll.u32 %v6321_v30, 16  ;;  %v1424_v6 = vor.u32 %v1422_v43, %v1421_v15  ;;  %v1290_v21 = vrot.slane %v6304_v53, 4  ;;  %5244 = vmatprep.subr.bf16.mxu1 %v5392_v3 }
  0xe1   : > { %v1723_v57 = vld [vmem:[#allocation3 + $0x18] sm:$0xf]  ;;  %v6349_v13 = vld [vmem:[#allocation3 + $0x1c] sm:$0xf]  ;;  %v3595_v27 = vrot.slane %v3593_v45, 1  ;;  %v3598_v51 = vshll.u32 %v6331_v8, 16  ;;  %v6358_v53 = vcombine.low %v1866_v38, %v6337_v0  ;;  %5202 = vmatpush3.bf16.msra.mxu0 %v5392_v3 }
  0xe2   : > { %v1413_v62 = vrot.slane %v1411_v29, 7  ;;  %v3684_v31 = vrot.slane %v3682_v55, 1  ;;  %v6368_v20 = vcombine.low %v1723_v57, %v6349_v13  ;;  %v1426_v45 = vrot.slane %v1421_v15, 4  ;;  %5250 = vmatpush3.bf16.msra.mxu1 %v5392_v3  ;;  %v6381_v38 = vld [vmem:[#allocation3 + $0x80] ss:$0 sps:$4 sm:$0x11]  }
  0xe3   : > { %3514 = vrot.lane.b32.xlu0 %v6293_v28, %s5485_s15  ;;  %v2325_v28 = vsel %vm2313_vm2, %v2323_v39, %v2324_v50  ;;  %v5450_v39 = vld [vmem:[#allocation2 + $0x88] sm:$0xf]  ;;  %v1624_v50 = vld [vmem:[#allocation3 + $0x8c] sm:$0x1]  ;;  %v1739_v3 = vld [vmem:[#allocation3 + $0x78] sm:$0xf] }
  0xe4   : > { %3388 = vrot.lane.b32.xlu1 %v3343_v61, %s5484_s14  ;;  %v1568_v61 = vld [vmem:[#allocation3 + $0x2c] sm:$0x1]  ;;  %v1416_v5 = vor.u32 %v1414_v32, %v1413_v62  ;;  %v1417_v63 = vrot.slane %v1413_v62, 4  ;;  %v3680_v32 = vor.u32 %v3679_v52, %v3675_v22  ;;  %v4935_v40 = vcombine.low %v1714_v44, %v5450_v39  ;;  %v6375_v22 = vpop.permute.xlu0 %2235  ;;  %v6396_v57 = vld [vmem:[#allocation3 + $0x7c] sm:$0xf] }
  0xe5   : > { %v1569_v29 = vsel %vm5781_vm8, %v1290_v21, %v1568_v61  ;;  %v3600_v62 = vrot.slane %v3598_v51, 1  ;;  %v3689_v52 = vshll.u32 %v6358_v53, 16  ;;  %v6393_v21 = vld [vmem:[#allocation3 + $0x20] ss:$0 sps:$4 sm:$0x11]   ;;  %v3687_v51 = vshrl.u32 %v6358_v53, 16 }
  0xe6   : > { %v1425_v23 = vsel %vm5787_vm9, %v1417_v63, %v1424_v6  ;;  %1570 = vst [vmem:[#allocation3 + $0x2c] sm:$0x1] %v1569_v29  ;;  %v3685_v15 = vsel %vm2040_vm3, %v3680_v32, %v3684_v31  ;;  %v2347_v44 = vrot.slane %v4935_v40, 1  ;;  %v6386_v63 = vpop.permute.xlu1 %2237  ;;  %v5397_v6 = vld [vmem:[%s7887_s3 + $0x18] sm:$0xff]   ;;  %v1725_v32 = vld [vmem:[#allocation3 + $0x24] sm:$0xf] }
  0xe7   : > { %3500 = vrot.lane.b32.xlu0 %v6310_v60, %s5485_s15  ;;  %v1621_v60 = vsel %vm5775_vm7, %v1416_v5, %v1620_v17  ;;  %1623 = vst.msk [vmem:[#allocation3 + $0x88] sm:$0xf] %vm7906_vm0, %v1425_v23  ;;  %v5451_v17 = vld [vmem:[#allocation2 + $0x8c] ss:$0 sps:$4 sm:$0x11]   ;;  %v3851_v5 = vrot.slane %v6287_v36, 1 }
  0xe8   : > { %3498 = vrot.lane.b32.xlu1 %v6271_v54, %s5485_s15  ;;  %v1896_v54 = vld [vmem:[#allocation3 + $0xc] sm:$0xe]  ;;  %1622 = vst [vmem:[#allocation3 + $0x84] sm:$0xf] %v1621_v60  ;;  %v2348_v61 = vrot.slane %v5451_v17, 1  ;;  %7925 = vst [vmem:[#allocation17_spill] sm:$0xff] %v6386_v63  ;;  %v6405_v39 = vpop.permute.xlu0 %2241 }
  0xe9   : > { %v5068_v43 = vcombine.low %v1896_v54, %v6255_v49  ;;  %v1625_v49 = vsel %vm5781_vm8, %v1426_v45, %v1624_v50  ;;  %v1904_v54 = vld [vmem:[#allocation3 + $0x6c] sm:$0xe]  ;;  %v1897_v36 = vld [vmem:[#allocation3 + $0x18] sm:$0xe]  ;;  %v3691_v23 = vrot.slane %v3689_v52, 1  ;;  %v3694_v60 = vshll.u32 %v6381_v38, 16 }
  0xea   : > { %1626 = vst [vmem:[#allocation3 + $0x8c] sm:$0x1] %v1625_v49  ;;  %v6403_v31 = vld [vmem:[#allocation3 + $0x28] sm:$0xf]  ;;  %7926 = vst [vmem:[#allocation18_spill] sm:$0xff] %v6405_v39  ;;  %v5400_v40 = vld [vmem:[%s7887_s3 + $0x20] sm:$0xff]  }
  0xeb   : > { %3770 = vrot.lane.b32.xlu0 %v3589_v24, %s5486_s18  ;;  %v3596_v24 = vor.u32 %v3595_v27, %v3591_v14  ;;  %v3850_v55 = vrot.slane %v5068_v43, 1  ;;  %v2349_v27 = vsel %vm2313_vm2, %v2347_v44, %v2348_v61  ;;  %v2579_v50 = vshrl.u32 %v6368_v20, 16  ;;  %v1905_v49 = vld [vmem:[#allocation3 + $0x78] sm:$0xe]  ;;  %v1770_v16 = vld [vmem:[#allocation3 + $0x24] sm:$0xe] }
  0xec   : > { %2382 = vrot.lane.b32.xlu1 %v2346_v46, %s5477_s7  ;;  %v5394_v46 = vld [vmem:[%s7887_s3 + $0x10] sm:$0xff]   ;;  %v2586_v45 = vshll.u32 %v6393_v21, 16  ;;  %v3696_v44 = vrot.slane %v3694_v60, 1  ;;  %v4943_v17 = vcombine.low %v1725_v32, %v6403_v31  ;;  %v415_v39 = vld [vmem:[%s5753_s30 + $0x1c8] sm:$0xff] }
  0xed   : > { %5203 = vmatprep.subr.bf16.mxu0 %v5394_v46  ;;  %5245 = vmatprep.subr.bf16.mxu1 %v5394_v46  ;;  %v3601_v14 = vsel %vm2040_vm3, %v3596_v24, %v3600_v62  ;;  %v3852_v29 = vsel %vm2313_vm2, %v3850_v55, %v3851_v5  ;;  %v5076_v24 = vcombine.low %v1904_v54, %v6280_v7  ;;  %v5403_v7 = vld [vmem:[%s7887_s3 + $0x28] sm:$0xff]   ;;  %v6425_v5 = vld [vmem:[#allocation3 + $0x2c] ss:$0 sps:$4 sm:$0x11]   ;;  %v6428_v54 = vpop.permute.xlu0 %2245 }
  0xee   : > { %5204 = vmatpush3.bf16.msra.mxu0 %v5394_v46  ;;  %5251 = vmatpush3.bf16.msra.mxu1 %v5394_v46  ;;  %v5069_v62 = vcombine.low %v1897_v36, %v6301_v12  ;;  %v6416_v46 = vpop.permute.xlu1 %2239  ;;  %v2593_v12 = vshll.u32 %v4943_v17, 16  ;;  %v2588_v55 = vrot.slane %v2586_v45, 1  ;;  %7928 = vst [vmem:[#allocation20_spill] sm:$0xff] %v6428_v54  ;;  %v310_v45 = vld [vmem:[%s5748_s27 + $0x80] sm:$0xff] }
  0xef   : > { %2368 = vrot.lane.b32.xlu0 %v2325_v28, %s5477_s7  ;;  %v2581_v28 = vshll.u32 %v6368_v20, 16  ;;  %5205 = vmatprep.subr.bf16.mxu0 %v5397_v6  ;;  %7927 = vst [vmem:[#allocation19_spill] sm:$0xff] %v6416_v46  ;;  %v1778_v54 = vld [vmem:[#allocation3 + $0x84] sm:$0xe] }
  0xf0   : > { %3516 = vrot.lane.b32.xlu1 %v6358_v53, %s5485_s15  ;;  %5246 = vmatprep.subr.bf16.mxu1 %v5397_v6  ;;  %v4950_v53 = vcombine.low %v1739_v3, %v6396_v57  ;;  %v3875_v3 = vrot.slane %v6321_v30, 1  ;;  %v3853_v36 = vrot.slane %v5069_v62, 1 }
  0xf1   : > { %v2583_v43 = vrot.slane %v2581_v28, 1  ;;  %v5077_v28 = vcombine.low %v1905_v49, %v6337_v0  ;;  %v2591_v0 = vshrl.u32 %v4943_v17, 16  ;;  %v311_v49 = vld [vmem:[%s5748_s27 + $0x88] sm:$0xff] }
  0xf2   : > { %5206 = vmatpush3.bf16.msra.mxu0 %v5397_v6  ;;  %5252 = vmatpush3.bf16.msra.mxu1 %v5397_v6  ;;  %v2677_v52 = vshll.u32 %v4950_v53, 16  ;;  %v3874_v6 = vrot.slane %v5076_v24, 1  ;;  %v6436_v32 = vpop.permute.xlu1 %2243 }
  0xf3   : > { %2478 = vrot.lane.b32.xlu0 %v6368_v20, %s5479_s9  ;;  %5207 = vmatprep.subr.bf16.mxu0 %v5400_v40  ;;  %v6420_v20 = vld [vmem:[#allocation3 + $0x80] ss:$0 sps:$4 sm:$0x11]   ;;  %v2584_v61 = vor.u32 %v2583_v43, %v2579_v50  ;;  %7929 = vst [vmem:[#allocation21_spill] sm:$0xff] %v6436_v32  ;;  %v2598_v50 = vshll.u32 %v6425_v5, 16 }
  0xf4   : > { %3786 = vrot.lane.b32.xlu1 %v3685_v15, %s5486_s18  ;;  %v3692_v15 = vor.u32 %v3691_v23, %v3687_v51  ;;  %5247 = vmatprep.subr.bf16.mxu1 %v5400_v40  ;;  %v3854_v51 = vrot.slane %v6331_v8, 1  ;;  %v2675_v23 = vshrl.u32 %v4950_v53, 16  ;;  %v2679_v60 = vrot.slane %v2677_v52, 1  ;;  %v1741_v8 = vld [vmem:[#allocation3 + $0x84] sm:$0xf]  ;;  %v374_v52 = vld [vmem:[%s5753_s30 + $0x80] sm:$0xff] }
  0xf5   : > { %v2589_v30 = vsel %vm2040_vm3, %v2584_v61, %v2588_v55  ;;  %v1787_v43 = vld [vmem:[#allocation2 + $0x24] sm:$0xf]  ;;  %v3876_v62 = vsel %vm2313_vm2, %v3874_v6, %v3875_v3  ;;  %v3877_v61 = vrot.slane %v5077_v28, 1  ;;  %v6453_v55 = vpop.permute.xlu0 %2249  ;;  %v2600_v3 = vrot.slane %v2598_v50, 1  ;;  %v343_v28 = vld [vmem:[%s5748_s27 + $0x188] sm:$0xff] }
  0xf6   : > { %5208 = vmatpush3.bf16.msra.mxu0 %v5400_v40  ;;  %5253 = vmatpush3.bf16.msra.mxu1 %v5400_v40  ;;  %v2595_v40 = vrot.slane %v2593_v12, 1 }
  0xf7   : > { %3772 = vrot.lane.b32.xlu0 %v3601_v14, %s5486_s18  ;;  %5209 = vmatprep.subr.bf16.mxu0 %v5403_v7  ;;  %v3697_v14 = vsel %vm2040_vm3, %v3692_v15, %v3696_v44  ;;  %v375_v15 = vld [vmem:[%s5753_s30 + $0x88] sm:$0xff]  ;;  %v6449_v44 = vld [vmem:[#allocation3 + $0x78] sm:$0xe] }
  0xf8   : > { %2384 = vrot.lane.b32.xlu1 %v2349_v27, %s5477_s7  ;;  %5248 = vmatprep.subr.bf16.mxu1 %v5403_v7  ;;  %v1769_v27 = vld [vmem:[#allocation3 + $0x18] sm:$0xe]  ;;  %v2596_v6 = vor.u32 %v2595_v40, %v2591_v0  ;;  %v4975_v0 = vcombine.low %v1770_v16, %v6403_v31 }
  0xf9   : > { %v4974_v24 = vcombine.low %v1769_v27, %v6349_v13  ;;  %v3878_v27 = vrot.slane %v6381_v38, 1 }
  0xfa   : > { %5210 = vmatpush3.bf16.msra.mxu0 %v5403_v7  ;;  %5254 = vmatpush3.bf16.msra.mxu1 %v5403_v7  ;;  %v2680_v7 = vor.u32 %v2679_v60, %v2675_v23  ;;  %v6464_v60 = vld [vmem:[#allocation3 + $0x8c] ss:$0 sps:$4 sm:$0x11]  }
  0xfb   : > { %3898 = vrot.lane.b32.xlu0 %v3852_v29, %s5487_s29  ;;  %v2682_v29 = vshll.u32 %v6420_v20, 16  ;;  %v2694_v56 = vshll.u32 %v6464_v60, 16 }
  0xfc   : > { %2494 = vrot.lane.b32.xlu1 %v4950_v53, %s5479_s9  ;;  %v6441_v53 = vld [vmem:[#allocation3 + $0x88] sm:$0xf]  ;;  %v6480_v16 = vpop.permute.xlu0 %2253 }
  0xfd   : > { %v2684_v12 = vrot.slane %v2682_v29, 1  ;;  %v4951_v13 = vcombine.low %v1741_v8, %v6441_v53  ;;  %v342_v8 = vld [vmem:[%s5748_s27 + $0x180] sm:$0xff]  ;;  %7931 = vst [vmem:[#allocation23_spill] sm:$0xff] %v6480_v16 }
  0xff   : > { %2480 = vrot.lane.b32.xlu0 %v4943_v17, %s5479_s9  ;;  %v3855_v17 = vsel %vm2313_vm2, %v3853_v36, %v3854_v51  ;;  %v438_v36 = vsub.f32 %v310_v45, %v374_v52  ;;  %v439_v51 = vsub.f32 %v311_v49, %v375_v15  ;;  %v2689_v23 = vshll.u32 %v4951_v13, 16  ;;  %v406_v45 = vld [vmem:[%s5753_s30 + $0x180] sm:$0xff] }
 0x100   : > { %3788 = vrot.lane.b32.xlu1 %v3697_v14, %s5486_s18  ;;  %v6455_v14 = vld [vmem:[#allocation2 + $0x28] sm:$0xf]  ;;  %v2685_v38 = vsel %vm2040_vm3, %v2680_v7, %v2684_v12  ;;  %v3879_v49 = vsel %vm2313_vm2, %v3877_v61, %v3878_v27  ;;  %v2832_v52 = vrot.slane %v4974_v24, 1  ;;  %v2833_v15 = vrot.slane %v6393_v21, 1  ;;  %v1789_v61 = vld [vmem:[#allocation2 + $0x30] sm:$0xf] }
 0x101   : > { %v6467_v29 = vcombine.low %v1787_v43, %v6455_v14  ;;  %v5153_v40 = vpack.c.bf16 %v438_v36, %v438_v36  ;;  %v5154_v50 = vpack.c.bf16 %v439_v51, %v439_v51  ;;  %v407_v43 = vld [vmem:[%s5753_s30 + $0x188] sm:$0xff]  ;;  %v2687_v36 = vshrl.u32 %v4951_v13, 16 }
 0x102   : > { %v2691_v51 = vrot.slane %v2689_v23, 1  ;;  %v2835_v21 = vrot.slane %v4975_v0, 1  ;;  %v2834_v18 = vsel %vm2313_vm2, %v2832_v52, %v2833_v15  ;;  %v6491_v23 = vld [vmem:[#allocation2 + $0x34] sm:$0xf]  ;;  %v2696_v52 = vrot.slane %v2694_v56, 1 }
 0x103   : > { %2750 = vrot.lane.b32.xlu0 %v2589_v30, %s5480_s10  ;;  %v6460_v30 = vpop.permute.xlu1 %2247  ;;  %v1292_v31 = vshrl.u32 %v5153_v40, 16  ;;  %v1300_v7 = vshrl.u32 %v5154_v50, 16  ;;  %v1303_v12 = vshll.u32 %v5154_v50, 16  ;;  %v1571_v50 = vld [vmem:[#allocation3 + $0x30] sm:$0xf]  ;;  %v6508_v56 = vcombine.low %v1789_v61, %v6491_v23 }
 0x104   : > { %3914 = vrot.lane.b32.xlu1 %v3876_v62, %s5487_s29  ;;  %7930 = vst [vmem:[#allocation22_spill] sm:$0xff] %v6460_v30  ;;  %v2601_v62 = vsel %vm2040_vm3, %v2596_v6, %v2600_v3  ;;  %v470_v6 = vsub.f32 %v342_v8, %v406_v45  ;;  %v471_v30 = vsub.f32 %v343_v28, %v407_v43  ;;  %v1803_v45 = vld [vmem:[#allocation2 + $0x84] sm:$0xf]  ;;  %v6497_v15 = vld [vmem:[#allocation2 + $0x2c] ss:$0 sps:$4 sm:$0x11]  }
 0x105   : > { %v1294_v3 = vrot.slane %v1292_v31, 7  ;;  %v6486_v27 = vrot.slane %v1300_v7, 7  ;;  %v2692_v43 = vor.u32 %v2691_v51, %v2687_v36  ;;  %v1627_v61 = vld [vmem:[#allocation3 + $0x90] sm:$0xf] }
 0x106   : > { %v5169_v8 = vpack.c.bf16 %v470_v6, %v470_v6  ;;  %v5170_v28 = vpack.c.bf16 %v471_v30, %v471_v30 }
 0x107   : > { %3900 = vrot.lane.b32.xlu0 %v3855_v17, %s5487_s29  ;;  %v1295_v17 = vshll.u32 %v5153_v40, 16  ;;  %v6484_v24 = vpop.permute.xlu1 %2251  ;;  %v2836_v40 = vrot.slane %v6425_v5, 1  ;;  %v1298_v31 = vrot.slane %v1294_v3, 4  ;;  %v1305_v7 = vor.u32 %v1303_v12, %v6486_v27 }
 0x108   : > { %2496 = vrot.lane.b32.xlu1 %v4951_v13, %s5479_s9  ;;  %v3093_v13 = vshll.u32 %v6467_v29, 16  ;;  %v1428_v5 = vshrl.u32 %v5169_v8, 16  ;;  %v1431_v25 = vshll.u32 %v5169_v8, 16  ;;  %v1439_v12 = vshll.u32 %v5170_v28, 16 }
 0x109   : > { %v1297_v0 = vor.u32 %v1295_v17, %v1294_v3  ;;  %v6500_v6 = vpop.permute.xlu0 %2257  ;;  %v1436_v3 = vshrl.u32 %v5170_v28, 16  ;;  %v2837_v30 = vsel %vm2313_vm2, %v2835_v21, %v2836_v40  ;;  %v2857_v8 = vrot.slane %v6420_v20, 1 }
 0x10a   : > { %7932 = vst [vmem:[#allocation24_spill] sm:$0xff] %v6500_v6  ;;  %v1430_v36 = vrot.slane %v1428_v5, 7  ;;  %v4983_v40 = vcombine.low %v1778_v54, %v6441_v53  ;;  %v3091_v20 = vshrl.u32 %v6467_v29, 16  ;;  %v3095_v28 = vrot.slane %v3093_v13, 1 }
 0x10b   : > { %2752 = vrot.lane.b32.xlu0 %v2601_v62, %s5480_s10  ;;  %v6494_v62 = vld [vmem:[#allocation2 + $0x88] sm:$0xf]  ;;  %v1572_v17 = vsel %vm5775_vm7, %v1297_v0, %v1571_v50  ;;  %v6516_v50 = vpop.permute.xlu1 %2255  ;;  %v1438_v21 = vrot.slane %v1436_v3, 7  ;;  %v3105_v54 = vshll.u32 %v6508_v56, 16 }
 0x10c   : > { %2766 = vrot.lane.b32.xlu1 %v2685_v38, %s5480_s10  ;;  %v1306_v38 = vsel %vm5787_vm9, %v1298_v31, %v1305_v7  ;;  %1573 = vst [vmem:[#allocation3 + $0x30] sm:$0xf] %v1572_v17  ;;  %7934 = vst [vmem:[#allocation25_spill] sm:$0xff] %v6516_v50  ;;  %v6519_v0 = vcombine.low %v1803_v45, %v6494_v62  ;;  %v2697_v31 = vsel %vm2040_vm3, %v2692_v43, %v2696_v52  ;;  %v314_v52 = vld [vmem:[%s5748_s27 + $0xa0] sm:$0xff] }
 0x10d   : > { %1574 = vst.msk [vmem:[#allocation3 + $0x34] sm:$0xf] %vm7906_vm0, %v1306_v38  ;;  %v1433_v7 = vor.u32 %v1431_v25, %v1430_v36  ;;  %v3098_v45 = vshll.u32 %v6497_v15, 16  ;;  %v1441_v5 = vor.u32 %v1439_v12, %v1438_v21  ;;  %v1631_v38 = vld [vmem:[#allocation3 + $0x98] sm:$0x1]  ;;  %v1307_v25 = vrot.slane %v6486_v27, 4 }
 0x10e   : > { %v1443_v43 = vrot.slane %v1438_v21, 4  ;;  %v378_v17 = vld [vmem:[%s5753_s30 + $0xa0] sm:$0xff]  ;;  %v315_v21 = vld [vmem:[%s5748_s27 + $0xa8] sm:$0xff] }
 0x10f   : > { %2878 = vrot.lane.b32.xlu0 %v2834_v18, %s5481_s11  ;;  %v7933_v18 = vcombine.low %v6449_v44, %v6396_v57  ;;  %v1434_v57 = vrot.slane %v1430_v36, 4  ;;  %v1575_v44 = vld [vmem:[#allocation3 + $0x38] sm:$0x1]  ;;  %v1628_v53 = vsel %vm5775_vm7, %v1433_v7, %v1627_v61  ;;  %v2860_v36 = vrot.slane %v6464_v60, 1  ;;  %v379_v61 = vld [vmem:[%s5753_s30 + $0xa8] sm:$0xff] }
 0x110   : > { %3916 = vrot.lane.b32.xlu1 %v3879_v49, %s5487_s29  ;;  %v6523_v49 = vld [vmem:[#allocation2 + $0x38] ss:$0 sps:$4 sm:$0x11]   ;;  %1629 = vst [vmem:[#allocation3 + $0x90] sm:$0xf] %v1628_v53  ;;  %v1576_v27 = vsel %vm5781_vm8, %v1307_v25, %v1575_v44  ;;  %v442_v60 = vsub.f32 %v314_v52, %v378_v17  ;;  %v3189_v44 = vshll.u32 %v6519_v0, 16 }
 0x111   : > { %v2856_v51 = vrot.slane %v7933_v18, 1  ;;  %v1442_v12 = vsel %vm5787_vm9, %v1434_v57, %v1441_v5  ;;  %v1632_v18 = vsel %vm5781_vm8, %v1443_v43, %v1631_v38  ;;  %v6552_v7 = vld [vmem:[#allocation2 + $0x94] sm:$0xf]  ;;  %1577 = vst [vmem:[#allocation3 + $0x38] sm:$0x1] %v1576_v27  ;;  %v3103_v5 = vshrl.u32 %v6508_v56, 16 }
 0x112   : > { %1630 = vst.msk [vmem:[#allocation3 + $0x94] sm:$0xf] %vm7906_vm0, %v1442_v12  ;;  %1633 = vst [vmem:[#allocation3 + $0x98] sm:$0x1] %v1632_v18  ;;  %v1833_v57 = vld [vmem:[#allocation2 + $0x24] sm:$0xe]  ;;  %v5155_v53 = vpack.c.bf16 %v442_v60, %v442_v60 }
 0x113   : > { %2880 = vrot.lane.b32.xlu0 %v2837_v30, %s5481_s11  ;;  %v2858_v13 = vsel %vm2313_vm2, %v2856_v51, %v2857_v8  ;;  %v2859_v30 = vrot.slane %v4983_v40, 1  ;;  %v6550_v51 = vpop.permute.xlu1 %2259  ;;  %v3096_v8 = vor.u32 %v3095_v28, %v3091_v20  ;;  %v1805_v40 = vld [vmem:[#allocation2 + $0x90] sm:$0xf]  ;;  %v3107_v38 = vrot.slane %v3105_v54, 1  ;;  %v346_v12 = vld [vmem:[%s5748_s27 + $0x1a0] sm:$0xff]  ;;  %v347_v60 = vld [vmem:[%s5748_s27 + $0x1a8] sm:$0xff] }
 0x114   : > { %2768 = vrot.lane.b32.xlu1 %v2697_v31, %s5480_s10  ;;  %7936 = vst [vmem:[#allocation27_spill] sm:$0xff] %v6550_v51  ;;  %v3100_v31 = vrot.slane %v3098_v45, 1  ;;  %v6560_v28 = vld [vmem:[#allocation2 + $0x8c] ss:$0 sps:$4 sm:$0x11]   ;;  %v443_v45 = vsub.f32 %v315_v21, %v379_v61  ;;  %v4999_v43 = vcombine.low %v1805_v40, %v6552_v7  ;;  %v5022_v52 = vcombine.low %v1833_v57, %v6455_v14  ;;  %v410_v27 = vld [vmem:[%s5753_s30 + $0x1a0] sm:$0xff] }
 0x115   : > { %v2861_v25 = vsel %vm2313_vm2, %v2859_v30, %v2860_v36  ;;  %v1834_v17 = vld [vmem:[#allocation2 + $0x30] sm:$0xe]  ;;  %v3108_v18 = vor.u32 %v3107_v38, %v3103_v5  ;;  %v3187_v21 = vshrl.u32 %v6519_v0, 16  ;;  %v3191_v61 = vrot.slane %v3189_v44, 1  ;;  %v411_v30 = vld [vmem:[%s5753_s30 + $0x1a8] sm:$0xff] }
 0x116   : > { %v6536_v3 = vpop.permute.xlu0 %2261  ;;  %v3101_v54 = vsel %vm2040_vm3, %v3096_v8, %v3100_v31  ;;  %v5156_v40 = vpack.c.bf16 %v443_v45, %v443_v45  ;;  %v1312_v31 = vshll.u32 %v5155_v53, 16  ;;  %v3201_v57 = vshll.u32 %v4999_v43, 16  ;;  %v1841_v51 = vld [vmem:[#allocation2 + $0x84] sm:$0xe] }
 0x117   : > { %7935 = vst [vmem:[#allocation26_spill] sm:$0xff] %v6536_v3  ;;  %2990 = vrot.lane.b32.xlu0 %v6467_v29, %s5482_s12  ;;  %v3110_v29 = vshll.u32 %v6523_v49, 16  ;;  %v474_v5 = vsub.f32 %v346_v12, %v410_v27  ;;  %v5023_v38 = vcombine.low %v1834_v17, %v6491_v23  ;;  %v475_v44 = vsub.f32 %v347_v60, %v411_v30 }
 0x118   : > { %2894 = vrot.lane.b32.xlu1 %v2858_v13, %s5481_s11  ;;  %v1309_v13 = vshrl.u32 %v5155_v53, 16  ;;  %v3192_v45 = vor.u32 %v3191_v61, %v3187_v21  ;;  %v1317_v58 = vshrl.u32 %v5156_v40, 16  ;;  %v3199_v12 = vshrl.u32 %v4999_v43, 16 }
 0x119   : > { %v3112_v3 = vrot.slane %v3110_v29, 1  ;;  %v3203_v23 = vrot.slane %v3201_v57, 1  ;;  %v3206_v17 = vshll.u32 %v6579_v41, 16  ;;  %v5171_v27 = vpack.c.bf16 %v474_v5, %v474_v5  ;;  %v1707_v57 = vld [vmem:[#allocation2 + $0x30] sm:$0xe] }
 0x11a   : > { %v6558_v20 = vpop.permute.xlu0 %2366  ;;  %v1311_v8 = vrot.slane %v1309_v13, 7  ;;  %v1319_v61 = vrot.slane %v1317_v58, 7  ;;  %v1320_v60 = vshll.u32 %v5156_v40, 16  ;;  %v5030_v30 = vcombine.low %v1841_v51, %v6494_v62 }
 0x11b   : > { %7937 = vst [vmem:[#allocation28_spill] sm:$0xff] %v6558_v20  ;;  %2992 = vrot.lane.b32.xlu0 %v6508_v56, %s5482_s12  ;;  %v3194_v56 = vshll.u32 %v6560_v28, 16  ;;  %v3113_v29 = vsel %vm2040_vm3, %v3108_v18, %v3112_v3  ;;  %v1445_v58 = vshrl.u32 %v5171_v27, 16  ;;  %v1448_v51 = vshll.u32 %v5171_v27, 16 }
 0x11c   : > { %2896 = vrot.lane.b32.xlu1 %v2861_v25, %s5481_s11  ;;  %v3344_v25 = vrot.slane %v5022_v52, 1  ;;  %v1314_v13 = vor.u32 %v1312_v31, %v1311_v8  ;;  %v3348_v52 = vrot.slane %v6523_v49, 1  ;;  %v1315_v21 = vrot.slane %v1311_v8, 4  ;;  %v1852_v49 = vld [vmem:[#allocation3 + $0x24] sm:$0xf] }
 0x11d   : > { %v3196_v53 = vrot.slane %v3194_v56, 1  ;;  %v1842_v56 = vld [vmem:[#allocation2 + $0x90] sm:$0xe]  ;;  %v5452_v8 = vld [vmem:[#allocation2 + $0x34] sm:$0xf] }
 0x11e   : > { %v6574_v36 = vpop.permute.xlu1 %2263  ;;  %v6576_v14 = vpop.permute.xlu0 %2380 }
 0x11f   : > { %7938 = vst [vmem:[#allocation29_spill] sm:$0xff] %v6574_v36  ;;  %3262 = vrot.lane.b32.xlu0 %v3101_v54, %s5483_s13  ;;  %v3345_v36 = vrot.slane %v6497_v15, 1  ;;  %v1578_v54 = vld [vmem:[#allocation3 + $0x3c] sm:$0xf]  ;;  %v3347_v15 = vrot.slane %v5023_v38, 1  ;;  %v3197_v31 = vsel %vm2040_vm3, %v3192_v45, %v3196_v53  ;;  %v3204_v38 = vor.u32 %v3203_v23, %v3199_v12 }
 0x120   : > { %3006 = vrot.lane.b32.xlu1 %v6519_v0, %s5482_s12  ;;  %v5172_v0 = vpack.c.bf16 %v475_v44, %v475_v44  ;;  %v1579_v5 = vsel %vm5775_vm7, %v1314_v13, %v1578_v54  ;;  %v6600_v44 = vld [vmem:[#allocation3 + $0x28] sm:$0xf]  ;;  %v1447_v53 = vrot.slane %v1445_v58, 7  ;;  %v5031_v12 = vcombine.low %v1842_v56, %v6552_v7 }
 0x121   : > { %v3346_v18 = vsel %vm2313_vm2, %v3344_v25, %v3345_v36  ;;  %v1322_v36 = vor.u32 %v1320_v60, %v1319_v61  ;;  %1580 = vst [vmem:[#allocation3 + $0x3c] sm:$0xf] %v1579_v5  ;;  %v3349_v62 = vsel %vm2313_vm2, %v3347_v15, %v3348_v52  ;;  %v4928_v25 = vcombine.low %v1707_v57, %v5452_v8  ;;  %v1634_v15 = vld [vmem:[#allocation3 + $0x9c] sm:$0xf] }
 0x122   : > { %v6587_v50 = vpop.permute.xlu0 %2490  ;;  %v6590_v3 = vpop.permute.xlu1 %2378  ;;  %v1456_v13 = vshll.u32 %v5172_v0, 16  ;;  %v5038_v54 = vcombine.low %v1852_v49, %v6600_v44  ;;  %v1451_v60 = vrot.slane %v1447_v53, 4  ;;  %v1324_v56 = vrot.slane %v1319_v61, 4  ;;  %v5453_v5 = vld [vmem:[#allocation2 + $0x38] ss:$0 sps:$4 sm:$0x11]  }
 0x123   : > { %3264 = vrot.lane.b32.xlu0 %v3113_v29, %s5483_s13  ;;  %v3208_v29 = vrot.slane %v3206_v17, 1  ;;  %v1323_v45 = vsel %vm5787_vm9, %v1315_v21, %v1322_v36  ;;  %v3368_v17 = vrot.slane %v5030_v30, 1  ;;  %v1450_v21 = vor.u32 %v1448_v51, %v1447_v53  ;;  %v6617_v36 = vld [vmem:[#allocation3 + $0x2c] ss:$0 sps:$4 sm:$0x11]  }
 0x124   : > { %3008 = vrot.lane.b32.xlu1 %v4999_v43, %s5482_s12  ;;  %v1453_v43 = vshrl.u32 %v5172_v0, 16  ;;  %1581 = vst.msk [vmem:[#allocation3 + $0x40] sm:$0xf] %vm7906_vm0, %v1323_v45  ;;  %v1582_v0 = vld [vmem:[#allocation3 + $0x44] sm:$0x1]  ;;  %v3605_v57 = vshll.u32 %v5038_v54, 16 }
 0x125   : > { %v3209_v52 = vsel %vm2040_vm3, %v3204_v38, %v3208_v29  ;;  %v2326_v30 = vrot.slane %v4928_v25, 1  ;;  %v2327_v49 = vrot.slane %v5453_v5, 1  ;;  %v1635_v58 = vsel %vm5775_vm7, %v1450_v21, %v1634_v15  ;;  %v1715_v25 = vld [vmem:[#allocation2 + $0x90] sm:$0xe]  ;;  %v6637_v15 = vld [vmem:[#allocation3 + $0x34] sm:$0xf] }
 0x126   : > { %v6610_v23 = vpop.permute.xlu1 %2474  ;;  %v1455_v27 = vrot.slane %v1453_v43, 7  ;;  %1636 = vst [vmem:[#allocation3 + $0x9c] sm:$0xf] %v1635_v58  ;;  %v1583_v61 = vsel %vm5781_vm8, %v1324_v56, %v1582_v0  ;;  %v3371_v51 = vrot.slane %v5031_v12, 1  ;;  %v3372_v43 = vrot.slane %v6579_v41, 1 }
 0x127   : > { %3390 = vrot.lane.b32.xlu0 %v3346_v18, %s5484_s14  ;;  %v3369_v18 = vrot.slane %v6560_v28, 1  ;;  %1584 = vst [vmem:[#allocation3 + $0x44] sm:$0x1] %v1583_v61  ;;  %v3603_v45 = vshrl.u32 %v5038_v54, 16  ;;  %v3607_v12 = vrot.slane %v3605_v57, 1  ;;  %v3610_v41 = vshll.u32 %v6617_v36, 16 }
 0x128   : > { %3278 = vrot.lane.b32.xlu1 %v3197_v31, %s5483_s13  ;;  %v1458_v7 = vor.u32 %v1456_v13, %v1455_v27  ;;  %v1638_v31 = vld [vmem:[#allocation3 + $0xa4] sm:$0x1]  ;;  %v1460_v29 = vrot.slane %v1455_v27, 4  ;;  %v2328_v13 = vsel %vm2313_vm2, %v2326_v30, %v2327_v49  ;;  %v1854_v27 = vld [vmem:[#allocation3 + $0x30] sm:$0xf]  ;;  %v3373_v21 = vsel %vm2313_vm2, %v3371_v51, %v3372_v43 }
 0x129   : > { %v6604_v40 = vpop.permute.xlu0 %2492  ;;  %v5039_v56 = vcombine.low %v1854_v27, %v6637_v15  ;;  %v3608_v57 = vor.u32 %v3607_v12, %v3603_v45  ;;  %v3612_v30 = vrot.slane %v3610_v41, 1  ;;  %v5455_v5 = vld [vmem:[#allocation2 + $0x40] sm:$0xf]  ;;  %v6654_v51 = vld [vmem:[#allocation3 + $0x8c] ss:$0 sps:$4 sm:$0x11]  }
 0x12a   : > { %7939 = vst [vmem:[#allocation30_spill] sm:$0xff] %v6604_v40  ;;  %v1459_v38 = vsel %vm5787_vm9, %v1451_v60, %v1458_v7  ;;  %v1639_v53 = vsel %vm5781_vm8, %v1460_v29, %v1638_v31  ;;  %v5454_v60 = vld [vmem:[#allocation2 + $0x94] sm:$0xf]  ;;  %v5456_v29 = vld [vmem:[#allocation2 + $0x98] ss:$0 sps:$4 sm:$0x11]  }
 0x12b   : > { %3392 = vrot.lane.b32.xlu0 %v3349_v62, %s5484_s14  ;;  %v3370_v62 = vsel %vm2313_vm2, %v3368_v17, %v3369_v18  ;;  %1637 = vst.msk [vmem:[#allocation3 + $0xa0] sm:$0xf] %vm7906_vm0, %v1459_v38  ;;  %1640 = vst [vmem:[#allocation3 + $0xa4] sm:$0x1] %v1639_v53  ;;  %v6643_v18 = vld [vmem:[#allocation3 + $0x88] sm:$0xf]  ;;  %v4936_v0 = vcombine.low %v1715_v25, %v5454_v60  ;;  %v3613_v45 = vsel %vm2040_vm3, %v3608_v57, %v3612_v30 }
 0x12c   : > { %3280 = vrot.lane.b32.xlu1 %v3209_v52, %s5483_s13  ;;  %v1868_v52 = vld [vmem:[#allocation3 + $0x84] sm:$0xf]  ;;  %v3617_v25 = vshll.u32 %v5039_v56, 16  ;;  %v6660_v12 = vld [vmem:[#allocation3 + $0x38] ss:$0 sps:$4 sm:$0x11]  }
 0x12d   : > { %v6622_v28 = vpop.permute.xlu0 %2762  ;;  %v5046_v31 = vcombine.low %v1868_v52, %v6643_v18  ;;  %v2350_v61 = vrot.slane %v4936_v0, 1  ;;  %v1870_v60 = vld [vmem:[#allocation3 + $0x90] sm:$0xf]  ;;  %v6666_v0 = vld [vmem:[#allocation3 + $0x94] sm:$0xf]  ;;  %v3706_v57 = vshll.u32 %v6654_v51, 16 }
 0x12e   : > { %v6631_v8 = vpop.permute.xlu1 %2476  ;;  %v3619_v6 = vrot.slane %v3617_v25, 1  ;;  %v1589_v40 = vld [vmem:[#allocation3 + $0x50] sm:$0x1] }
 0x12f   : > { %3502 = vrot.lane.b32.xlu0 %v5038_v54, %s5485_s15  ;;  %v1708_v54 = vld [vmem:[#allocation2 + $0x3c] sm:$0xe]  ;;  %v3701_v38 = vshll.u32 %v5046_v31, 16  ;;  %v3699_v52 = vshrl.u32 %v5046_v31, 16 }
 0x130   : > { %3406 = vrot.lane.b32.xlu1 %v3370_v62, %s5484_s14  ;;  %v4929_v49 = vcombine.low %v1708_v54, %v5455_v5  ;;  %v2351_v62 = vrot.slane %v5456_v29, 1  ;;  %v1716_v54 = vld [vmem:[#allocation2 + $0x9c] sm:$0xe]  ;;  %v6672_v29 = vld [vmem:[#allocation3 + $0x34] sm:$0xf] }
 0x131   : > { %v6641_v17 = vpop.permute.xlu0 %2764  ;;  %v3703_v5 = vrot.slane %v3701_v38, 1  ;;  %v6678_v38 = vcombine.low %v1870_v60, %v6666_v0  ;;  %v4937_v32 = vcombine.low %v1716_v54, %v5458_v4  ;;  %v318_v4 = vld [vmem:[%s5748_s27 + $0xc0] sm:$0xff]  ;;  %v319_v54 = vld [vmem:[%s5748_s27 + $0xc8] sm:$0xff] }
 0x132   : > { %7940 = vst [vmem:[#allocation31_spill] sm:$0xff] %v6641_v17  ;;  %v6646_v7 = vpop.permute.xlu1 %2746  ;;  %v2329_v53 = vrot.slane %v4929_v49, 1  ;;  %v1727_v49 = vld [vmem:[#allocation3 + $0x30] sm:$0xf] }
 0x133   : > { %2370 = vrot.lane.b32.xlu0 %v2328_v13, %s5477_s7  ;;  %v5457_v13 = vld [vmem:[#allocation2 + $0x44] ss:$0 sps:$4 sm:$0x11]   ;;  %v3704_v10 = vor.u32 %v3703_v5, %v3699_v52  ;;  %v6683_v16 = vcombine.low %v1727_v49, %v6672_v29 }
 0x134   : > { %3408 = vrot.lane.b32.xlu1 %v3373_v21, %s5484_s14  ;;  %v2330_v27 = vrot.slane %v5457_v13, 1  ;;  %v2352_v21 = vsel %vm2313_vm2, %v2350_v61, %v2351_v62  ;;  %v1898_v13 = vld [vmem:[#allocation3 + $0x24] sm:$0xe]  ;;  %v3622_v61 = vshll.u32 %v6660_v12, 16  ;;  %v382_v5 = vld [vmem:[%s5753_s30 + $0xc0] sm:$0xff] }
 0x135   : > { %v6652_v58 = vpop.permute.xlu0 %2890  ;;  %v5070_v25 = vcombine.low %v1898_v13, %v6600_v44  ;;  %v2605_v52 = vshll.u32 %v6683_v16, 16  ;;  %v3713_v44 = vshll.u32 %v6678_v38, 16  ;;  %v6716_v49 = vld [vmem:[#allocation3 + $0x38] ss:$0 sps:$4 sm:$0x11]   ;;  %v383_v13 = vld [vmem:[%s5753_s30 + $0xc8] sm:$0xff] }
 0x136   : > { %v6656_v43 = vpop.permute.xlu1 %2748  ;;  %v2331_v42 = vsel %vm2313_vm2, %v2329_v53, %v2330_v27  ;;  %v1906_v27 = vld [vmem:[#allocation3 + $0x84] sm:$0xe]  ;;  %v3624_v60 = vrot.slane %v3622_v61, 1  ;;  %v447_v20 = vsub.f32 %v319_v54, %v383_v13 }
 0x137   : > { %3504 = vrot.lane.b32.xlu0 %v5039_v56, %s5485_s15  ;;  %v3856_v61 = vrot.slane %v5070_v25, 1  ;;  %v5078_v34 = vcombine.low %v1906_v27, %v6643_v18  ;;  %v6735_v18 = vld [vmem:[#allocation3 + $0x94] sm:$0xf]  ;;  %v3711_v25 = vshrl.u32 %v6678_v38, 16  ;;  %v3715_v27 = vrot.slane %v3713_v44, 1 }
 0x138   : > { %3518 = vrot.lane.b32.xlu1 %v5046_v31, %s5485_s15  ;;  %v3615_v31 = vshrl.u32 %v5039_v56, 16  ;;  %v3932_v56 = vsel %vm7903_vm10, %v5759_v11, %v6343_v2  ;;  %v3934_v11 = vsel %vm7903_vm10, %v5826_v59, %v6375_v22  ;;  %v6700_v2 = vsel %vm7903_vm10, %v5955_v1, %v6453_v55  ;;  %v5459_v1 = vld [vmem:[#allocation2 + $0xa4] ss:$0 sps:$4 sm:$0x11]  }
 0x139   : > { %v6663_v41 = vpop.permute.xlu0 %2892  ;;  %v2353_v22 = vrot.slane %v4937_v32, 1  ;;  %v2354_v55 = vrot.slane %v5459_v1, 1  ;;  %v2603_v32 = vshrl.u32 %v6683_v16, 16  ;;  %v1743_v1 = vld [vmem:[#allocation3 + $0x90] sm:$0xf] }
 0x13a   : > { %7941 = vst [vmem:[#allocation32_spill] sm:$0xff] %v6663_v41  ;;  %v6669_v30 = vpop.permute.xlu1 %2874 }
 0x13b   : > { %3774 = vrot.lane.b32.xlu0 %v3613_v45, %s5486_s18  ;;  %v3708_v45 = vrot.slane %v3706_v57, 1  ;;  %v6713_v57 = vsel %vm3963_vm11, %v3932_v56, %v6315_v35  ;;  %v1899_v35 = vld [vmem:[#allocation3 + $0x30] sm:$0xe] }
 0x13c   : > { %2386 = vrot.lane.b32.xlu1 %v2352_v21, %s5477_s7  ;;  %v3620_v21 = vor.u32 %v3619_v6, %v3615_v31  ;;  %v6707_v6 = vld [vmem:[#allocation3 + $0x98] ss:$0 sps:$4 sm:$0x11]   ;;  %v6722_v31 = vsel %vm7903_vm10, %v5974_v33, %v6484_v24  ;;  %v446_v33 = vsub.f32 %v318_v4, %v382_v5  ;;  %v6746_v5 = vrot.slane %v5078_v34, 1 }
 0x13d   : > { %v6680_v62 = vpop.permute.xlu0 %3002  ;;  %v3709_v59 = vsel %vm2040_vm3, %v3704_v10, %v3708_v45  ;;  %v3857_v10 = vrot.slane %v6617_v36, 1  ;;  %v2607_v45 = vrot.slane %v2605_v52, 1  ;;  %v3718_v36 = vshll.u32 %v6707_v6, 16  ;;  %v350_v4 = vld [vmem:[%s5748_s27 + $0x1c0] sm:$0xff] }
 0x13e   : > { %7942 = vst [vmem:[#allocation33_spill] sm:$0xff] %v6680_v62  ;;  %v6689_v53 = vpop.permute.xlu1 %2876  ;;  %v3625_v56 = vsel %vm2040_vm3, %v3620_v21, %v3624_v60  ;;  %v2355_v52 = vsel %vm2313_vm2, %v2353_v22, %v2354_v55  ;;  %v2610_v21 = vshll.u32 %v6716_v49, 16  ;;  %v5157_v60 = vpack.c.bf16 %v446_v33, %v446_v33  ;;  %v414_v22 = vld [vmem:[%s5753_s30 + $0x1c0] sm:$0xff]  ;;  %v6833_v62 = vld [vmem:[#allocation3 + $0x90] sm:$0xe] }
 0x13f   : > { %7943 = vst [vmem:[#allocation34_spill] sm:$0xff] %v6689_v53  ;;  %2372 = vrot.lane.b32.xlu0 %v2331_v42, %s5477_s7  ;;  %v3858_v54 = vsel %vm2313_vm2, %v3856_v61, %v3857_v10  ;;  %v6757_v55 = vcombine.low %v1743_v1, %v6735_v18  ;;  %v2608_v13 = vor.u32 %v2607_v45, %v2603_v32  ;;  %v6790_v45 = vld [vmem:[#allocation3 + $0x98] ss:$0 sps:$4 sm:$0x11]   ;;  %v387_v53 = vld [vmem:[%s5753_s30 + $0xe8] sm:$0xff]  ;;  %vm4260_vm10 = vcmask 719872  }
 0x140   : > { %3520 = vrot.lane.b32.xlu1 %v6678_v38, %s5485_s15  ;;  %v5071_v38 = vcombine.low %v1899_v35, %v6637_v15  ;;  %v1326_v33 = vshrl.u32 %v5157_v60, 16  ;;  %v1329_v34 = vshll.u32 %v5157_v60, 16  ;;  %v3716_v35 = vor.u32 %v3715_v27, %v3711_v25  ;;  %v1585_v60 = vld [vmem:[#allocation3 + $0x48] sm:$0xf] }
 0x141   : > { %v6705_v42 = vpop.permute.xlu0 %3004  ;;  %v478_v1 = vsub.f32 %v350_v4, %v414_v22  ;;  %v479_v25 = vsub.f32 %v351_v9, %v415_v39  ;;  %v2701_v27 = vshll.u32 %v6757_v55, 16  ;;  %v6777_v4 = vld [vmem:[#allocation3 + $0x30] sm:$0xe] }
 0x142   : > { %7944 = vst [vmem:[#allocation35_spill] sm:$0xff] %v6705_v42  ;;  %v6725_v46 = vpop.permute.xlu1 %2986  ;;  %v1328_v63 = vrot.slane %v1326_v33, 7  ;;  %v3859_v42 = vrot.slane %v5071_v38, 1  ;;  %v6785_v33 = vld [vmem:[#allocation3 + $0x90] sm:$0xe] }
 0x143   : > { %2482 = vrot.lane.b32.xlu0 %v6683_v16, %s5479_s9  ;;  %v6741_v16 = vsel %vm3963_vm11, %v3934_v11, %v6360_v26  ;;  %v1729_v26 = vld [vmem:[#allocation3 + $0x3c] sm:$0xf]  ;;  %v6753_v11 = vld [vmem:[#allocation3 + $0x40] sm:$0xf]  ;;  %v5173_v9 = vpack.c.bf16 %v478_v1, %v478_v1  ;;  %v5174_v39 = vpack.c.bf16 %v479_v25, %v479_v25  ;;  %v1791_v1 = vld [vmem:[#allocation2 + $0x3c] sm:$0xf] }
 0x144   : > { %3790 = vrot.lane.b32.xlu1 %v3709_v59, %s5486_s18  ;;  %v5158_v59 = vpack.c.bf16 %v447_v20, %v447_v20  ;;  %v6765_v19 = vcombine.low %v1729_v26, %v6753_v11  ;;  %v2612_v20 = vrot.slane %v2610_v21, 1  ;;  %v1331_v21 = vor.u32 %v1329_v34, %v1328_v63  ;;  %v6802_v25 = vld [vmem:[#allocation2 + $0x40] sm:$0xf] }
 0x145   : > { %v6733_v24 = vpop.permute.xlu0 %3274  ;;  %v1473_v17 = vshll.u32 %v5174_v39, 16 }
 0x146   : > { %7945 = vst [vmem:[#allocation36_spill] sm:$0xff] %v6733_v24  ;;  %v6749_v44 = vpop.permute.xlu1 %2988  ;;  %v1334_v61 = vshrl.u32 %v5158_v59, 16  ;;  %v1337_v10 = vshll.u32 %v5158_v59, 16  ;;  %v2617_v26 = vshll.u32 %v6765_v19, 16  ;;  %v1332_v59 = vrot.slane %v1328_v63, 4  ;;  %v386_v24 = vld [vmem:[%s5753_s30 + $0xe0] sm:$0xff] }
 0x147   : > { %7946 = vst [vmem:[#allocation37_spill] sm:$0xff] %v6749_v44  ;;  %3776 = vrot.lane.b32.xlu0 %v3625_v56, %s5486_s18  ;;  %v3720_v56 = vrot.slane %v3718_v36, 1  ;;  %v6774_v36 = vld [vmem:[#allocation3 + $0x44] ss:$0 sps:$4 sm:$0x11]   ;;  %v2613_v34 = vsel %vm2040_vm3, %v2608_v13, %v2612_v20  ;;  %v3860_v63 = vrot.slane %v6660_v12, 1 }
 0x148   : > { %2388 = vrot.lane.b32.xlu1 %v2355_v52, %s5477_s7  ;;  %v6771_v52 = vrot.slane %v1334_v61, 7  ;;  %v2615_v13 = vshrl.u32 %v6765_v19, 16  ;;  %v2619_v12 = vrot.slane %v2617_v26, 1  ;;  %v2622_v20 = vshll.u32 %v6774_v36, 16  ;;  %v1745_v26 = vld [vmem:[#allocation3 + $0x9c] sm:$0xf] }
 0x149   : > { %v6762_v15 = vpop.permute.xlu0 %3276  ;;  %v3721_v61 = vsel %vm2040_vm3, %v3716_v35, %v3720_v56  ;;  %v1465_v35 = vshll.u32 %v5173_v9, 16  ;;  %v1470_v56 = vshrl.u32 %v5174_v39, 16 }
 0x14a   : > { %7947 = vst [vmem:[#allocation38_spill] sm:$0xff] %v6762_v15  ;;  %v6767_v32 = vpop.permute.xlu1 %3258  ;;  %v1339_v22 = vor.u32 %v1337_v10, %v6771_v52  ;;  %v1586_v15 = vsel %vm5775_vm7, %v1331_v21, %v1585_v60  ;;  %v1462_v10 = vshrl.u32 %v5173_v9, 16  ;;  %v1793_v60 = vld [vmem:[#allocation2 + $0x48] sm:$0xf]  ;;  %v6804_v21 = vld [vmem:[#allocation2 + $0x4c] sm:$0xf] }
 0x14b   : > { %3902 = vrot.lane.b32.xlu0 %v3858_v54, %s5487_s29  ;;  %v3881_v54 = vrot.slane %v6654_v51, 1  ;;  %1587 = vst [vmem:[#allocation3 + $0x48] sm:$0xf] %v1586_v15  ;;  %v5079_v15 = vcombine.low %v6785_v33, %v6666_v0  ;;  %v2706_v0 = vshll.u32 %v6790_v45, 16  ;;  %v1641_v33 = vld [vmem:[#allocation3 + $0xa8] sm:$0xf] }
 0x14c   : > { %2498 = vrot.lane.b32.xlu1 %v6757_v55, %s5479_s9  ;;  %v1340_v51 = vsel %vm5787_vm9, %v1332_v59, %v1339_v22  ;;  %v4976_v59 = vcombine.low %v6777_v4, %v6672_v29  ;;  %v6814_v22 = vld [vmem:[#allocation3 + $0xa0] sm:$0xf]  ;;  %v1464_v9 = vrot.slane %v1462_v10, 7  ;;  %v1341_v29 = vrot.slane %v6771_v52, 4 }
 0x14d   : > { %v6781_v38 = vpop.permute.xlu0 %3402  ;;  %1588 = vst.msk [vmem:[#allocation3 + $0x4c] sm:$0xf] %vm7906_vm0, %v1340_v51  ;;  %v3882_v39 = vsel %vm2313_vm2, %v6746_v5, %v3881_v54  ;;  %v6826_v5 = vcombine.low %v1745_v26, %v6814_v22  ;;  %v2620_v54 = vor.u32 %v2619_v12, %v2615_v13  ;;  %v323_v52 = vld [vmem:[%s5748_s27 + $0xe8] sm:$0xff]  ;;  %v1645_v13 = vld [vmem:[#allocation3 + $0xb0] sm:$0x1]  ;;  %v7951_v12 = vshrl.u32 %v6757_v55, 16 }
 0x14e   : > { %7948 = vst [vmem:[#allocation39_spill] sm:$0xff] %v6781_v38  ;;  %v6794_v41 = vpop.permute.xlu1 %3260  ;;  %v2703_v38 = vrot.slane %v2701_v27, 1  ;;  %v1467_v51 = vor.u32 %v1465_v35, %v1464_v9  ;;  %v1468_v10 = vrot.slane %v1464_v9, 4  ;;  %v1590_v44 = vsel %vm5781_vm8, %v1341_v29, %v1589_v40  ;;  %v6850_v9 = vld [vmem:[#allocation3 + $0xa4] ss:$0 sps:$4 sm:$0x11]  }
 0x14f   : > { %7949 = vst [vmem:[#allocation40_spill] sm:$0xff] %v6794_v41  ;;  %2484 = vrot.lane.b32.xlu0 %v6765_v19, %s5479_s9  ;;  %v1472_v41 = vrot.slane %v1470_v56, 7  ;;  %v322_v56 = vld [vmem:[%s5748_s27 + $0xe0] sm:$0xff]  ;;  %1591 = vst [vmem:[#allocation3 + $0x50] sm:$0x1] %v1590_v44  ;;  %v2708_v26 = vrot.slane %v2706_v0, 1  ;;  %v4984_v0 = vcombine.low %v6833_v62, %v6735_v18 }
 0x150   : > { %3792 = vrot.lane.b32.xlu1 %v3721_v61, %s5486_s18  ;;  %v3861_v61 = vsel %vm2313_vm2, %v3859_v42, %v3860_v63  ;;  %v6842_v63 = vcombine.low %v1793_v60, %v6804_v21  ;;  %v1642_v40 = vsel %vm5775_vm7, %v1467_v51, %v1641_v33  ;;  %v2838_v29 = vrot.slane %v4976_v59, 1  ;;  %v1807_v44 = vld [vmem:[#allocation2 + $0x9c] sm:$0xf]  ;;  %v6857_v33 = vld [vmem:[#allocation2 + $0xa0] sm:$0xf] }
 0x151   : > { %v6812_v19 = vpop.permute.xlu0 %3404  ;;  %v1475_v27 = vor.u32 %v1473_v17, %v1472_v41  ;;  %v1772_v17 = vld [vmem:[#allocation3 + $0x3c] sm:$0xe]  ;;  %1643 = vst [vmem:[#allocation3 + $0xa8] sm:$0xf] %v1642_v40  ;;  %v1477_v60 = vrot.slane %v1472_v41, 4  ;;  %v450_v55 = vsub.f32 %v322_v56, %v386_v24 }
 0x152   : > { %7950 = vst [vmem:[#allocation41_spill] sm:$0xff] %v6812_v19  ;;  %v6820_v4 = vpop.permute.xlu1 %3386  ;;  %v2624_v19 = vrot.slane %v2622_v20, 1  ;;  %v2704_v20 = vor.u32 %v2703_v38, %v7951_v12  ;;  %v451_v38 = vsub.f32 %v323_v52, %v387_v53  ;;  %v4977_v41 = vcombine.low %v1772_v17, %v6753_v11  ;;  %v6864_v59 = vld [vmem:[#allocation2 + $0xac] sm:$0xf]  ;;  %v6871_v24 = vld [vmem:[#allocation2 + $0x3c] sm:$0xe] }
 0x153   : > { %2754 = vrot.lane.b32.xlu0 %v2613_v34, %s5480_s10  ;;  %v6839_v34 = vcombine.low %v1791_v1, %v6802_v25  ;;  %v1476_v35 = vsel %vm5787_vm9, %v1468_v10, %v1475_v27  ;;  %v2713_v1 = vshll.u32 %v6826_v5, 16  ;;  %v2839_v27 = vrot.slane %v6716_v49, 1  ;;  %v354_v52 = vld [vmem:[%s5748_s27 + $0x1e0] sm:$0xff] }
 0x154   : > { %3918 = vrot.lane.b32.xlu1 %v3882_v39, %s5487_s29  ;;  %1644 = vst.msk [vmem:[#allocation3 + $0xac] sm:$0xf] %vm7906_vm0, %v1476_v35  ;;  %v3883_v39 = vrot.slane %v5079_v15, 1  ;;  %v2625_v51 = vsel %vm2040_vm3, %v2620_v54, %v2624_v19  ;;  %v1809_v15 = vld [vmem:[#allocation2 + $0xa8] sm:$0xf]  ;;  %v3884_v53 = vrot.slane %v6707_v6, 1  ;;  %v1646_v62 = vsel %vm5781_vm8, %v1477_v60, %v1645_v13 }
 0x155   : > { %v6836_v42 = vpop.permute.xlu0 %3514  ;;  %v5159_v49 = vpack.c.bf16 %v450_v55, %v450_v55  ;;  %v5160_v18 = vpack.c.bf16 %v451_v38, %v451_v38  ;;  %v2709_v11 = vsel %vm2040_vm3, %v2704_v20, %v2708_v26  ;;  %v2711_v19 = vshrl.u32 %v6826_v5, 16  ;;  %1647 = vst [vmem:[#allocation3 + $0xb0] sm:$0x1] %v1646_v62  ;;  %v418_v17 = vld [vmem:[%s5753_s30 + $0x1e0] sm:$0xff] }
 0x156   : > { %v6854_v10 = vpop.permute.xlu1 %3388  ;;  %v2715_v56 = vrot.slane %v2713_v1, 1  ;;  %v2718_v54 = vshll.u32 %v6850_v9, 16  ;;  %v6884_v6 = vcombine.low %v1807_v44, %v6857_v33  ;;  %v6886_v40 = vld [vmem:[#allocation2 + $0x44] ss:$0 sps:$4 sm:$0x11]   ;;  %v6889_v13 = vcombine.low %v1809_v15, %v6864_v59  ;;  %v355_v15 = vld [vmem:[%s5748_s27 + $0x1e8] sm:$0xff] }
 0x157   : > { %3904 = vrot.lane.b32.xlu0 %v3861_v61, %s5487_s29  ;;  %v1351_v12 = vshrl.u32 %v5160_v18, 16  ;;  %v2840_v20 = vsel %vm2313_vm2, %v2838_v29, %v2839_v27  ;;  %v2841_v26 = vrot.slane %v4977_v41, 1  ;;  %v2842_v1 = vrot.slane %v6774_v36, 1  ;;  %v419_v29 = vld [vmem:[%s5753_s30 + $0x1e8] sm:$0xff] }
 0x158   : > { %2500 = vrot.lane.b32.xlu1 %v6826_v5, %s5479_s9  ;;  %v1343_v5 = vshrl.u32 %v5159_v49, 16  ;;  %v6898_v44 = vsel %vm3963_vm11, %v6700_v2, %v6590_v3  ;;  %v1346_v38 = vshll.u32 %v5159_v49, 16  ;;  %v482_v27 = vsub.f32 %v354_v52, %v418_v17  ;;  %v1780_v49 = vld [vmem:[#allocation3 + $0x9c] sm:$0xe] }
 0x159   : > { %v6868_v61 = vpop.permute.xlu0 %3500  ;;  %v2862_v36 = vrot.slane %v4984_v0, 1  ;;  %v3885_v41 = vsel %vm2313_vm2, %v3883_v39, %v3884_v53  ;;  %v2716_v62 = vor.u32 %v2715_v56, %v2711_v19  ;;  %v2720_v60 = vrot.slane %v2718_v54, 1  ;;  %v1592_v19 = vld [vmem:[#allocation3 + $0x54] sm:$0xf] }
 0x15a   : > { %v6880_v35 = vpop.permute.xlu1 %3498  ;;  %v3998_v3 = vsel %vm7904_vm12, %v6713_v57, %v6610_v23  ;;  %v6913_v52 = vrot.slane %v1351_v12, 7  ;;  %v2843_v39 = vsel %vm2313_vm2, %v2841_v26, %v2842_v1  ;;  %v2863_v0 = vrot.slane %v6790_v45, 1 }
 0x15b   : > { %2756 = vrot.lane.b32.xlu0 %v2625_v51, %s5480_s10  ;;  %v1354_v51 = vshll.u32 %v5160_v18, 16  ;;  %v3117_v18 = vshll.u32 %v6839_v34, 16  ;;  %v3122_v53 = vshll.u32 %v6886_v40, 16  ;;  %v483_v23 = vsub.f32 %v355_v15, %v419_v29  ;;  %v6933_v29 = vld [vmem:[#allocation2 + $0x50] ss:$0 sps:$4 sm:$0x11]  }
 0x15c   : > { %2770 = vrot.lane.b32.xlu1 %v2709_v11, %s5480_s10  ;;  %v1345_v11 = vrot.slane %v1343_v5, 7  ;;  %v5175_v5 = vpack.c.bf16 %v482_v27, %v482_v27  ;;  %v2721_v12 = vsel %vm2040_vm3, %v2716_v62, %v2720_v60  ;;  %v3115_v26 = vshrl.u32 %v6839_v34, 16 }
 0x15d   : > { %v6901_v55 = vpop.permute.xlu0 %3770  ;;  %v1356_v17 = vor.u32 %v1354_v51, %v6913_v52  ;;  %v3119_v1 = vrot.slane %v3117_v18, 1  ;;  %v2864_v15 = vsel %vm2313_vm2, %v2862_v36, %v2863_v0  ;;  %v5176_v60 = vpack.c.bf16 %v483_v23, %v483_v23 }
 0x15e   : > { %v6909_v2 = vpop.permute.xlu1 %2382  ;;  %v1348_v56 = vor.u32 %v1346_v38, %v1345_v11  ;;  %v1349_v54 = vrot.slane %v1345_v11, 4  ;;  %vm4348_vm12 = vcmask 785408   ;;  %v1479_v62 = vshrl.u32 %v5175_v5, 16 }
 0x15f   : > { %2882 = vrot.lane.b32.xlu0 %v2840_v20, %s5481_s11  ;;  %v4985_v20 = vcombine.low %v1780_v49, %v6814_v22  ;;  %v3129_v22 = vshll.u32 %v6842_v63, 16  ;;  %v1482_v49 = vshll.u32 %v5175_v5, 16  ;;  %v2866_v36 = vrot.slane %v6850_v9, 1 }
 0x160   : > { %3920 = vrot.lane.b32.xlu1 %v3885_v41, %s5487_s29  ;;  %v1357_v38 = vsel %vm5787_vm9, %v1349_v54, %v1356_v17  ;;  %v1593_v51 = vsel %vm5775_vm7, %v1348_v56, %v1592_v19  ;;  %v3124_v41 = vrot.slane %v3122_v53, 1  ;;  %v1487_v11 = vshrl.u32 %v5176_v60, 16 }
 0x161   : > { %v6919_v57 = vpop.permute.xlu0 %2368  ;;  %1594 = vst [vmem:[#allocation3 + $0x54] sm:$0xf] %v1593_v51  ;;  %1595 = vst.msk [vmem:[#allocation3 + $0x58] sm:$0xf] %vm7906_vm0, %v1357_v38  ;;  %v2865_v18 = vrot.slane %v4985_v20, 1  ;;  %v4031_v0 = vsel %vm4029_vm13, %v3998_v3, %v6646_v7  ;;  %v3120_v23 = vor.u32 %v3119_v1, %v3115_v26  ;;  %v3127_v56 = vshrl.u32 %v6842_v63, 16 }
 0x162   : > { %v6924_v45 = vpop.permute.xlu1 %3516  ;;  %v1481_v53 = vrot.slane %v1479_v62, 7  ;;  %v4064_v54 = vsel %vm4062_vm14, %v4031_v0, %v6669_v30  ;;  %v3131_v17 = vrot.slane %v3129_v22, 1  ;;  %v3134_v9 = vshll.u32 %v6933_v29, 16 }
 0x163   : > { %2884 = vrot.lane.b32.xlu0 %v2843_v39, %s5481_s11  ;;  %v1490_v39 = vshll.u32 %v5176_v60, 16  ;;  %v1489_v5 = vrot.slane %v1487_v11, 7  ;;  %v4097_v7 = vsel %vm4095_vm15, %v4064_v54, %v6725_v46  ;;  %v3213_v20 = vshll.u32 %v6884_v6, 16  ;;  %v1596_v60 = vld [vmem:[#allocation3 + $0x5c] sm:$0x1] }
 0x164   : > { %2772 = vrot.lane.b32.xlu1 %v2721_v12, %s5480_s10  ;;  %v1648_v12 = vld [vmem:[#allocation3 + $0xb4] sm:$0xf]  ;;  %v1484_v26 = vor.u32 %v1482_v49, %v1481_v53  ;;  %v1485_v1 = vrot.slane %v1481_v53, 4  ;;  %v4130_v30 = vsel %vm4128_vm1, %v4097_v7, %v6767_v32  ;;  %v2867_v38 = vsel %vm2313_vm2, %v2865_v18, %v2866_v36  ;;  %v1836_v11 = vld [vmem:[#allocation2 + $0x48] sm:$0xe] }
 0x165   : > { %v6938_v27 = vpop.permute.xlu0 %2478  ;;  %v1492_v51 = vor.u32 %v1490_v39, %v1489_v5  ;;  %v1358_v22 = vrot.slane %v6913_v52, 4  ;;  %v4163_v46 = vsel %vm4161_vm4, %v4130_v30, %v6820_v4  ;;  %v3125_v62 = vsel %vm2040_vm3, %v3120_v23, %v3124_v41  ;;  %v6981_v23 = vld [vmem:[#allocation2 + $0x9c] sm:$0xe]  ;;  %v6995_v54 = vld [vmem:[#allocation2 + $0xb0] ss:$0 sps:$4 sm:$0x11]  }
 0x166   : > { %v6943_v19 = vpop.permute.xlu1 %3786  ;;  %v3211_v49 = vshrl.u32 %v6884_v6, 16  ;;  %v1649_v32 = vsel %vm5775_vm7, %v1484_v26, %v1648_v12  ;;  %v4196_v18 = vsel %vm4194_vm5, %v4163_v46, %v6880_v35  ;;  %v3132_v52 = vor.u32 %v3131_v17, %v3127_v56  ;;  %v356_v26 = vld [vmem:[%s5748_s27 + $0x1f0] sm:$0xff] }
 0x167   : > { %2994 = vrot.lane.b32.xlu0 %v6839_v34, %s5482_s12  ;;  %v6956_v34 = vld [vmem:[#allocation2 + $0xa4] ss:$0 sps:$4 sm:$0x11]   ;;  %v3136_v36 = vrot.slane %v3134_v9, 1  ;;  %v1493_v4 = vsel %vm5787_vm9, %v1485_v1, %v1492_v51  ;;  %1650 = vst [vmem:[#allocation3 + $0xb4] sm:$0xf] %v1649_v32  ;;  %v1597_v35 = vsel %vm5781_vm8, %v1358_v22, %v1596_v60  ;;  %v6989_v56 = vsel %vm3963_vm11, %v6722_v31, %v6576_v14 }
 0x168   : > { %2898 = vrot.lane.b32.xlu1 %v2864_v15, %s5481_s11  ;;  %v3215_v39 = vrot.slane %v3213_v20, 1  ;;  %v3218_v0 = vshll.u32 %v6956_v34, 16  ;;  %1651 = vst.msk [vmem:[#allocation3 + $0xb8] sm:$0xf] %vm7906_vm0, %v1493_v4  ;;  %v3225_v17 = vshll.u32 %v6889_v13, 16  ;;  %v7954_v20 = vcombine.low %v6871_v24, %v6802_v25  ;;  %v420_v1 = vld [vmem:[%s5753_s30 + $0x1f0] sm:$0xff] }
 0x169   : > { %v6954_v3 = vpop.permute.xlu0 %3772  ;;  %1598 = vst [vmem:[#allocation3 + $0x5c] sm:$0x1] %v1597_v35  ;;  %v1652_v9 = vld [vmem:[#allocation3 + $0xbc] sm:$0x1]  ;;  %v3137_v7 = vsel %vm2040_vm3, %v3132_v52, %v3136_v36  ;;  %v357_v24 = vld [vmem:[%s5748_s27 + $0x1f8] sm:$0xff]  ;;  %v3223_v51 = vshrl.u32 %v6889_v13, 16  ;;  %v484_v32 = vsub.f32 %v356_v26, %v420_v1 }
 0x16a   : > { %v6965_v15 = vpop.permute.xlu1 %2384  ;;  %v3227_v22 = vrot.slane %v3225_v17, 1  ;;  %v7955_v60 = vld [vmem:[#allocation33_spill] sm:$0xff]  ;;  %v7957_v52 = vld [vmem:[#allocation36_spill] sm:$0xff]  ;;  %v1709_v4 = vld [vmem:[#allocation2 + $0x48] sm:$0xe]  ;;  %s4542_s27 = sld [smem:[#allocation4]] }
 0x16b   : > { %2996 = vrot.lane.b32.xlu0 %v6842_v63, %s5482_s12  ;;  %v4229_v63 = vsel %vm7905_vm6, %v4196_v18, %v6901_v55  ;;  %vm7952_vm6 = vcmask 195584   ;;  %v7956_v18 = vld [vmem:[#allocation34_spill] sm:$0xff]  ;;  %v5143_v17 = vpack.c.bf16 %v484_v32, %v484_v32  ;;  %v5460_v26 = vld [vmem:[#allocation2 + $0x4c] sm:$0xf] }
 0x16c   : > { %2900 = vrot.lane.b32.xlu1 %v2867_v38, %s5481_s11  ;;  %v4014_v55 = vsel %vm7952_vm6, %v6898_v44, %v6587_v50  ;;  %vm7953_vm0 = vmmov %vm7952_vm6  ;;  %v5025_v50 = vcombine.low %v1836_v11, %v6804_v21  ;;  %v1494_v44 = vrot.slane %v1489_v5, 4  ;;  %v3216_v5 = vor.u32 %v3215_v39, %v3211_v49  ;;  %v7965_v32 = vld [vmem:[#allocation31_spill] sm:$0xff] }
 0x16d   : > { %v3899_v41 = vpop.permute.xlu0 %3898  ;;  %v4000_v12 = vsel %vm7953_vm0, %v6741_v16, %v6631_v8  ;;  %v4047_v14 = vsel %vm4029_vm13, %v4014_v55, %v6622_v28  ;;  %v3350_v8 = vrot.slane %v7954_v20, 1  ;;  %v3351_v16 = vrot.slane %v6886_v40, 1  ;;  %v421_v40 = vld [vmem:[%s5753_s30 + $0x1f8] sm:$0xff]  ;;  %v1856_v55 = vld [vmem:[#allocation3 + $0x3c] sm:$0xf]  ;;  %s5111_s30 = sshll.u32 %s8061_s24, 8 }
 0x16e   : > { %v4262_v53 = vsel %vm4260_vm10, %v4229_v63, %v3899_v41  ;;  %v7003_v31 = vpop.permute.xlu1 %2494  ;;  %v5032_v28 = vcombine.low %v6981_v23, %v6857_v33  ;;  %v4080_v30 = vsel %vm4062_vm14, %v4047_v14, %v6652_v58  ;;  %v3220_v38 = vrot.slane %v3218_v0, 1  ;;  %v7958_v41 = vld [vmem:[#allocation37_spill] sm:$0xff]  ;;  %v7959_v0 = vld [vmem:[#allocation39_spill] sm:$0xff] }
 0x16f   : > { %3266 = vrot.lane.b32.xlu0 %v3125_v62, %s5483_s13  ;;  %5211 = vmatprep.mubr.msk.bf16.mxu0 %vm4348_vm12, %v4262_v53  ;;  %v1653_v25 = vsel %vm5781_vm8, %v1494_v44, %v1652_v9  ;;  %v4033_v33 = vsel %vm4029_vm13, %v4000_v12, %v6656_v43  ;;  %v3230_v58 = vshll.u32 %v6995_v54, 16  ;;  %v3353_v62 = vrot.slane %v5025_v50, 1  ;;  %v1844_v53 = vld [vmem:[#allocation2 + $0xa8] sm:$0xe]  ;;  %v7960_v9 = vld [vmem:[#allocation40_spill] sm:$0xff] }
 0x170   : > { %3010 = vrot.lane.b32.xlu1 %v6884_v6, %s5482_s12  ;;  %1654 = vst [vmem:[#allocation3 + $0xbc] sm:$0x1] %v1653_v25  ;;  %v4113_v6 = vsel %vm4095_vm15, %v4080_v30, %v7955_v60  ;;  %v3354_v49 = vrot.slane %v6933_v29, 1  ;;  %v4066_v43 = vsel %vm4062_vm14, %v4033_v33, %v7956_v18  ;;  %v3352_v11 = vsel %vm2313_vm2, %v3350_v8, %v3351_v16 }
 0x171   : > { %v7021_v21 = vpop.permute.xlu0 %2480  ;;  %v4146_v36 = vsel %vm4128_vm1, %v4113_v6, %v7957_v52  ;;  %v485_v63 = vsub.f32 %v357_v24, %v421_v40  ;;  %v4099_v39 = vsel %vm4095_vm15, %v4066_v43, %v7958_v41  ;;  %v3221_v29 = vsel %vm2040_vm3, %v3216_v5, %v3220_v38  ;;  %v5461_v6 = vld [vmem:[#allocation2 + $0x50] ss:$0 sps:$4 sm:$0x11]   ;;  %v1136_v52 = vld [vmem:[#allocation2 + $0xc0] sm:$0xf] }
 0x172   : > { %v7033_v46 = vpop.permute.xlu1 %3788  ;;  %v4179_v23 = vsel %vm4161_vm4, %v4146_v36, %v7959_v0  ;;  %v4132_v12 = vsel %vm4128_vm1, %v4099_v39, %v7960_v9  ;;  %v3228_v50 = vor.u32 %v3227_v22, %v3223_v51  ;;  %v3232_v44 = vrot.slane %v3230_v58, 1  ;;  %v7963_v58 = vld [vmem:[#allocation30_spill] sm:$0xff] }
 0x173   : > { %3268 = vrot.lane.b32.xlu0 %v3137_v7, %s5483_s13  ;;  %v4212_v14 = vsel %vm4194_vm5, %v4179_v23, %v6836_v42  ;;  %v7055_v7 = vld [vmem:[#allocation3 + $0x40] sm:$0xf]  ;;  %vm7961_vm0 = vcmask 654336   ;;  %v3355_v16 = vsel %vm2313_vm2, %v3353_v62, %v3354_v49  ;;  %v4930_v1 = vcombine.low %v1709_v4, %v5460_v26  ;;  %v7084_v62 = vld [vmem:[#allocation3 + $0x44] ss:$0 sps:$4 sm:$0x11]  }
 0x174   : > { %3012 = vrot.lane.b32.xlu1 %v6889_v13, %s5482_s12  ;;  %v4165_v13 = vsel %vm4161_vm4, %v4132_v12, %v6854_v10  ;;  %v4245_v20 = vsel %vm7961_vm0, %v4212_v14, %v6943_v19  ;;  %v5144_v5 = vpack.c.bf16 %v485_v63, %v485_v63  ;;  %v961_v38 = vshrl.u32 %v5143_v17, 16  ;;  %vm7962_vm6 = vmmov %vm7961_vm0  ;;  %v1717_v63 = vld [vmem:[#allocation2 + $0xa8] sm:$0xe]  ;;  %v7110_v26 = vld [vmem:[#allocation3 + $0x4c] sm:$0xf] }
 0x175   : > { %v7049_v35 = vpop.permute.xlu0 %2750  ;;  %v4198_v42 = vsel %vm4194_vm5, %v4165_v13, %v6868_v61  ;;  %v3374_v25 = vrot.slane %v5032_v28, 1  ;;  %v7071_v24 = vcombine.low %v1856_v55, %v7055_v7  ;;  %v5033_v40 = vcombine.low %v1844_v53, %v6864_v59  ;;  %v1140_v13 = vld [vmem:[#allocation2 + $0xc8] sm:$0x1] }
 0x176   : > { %v3915_v8 = vpop.permute.xlu1 %3914  ;;  %v4231_v10 = vsel %vm7962_vm6, %v4198_v42, %v6954_v3  ;;  %v3233_v61 = vsel %vm2040_vm3, %v3228_v50, %v3232_v44  ;;  %v3375_v51 = vrot.slane %v6956_v34, 1  ;;  %v963_v22 = vrot.slane %v961_v38, 7  ;;  %v7103_v50 = vld [vmem:[#allocation3 + $0xa0] sm:$0xf] }
 0x177   : > { %3394 = vrot.lane.b32.xlu0 %v3352_v11, %s5484_s14  ;;  %v4278_v30 = vsel %vm4260_vm10, %v4245_v20, %v3915_v8  ;;  %vm7964_vm0 = vcmask 195584   ;;  %v2332_v28 = vrot.slane %v4930_v1, 1  ;;  %v2333_v59 = vrot.slane %v5461_v6, 1  ;;  %v7968_v20 = vld [vmem:[#allocation38_spill] sm:$0xff] }
 0x178   : > { %3282 = vrot.lane.b32.xlu1 %v3221_v29, %s5483_s13  ;;  %5227 = vmatprep.mubr.msk.bf16.mxu1 %vm4348_vm12, %v4278_v30  ;;  %v4016_v3 = vsel %vm7964_vm0, %v6989_v56, %v7963_v58  ;;  %v964_v49 = vshll.u32 %v5143_v17, 16  ;;  %v3629_v18 = vshll.u32 %v7071_v24, 16  ;;  %v969_v43 = vshrl.u32 %v5144_v5, 16  ;;  %v7966_v56 = vld [vmem:[#allocation32_spill] sm:$0xff]  ;;  %v1872_v29 = vld [vmem:[#allocation3 + $0x9c] sm:$0xf] }
 0x179   : > { %v3901_v19 = vpop.permute.xlu0 %3900  ;;  %v4049_v34 = vsel %vm4029_vm13, %v4016_v3, %v7965_v32  ;;  %v3377_v4 = vrot.slane %v5033_v40, 1  ;;  %v972_v39 = vshll.u32 %v5144_v5, 16  ;;  %v3376_v0 = vsel %vm2313_vm2, %v3374_v25, %v3375_v51  ;;  %v7967_v17 = vld [vmem:[#allocation35_spill] sm:$0xff]  ;;  %v7969_v5 = vld [vmem:[#allocation41_spill] sm:$0xff] }
 0x17a   : > { %v4264_v33 = vsel %vm4260_vm10, %v4231_v10, %v3901_v19  ;;  %v7080_v60 = vpop.permute.xlu1 %2496  ;;  %v4082_v36 = vsel %vm4062_vm14, %v4049_v34, %v7966_v56  ;;  %v966_v41 = vor.u32 %v964_v49, %v963_v22  ;;  %v3378_v23 = vrot.slane %v6995_v54, 1  ;;  %v5462_v40 = vld [vmem:[#allocation2 + $0xac] sm:$0xf]  ;;  %v5464_v34 = vld [vmem:[#allocation2 + $0xb0] ss:$0 sps:$4 sm:$0x11]  }
 0x17b   : > { %3396 = vrot.lane.b32.xlu0 %v3355_v16, %s5484_s14  ;;  %5212 = vmatmul.mubr.msk.bf16.vlgmr.msra.gmra.mrb[0].mxu0 %vm4348_vm12, %v4264_v33  ;;  %v967_v55 = vrot.slane %v963_v22, 4  ;;  %v971_v53 = vrot.slane %v969_v43, 7  ;;  %v4115_v9 = vsel %vm4095_vm15, %v4082_v36, %v7967_v17  ;;  %v2334_v14 = vsel %vm2313_vm2, %v2332_v28, %v2333_v59  ;;  %v1858_v16 = vld [vmem:[#allocation3 + $0x48] sm:$0xf]  ;;  %v5463_v59 = vld [vmem:[#allocation2 + $0x58] sm:$0xf] }
 0x17c   : > { %3284 = vrot.lane.b32.xlu1 %v3233_v61, %s5483_s13  ;;  %v3627_v44 = vshrl.u32 %v7071_v24, 16  ;;  %v1137_v54 = vsel %vm5775_vm7, %v966_v41, %v1136_v52  ;;  %v4148_v8 = vsel %vm4128_vm1, %v4115_v9, %v7968_v20  ;;  %v3631_v1 = vrot.slane %v3629_v18, 1  ;;  %vm7970_vm7 = vmmov %vm7962_vm6  ;;  %v7136_v43 = vld [vmem:[#allocation3 + $0xa4] ss:$0 sps:$4 sm:$0x11]  }
 0x17d   : > { %v7092_v11 = vpop.permute.xlu0 %2752  ;;  %v3634_v42 = vshll.u32 %v7084_v62, 16  ;;  %v974_v30 = vor.u32 %v972_v39, %v971_v53  ;;  %1138 = vst [vmem:[#allocation2 + $0xc0] sm:$0xf] %v1137_v54  ;;  %v4181_v38 = vsel %vm4161_vm4, %v4148_v8, %v7969_v5  ;;  %v976_v19 = vrot.slane %v971_v53, 4  ;;  %v1874_v53 = vld [vmem:[#allocation3 + $0xa8] sm:$0xf] }
 0x17e   : > { %v7098_v12 = vpop.permute.xlu1 %2766  ;;  %v4214_v25 = vsel %vm4194_vm5, %v4181_v38, %v6924_v45  ;;  %v4938_v61 = vcombine.low %v1717_v63, %v5462_v40  ;;  %v5048_v58 = vcombine.low %v1872_v29, %v7103_v50  ;;  %v5041_v3 = vcombine.low %v1858_v16, %v7110_v26  ;;  %v7142_v41 = vld [vmem:[#allocation3 + $0x50] ss:$0 sps:$4 sm:$0x11]   ;;  %v1718_v29 = vld [vmem:[#allocation2 + $0xb4] sm:$0xe] }
 0x17f   : > { %3506 = vrot.lane.b32.xlu0 %v7071_v24, %s5485_s15  ;;  %v3379_v24 = vsel %vm2313_vm2, %v3377_v4, %v3378_v23  ;;  %v975_v33 = vsel %vm5787_vm9, %v967_v55, %v974_v30  ;;  %v4247_v51 = vsel %vm7970_vm7, %v4214_v25, %v7033_v46  ;;  %vm7971_vm6 = vcmask 60416   ;;  %v5465_v4 = vld [vmem:[#allocation2 + $0x5c] ss:$0 sps:$4 sm:$0x11]   ;;  %v7148_v17 = vld [vmem:[#allocation3 + $0xac] sm:$0xf]  ;;  %vm7981_vm7 = vmmov %vm7964_vm0 }
 0x180   : > { %3410 = vrot.lane.b32.xlu1 %v3376_v0, %s5484_s14  ;;  %1139 = vst.msk [vmem:[#allocation2 + $0xc4] sm:$0xf] %vm7971_vm6, %v975_v33  ;;  %v1141_v45 = vsel %vm5781_vm8, %v976_v19, %v1140_v13  ;;  %v3632_v6 = vor.u32 %v3631_v1, %v3627_v44  ;;  %v3636_v48 = vrot.slane %v3634_v42, 1  ;;  %v4931_v49 = vcombine.low %v1710_v37, %v5463_v59  ;;  %v1731_v54 = vld [vmem:[#allocation3 + $0x48] sm:$0xf] }
 0x181   : > { %v7116_v10 = vpop.permute.xlu0 %2878  ;;  %1142 = vst [vmem:[#allocation2 + $0xc8] sm:$0x1] %v1141_v45  ;;  %v2356_v32 = vrot.slane %v4938_v61, 1  ;;  %v2357_v18 = vrot.slane %v5464_v34, 1  ;;  %v3725_v47 = vshll.u32 %v5048_v58, 16  ;;  %v2336_v63 = vrot.slane %v5465_v4, 1 }
 0x182   : > { %v3917_v22 = vpop.permute.xlu1 %3916  ;;  %v3637_v56 = vsel %vm2040_vm3, %v3632_v6, %v3636_v48  ;;  %v2335_v36 = vrot.slane %v4931_v49, 1  ;;  %v3641_v39 = vshll.u32 %v5041_v3, 16  ;;  %v3723_v23 = vshrl.u32 %v5048_v58, 16  ;;  %v7155_v20 = vld [vmem:[#allocation3 + $0x4c] sm:$0xf] }
 0x183   : > { %2374 = vrot.lane.b32.xlu0 %v2334_v14, %s5477_s7  ;;  %v4280_v28 = vsel %vm4260_vm10, %v4247_v51, %v3917_v22  ;;  %v2358_v55 = vsel %vm2313_vm2, %v2356_v32, %v2357_v18  ;;  %v3727_v9 = vrot.slane %v3725_v47, 1  ;;  %v3730_v14 = vshll.u32 %v7136_v43, 16  ;;  %v5466_v5 = vld [vmem:[#allocation2 + $0xb8] sm:$0xf]  ;;  %v1900_v37 = vld [vmem:[#allocation3 + $0x3c] sm:$0xe] }
 0x184   : > { %3412 = vrot.lane.b32.xlu1 %v3379_v24, %s5484_s14  ;;  %5228 = vmatmul.mubr.msk.bf16.vlgmr.msra.gmra.mrb[0].mxu1 %vm4348_vm12, %v4280_v28  ;;  %v2337_v13 = vsel %vm2313_vm2, %v2335_v36, %v2336_v63  ;;  %v3639_v8 = vshrl.u32 %v5041_v3, 16  ;;  %v3643_v16 = vrot.slane %v3641_v39, 1  ;;  %v3646_v1 = vshll.u32 %v7142_v41, 16  ;;  %v7171_v6 = vld [vmem:[#allocation3 + $0xb0] ss:$0 sps:$4 sm:$0x11]  }
 0x185   : > { %v7134_v46 = vpop.permute.xlu0 %2880  ;;  %v5049_v42 = vcombine.low %v1874_v53, %v7148_v17  ;;  %v4939_v38 = vcombine.low %v1718_v29, %v5466_v5  ;;  %v3728_v19 = vor.u32 %v3727_v9, %v3723_v23  ;;  %v3732_v25 = vrot.slane %v3730_v14, 1  ;;  %v7176_v49 = vld [vmem:[#allocation3 + $0x50] ss:$0 sps:$4 sm:$0x11]   ;;  %v1747_v36 = vld [vmem:[#allocation3 + $0xa8] sm:$0xf] }
 0x186   : > { %v7138_v52 = vpop.permute.xlu1 %2768  ;;  %v4946_v40 = vcombine.low %v1731_v54, %v7155_v20  ;;  %v3644_v61 = vor.u32 %v3643_v16, %v3639_v8  ;;  %v3648_v33 = vrot.slane %v3646_v1, 1  ;;  %v5072_v51 = vcombine.low %v1900_v37, %v7055_v7  ;;  %v1908_v4 = vld [vmem:[#allocation3 + $0x9c] sm:$0xe]  ;;  %v7184_v63 = vld [vmem:[#allocation3 + $0xac] sm:$0xf] }
 0x187   : > { %3508 = vrot.lane.b32.xlu0 %v5041_v3, %s5485_s15  ;;  %v5467_v3 = vld [vmem:[#allocation2 + $0xbc] ss:$0 sps:$4 sm:$0x11]   ;;  %v3733_v28 = vsel %vm2040_vm3, %v3728_v19, %v3732_v25  ;;  %v3737_v48 = vshll.u32 %v5049_v42, 16  ;;  %v3863_v18 = vrot.slane %v7084_v62, 1  ;;  %v3735_v39 = vshrl.u32 %v5049_v42, 16 }
 0x188   : > { %3522 = vrot.lane.b32.xlu1 %v5048_v58, %s5485_s15  ;;  %v2359_v58 = vrot.slane %v4939_v38, 1  ;;  %v2360_v45 = vrot.slane %v5467_v3, 1  ;;  %v2629_v32 = vshll.u32 %v4946_v40, 16  ;;  %v3649_v7 = vsel %vm2040_vm3, %v3644_v61, %v3648_v33  ;;  %v1733_v62 = vld [vmem:[#allocation3 + $0x54] sm:$0xf] }
 0x189   : > { %v7145_v0 = vpop.permute.xlu0 %2990  ;;  %v3862_v34 = vrot.slane %v5072_v51, 1  ;;  %v3739_v23 = vrot.slane %v3737_v48, 1  ;;  %v3742_v29 = vshll.u32 %v7171_v6, 16  ;;  %v7190_v9 = vld [vmem:[#allocation3 + $0x58] sm:$0xf]  ;;  %v2634_v54 = vshll.u32 %v7176_v49, 16 }
 0x18a   : > { %v7151_v44 = vpop.permute.xlu1 %2894  ;;  %v2361_v47 = vsel %vm2313_vm2, %v2359_v58, %v2360_v45  ;;  %v2631_v14 = vrot.slane %v2629_v32, 1  ;;  %v1901_v8 = vld [vmem:[#allocation3 + $0x48] sm:$0xe]  ;;  %v4954_v16 = vcombine.low %v1747_v36, %v7184_v63  ;;  %v4947_v38 = vcombine.low %v1733_v62, %v7190_v9  ;;  %v7204_v33 = vld [vmem:[#allocation3 + $0x5c] ss:$0 sps:$4 sm:$0x11]  }
 0x18b   : > { %3778 = vrot.lane.b32.xlu0 %v3637_v56, %s5486_s18  ;;  %v3744_v5 = vrot.slane %v3742_v29, 1  ;;  %v5080_v37 = vcombine.low %v1908_v4, %v7103_v50  ;;  %v5073_v61 = vcombine.low %v1901_v8, %v7110_v26  ;;  %v3887_v50 = vrot.slane %v7136_v43, 1  ;;  %v1773_v4 = vld [vmem:[#allocation3 + $0x48] sm:$0xe] }
 0x18c   : > { %2390 = vrot.lane.b32.xlu1 %v2358_v55, %s5477_s7  ;;  %v2627_v55 = vshrl.u32 %v4946_v40, 16  ;;  %v2641_v51 = vshll.u32 %v4947_v38, 16  ;;  %v2725_v48 = vshll.u32 %v4954_v16, 16  ;;  %v2646_v36 = vshll.u32 %v7204_v33, 16 }
 0x18d   : > { %v7160_v30 = vpop.permute.xlu0 %2992  ;;  %v3886_v45 = vrot.slane %v5080_v37, 1  ;;  %vm7975_vm8 = vcmask 64512  }
 0x18e   : > { %v7162_v24 = vpop.permute.xlu1 %2896  ;;  %v2632_v25 = vor.u32 %v2631_v14, %v2627_v55  ;;  %v2723_v55 = vshrl.u32 %v4954_v16, 16  ;;  %v2727_v62 = vrot.slane %v2725_v48, 1  ;;  %v2845_v48 = vrot.slane %v7176_v49, 1  ;;  %v1781_v49 = vld [vmem:[#allocation3 + $0xa8] sm:$0xe]  ;;  %vm7978_vm9 = vmmov %vm7975_vm8 }
 0x18f   : > { %2376 = vrot.lane.b32.xlu0 %v2337_v13, %s5477_s7  ;;  %v3864_v13 = vsel %vm2313_vm2, %v3862_v34, %v3863_v18  ;;  %v3866_v34 = vrot.slane %v7142_v41, 1  ;;  %v2639_v18 = vshrl.u32 %v4947_v38, 16  ;;  %v3888_v29 = vsel %vm2313_vm2, %v3886_v45, %v3887_v50  ;;  %vm7984_vm6 = vmmov %vm7975_vm8 }
 0x190   : > { %3524 = vrot.lane.b32.xlu1 %v5049_v42, %s5485_s15  ;;  %v3740_v42 = vor.u32 %v3739_v23, %v3735_v39  ;;  %v1749_v39 = vld [vmem:[#allocation3 + $0xb4] sm:$0xf]  ;;  %v7222_v23 = vld [vmem:[#allocation3 + $0xb8] sm:$0xf] }
 0x191   : > { %v7168_v22 = vpop.permute.xlu0 %3262  ;;  %v4955_v8 = vcombine.low %v1749_v39, %v7222_v23 }
 0x192   : > { %v7173_v59 = vpop.permute.xlu1 %3006  ;;  %v3745_v3 = vsel %vm2040_vm3, %v3740_v42, %v3744_v5 }
 0x193   : > { %2486 = vrot.lane.b32.xlu0 %v4946_v40, %s5479_s9  ;;  %v2636_v40 = vrot.slane %v2634_v54, 1  ;;  %v1909_v54 = vld [vmem:[#allocation3 + $0xa8] sm:$0xe] }
 0x194   : > { %3794 = vrot.lane.b32.xlu1 %v3733_v28, %s5486_s18  ;;  %v7211_v28 = vld [vmem:[#allocation3 + $0xb0] ss:$0 sps:$4 sm:$0x11]  }
 0x195   : > { %v7182_v56 = vpop.permute.xlu0 %3264  ;;  %v2637_v26 = vsel %vm2040_vm3, %v2632_v25, %v2636_v40  ;;  %v2730_v14 = vshll.u32 %v7211_v28, 16  ;;  %v1774_v25 = vld [vmem:[#allocation3 + $0x54] sm:$0xe]  ;;  %v2728_v40 = vor.u32 %v2727_v62, %v2723_v55 }
 0x196   : > { %v7187_v53 = vpop.permute.xlu1 %3008 }
 0x197   : > { %3780 = vrot.lane.b32.xlu0 %v3649_v7, %s5486_s18  ;;  %v3865_v7 = vrot.slane %v5073_v61, 1  ;;  %v2732_v61 = vrot.slane %v2730_v14, 1  ;;  %v2848_v14 = vrot.slane %v7204_v33, 1  ;;  %v1782_v33 = vld [vmem:[#allocation3 + $0xb4] sm:$0xe] }
 0x198   : > { %2392 = vrot.lane.b32.xlu1 %v2361_v47, %s5477_s7  ;;  %v2643_v47 = vrot.slane %v2641_v51, 1  ;;  %v7236_v51 = vld [vmem:[#allocation3 + $0xbc] ss:$0 sps:$4 sm:$0x11]  }
 0x199   : > { %v7196_v1 = vpop.permute.xlu0 %3390  ;;  %v3867_v42 = vsel %vm2313_vm2, %v3865_v7, %v3866_v34  ;;  %v3890_v34 = vrot.slane %v7171_v6, 1 }
 0x19a   : > { %v7200_v19 = vpop.permute.xlu1 %3278  ;;  %v2644_v5 = vor.u32 %v2643_v47, %v2639_v18  ;;  %v1795_v18 = vld [vmem:[#allocation2 + $0x54] sm:$0xf]  ;;  %v7248_v47 = vld [vmem:[#allocation2 + $0x58] sm:$0xf] }
 0x19b   : > { %3906 = vrot.lane.b32.xlu0 %v3864_v13, %s5487_s29  ;;  %v4978_v13 = vcombine.low %v1773_v4, %v7155_v20  ;;  %v2735_v4 = vshrl.u32 %v4955_v8, 16  ;;  %v4994_v6 = vcombine.low %v1795_v18, %v7248_v47  ;;  %v7278_v18 = vld [vmem:[#allocation2 + $0xb8] sm:$0xf] }
 0x19c   : > { %2502 = vrot.lane.b32.xlu1 %v4954_v16, %s5479_s9  ;;  %v5081_v16 = vcombine.low %v1909_v54, %v7148_v17 }
 0x19d   : > { %v7207_v58 = vpop.permute.xlu0 %3392  ;;  %v2844_v50 = vrot.slane %v4978_v13, 1  ;;  %v1797_v13 = vld [vmem:[#allocation2 + $0x60] sm:$0xf] }
 0x19e   : > { %v7213_v32 = vpop.permute.xlu1 %3280  ;;  %v3889_v7 = vrot.slane %v5081_v16, 1  ;;  %v4986_v16 = vcombine.low %v1781_v49, %v7184_v63  ;;  %v2869_v63 = vrot.slane %v7211_v28, 1  ;;  %v7977_v49 = vld [vmem:[#allocation7_spill] sm:$0xff]  ;;  %v7980_v28 = vld [vmem:[#allocation28_spill] sm:$0xff] }
 0x19f   : > { %2488 = vrot.lane.b32.xlu0 %v4947_v38, %s5479_s9  ;;  %v2648_v38 = vrot.slane %v2646_v36, 1  ;;  %v2733_v36 = vsel %vm2040_vm3, %v2728_v40, %v2732_v61  ;;  %v7268_v40 = vld [vmem:[#allocation2 + $0x5c] ss:$0 sps:$4 sm:$0x11]  }
 0x1a0   : > { %3796 = vrot.lane.b32.xlu1 %v3745_v3, %s5486_s18  ;;  %v2737_v3 = vshll.u32 %v4955_v8, 16 }
 0x1a1   : > { %v7220_v43 = vpop.permute.xlu0 %3502  ;;  %v2649_v20 = vsel %vm2040_vm3, %v2644_v5, %v2648_v38 }
 0x1a2   : > { %v7226_v41 = vpop.permute.xlu1 %3406  ;;  %v2739_v39 = vrot.slane %v2737_v3, 1 }
 0x1a3   : > { %2758 = vrot.lane.b32.xlu0 %v2637_v26, %s5480_s10  ;;  %v4979_v26 = vcombine.low %v1774_v25, %v7190_v9  ;;  %v2846_v9 = vsel %vm2313_vm2, %v2844_v50, %v2845_v48 }
 0x1a4   : > { %3922 = vrot.lane.b32.xlu1 %v3888_v29, %s5487_s29  ;;  %v2742_v29 = vshll.u32 %v7236_v51, 16  ;;  %v2740_v5 = vor.u32 %v2739_v39, %v2735_v4  ;;  %v7974_v4 = vld [vmem:[#allocation5_spill] sm:$0xff] }
 0x1a5   : > { %v7233_v37 = vpop.permute.xlu0 %2370  ;;  %v2847_v62 = vrot.slane %v4979_v26, 1  ;;  %v2868_v26 = vrot.slane %v4986_v16, 1 }
 0x1a6   : > { %v7238_v45 = vpop.permute.xlu1 %3408  ;;  %v2744_v38 = vrot.slane %v2742_v29, 1  ;;  %v7976_v29 = vld [vmem:[#allocation18_spill] sm:$0xff] }
 0x1a7   : > { %7972 = vst [vmem:[#allocation33_spill] sm:$0xff] %v7238_v45  ;;  %3908 = vrot.lane.b32.xlu0 %v3867_v42, %s5487_s29  ;;  %v3891_v42 = vsel %vm2313_vm2, %v3889_v7, %v3890_v34  ;;  %v2849_v61 = vsel %vm2313_vm2, %v2847_v62, %v2848_v14  ;;  %v4987_v7 = vcombine.low %v1782_v33, %v7222_v23  ;;  %v1811_v34 = vld [vmem:[#allocation2 + $0xb4] sm:$0xf]  ;;  %v3146_v14 = vshll.u32 %v7268_v40, 16 }
 0x1a8   : > { %2504 = vrot.lane.b32.xlu1 %v4955_v8, %s5479_s9  ;;  %v7261_v8 = vld [vmem:[#allocation2 + $0x64] sm:$0xf]  ;;  %v2745_v48 = vsel %vm2040_vm3, %v2740_v5, %v2744_v38  ;;  %v7292_v5 = vld [vmem:[#allocation2 + $0x68] ss:$0 sps:$4 sm:$0x11]  }
 0x1a9   : > { %v7245_v17 = vpop.permute.xlu0 %3504  ;;  %v4995_v3 = vcombine.low %v1797_v13, %v7261_v8  ;;  %v3139_v13 = vshrl.u32 %v4994_v6, 16 }
 0x1aa   : > { %v7252_v55 = vpop.permute.xlu1 %3518 }
 0x1ab   : > { %2760 = vrot.lane.b32.xlu0 %v2649_v20, %s5480_s10  ;;  %v3141_v20 = vshll.u32 %v4994_v6, 16  ;;  %v3153_v38 = vshll.u32 %v4995_v3, 16 }
 0x1ac   : > { %2774 = vrot.lane.b32.xlu1 %v2733_v36, %s5480_s10  ;;  %v7973_v36 = vld [vmem:[#allocation17_spill] sm:$0xff] }
 0x1ad   : > { %v7259_v54 = vpop.permute.xlu0 %3774  ;;  %v3936_v39 = vsel %vm7975_vm8, %v7974_v4, %v7973_v36  ;;  %v2870_v4 = vsel %vm2313_vm2, %v2868_v26, %v2869_v63  ;;  %v7315_v26 = vld [vmem:[#allocation2 + $0xc4] sm:$0xf]  ;;  %v3151_v63 = vshrl.u32 %v4995_v3, 16  ;;  %vm7987_vm8 = vmmov %vm7984_vm6 }
 0x1ae   : > { %v7265_v25 = vpop.permute.xlu1 %2386  ;;  %v3969_v23 = vsel %vm3963_vm11, %v3936_v39, %v7980_v28  ;;  %v7983_v28 = vld [vmem:[#allocation6_spill] sm:$0xff] }
 0x1af   : > { %2886 = vrot.lane.b32.xlu0 %v2846_v9, %s5481_s11  ;;  %v3940_v9 = vsel %vm7978_vm9, %v7977_v49, %v7976_v29  ;;  %v4002_v16 = vsel %vm7964_vm0, %v3969_v23, %v6938_v27  ;;  %v2872_v29 = vrot.slane %v7236_v51, 1  ;;  %v7982_v49 = vld [vmem:[#allocation19_spill] sm:$0xff]  ;;  %v3155_v23 = vrot.slane %v3153_v38, 1  ;;  %vm7990_vm9 = vmmov %vm7984_vm6  ;;  %v7992_v38 = vld [vmem:[#allocation13_spill] sm:$0xff] }
 0x1b0   : > { %3924 = vrot.lane.b32.xlu1 %v3891_v42, %s5487_s29  ;;  %v3143_v42 = vrot.slane %v3141_v20, 1  ;;  %v3973_v33 = vsel %vm3963_vm11, %v3940_v9, %v7233_v37  ;;  %v2871_v20 = vrot.slane %v4987_v7, 1  ;;  %v3938_v27 = vsel %vm7984_vm6, %v7983_v28, %v7982_v49  ;;  %v1813_v9 = vld [vmem:[#allocation2 + $0xc0] sm:$0xf]  ;;  %v7985_v49 = vld [vmem:[#allocation21_spill] sm:$0xff]  ;;  %v7986_v28 = vld [vmem:[#allocation8_spill] sm:$0xff] }
 0x1b1   : > { %v7273_v50 = vpop.permute.xlu0 %2372  ;;  %v4035_v37 = vsel %vm4029_vm13, %v4002_v16, %v7049_v35  ;;  %v3942_v35 = vsel %vm7987_vm8, %v7986_v28, %v7985_v49  ;;  %v7988_v16 = vld [vmem:[#allocation23_spill] sm:$0xff]  ;;  %vm7993_vm0 = vmmov %vm7984_vm6  ;;  %v7341_v28 = vcombine.low %v1813_v9, %v7315_v26  ;;  %v3156_v9 = vor.u32 %v3155_v23, %v3151_v63 }
 0x1b2   : > { %v7286_v62 = vpop.permute.xlu1 %3520  ;;  %v4068_v7 = vsel %vm4062_vm14, %v4035_v37, %v7116_v10  ;;  %v3144_v51 = vor.u32 %v3143_v42, %v3139_v13  ;;  %v7331_v10 = vld [vmem:[#allocation2 + $0xbc] ss:$0 sps:$4 sm:$0x11]   ;;  %v7991_v42 = vld [vmem:[#allocation24_spill] sm:$0xff]  ;;  %vm7995_vm6 = vcmask 195584  }
 0x1b3   : > { %7979 = vst [vmem:[#allocation34_spill] sm:$0xff] %v7286_v62  ;;  %2888 = vrot.lane.b32.xlu0 %v2849_v61, %s5481_s11  ;;  %v7300_v61 = vcombine.low %v1811_v34, %v7278_v18  ;;  %v3148_v34 = vrot.slane %v3146_v14, 1  ;;  %v7989_v62 = vld [vmem:[#allocation11_spill] sm:$0xff]  ;;  %v4101_v14 = vsel %vm4095_vm15, %v4068_v7, %v7145_v0  ;;  %v3956_v37 = vsel %vm7993_vm0, %v7992_v38, %v7991_v42  ;;  %vm7996_vm8 = vmmov %vm7995_vm6  ;;  %v1845_v38 = vld [vmem:[#allocation2 + $0xb4] sm:$0xe] }
 0x1b4   : > { %2776 = vrot.lane.b32.xlu1 %v2745_v48, %s5480_s10  ;;  %v4134_v49 = vsel %vm4128_vm1, %v4101_v14, %v7168_v22  ;;  %vm7998_vm0 = vmmov %vm7995_vm6 }
 0x1b5   : > { %v2483_v36 = vpop.permute.xlu0 %2482  ;;  %v3237_v13 = vshll.u32 %v7300_v61, 16  ;;  %v4167_v7 = vsel %vm4161_vm4, %v4134_v49, %v7196_v1 }
 0x1b6   : > { %v7304_v39 = vsel %vm7981_vm7, %v3973_v33, %v2483_v36  ;;  %v7312_v48 = vpop.permute.xlu1 %3790  ;;  %v3158_v33 = vshll.u32 %v7292_v5, 16  ;;  %v1837_v36 = vld [vmem:[#allocation2 + $0x54] sm:$0xe]  ;;  %vm7994_vm7 = vcmask 654336  }
 0x1b7   : > { %2998 = vrot.lane.b32.xlu0 %v4994_v6, %s5482_s12  ;;  %v3952_v6 = vsel %vm7990_vm9, %v7989_v62, %v7988_v16  ;;  %v2873_v62 = vsel %vm2313_vm2, %v2871_v20, %v2872_v29  ;;  %v5026_v22 = vcombine.low %v1837_v36, %v7248_v47  ;;  %v4200_v20 = vsel %vm4194_vm5, %v4167_v7, %v7220_v43  ;;  %v7361_v47 = vld [vmem:[#allocation2 + $0xc8] ss:$0 sps:$4 sm:$0x11]   ;;  %vm7997_vm9 = vmmov %vm7995_vm6 }
 0x1b8   : > { %2902 = vrot.lane.b32.xlu1 %v2870_v4, %s5481_s11  ;;  %v3985_v0 = vsel %vm3963_vm11, %v3952_v6, %v6909_v2  ;;  %v3971_v4 = vsel %vm3963_vm11, %v3938_v27, %v6919_v57  ;;  %v3149_v29 = vsel %vm2040_vm3, %v3144_v51, %v3148_v34  ;;  %v3160_v14 = vrot.slane %v3158_v33, 1  ;;  %v1838_v2 = vld [vmem:[#allocation2 + $0x60] sm:$0xe] }
 0x1b9   : > { %v7329_v45 = vpop.permute.xlu0 %3776  ;;  %v4233_v57 = vsel %vm7994_vm7, %v4200_v20, %v7259_v54  ;;  %v3235_v27 = vshrl.u32 %v7300_v61, 16  ;;  %v3239_v6 = vrot.slane %v3237_v13, 1  ;;  %v4018_v43 = vsel %vm7995_vm6, %v3985_v0, %v7003_v31  ;;  %v7388_v0 = vld [vmem:[#allocation3 + $0x58] sm:$0xf] }
 0x1ba   : > { %v7349_v16 = vpop.permute.xlu1 %2388  ;;  %v4004_v34 = vsel %vm7996_vm8, %v3971_v4, %v7021_v21  ;;  %v3249_v54 = vshll.u32 %v7341_v28, 16  ;;  %v3989_v51 = vsel %vm3963_vm11, %v3956_v37, %v7265_v25  ;;  %v3356_v33 = vrot.slane %v5026_v22, 1 }
 0x1bb   : > { %3000 = vrot.lane.b32.xlu0 %v4995_v3, %s5482_s12  ;;  %v3242_v3 = vshll.u32 %v7331_v10, 16  ;;  %v3357_v36 = vrot.slane %v7268_v40, 1  ;;  %v5027_v31 = vcombine.low %v1838_v2, %v7261_v8  ;;  %v4051_v21 = vsel %vm4029_vm13, %v4018_v43, %v7098_v12  ;;  %v7999_v43 = vld [vmem:[#allocation25_spill] sm:$0xff] }
 0x1bc   : > { %2904 = vrot.lane.b32.xlu1 %v2873_v62, %s5481_s11  ;;  %v4037_v13 = vsel %vm4029_vm13, %v4004_v34, %v7092_v11  ;;  %v3161_v25 = vsel %vm2040_vm3, %v3156_v9, %v3160_v14  ;;  %v3975_v37 = vsel %vm3963_vm11, %v3942_v35, %v7273_v50  ;;  %v3240_v8 = vor.u32 %v3239_v6, %v3235_v27  ;;  %v1860_v62 = vld [vmem:[#allocation3 + $0x54] sm:$0xf] }
 0x1bd   : > { %v3903_v1 = vpop.permute.xlu0 %3902  ;;  %v3244_v49 = vrot.slane %v3242_v3, 1  ;;  %v3254_v12 = vshll.u32 %v7361_v47, 16  ;;  %v4084_v11 = vsel %vm4062_vm14, %v4051_v21, %v7151_v44  ;;  %v3247_v7 = vshrl.u32 %v7341_v28, 16 }
 0x1be   : > { %v4266_v63 = vsel %vm4260_vm10, %v4233_v57, %v3903_v1  ;;  %v2499_v23 = vpop.permute.xlu1 %2498  ;;  %v3251_v50 = vrot.slane %v3249_v54, 1  ;;  %v3358_v22 = vsel %vm2313_vm2, %v3356_v33, %v3357_v36  ;;  %v3359_v20 = vrot.slane %v5027_v31, 1  ;;  %v7411_v57 = vld [vmem:[#allocation3 + $0x64] sm:$0xf]  ;;  %v8003_v36 = vld [vmem:[#allocation27_spill] sm:$0xff] }
 0x1bf   : > { %3270 = vrot.lane.b32.xlu0 %v3149_v29, %s5483_s13  ;;  %5215 = vmatprep.mubr.msk.bf16.mxu0 %vm4348_vm12, %v4266_v63  ;;  %v7380_v42 = vsel %vm7997_vm9, %v3989_v51, %v2499_v23  ;;  %v3360_v29 = vrot.slane %v7292_v5, 1  ;;  %v4070_v44 = vsel %vm4062_vm14, %v4037_v13, %v7134_v46  ;;  %v5034_v14 = vcombine.low %v1845_v38, %v7278_v18 }
 0x1c0   : > { %3014 = vrot.lane.b32.xlu1 %v7300_v61, %s5482_s12  ;;  %v4117_v61 = vsel %vm4095_vm15, %v4084_v11, %v7173_v59  ;;  %v7409_v2 = vcombine.low %v1860_v62, %v7388_v0  ;;  %v1862_v59 = vld [vmem:[#allocation3 + $0x60] sm:$0xf]  ;;  %v4103_v1 = vsel %vm4095_vm15, %v4070_v44, %v7160_v30  ;;  %v3245_v46 = vsel %vm2040_vm3, %v3240_v8, %v3244_v49  ;;  %v1876_v49 = vld [vmem:[#allocation3 + $0xb4] sm:$0xf] }
 0x1c1   : > { %v2485_v40 = vpop.permute.xlu0 %2484  ;;  %v4150_v9 = vsel %vm4128_vm1, %v4117_v61, %v7200_v19  ;;  %v3256_v27 = vrot.slane %v3254_v12, 1  ;;  %v4136_v18 = vsel %vm4128_vm1, %v4103_v1, %v7182_v56  ;;  %v3252_v30 = vor.u32 %v3251_v50, %v3247_v7  ;;  %v1846_v56 = vld [vmem:[#allocation2 + $0xc0] sm:$0xe]  ;;  %v7459_v12 = vld [vmem:[#allocation3 + $0xb8] sm:$0xf] }
 0x1c2   : > { %v7393_v4 = vsel %vm7998_vm0, %v3975_v37, %v2485_v40  ;;  %v7398_v35 = vpop.permute.xlu1 %3792  ;;  %v4183_v5 = vsel %vm4161_vm4, %v4150_v9, %v7226_v41  ;;  %v8000_v41 = vld [vmem:[#allocation12_spill] sm:$0xff]  ;;  %vm8001_vm7 = vcmask 64512   ;;  %vm8002_vm6 = vcmask 654336  }
 0x1c3   : > { %3272 = vrot.lane.b32.xlu0 %v3161_v25, %s5483_s13  ;;  %v4216_v6 = vsel %vm4194_vm5, %v4183_v5, %v7252_v55  ;;  %v3954_v34 = vsel %vm8001_vm7, %v8000_v41, %v7999_v43  ;;  %v7437_v55 = vcombine.low %v1862_v59, %v7411_v57  ;;  %v3361_v33 = vsel %vm2313_vm2, %v3359_v20, %v3360_v29  ;;  %vm8005_vm8 = vmmov %vm8001_vm7  ;;  %v1878_v59 = vld [vmem:[#allocation3 + $0xc0] sm:$0xf]  ;;  %v7504_v43 = vld [vmem:[#allocation3 + $0xbc] ss:$0 sps:$4 sm:$0x11]  }
 0x1c4   : > { %3016 = vrot.lane.b32.xlu1 %v7341_v28, %s5482_s12  ;;  %v4169_v28 = vsel %vm4161_vm4, %v4136_v18, %v7207_v58  ;;  %v4249_v63 = vsel %vm8002_vm6, %v4216_v6, %v7312_v48  ;;  %v3653_v58 = vshll.u32 %v7409_v2, 16  ;;  %v8004_v48 = vld [vmem:[#allocation14_spill] sm:$0xff]  ;;  %vm8006_vm9 = vmmov %vm8002_vm6  ;;  %v3380_v25 = vrot.slane %v5034_v14, 1  ;;  %v8008_v6 = vld [vmem:[#allocation33_spill] sm:$0xff]  ;;  %s7665_s12 = scalar_lea.vmem %s7886_s2, %s5111_s30 }
 0x1c5   : > { %v2755_v19 = vpop.permute.xlu0 %2754  ;;  %v4202_v51 = vsel %vm4194_vm5, %v4169_v28, %v7245_v17  ;;  %v3958_v31 = vsel %vm8005_vm8, %v8004_v48, %v8003_v36  ;;  %v3381_v17 = vrot.slane %v7331_v10, 1  ;;  %v3987_v38 = vsel %vm3963_vm11, %v3954_v34, %v6965_v15  ;;  %v7468_v10 = vld [vmem:[#allocation3 + $0x68] ss:$0 sps:$4 sm:$0x11]   ;;  %vm8007_vm7 = vmmov %vm7998_vm0  ;;  %v1902_v18 = vld [vmem:[#allocation3 + $0x54] sm:$0xe] }
 0x1c6   : > { %v7426_v3 = vsel %vm4029_vm13, %v7304_v39, %v2755_v19  ;;  %v3919_v54 = vpop.permute.xlu1 %3918  ;;  %v7439_v39 = vld [vmem:[#allocation3 + $0x5c] ss:$0 sps:$4 sm:$0x11]   ;;  %v4235_v21 = vsel %vm8006_vm9, %v4202_v51, %v7329_v45  ;;  %v3257_v37 = vsel %vm2040_vm3, %v3252_v30, %v3256_v27  ;;  %v5035_v8 = vcombine.low %v1846_v56, %v7315_v26  ;;  %v8009_v41 = vld [vmem:[#allocation34_spill] sm:$0xff]  ;;  %v1903_v48 = vld [vmem:[#allocation3 + $0x60] sm:$0xe] }
 0x1c7   : > { %3398 = vrot.lane.b32.xlu0 %v3358_v22, %s5484_s14  ;;  %v4282_v23 = vsel %vm4260_vm10, %v4249_v63, %v3919_v54  ;;  %v4020_v45 = vsel %vm7998_vm0, %v3987_v38, %v7080_v60  ;;  %v3991_v62 = vsel %vm3963_vm11, %v3958_v31, %v7349_v16  ;;  %v3658_v15 = vshll.u32 %v7439_v39, 16 }
 0x1c8   : > { %3286 = vrot.lane.b32.xlu1 %v3245_v46, %s5483_s13  ;;  %5231 = vmatprep.mubr.msk.bf16.mxu1 %vm4348_vm12, %v4282_v23  ;;  %v3651_v7 = vshrl.u32 %v7409_v2, 16  ;;  %v3655_v50 = vrot.slane %v3653_v58, 1  ;;  %v3665_v61 = vshll.u32 %v7437_v55, 16  ;;  %v4053_v60 = vsel %vm4029_vm13, %v4020_v45, %v7138_v52  ;;  %v7489_v46 = vld [vmem:[#allocation3 + $0xc4] sm:$0xf] }
 0x1c9   : > { %v3905_v13 = vpop.permute.xlu0 %3904  ;;  %v3382_v16 = vsel %vm2313_vm2, %v3380_v25, %v3381_v17  ;;  %v5050_v20 = vcombine.low %v1876_v49, %v7459_v12  ;;  %v4086_v29 = vsel %vm4062_vm14, %v4053_v60, %v7162_v24  ;;  %v3383_v9 = vrot.slane %v5035_v8, 1 }
 0x1ca   : > { %v4268_v40 = vsel %vm4260_vm10, %v4235_v21, %v3905_v13  ;;  %v2501_v11 = vpop.permute.xlu1 %2500  ;;  %v3384_v14 = vrot.slane %v7361_v47, 1  ;;  %v4119_v52 = vsel %vm4095_vm15, %v4086_v29, %v7187_v53  ;;  %v3660_v5 = vrot.slane %v3658_v15, 1 }
 0x1cb   : > { %3400 = vrot.lane.b32.xlu0 %v3361_v33, %s5484_s14  ;;  %5216 = vmatmul.mubr.msk.bf16.gmra.mrb[4].mxu0 %vm4348_vm12, %v4268_v40  ;;  %v4024_v26 = vsel %vm8007_vm7, %v3991_v62, %v2501_v11  ;;  %v3663_v24 = vshrl.u32 %v7437_v55, 16  ;;  %v3670_v19 = vshll.u32 %v7468_v10, 16  ;;  %v3656_v27 = vor.u32 %v3655_v50, %v3651_v7  ;;  %vm8018_vm7 = vmmov %vm8002_vm6 }
 0x1cc   : > { %3288 = vrot.lane.b32.xlu1 %v3257_v37, %s5483_s13  ;;  %v3667_v53 = vrot.slane %v3665_v61, 1  ;;  %v3749_v28 = vshll.u32 %v5050_v20, 16  ;;  %v5074_v56 = vcombine.low %v1902_v18, %v7388_v0  ;;  %v3747_v31 = vshrl.u32 %v5050_v20, 16 }
 0x1cd   : > { %v2757_v22 = vpop.permute.xlu0 %2756  ;;  %v3661_v23 = vsel %vm2040_vm3, %v3656_v27, %v3660_v5  ;;  %v3672_v58 = vrot.slane %v3670_v19, 1  ;;  %v3869_v37 = vrot.slane %v7439_v39, 1  ;;  %v5075_v40 = vcombine.low %v1903_v48, %v7411_v57 }
 0x1ce   : > { %v7482_v44 = vsel %vm4029_vm13, %v7393_v4, %v2757_v22  ;;  %v2771_v1 = vpop.permute.xlu1 %2770  ;;  %v4152_v4 = vsel %vm4128_vm1, %v4119_v52, %v7213_v32  ;;  %v3385_v32 = vsel %vm2313_vm2, %v3383_v9, %v3384_v14  ;;  %v3668_v33 = vor.u32 %v3667_v53, %v3663_v24  ;;  %v1911_v9 = vld [vmem:[#allocation3 + $0xc0] sm:$0xe] }
 0x1cf   : > { %3510 = vrot.lane.b32.xlu0 %v7409_v2, %s5485_s15  ;;  %v7497_v47 = vsel %vm4029_vm13, %v7380_v42, %v2771_v1  ;;  %v4185_v2 = vsel %vm4161_vm4, %v4152_v4, %v8008_v6  ;;  %v5051_v42 = vcombine.low %v1878_v59, %v7489_v46  ;;  %v3751_v21 = vrot.slane %v3749_v28, 1 }
 0x1d0   : > { %3414 = vrot.lane.b32.xlu1 %v3382_v16, %s5484_s14  ;;  %v4218_v34 = vsel %vm4194_vm5, %v4185_v2, %v8009_v41  ;;  %v3868_v25 = vrot.slane %v5074_v56, 1  ;;  %v3673_v38 = vsel %vm2040_vm3, %v3668_v33, %v3672_v58  ;;  %v3871_v61 = vrot.slane %v5075_v40, 1  ;;  %v8010_v33 = vld [vmem:[#allocation20_spill] sm:$0xff]  ;;  %v8011_v58 = vld [vmem:[#allocation9_spill] sm:$0xff] }
 0x1d1   : > { %v7502_v30 = vpop.permute.xlu0 %2882  ;;  %v4251_v63 = vsel %vm8002_vm6, %v4218_v34, %v7398_v35  ;;  %v3754_v35 = vshll.u32 %v7504_v43, 16  ;;  %v3761_v13 = vshll.u32 %v5051_v42, 16  ;;  %v3752_v45 = vor.u32 %v3751_v21, %v3747_v31 }
 0x1d2   : > { %v3921_v54 = vpop.permute.xlu1 %3920  ;;  %v3759_v62 = vshrl.u32 %v5051_v42, 16  ;;  %v3870_v50 = vsel %vm2313_vm2, %v3868_v25, %v3869_v37  ;;  %v3872_v39 = vrot.slane %v7468_v10, 1  ;;  %v3893_v1 = vrot.slane %v7504_v43, 1 }
 0x1d3   : > { %3512 = vrot.lane.b32.xlu0 %v7437_v55, %s5485_s15  ;;  %v4284_v51 = vsel %vm4260_vm10, %v4251_v63, %v3921_v54  ;;  %v5442_v55 = vld [vmem:[#allocation3 + $0xc8] ss:$0 sps:$4 sm:$0x11]   ;;  %v3756_v49 = vrot.slane %v3754_v35, 1  ;;  %v3763_v11 = vrot.slane %v3761_v13, 1  ;;  %v5083_v5 = vcombine.low %v1911_v9, %v7489_v46 }
 0x1d4   : > { %3416 = vrot.lane.b32.xlu1 %v3385_v32, %s5484_s14  ;;  %5232 = vmatmul.mubr.msk.bf16.gmra.mrb[4].mxu1 %vm4348_vm12, %v4284_v51  ;;  %v3766_v15 = vshll.u32 %v5442_v55, 16  ;;  %v3873_v14 = vsel %vm2313_vm2, %v3871_v61, %v3872_v39  ;;  %v3896_v27 = vrot.slane %v5442_v55, 1  ;;  %v4072_v13 = vsel %vm4062_vm14, %v7426_v3, %v7502_v30 }
 0x1d5   : > { %v7519_v36 = vpop.permute.xlu0 %2884  ;;  %v3757_v60 = vsel %vm2040_vm3, %v3752_v45, %v3756_v49  ;;  %v3764_v16 = vor.u32 %v3763_v11, %v3759_v62  ;;  %v3895_v4 = vrot.slane %v5083_v5, 1  ;;  %v8015_v11 = vld [vmem:[#allocation26_spill] sm:$0xff] }
 0x1d6   : > { %v2773_v0 = vpop.permute.xlu1 %2772  ;;  %v3768_v22 = vrot.slane %v3766_v15, 1  ;;  %v8016_v15 = vld [vmem:[#allocation15_spill] sm:$0xff] }
 0x1d7   : > { %3782 = vrot.lane.b32.xlu0 %v3661_v23, %s5486_s18  ;;  %v7524_v17 = vsel %vm4029_vm13, %v4024_v26, %v2773_v0  ;;  %v1910_v26 = vld [vmem:[#allocation3 + $0xb4] sm:$0xe]  ;;  %v3897_v6 = vsel %vm2313_vm2, %v3895_v4, %v3896_v27 }
 0x1d8   : > { %3526 = vrot.lane.b32.xlu1 %v5050_v20, %s5485_s15  ;;  %v5082_v20 = vcombine.low %v1910_v26, %v7459_v12  ;;  %v3769_v59 = vsel %vm2040_vm3, %v3764_v16, %v3768_v22  ;;  %vm8012_vm3 = vmmov %vm8005_vm8  ;;  %v4074_v22 = vsel %vm4062_vm14, %v7482_v44, %v7519_v36 }
 0x1d9   : > { %v2995_v8 = vpop.permute.xlu0 %2994  ;;  %v3944_v35 = vsel %vm8012_vm3, %v8011_v58, %v8010_v33  ;;  %vm8014_vm8 = vmmov %vm8002_vm6 }
 0x1da   : > { %v7530_v7 = vpop.permute.xlu1 %2898  ;;  %v3892_v52 = vrot.slane %v5082_v20, 1  ;;  %v4105_v0 = vsel %vm4095_vm15, %v4072_v13, %v2995_v8  ;;  %vm8017_vm9 = vmmov %vm8012_vm3 }
 0x1db   : > { %3784 = vrot.lane.b32.xlu0 %v3673_v38, %s5486_s18  ;;  %v3960_v26 = vsel %vm8017_vm9, %v8016_v15, %v8015_v11  ;;  %v4088_v39 = vsel %vm4062_vm14, %v7497_v47, %v7530_v7  ;;  %vm8019_vm3 = vmmov %vm8002_vm6 }
 0x1dc   : > { %3528 = vrot.lane.b32.xlu1 %v5051_v42, %s5485_s15  ;;  %v3894_v19 = vsel %vm2313_vm2, %v3892_v52, %v3893_v1  ;;  %vm8013_vm2 = vmmov %vm7998_vm0  ;;  %s7694_s15 = scalar_lea.vmem %s7890_s6, %s5111_s30 }
 0x1dd   : > { %v7536_v57 = vpop.permute.xlu0 %2996 }
 0x1de   : > { %v7540_v29 = vpop.permute.xlu1 %2900  ;;  %v4107_v9 = vsel %vm4095_vm15, %v4074_v22, %v7536_v57 }
 0x1df   : > { %3910 = vrot.lane.b32.xlu0 %v3870_v50, %s5487_s29  ;;  %v4090_v4 = vsel %vm4062_vm14, %v7524_v17, %v7540_v29 }
 0x1e0   : > { %3798 = vrot.lane.b32.xlu1 %v3757_v60, %s5486_s18 }
 0x1e1   : > { %v3267_v10 = vpop.permute.xlu0 %3266 }
 0x1e2   : > { %v3011_v24 = vpop.permute.xlu1 %3010  ;;  %v4138_v38 = vsel %vm4128_vm1, %v4105_v0, %v3267_v10 }
 0x1e3   : > { %3912 = vrot.lane.b32.xlu0 %v3873_v14, %s5487_s29  ;;  %v4121_v60 = vsel %vm4095_vm15, %v4088_v39, %v3011_v24  ;;  %v8025_v39 = vld [vmem:[#allocation16_spill] sm:$0xff] }
 0x1e4   : > { %3800 = vrot.lane.b32.xlu1 %v3769_v59, %s5486_s18 }
 0x1e5   : > { %v3269_v12 = vpop.permute.xlu0 %3268 }
 0x1e6   : > { %v7551_v53 = vpop.permute.xlu1 %3012  ;;  %v4140_v59 = vsel %vm4128_vm1, %v4107_v9, %v3269_v12 }
 0x1e7   : > { %v4123_v27 = vsel %vm4095_vm15, %v4090_v4, %v7551_v53 }
 0x1e8   : > { %3926 = vrot.lane.b32.xlu1 %v3894_v19, %s5487_s29 }
 0x1e9   : > { %v3395_v18 = vpop.permute.xlu0 %3394 }
 0x1ea   : > { %v3283_v2 = vpop.permute.xlu1 %3282  ;;  %v4171_v37 = vsel %vm4161_vm4, %v4138_v38, %v3395_v18 }
 0x1eb   : > { %v4154_v20 = vsel %vm4128_vm1, %v4121_v60, %v3283_v2 }
 0x1ec   : > { %3928 = vrot.lane.b32.xlu1 %v3897_v6, %s5487_s29 }
 0x1ed   : > { %v3397_v46 = vpop.permute.xlu0 %3396 }
 0x1ee   : > { %v3285_v43 = vpop.permute.xlu1 %3284  ;;  %v4173_v47 = vsel %vm4161_vm4, %v4140_v59, %v3397_v46 }
 0x1ef   : > { %v4156_v6 = vsel %vm4128_vm1, %v4123_v27, %v3285_v43 }
 0x1f1   : > { %v3507_v41 = vpop.permute.xlu0 %3506 }
 0x1f2   : > { %v3411_v34 = vpop.permute.xlu1 %3410  ;;  %v4204_v49 = vsel %vm4194_vm5, %v4171_v37, %v3507_v41  ;;  %v8020_v37 = vld [vmem:[#allocation22_spill] sm:$0xff] }
 0x1f3   : > { %v4187_v14 = vsel %vm4161_vm4, %v4154_v20, %v3411_v34 }
 0x1f5   : > { %v2375_v32 = vpop.permute.xlu0 %2374 }
 0x1f6   : > { %v3413_v42 = vpop.permute.xlu1 %3412  ;;  %v3977_v48 = vsel %vm3963_vm11, %v3944_v35, %v2375_v32 }
 0x1f7   : > { %v4189_v2 = vsel %vm4161_vm4, %v4156_v6, %v3413_v42 }
 0x1f9   : > { %v3509_v28 = vpop.permute.xlu0 %3508 }
 0x1fa   : > { %v3523_v63 = vpop.permute.xlu1 %3522  ;;  %v4206_v5 = vsel %vm4194_vm5, %v4173_v47, %v3509_v28 }
 0x1fb   : > { %v4220_v52 = vsel %vm4194_vm5, %v4187_v14, %v3523_v63  ;;  %v7667_v14 = vstv %s4542_s27 }
 0x1fd   : > { %v3779_v54 = vpop.permute.xlu0 %3778 }
 0x1fe   : > { %v2391_v56 = vpop.permute.xlu1 %2390  ;;  %v4237_v45 = vsel %vm8014_vm8, %v4204_v49, %v3779_v54  ;;  %v8021_v49 = vld [vmem:[#allocation10_spill] sm:$0xff]  ;;  %vm8023_vm8 = vmmov %vm7998_vm0 }
 0x1ff   : > { %v3993_v30 = vsel %vm3963_vm11, %v3960_v26, %v2391_v56 }
 0x201   : > { %v7556_v51 = vpop.permute.xlu0 %2376 }
 0x202   : > { %v3525_v23 = vpop.permute.xlu1 %3524 }
 0x203   : > { %v4222_v41 = vsel %vm4194_vm5, %v4189_v2, %v3525_v23 }
 0x205   : > { %v2487_v31 = vpop.permute.xlu0 %2486 }
 0x206   : > { %v7563_v21 = vsel %vm8013_vm2, %v3977_v48, %v2487_v31  ;;  %v3795_v55 = vpop.permute.xlu1 %3794  ;;  %vm8022_vm2 = vmmov %vm8017_vm9 }
 0x207   : > { %v4253_v7 = vsel %vm8018_vm7, %v4220_v52, %v3795_v55  ;;  %vm8026_vm9 = vmmov %vm8022_vm2 }
 0x209   : > { %v3781_v25 = vpop.permute.xlu0 %3780 }
 0x20a   : > { %v7571_v40 = vpop.permute.xlu1 %2392  ;;  %v4239_v36 = vsel %vm8002_vm6, %v4206_v5, %v3781_v25 }
 0x20d   : > { %v3907_v62 = vpop.permute.xlu0 %3906 }
 0x20e   : > { %v4270_v3 = vsel %vm4260_vm10, %v4237_v45, %v3907_v62  ;;  %v2503_v8 = vpop.permute.xlu1 %2502  ;;  %v3946_v45 = vsel %vm8022_vm2, %v8021_v49, %v8020_v37 }
 0x20f   : > { %5219 = vmatprep.mubr.msk.bf16.mxu0 %vm4348_vm12, %v4270_v3  ;;  %v7582_v50 = vsel %vm7998_vm0, %v3993_v30, %v2503_v8  ;;  %v3979_v62 = vsel %vm3963_vm11, %v3946_v45, %v7556_v51  ;;  %v7649_v30 = vld [vmem:[%s7888_s4] ss:$0 sm:$0xff]  ;;  %v8024_v8 = vld [vmem:[#allocation29_spill] sm:$0xff] }
 0x210   : > { %v3962_v60 = vsel %vm8026_vm9, %v8025_v39, %v8024_v8 }
 0x211   : > { %v2489_v61 = vpop.permute.xlu0 %2488  ;;  %v3995_v22 = vsel %vm3963_vm11, %v3962_v60, %v7571_v40  ;;  %vm8027_vm11 = vmmov %vm8019_vm3 }
 0x212   : > { %v3797_v16 = vpop.permute.xlu1 %3796  ;;  %v4012_v26 = vsel %vm8023_vm8, %v3979_v62, %v2489_v61  ;;  %vm8028_vm8 = vmmov %vm8027_vm11 }
 0x213   : > { %v4255_v34 = vsel %vm8019_vm3, %v4222_v41, %v3797_v16 }
 0x215   : > { %v2759_v10 = vpop.permute.xlu0 %2758 }
 0x216   : > { %v3923_v1 = vpop.permute.xlu1 %3922  ;;  %v4043_v11 = vsel %vm4029_vm13, %v7563_v21, %v2759_v10 }
 0x217   : > { %v4286_v44 = vsel %vm4260_vm10, %v4253_v7, %v3923_v1 }
 0x218   : > { %5235 = vmatprep.mubr.msk.bf16.mxu1 %vm4348_vm12, %v4286_v44 }
 0x219   : > { %v3909_v57 = vpop.permute.xlu0 %3908 }
 0x21a   : > { %v4272_v24 = vsel %vm4260_vm10, %v4239_v36, %v3909_v57  ;;  %v2505_v19 = vpop.permute.xlu1 %2504 }
 0x21b   : > { %5220 = vmatmul.mubr.msk.bf16.gmra.mrb[8].mxu0 %vm4348_vm12, %v4272_v24  ;;  %v4028_v10 = vsel %vm7998_vm0, %v3995_v22, %v2505_v19  ;;  %vm8029_vm0 = vmmov %vm8026_vm9 }
 0x21d   : > { %v2761_v12 = vpop.permute.xlu0 %2760 }
 0x21e   : > { %v2775_v18 = vpop.permute.xlu1 %2774  ;;  %v4045_v51 = vsel %vm4029_vm13, %v4012_v26, %v2761_v12  ;;  %v4642_v12 = vld [vmem:[%s7665_s12 + $0x10] sm:$0xff] }
 0x21f   : > { %v4059_v1 = vsel %vm4029_vm13, %v7582_v50, %v2775_v18  ;;  %v4640_v18 = vld [vmem:[%s7665_s12] sm:$0xff] }
 0x221   : > { %v2887_v46 = vpop.permute.xlu0 %2886 }
 0x222   : > { %v3925_v32 = vpop.permute.xlu1 %3924  ;;  %v4076_v3 = vsel %vm4062_vm14, %v4043_v11, %v2887_v46 }
 0x223   : > { %v4288_v28 = vsel %vm4260_vm10, %v4255_v34, %v3925_v32 }
 0x224   : > { %5236 = vmatmul.mubr.msk.bf16.gmra.mrb[8].mxu1 %vm4348_vm12, %v4288_v28 }
 0x225   : > { %v2889_v63 = vpop.permute.xlu0 %2888 }
 0x226   : > { %v7616_v17 = vpop.permute.xlu1 %2776  ;;  %v4078_v61 = vsel %vm4062_vm14, %v4045_v51, %v2889_v63  ;;  %v4643_v63 = vld [vmem:[%s7665_s12 + $0x18] sm:$0xff] }
 0x227   : > { %v4061_v49 = vsel %vm4029_vm13, %v4028_v10, %v7616_v17  ;;  %vm8030_vm13 = vmmov %vm8029_vm0 }
 0x229   : > { %v2999_v29 = vpop.permute.xlu0 %2998 }
 0x22a   : > { %v7618_v53 = vpop.permute.xlu1 %2902  ;;  %v4109_v21 = vsel %vm4095_vm15, %v4076_v3, %v2999_v29 }
 0x22b   : > { %v4092_v45 = vsel %vm4062_vm14, %v4059_v1, %v7618_v53 }
 0x22d   : > { %v3001_v54 = vpop.permute.xlu0 %3000 }
 0x22e   : > { %v7620_v43 = vpop.permute.xlu1 %2904  ;;  %v4111_v59 = vsel %vm4095_vm15, %v4078_v61, %v3001_v54  ;;  %v4658_v61 = vld [vmem:[%s7665_s12 + $0x90] sm:$0xff] }
 0x22f   : > { %v4094_v11 = vsel %vm4062_vm14, %v4061_v49, %v7620_v43  ;;  %vm8031_vm14 = vmmov %vm8029_vm0 }
 0x231   : > { %v3271_v42 = vpop.permute.xlu0 %3270 }
 0x232   : > { %v7622_v56 = vpop.permute.xlu1 %3014  ;;  %v4142_v20 = vsel %vm4128_vm1, %v4109_v21, %v3271_v42 }
 0x233   : > { %v4125_v26 = vsel %vm4095_vm15, %v4092_v45, %v7622_v56 }
 0x235   : > { %v3273_v23 = vpop.permute.xlu0 %3272 }
 0x236   : > { %v7624_v33 = vpop.permute.xlu1 %3016  ;;  %v4144_v5 = vsel %vm4128_vm1, %v4111_v59, %v3273_v23 }
 0x237   : > { %v4127_v17 = vsel %vm4095_vm15, %v4094_v11, %v7624_v33  ;;  %vm8032_vm15 = vmmov %vm8028_vm8 }
 0x239   : > { %v3399_v58 = vpop.permute.xlu0 %3398 }
 0x23a   : > { %v7626_v35 = vpop.permute.xlu1 %3286  ;;  %v4175_v40 = vsel %vm4161_vm4, %v4142_v20, %v3399_v58 }
 0x23b   : > { %v4158_v53 = vsel %vm4128_vm1, %v4125_v26, %v7626_v35 }
 0x23d   : > { %v3401_v48 = vpop.permute.xlu0 %3400 }
 0x23e   : > { %v7628_v31 = vpop.permute.xlu1 %3288  ;;  %v4177_v41 = vsel %vm4161_vm4, %v4144_v5, %v3401_v48  ;;  %v4659_v5 = vld [vmem:[%s7665_s12 + $0x98] sm:$0xff] }
 0x23f   : > { %v4160_v56 = vsel %vm4128_vm1, %v4127_v17, %v7628_v31 }
 0x241   : > { %v3511_v55 = vpop.permute.xlu0 %3510 }
 0x242   : > { %v7630_v13 = vpop.permute.xlu1 %3414  ;;  %v4208_v44 = vsel %vm4194_vm5, %v4175_v40, %v3511_v55 }
 0x243   : > { %v4191_v60 = vsel %vm4161_vm4, %v4158_v53, %v7630_v13 }
 0x245   : > { %v3513_v0 = vpop.permute.xlu0 %3512 }
 0x246   : > { %v7632_v25 = vpop.permute.xlu1 %3416  ;;  %v4210_v29 = vsel %vm4194_vm5, %v4177_v41, %v3513_v0 }
 0x247   : > { %v4193_v33 = vsel %vm4161_vm4, %v4160_v56, %v7632_v25 }
 0x249   : > { %v3783_v38 = vpop.permute.xlu0 %3782 }
 0x24a   : > { %v7641_v15 = vpop.permute.xlu1 %3526  ;;  %v4241_v24 = vsel %vm8027_vm11, %v4208_v44, %v3783_v38  ;;  %v4641_v38 = vld [vmem:[%s7665_s12 + $0x8] sm:$0xff] }
 0x24b   : > { %v4224_v35 = vsel %vm4194_vm5, %v4191_v60, %v7641_v15  ;;  %v4656_v15 = vld [vmem:[%s7665_s12 + $0x80] sm:$0xff] }
 0x24d   : > { %v3785_v16 = vpop.permute.xlu0 %3784 }
 0x24e   : > { %v5213_v9 = vpop.f32.mrb[0].mxu0  ;;  %v7672_v52 = vpop.permute.xlu1 %3528  ;;  %v4243_v23 = vsel %vm8028_vm8, %v4210_v29, %v3785_v16 }
 0x24f   : > { %v4424_v47 = vadd.f32 %v5213_v9, %v7649_v30  ;;  %v4415_v7 = vpop.f32.mrb[1].mxu0 }
 0x250   : > { %v4416_v36 = vadd.f32 %v7649_v30, %v4415_v7  ;;  %v5214_v57 = vpop.f32.mrb[2].mxu0 }
 0x251   : > { %vm4545_vm7 = vcmp.ge.f32.partialorder %v4424_v47, 0.0  ;;  %v4578_v19 = vmul.f32 %v7667_v14, %v4424_v47  ;;  %v4427_v4 = vadd.f32 %v5214_v57, %v7649_v30  ;;  %v3911_v27 = vpop.permute.xlu0 %3910  ;;  %v4418_v6 = vpop.f32.mrb[3].mxu0 }
 0x252   : > { %vm4543_vm6 = vcmp.ge.f32.partialorder %v4416_v36, 0.0  ;;  %v4576_v50 = vmul.f32 %v7667_v14, %v4416_v36  ;;  %v4274_v2 = vsel %vm4260_vm10, %v4241_v24, %v3911_v27  ;;  %v4419_v46 = vadd.f32 %v7649_v30, %v4418_v6  ;;  %v3799_v34 = vpop.permute.xlu1 %3798  ;;  %v4657_v24 = vld [vmem:[%s7665_s12 + $0x88] sm:$0xff] }
 0x253   : > { %v4610_v32 = vsel %vm4545_vm7, %v4424_v47, %v4578_v19  ;;  %vm4546_vm3 = vcmp.ge.f32.partialorder %v4427_v4, 0.0  ;;  %v4579_v28 = vmul.f32 %v7667_v14, %v4427_v4  ;;  %5223 = vmatprep.mubr.msk.bf16.mxu0 %vm4348_vm12, %v4274_v2  ;;  %v4257_v31 = vsel %vm8032_vm15, %v4224_v35, %v3799_v34 }
 0x254   : > { %v4674_v54 = vadd.f32 %v4642_v12, %v4610_v32  ;;  %v4608_v42 = vsel %vm4543_vm6, %v4416_v36, %v4576_v50  ;;  %vm4544_vm2 = vcmp.ge.f32.partialorder %v4419_v46, 0.0  ;;  %v4577_v55 = vmul.f32 %v7667_v14, %v4419_v46  ;;  %vm8033_vm6 = vmmov %vm8028_vm8 }
 0x255   : > { %v4672_v58 = vadd.f32 %v4640_v18, %v4608_v42  ;;  %v4611_v48 = vsel %vm4546_vm3, %v4427_v4, %v4579_v28  ;;  %v3913_v37 = vpop.permute.xlu0 %3912  ;;  %v4226_v47 = vsel %vm4194_vm5, %v4193_v33, %v7672_v52  ;;  %vm8034_vm5 = vmmov %vm8029_vm0 }
 0x256   : > { %4706 = vst.msk [vmem:[%s7694_s15 + $0x10] sm:$0xff] %vm8026_vm9, %v4674_v54  ;;  %v4675_v0 = vadd.f32 %v4643_v63, %v4611_v48  ;;  %v4276_v62 = vsel %vm4260_vm10, %v4243_v23, %v3913_v37  ;;  %v4609_v3 = vsel %vm4544_vm2, %v4419_v46, %v4577_v55  ;;  %v3801_v8 = vpop.permute.xlu1 %3800  ;;  %vm8035_vm3 = vmmov %vm8029_vm0  ;;  %v4646_v63 = vld [vmem:[%s7665_s12 + $0x30] sm:$0xff]  ;;  %v4644_v23 = vld [vmem:[%s7665_s12 + $0x20] sm:$0xff] }
 0x257   : > { %4704 = vst.msk [vmem:[%s7694_s15] sm:$0xff] %vm8029_vm0, %v4672_v58  ;;  %5224 = vmatmul.mubr.msk.bf16.gmra.mrb[12].mxu0 %vm4348_vm12, %v4276_v62  ;;  %v4673_v43 = vadd.f32 %v4641_v38, %v4609_v3  ;;  %v5229_v39 = vpop.f32.mrb[0].mxu1  ;;  %v4259_v19 = vsel %vm8033_vm6, %v4226_v47, %v3801_v8  ;;  %vm8036_vm2 = vmmov %vm8029_vm0  ;;  %v4647_v38 = vld [vmem:[%s7665_s12 + $0x38] sm:$0xff] }
 0x258   : > { %4707 = vst.msk [vmem:[%s7694_s15 + $0x18] sm:$0xff] %vm8030_vm13, %v4675_v0  ;;  %v4488_v51 = vadd.f32 %v5229_v39, %v7649_v30  ;;  %v4479_v21 = vpop.f32.mrb[1].mxu1  ;;  %vm8037_vm8 = vmmov %vm8029_vm0  ;;  %v4645_v0 = vld [vmem:[%s7665_s12 + $0x28] sm:$0xff] }
 0x259   : > { %4705 = vst.msk [vmem:[%s7694_s15 + $0x8] sm:$0xff] %vm8031_vm14, %v4673_v43  ;;  %v4480_v16 = vadd.f32 %v7649_v30, %v4479_v21  ;;  %v5230_v22 = vpop.f32.mrb[2].mxu1  ;;  %vm8038_vm13 = vmmov %vm8036_vm2 }
 0x25a   : > { %vm4561_vm1 = vcmp.ge.f32.partialorder %v4488_v51, 0.0  ;;  %v4594_v13 = vmul.f32 %v7667_v14, %v4488_v51  ;;  %v4491_v20 = vadd.f32 %v5230_v22, %v7649_v30  ;;  %v4482_v9 = vpop.f32.mrb[3].mxu1  ;;  %v3927_v10 = vpop.permute.xlu1 %3926  ;;  %vm8039_vm14 = vmmov %vm8036_vm2 }
 0x25b   : > { %vm4559_vm4 = vcmp.ge.f32.partialorder %v4480_v16, 0.0  ;;  %v4592_v25 = vmul.f32 %v7667_v14, %v4480_v16  ;;  %v4483_v59 = vadd.f32 %v7649_v30, %v4482_v9  ;;  %v4290_v40 = vsel %vm4260_vm10, %v4257_v31, %v3927_v10  ;;  %vm8040_vm15 = vmmov %vm8036_vm2 }
 0x25c   : > { %v4626_v7 = vsel %vm4561_vm1, %v4488_v51, %v4594_v13  ;;  %vm4562_vm11 = vcmp.ge.f32.partialorder %v4491_v20, 0.0  ;;  %v4595_v1 = vmul.f32 %v7667_v14, %v4491_v20  ;;  %5239 = vmatprep.mubr.msk.bf16.mxu1 %vm4348_vm12, %v4290_v40  ;;  %vm8041_vm1 = vmmov %vm8036_vm2  ;;  %v4662_v51 = vld [vmem:[%s7665_s12 + $0xb0] sm:$0xff] }
 0x25d   : > { %v4690_v44 = vadd.f32 %v4658_v61, %v4626_v7  ;;  %v4624_v36 = vsel %vm4559_vm4, %v4480_v16, %v4592_v25  ;;  %vm4560_vm7 = vcmp.ge.f32.partialorder %v4483_v59, 0.0  ;;  %v4593_v57 = vmul.f32 %v7667_v14, %v4483_v59  ;;  %v4660_v16 = vld [vmem:[%s7665_s12 + $0xa0] sm:$0xff]  ;;  %v4663_v61 = vld [vmem:[%s7665_s12 + $0xb8] sm:$0xff]  ;;  %v4661_v25 = vld [vmem:[%s7665_s12 + $0xa8] sm:$0xff] }
 0x25e   : > { %v4688_v12 = vadd.f32 %v4656_v15, %v4624_v36  ;;  %v4627_v52 = vsel %vm4562_vm11, %v4491_v20, %v4595_v1  ;;  %v3929_v4 = vpop.permute.xlu1 %3928 }
 0x25f   : > { %4722 = vst.msk [vmem:[%s7694_s15 + $0x90] sm:$0xff] %vm8034_vm5, %v4690_v44  ;;  %v4691_v27 = vadd.f32 %v4659_v5, %v4627_v52  ;;  %v4625_v6 = vsel %vm4560_vm7, %v4483_v59, %v4593_v57  ;;  %v4292_v50 = vsel %vm4260_vm10, %v4259_v19, %v3929_v4  ;;  %vm8042_vm5 = vmmov %vm8041_vm1  ;;  %v4650_v19 = vld [vmem:[%s7665_s12 + $0x50] sm:$0xff] }
 0x260   : > { %4720 = vst.msk [vmem:[%s7694_s15 + $0x80] sm:$0xff] %vm8035_vm3, %v4688_v12  ;;  %v4689_v18 = vadd.f32 %v4657_v24, %v4625_v6  ;;  %5240 = vmatmul.mubr.msk.bf16.gmra.mrb[12].mxu1 %vm4348_vm12, %v4292_v50  ;;  %vm8043_vm3 = vmmov %vm8041_vm1 }
 0x261   : > { %4723 = vst.msk [vmem:[%s7694_s15 + $0x98] sm:$0xff] %vm8036_vm2, %v4691_v27  ;;  %vm8044_vm2 = vmmov %vm8041_vm1  ;;  %v4648_v27 = vld [vmem:[%s7665_s12 + $0x40] sm:$0xff] }
 0x262   : > { %4721 = vst.msk [vmem:[%s7694_s15 + $0x88] sm:$0xff] %vm8037_vm8, %v4689_v18  ;;  %vm8045_vm8 = vmmov %vm8041_vm1 }
 0x29e   : > { %v5217_v2 = vpop.f32.mrb[4].mxu0 }
 0x29f   : > { %v4440_v46 = vadd.f32 %v5217_v2, %v7649_v30  ;;  %v4431_v41 = vpop.f32.mrb[5].mxu0  ;;  %v4651_v2 = vld [vmem:[%s7665_s12 + $0x58] sm:$0xff] }
 0x2a0   : > { %v4432_v34 = vadd.f32 %v7649_v30, %v4431_v41  ;;  %v5218_v32 = vpop.f32.mrb[6].mxu0 }
 0x2a1   : > { %vm4549_vm9 = vcmp.ge.f32.partialorder %v4440_v46, 0.0  ;;  %v4582_v28 = vmul.f32 %v7667_v14, %v4440_v46  ;;  %v4443_v29 = vadd.f32 %v5218_v32, %v7649_v30  ;;  %v4434_v54 = vpop.f32.mrb[7].mxu0  ;;  %v4649_v32 = vld [vmem:[%s7665_s12 + $0x48] sm:$0xff] }
 0x2a2   : > { %vm4547_vm10 = vcmp.ge.f32.partialorder %v4432_v34, 0.0  ;;  %v4580_v42 = vmul.f32 %v7667_v14, %v4432_v34  ;;  %v4435_v58 = vadd.f32 %v7649_v30, %v4434_v54 }
 0x2a3   : > { %v4614_v48 = vsel %vm4549_vm9, %v4440_v46, %v4582_v28  ;;  %vm4550_vm12 = vcmp.ge.f32.partialorder %v4443_v29, 0.0  ;;  %v4583_v55 = vmul.f32 %v7667_v14, %v4443_v29 }
 0x2a4   : > { %v4678_v37 = vadd.f32 %v4646_v63, %v4614_v48  ;;  %v4612_v49 = vsel %vm4547_vm10, %v4432_v34, %v4580_v42  ;;  %vm4548_vm0 = vcmp.ge.f32.partialorder %v4435_v58, 0.0  ;;  %v4581_v45 = vmul.f32 %v7667_v14, %v4435_v58 }
 0x2a5   : > { %v4676_v62 = vadd.f32 %v4644_v23, %v4612_v49  ;;  %v4615_v11 = vsel %vm4550_vm12, %v4443_v29, %v4583_v55  ;;  %v4666_v49 = vld [vmem:[%s7665_s12 + $0xd0] sm:$0xff] }
 0x2a6   : > { %4710 = vst.msk [vmem:[%s7694_s15 + $0x30] sm:$0xff] %vm8038_vm13, %v4678_v37  ;;  %v4679_v26 = vadd.f32 %v4647_v38, %v4615_v11  ;;  %v4613_v3 = vsel %vm4548_vm0, %v4435_v58, %v4581_v45  ;;  %vm8046_vm13 = vmmov %vm8041_vm1  ;;  %v4664_v11 = vld [vmem:[%s7665_s12 + $0xc0] sm:$0xff] }
 0x2a7   : > { %4708 = vst.msk [vmem:[%s7694_s15 + $0x20] sm:$0xff] %vm8039_vm14, %v4676_v62  ;;  %v4677_v8 = vadd.f32 %v4645_v0, %v4613_v3  ;;  %v5233_v17 = vpop.f32.mrb[4].mxu1  ;;  %vm8047_vm14 = vmmov %vm8041_vm1 }
 0x2a8   : > { %4711 = vst.msk [vmem:[%s7694_s15 + $0x38] sm:$0xff] %vm8040_vm15, %v4679_v26  ;;  %v4504_v53 = vadd.f32 %v5233_v17, %v7649_v30  ;;  %v4495_v43 = vpop.f32.mrb[5].mxu1  ;;  %vm8048_vm15 = vmmov %vm8041_vm1  ;;  %v4667_v17 = vld [vmem:[%s7665_s12 + $0xd8] sm:$0xff] }
 0x2a9   : > { %4709 = vst.msk [vmem:[%s7694_s15 + $0x28] sm:$0xff] %vm8041_vm1, %v4677_v8  ;;  %v4496_v39 = vadd.f32 %v7649_v30, %v4495_v43  ;;  %v5234_v56 = vpop.f32.mrb[6].mxu1 }
 0x2aa   : > { %vm4565_vm4 = vcmp.ge.f32.partialorder %v4504_v53, 0.0  ;;  %v4598_v60 = vmul.f32 %v7667_v14, %v4504_v53  ;;  %v4507_v21 = vadd.f32 %v5234_v56, %v7649_v30  ;;  %v4498_v33 = vpop.f32.mrb[7].mxu1  ;;  %v4665_v56 = vld [vmem:[%s7665_s12 + $0xc8] sm:$0xff] }
 0x2ab   : > { %vm4563_vm11 = vcmp.ge.f32.partialorder %v4496_v39, 0.0  ;;  %v4596_v35 = vmul.f32 %v7667_v14, %v4496_v39  ;;  %v4499_v22 = vadd.f32 %v7649_v30, %v4498_v33 }
 0x2ac   : > { %v4630_v31 = vsel %vm4565_vm4, %v4504_v53, %v4598_v60  ;;  %vm4566_vm7 = vcmp.ge.f32.partialorder %v4507_v21, 0.0  ;;  %v4599_v13 = vmul.f32 %v7667_v14, %v4507_v21 }
 0x2ad   : > { %v4694_v20 = vadd.f32 %v4662_v51, %v4630_v31  ;;  %v4628_v9 = vsel %vm4563_vm11, %v4496_v39, %v4596_v35  ;;  %vm4564_vm6 = vcmp.ge.f32.partialorder %v4499_v22, 0.0  ;;  %v4597_v10 = vmul.f32 %v7667_v14, %v4499_v22 }
 0x2ae   : > { %v4692_v15 = vadd.f32 %v4660_v16, %v4628_v9  ;;  %v4631_v59 = vsel %vm4566_vm7, %v4507_v21, %v4599_v13  ;;  %v4654_v9 = vld [vmem:[%s7665_s12 + $0x70] sm:$0xff] }
 0x2af   : > { %4726 = vst.msk [vmem:[%s7694_s15 + $0xb0] sm:$0xff] %vm8042_vm5, %v4694_v20  ;;  %v4695_v40 = vadd.f32 %v4663_v61, %v4631_v59  ;;  %v4629_v47 = vsel %vm4564_vm6, %v4499_v22, %v4597_v10  ;;  %vm8049_vm5 = vmmov %vm8041_vm1  ;;  %v4652_v59 = vld [vmem:[%s7665_s12 + $0x60] sm:$0xff] }
 0x2b0   : > { %4724 = vst.msk [vmem:[%s7694_s15 + $0xa0] sm:$0xff] %vm8043_vm3, %v4692_v15  ;;  %v4693_v7 = vadd.f32 %v4661_v25, %v4629_v47  ;;  %vm8050_vm3 = vmmov %vm8041_vm1 }
 0x2b1   : > { %4727 = vst.msk [vmem:[%s7694_s15 + $0xb8] sm:$0xff] %vm8044_vm2, %v4695_v40  ;;  %vm8051_vm2 = vmmov %vm8041_vm1 }
 0x2b2   : > { %4725 = vst.msk [vmem:[%s7694_s15 + $0xa8] sm:$0xff] %vm8045_vm8, %v4693_v7  ;;  %vm8052_vm8 = vmmov %vm8041_vm1 }
 0x2ee   : > { %v5221_v1 = vpop.f32.mrb[8].mxu0 }
 0x2ef   : > { %v4456_v5 = vadd.f32 %v5221_v1, %v7649_v30  ;;  %v4447_v44 = vpop.f32.mrb[9].mxu0  ;;  %v4655_v1 = vld [vmem:[%s7665_s12 + $0x78] sm:$0xff] }
 0x2f0   : > { %v4448_v36 = vadd.f32 %v7649_v30, %v4447_v44  ;;  %v5222_v57 = vpop.f32.mrb[10].mxu0 }
 0x2f1   : > { %vm4553_vm9 = vcmp.ge.f32.partialorder %v4456_v5, 0.0  ;;  %v4586_v24 = vmul.f32 %v7667_v14, %v4456_v5  ;;  %v4459_v12 = vadd.f32 %v5222_v57, %v7649_v30  ;;  %v4450_v52 = vpop.f32.mrb[11].mxu0  ;;  %v4653_v57 = vld [vmem:[%s7665_s12 + $0x68] sm:$0xff] }
 0x2f2   : > { %vm4551_vm10 = vcmp.ge.f32.partialorder %v4448_v36, 0.0  ;;  %v4584_v4 = vmul.f32 %v7667_v14, %v4448_v36  ;;  %v4451_v6 = vadd.f32 %v7649_v30, %v4450_v52 }
 0x2f3   : > { %v4618_v50 = vsel %vm4553_vm9, %v4456_v5, %v4586_v24  ;;  %vm4554_vm12 = vcmp.ge.f32.partialorder %v4459_v12, 0.0  ;;  %v4587_v18 = vmul.f32 %v7667_v14, %v4459_v12 }
 0x2f4   : > { %v4682_v46 = vadd.f32 %v4650_v19, %v4618_v50  ;;  %v4616_v41 = vsel %vm4551_vm10, %v4448_v36, %v4584_v4  ;;  %vm4552_vm0 = vcmp.ge.f32.partialorder %v4451_v6, 0.0  ;;  %v4585_v34 = vmul.f32 %v7667_v14, %v4451_v6 }
 0x2f5   : > { %v4680_v28 = vadd.f32 %v4648_v27, %v4616_v41  ;;  %v4619_v63 = vsel %vm4554_vm12, %v4459_v12, %v4587_v18  ;;  %v4670_v41 = vld [vmem:[%s7665_s12 + $0xf0] sm:$0xff] }
 0x2f6   : > { %4714 = vst.msk [vmem:[%s7694_s15 + $0x50] sm:$0xff] %vm8046_vm13, %v4682_v46  ;;  %v4683_v29 = vadd.f32 %v4651_v2, %v4619_v63  ;;  %v4617_v54 = vsel %vm4552_vm0, %v4451_v6, %v4585_v34  ;;  %vm8053_vm13 = vmmov %vm8041_vm1  ;;  %v4668_v63 = vld [vmem:[%s7665_s12 + $0xe0] sm:$0xff] }
 0x2f7   : > { %4712 = vst.msk [vmem:[%s7694_s15 + $0x40] sm:$0xff] %vm8047_vm14, %v4680_v28  ;;  %v4681_v42 = vadd.f32 %v4649_v32, %v4617_v54  ;;  %v5237_v23 = vpop.f32.mrb[8].mxu1  ;;  %vm8054_vm14 = vmmov %vm8041_vm1 }
 0x2f8   : > { %4715 = vst.msk [vmem:[%s7694_s15 + $0x58] sm:$0xff] %vm8048_vm15, %v4683_v29  ;;  %v4520_v58 = vadd.f32 %v5237_v23, %v7649_v30  ;;  %v4511_v48 = vpop.f32.mrb[9].mxu1  ;;  %vm8055_vm15 = vmmov %vm8041_vm1  ;;  %v4671_v23 = vld [vmem:[%s7665_s12 + $0xf8] sm:$0xff] }
 0x2f9   : > { %4713 = vst.msk [vmem:[%s7694_s15 + $0x48] sm:$0xff] %vm8041_vm1, %v4681_v42  ;;  %v4512_v55 = vadd.f32 %v7649_v30, %v4511_v48  ;;  %v5238_v38 = vpop.f32.mrb[10].mxu1 }
 0x2fa   : > { %vm4569_vm4 = vcmp.ge.f32.partialorder %v4520_v58, 0.0  ;;  %v4602_v37 = vmul.f32 %v7667_v14, %v4520_v58  ;;  %v4523_v45 = vadd.f32 %v5238_v38, %v7649_v30  ;;  %v4514_v0 = vpop.f32.mrb[11].mxu1  ;;  %v4669_v38 = vld [vmem:[%s7665_s12 + $0xe8] sm:$0xff] }
 0x2fb   : > { %vm4567_vm11 = vcmp.ge.f32.partialorder %v4512_v55, 0.0  ;;  %v4600_v62 = vmul.f32 %v7667_v14, %v4512_v55  ;;  %v4515_v26 = vadd.f32 %v7649_v30, %v4514_v0 }
 0x2fc   : > { %v4634_v3 = vsel %vm4569_vm4, %v4520_v58, %v4602_v37  ;;  %vm4570_vm7 = vcmp.ge.f32.partialorder %v4523_v45, 0.0  ;;  %v4603_v8 = vmul.f32 %v7667_v14, %v4523_v45 }
 0x2fd   : > { %v4698_v53 = vadd.f32 %v4666_v49, %v4634_v3  ;;  %v4632_v43 = vsel %vm4567_vm11, %v4512_v55, %v4600_v62  ;;  %vm4568_vm6 = vcmp.ge.f32.partialorder %v4515_v26, 0.0  ;;  %v4601_v39 = vmul.f32 %v7667_v14, %v4515_v26 }
 0x2fe   : > { %v4696_v60 = vadd.f32 %v4664_v11, %v4632_v43  ;;  %v4635_v51 = vsel %vm4570_vm7, %v4523_v45, %v4603_v8 }
 0x2ff   : > { %4730 = vst.msk [vmem:[%s7694_s15 + $0xd0] sm:$0xff] %vm8049_vm5, %v4698_v53  ;;  %v4699_v21 = vadd.f32 %v4667_v17, %v4635_v51  ;;  %v4633_v33 = vsel %vm4568_vm6, %v4515_v26, %v4601_v39  ;;  %vm8056_vm5 = vmmov %vm8041_vm1 }
 0x300   : > { %4728 = vst.msk [vmem:[%s7694_s15 + $0xc0] sm:$0xff] %vm8050_vm3, %v4696_v60  ;;  %v4697_v35 = vadd.f32 %v4665_v56, %v4633_v33  ;;  %vm8057_vm3 = vmmov %vm8041_vm1 }
 0x301   : > { %4731 = vst.msk [vmem:[%s7694_s15 + $0xd8] sm:$0xff] %vm8051_vm2, %v4699_v21  ;;  %vm8058_vm2 = vmmov %vm8041_vm1 }
 0x302   : > { %4729 = vst.msk [vmem:[%s7694_s15 + $0xc8] sm:$0xff] %vm8052_vm8, %v4697_v35  ;;  %vm8059_vm8 = vmmov %vm8041_vm1 }
 0x32a   : > { %v5225_v16 = vpop.f32.mrb[12].mxu0 }
 0x32b   : > { %v4472_v22 = vadd.f32 %v5225_v16, %v7649_v30  ;;  %v4463_v31 = vpop.f32.mrb[13].mxu0 }
 0x32c   : > { %v4464_v13 = vadd.f32 %v7649_v30, %v4463_v31  ;;  %v5226_v61 = vpop.f32.mrb[14].mxu0 }
 0x32d   : > { %vm4557_vm9 = vcmp.ge.f32.partialorder %v4472_v22, 0.0  ;;  %v4590_v20 = vmul.f32 %v7667_v14, %v4472_v22  ;;  %v4475_v10 = vadd.f32 %v5226_v61, %v7649_v30  ;;  %v4466_v25 = vpop.f32.mrb[15].mxu0 }
 0x32e   : > { %vm4555_vm10 = vcmp.ge.f32.partialorder %v4464_v13, 0.0  ;;  %v4588_v15 = vmul.f32 %v7667_v14, %v4464_v13  ;;  %v4467_v40 = vadd.f32 %v7649_v30, %v4466_v25 }
 0x32f   : > { %v4622_v47 = vsel %vm4557_vm9, %v4472_v22, %v4590_v20  ;;  %vm4558_vm12 = vcmp.ge.f32.partialorder %v4475_v10, 0.0  ;;  %v4591_v7 = vmul.f32 %v7667_v14, %v4475_v10 }
 0x330   : > { %v4686_v5 = vadd.f32 %v4654_v9, %v4622_v47  ;;  %v4620_v44 = vsel %vm4555_vm10, %v4464_v13, %v4588_v15  ;;  %vm4556_vm0 = vcmp.ge.f32.partialorder %v4467_v40, 0.0  ;;  %v4589_v36 = vmul.f32 %v7667_v14, %v4467_v40 }
 0x331   : > { %v4684_v24 = vadd.f32 %v4652_v59, %v4620_v44  ;;  %v4623_v19 = vsel %vm4558_vm12, %v4475_v10, %v4591_v7 }
 0x332   : > { %4718 = vst.msk [vmem:[%s7694_s15 + $0x70] sm:$0xff] %vm8053_vm13, %v4686_v5  ;;  %v4687_v12 = vadd.f32 %v4655_v1, %v4623_v19  ;;  %v4621_v52 = vsel %vm4556_vm0, %v4467_v40, %v4589_v36 }
 0x333   : > { %4716 = vst.msk [vmem:[%s7694_s15 + $0x60] sm:$0xff] %vm8054_vm14, %v4684_v24  ;;  %v4685_v4 = vadd.f32 %v4653_v57, %v4621_v52  ;;  %v5241_v27 = vpop.f32.mrb[12].mxu1 }
 0x334   : > { %4719 = vst.msk [vmem:[%s7694_s15 + $0x78] sm:$0xff] %vm8055_vm15, %v4687_v12  ;;  %v4536_v6 = vadd.f32 %v5241_v27, %v7649_v30  ;;  %v4527_v50 = vpop.f32.mrb[13].mxu1 }
 0x335   : > { %4717 = vst.msk [vmem:[%s7694_s15 + $0x68] sm:$0xff] %vm8041_vm1, %v4685_v4  ;;  %v4528_v18 = vadd.f32 %v7649_v30, %v4527_v50  ;;  %v5242_v2 = vpop.f32.mrb[14].mxu1 }
 0x336   : > { %vm4573_vm4 = vcmp.ge.f32.partialorder %v4536_v6, 0.0  ;;  %v4606_v46 = vmul.f32 %v7667_v14, %v4536_v6  ;;  %v4539_v34 = vadd.f32 %v5242_v2, %v7649_v30  ;;  %v4530_v32 = vpop.f32.mrb[15].mxu1 }
 0x337   : > { %vm4571_vm11 = vcmp.ge.f32.partialorder %v4528_v18, 0.0  ;;  %v4604_v28 = vmul.f32 %v7667_v14, %v4528_v18  ;;  %v4531_v29 = vadd.f32 %v7649_v30, %v4530_v32 }
 0x338   : > { %v4638_v54 = vsel %vm4573_vm4, %v4536_v6, %v4606_v46  ;;  %vm4574_vm7 = vcmp.ge.f32.partialorder %v4539_v34, 0.0  ;;  %v4607_v42 = vmul.f32 %v7667_v14, %v4539_v34 }
 0x339   : > { %v4702_v58 = vadd.f32 %v4670_v41, %v4638_v54  ;;  %v4636_v48 = vsel %vm4571_vm11, %v4528_v18, %v4604_v28  ;;  %vm4572_vm6 = vcmp.ge.f32.partialorder %v4531_v29, 0.0  ;;  %v4605_v55 = vmul.f32 %v7667_v14, %v4531_v29 }
 0x33a   : > { %v4700_v37 = vadd.f32 %v4668_v63, %v4636_v48  ;;  %v4639_v49 = vsel %vm4574_vm7, %v4539_v34, %v4607_v42 }
 0x33b   : > { %4734 = vst.msk [vmem:[%s7694_s15 + $0xf0] sm:$0xff] %vm8056_vm5, %v4702_v58  ;;  %v4703_v45 = vadd.f32 %v4671_v23, %v4639_v49  ;;  %v4637_v0 = vsel %vm4572_vm6, %v4531_v29, %v4605_v55 }
 0x33c   : > { %4732 = vst.msk [vmem:[%s7694_s15 + $0xe0] sm:$0xff] %vm8057_vm3, %v4700_v37  ;;  %v4701_v30 = vadd.f32 %v4669_v38, %v4637_v0 }
 0x33d   : > { %4735 = vst.msk [vmem:[%s7694_s15 + $0xf8] sm:$0xff] %vm8058_vm2, %v4703_v45 }
 0x33e   : > { %4733 = vst.msk [vmem:[%s7694_s15 + $0xe8] sm:$0xff] %vm8059_vm8, %v4701_v30 }
 0x33f PF: > { %s17_s23 = sadd.s32 1, %s5474_s23  }
 0x340   : > { %p14_p4 = scmp.ge.s32.totalorder %s17_s23, 4  }
 0x342   :  { %16 = sbr.rel (!%p14_p4) target bundleno = 2 (0x2), region = 82 }

</bundles_post_ra>
